<compile_context>
chip_gen: v6e
topology: v6e:2x2x1
jax: 0.10.0
libtpu: 0.0.40
codegen_flags: <defaults>
</compile_context>

<pallas_src>
import functools

import jax
import jax.numpy as jnp
from jax import lax
from jax.experimental import pallas as pl
from jax.experimental.pallas import tpu as pltpu

LANES = 128          # TPU lane width; all channel/feature dims padded to this
_K = 5               # conv kernel size
_H1 = 28             # conv1 output spatial size (32 - 5 + 1)
_P1 = 14             # pool1 output spatial size
_H2 = 10             # conv2 output spatial size (14 - 5 + 1)
_W2 = 10
_P2 = 5              # pool2 output spatial size


# ----------------------------------------------------------------------------
# The single fused Pallas kernel
# ----------------------------------------------------------------------------
def _lenet_fused_kernel(cols1_ref, w1_ref, b1_ref, w2_ref, b2_ref,
                        w3_ref, b3_ref, w4_ref, b4_ref, w5_ref, b5_ref,
                        out_ref, p1_ref, c2_ref, p2_ref):
    f32 = jnp.float32
    bf16 = jnp.bfloat16
    B = out_ref.shape[0]
    n1 = B * _P1 * _P1                       # rows of one conv1 parity block

    # ---- conv1 + bias + ReLU + maxpool1 -------------------------------------
    # cols1 rows are ordered (parity s, b, ph, pw) with s = (oh%2)*2 + (ow%2),
    # so the 2x2 max-pool is just an elementwise max of 4 contiguous blocks.
    pooled = None
    for s in range(4):
        a = jnp.dot(cols1_ref[pl.ds(s * n1, n1), :], w1_ref[...],
                    preferred_element_type=f32)
        a = jnp.maximum(a + b1_ref[...], 0.0)
        pooled = a if pooled is None else jnp.maximum(pooled, a)
    p1_ref[...] = pooled                     # rows (b, ph, pw), lanes = channels

    # ---- conv2 + bias + ReLU ------------------------------------------------
    # Shifted-span formulation (im2col never materialized): for each output
    # row (b, oh) accumulate 25 (10,128)x(128,128) MXU dots over the 5x5 taps.
    for b in range(B):
        def conv2_row(oh, carry, b=b):
            acc = jnp.zeros((_W2, LANES), f32)
            for dh in range(_K):
                span = p1_ref[pl.ds(b * (_P1 * _P1) + (oh + dh) * _P1, _P1), :]
                for dw in range(_K):
                    lhs = span[dw:dw + _W2, :].astype(bf16)          # (10,128)
                    acc = acc + jnp.dot(lhs, w2_ref[dh * _K + dw],
                                        preferred_element_type=f32)
            c2_ref[pl.ds(b * (_H2 * _W2) + oh * _W2, _W2), :] = jnp.maximum(
                acc + b2_ref[...], 0.0)
            return carry
        lax.fori_loop(0, _H2, conv2_row, 0)

    # ---- maxpool2 -----------------------------------------------------------
    # p2 rows are ordered (spatial position p = ph*5+pw, batch b) so fc1 can
    # read each position as a contiguous (B, 128) block.
    for b in range(B):
        for po in range(_P2):
            v = c2_ref[pl.ds(b * (_H2 * _W2) + po * 2 * _W2, 2 * _W2), :]
            vt = jnp.maximum(v[0:_W2, :], v[_W2:2 * _W2, :])     # max over oh pair
            for pw in range(_P2):
                m = jnp.maximum(vt[2 * pw:2 * pw + 1, :],
                                vt[2 * pw + 1:2 * pw + 2, :])    # max over ow pair
                p2_ref[pl.ds((po * _P2 + pw) * B + b, 1), :] = m

    # ---- fc1 (nn.Flatten's (C,H,W) order folded into w3's packing) ----------
    h = jnp.zeros((B, w3_ref.shape[2]), f32)
    for p in range(_P2 * _P2):
        rows = p2_ref[pl.ds(p * B, B), :].astype(bf16)           # (B, 128)
        h = h + jnp.dot(rows, w3_ref[p], preferred_element_type=f32)
    h = jnp.maximum(h + b3_ref[...], 0.0)                        # (B, 256)

    # ---- fc2 ----------------------------------------------------------------
    h = jnp.maximum(
        jnp.dot(h.astype(bf16), w4_ref[...], preferred_element_type=f32)
        + b4_ref[...], 0.0)                                      # (B, 128)

    # ---- fc3 (logits zero-padded to 128 lanes; sliced in the wrapper) -------
    out_ref[...] = (
        jnp.dot(h.astype(bf16), w5_ref[...], preferred_element_type=f32)
        + b5_ref[...]).astype(out_ref.dtype)


# ----------------------------------------------------------------------------
# Wrapper-side glue
# ----------------------------------------------------------------------------
def _conv1_cols(x_nchw):
    """conv1 patch extraction (single fused XLA gather), rows ordered
    (parity, b, ph, pw) so the kernel can max-pool with contiguous blocks."""
    B = x_nchw.shape[0]
    x = jnp.transpose(x_nchw, (0, 2, 3, 1))                      # NHWC (B,32,32,3)
    patches = [x[:, dh:dh + _H1, dw:dw + _H1, :]
               for dh in range(_K) for dw in range(_K)]
    cols = jnp.stack(patches, axis=3).reshape(B, _H1, _H1, _K * _K * 3)
    blocks = [cols[:, i::2, j::2, :] for i in range(2) for j in range(2)]
    cols = jnp.stack(blocks, axis=0).reshape(4 * B * _P1 * _P1, _K * _K * 3)
    cols = jnp.pad(cols, ((0, 0), (0, LANES - _K * _K * 3)))
    return cols.astype(jnp.bfloat16)


def _index2(i):
    return (0, 0)


def _index3(i):
    return (0, 0, 0)


@functools.partial(jax.jit, static_argnames=("num_classes",))
def _forward_logits(packed, x_nchw, num_classes):
    B = x_nchw.shape[0]
    cols1 = _conv1_cols(x_nchw)                                  # (B*784, 128) bf16

    operands = (cols1, packed["w1"], packed["b1"], packed["w2"], packed["b2"],
                packed["w3"], packed["b3"], packed["w4"], packed["b4"],
                packed["w5"], packed["b5"])
    in_specs = [pl.BlockSpec(op.shape, _index3 if op.ndim == 3 else _index2)
                for op in operands]

    logits_padded = pl.pallas_call(
        _lenet_fused_kernel,
        out_shape=jax.ShapeDtypeStruct((B, LANES), jnp.float32),
        grid=(1,),
        in_specs=in_specs,
        out_specs=pl.BlockSpec((B, LANES), _index2),
        scratch_shapes=[
            pltpu.VMEM((B * _P1 * _P1, LANES), jnp.float32),     # pooled conv1
            pltpu.VMEM((B * _H2 * _W2, LANES), jnp.float32),     # conv2 output
            pltpu.VMEM((B * _P2 * _P2, LANES), jnp.float32),     # pooled conv2
        ],
        compiler_params=pltpu.CompilerParams(
            dimension_semantics=("arbitrary",)),
    )(*operands)
    return logits_padded[:, :num_classes]


def pack_params(params):
    """One-time packing of PyTorch-layout params: pre-transposed, zero-padded
    to 128 lanes, matmul operands in bf16, biases pre-shaped (1, N) f32."""
    f32, bf16 = jnp.float32, jnp.bfloat16
    w1, b1 = params["w1"], params["b1"]          # (6,3,5,5), (6,)
    w2, b2 = params["w2"], params["b2"]          # (16,6,5,5), (16,)
    w3, b3 = params["w3"], params["b3"]          # (256,400), (256,)
    w4, b4 = params["w4"], params["b4"]          # (128,256), (128,)
    w5, b5 = params["w5"], params["b5"]          # (nc,128), (nc,)
    nc = w5.shape[0]
    assert nc <= LANES

    # conv1: rows = (kh, kw, cin) im2col order, cols = cout (6 -> 128)
    w1m = jnp.transpose(w1, (2, 3, 1, 0)).reshape(_K * _K * 3, 6)
    w1k = jnp.zeros((LANES, LANES), f32).at[:_K * _K * 3, :6].set(w1m)

    # conv2: 25 taps of (cin -> cout) matrices, both padded to 128
    w2m = jnp.transpose(w2, (2, 3, 1, 0)).reshape(_K * _K, 6, 16)
    w2k = jnp.zeros((_K * _K, LANES, LANES), f32).at[:, :6, :16].set(w2m)

    # fc1: fold the PyTorch (C,H,W) flatten order into 25 per-position blocks
    w3m = jnp.transpose(w3.reshape(256, 16, _P2 * _P2), (2, 1, 0))   # (25,16,256)
    w3k = jnp.zeros((_P2 * _P2, LANES, 256), f32).at[:, :16, :].set(w3m)

    w4k = jnp.transpose(w4)                                          # (256,128)
    w5k = jnp.zeros((LANES, LANES), f32).at[:, :nc].set(jnp.transpose(w5))

    return {
        "w1": w1k.astype(bf16),
        "b1": jnp.zeros((1, LANES), f32).at[0, :6].set(b1),
        "w2": w2k.astype(bf16),
        "b2": jnp.zeros((1, LANES), f32).at[0, :16].set(b2),
        "w3": w3k.astype(bf16),
        "b3": b3.reshape(1, 256).astype(f32),
        "w4": w4k.astype(bf16),
        "b4": b4.reshape(1, LANES).astype(f32),
        "w5": w5k.astype(bf16),
        "b5": jnp.zeros((1, LANES), f32).at[0, :nc].set(b5),
    }


def lenet_forward(packed, x_nchw, num_classes=100):
    """Matches LeNet.forward: returns (logits, shape_dict)."""
    B = x_nchw.shape[0]
    logits = _forward_logits(packed, x_nchw, num_classes=num_classes)
    shape_dict = {1: [B, 6, _P1, _P1], 2: [B, 16, _P2, _P2],
                  3: [B, 400], 4: [B, 256], 5: [B, 128], 6: [B, num_classes]}
    return logits, shape_dict


# ----------------------------------------------------------------------------
# Parameters (deterministic synthetic init, PyTorch layouts) and a pure-JAX
# f32 reference that mirrors the nn.Module exactly.
# ----------------------------------------------------------------------------
def init_params(key, num_classes=100):
    ks = jax.random.split(key, 10)
    p = {}
    p["w1"] = 0.1 * jax.random.normal(ks[0], (6, 3, 5, 5), jnp.float32)
    p["b1"] = 0.1 * jax.random.normal(ks[1], (6,), jnp.float32)
    p["w2"] = 0.1 * jax.random.normal(ks[2], (16, 6, 5, 5), jnp.float32)
    p["b2"] = 0.1 * jax.random.normal(ks[3], (16,), jnp.float32)
    p["w3"] = 0.05 * jax.random.normal(ks[4], (256, 400), jnp.float32)
    p["b3"] = 0.05 * jax.random.normal(ks[5], (256,), jnp.float32)
    p["w4"] = 0.05 * jax.random.normal(ks[6], (128, 256), jnp.float32)
    p["b4"] = 0.05 * jax.random.normal(ks[7], (128,), jnp.float32)
    p["w5"] = 0.05 * jax.random.normal(ks[8], (num_classes, 128), jnp.float32)
    p["b5"] = 0.05 * jax.random.normal(ks[9], (num_classes,), jnp.float32)
    return p


def lenet_forward_ref(params, x_nchw):
    hi = lax.Precision.HIGHEST

    def conv(x, w, b):
        y = lax.conv_general_dilated(
            x, w, window_strides=(1, 1), padding="VALID",
            dimension_numbers=("NCHW", "OIHW", "NCHW"), precision=hi)
        return y + b[None, :, None, None]

    def pool(t):
        B, C, H, W = t.shape
        return jnp.max(t.reshape(B, C, H // 2, 2, W // 2, 2), axis=(3, 5))

    x1 = pool(jnp.maximum(conv(x_nchw, params["w1"], params["b1"]), 0.0))
    x2 = pool(jnp.maximum(conv(x1, params["w2"], params["b2"]), 0.0))
    x3 = x2.reshape(x2.shape[0], -1)          # NCHW flatten == nn.Flatten order
    x4 = jnp.maximum(jnp.dot(x3, params["w3"].T, precision=hi) + params["b3"], 0.0)
    x5 = jnp.maximum(jnp.dot(x4, params["w4"].T, precision=hi) + params["b4"], 0.0)
    return jnp.dot(x5, params["w5"].T, precision=hi) + params["b5"]


if __name__ == "__main__":
    key = jax.random.PRNGKey(0)
    pkey, xkey = jax.random.split(key)
    num_classes = 100

    params = init_params(pkey, num_classes=num_classes)
    packed = pack_params(params)                       # one-time weight packing
    # LeNet's flatten requires 32x32 spatial input (-> 16*5*5 = 400 features).
    x = jax.random.normal(xkey, (2, 3, 32, 32), jnp.float32)   # NCHW, batch=2

    out, shape_dict = lenet_forward(packed, x, num_classes=num_classes)
    out = jax.block_until_ready(out)

    ref = jax.block_until_ready(lenet_forward_ref(params, x))
    assert out.shape == (2, num_classes), out.shape
    assert shape_dict == {1: [2, 6, 14, 14], 2: [2, 16, 5, 5], 3: [2, 400],
                          4: [2, 256], 5: [2, 128], 6: [2, 100]}, shape_dict
    max_err = float(jnp.max(jnp.abs(out - ref)))
    assert max_err < 4e-2, f"mismatch vs JAX reference: max abs err {max_err}"

    print("KERNEL_OK")
</pallas_src>

<mosaic_0001>
module attributes {stable_mosaic.version = 11 : i64} {
  func.func @_lenet_fused_kernel(%arg0: i32, %arg1: memref<1568x128xbf16, #tpu.memory_space<vmem>>, %arg2: memref<128x128xbf16, #tpu.memory_space<vmem>>, %arg3: memref<1x128xf32, #tpu.memory_space<vmem>>, %arg4: memref<25x128x128xbf16, #tpu.memory_space<vmem>>, %arg5: memref<1x128xf32, #tpu.memory_space<vmem>>, %arg6: memref<25x128x256xbf16, #tpu.memory_space<vmem>>, %arg7: memref<1x256xf32, #tpu.memory_space<vmem>>, %arg8: memref<256x128xbf16, #tpu.memory_space<vmem>>, %arg9: memref<1x128xf32, #tpu.memory_space<vmem>>, %arg10: memref<128x128xbf16, #tpu.memory_space<vmem>>, %arg11: memref<1x128xf32, #tpu.memory_space<vmem>>, %arg12: memref<2x128xf32, #tpu.memory_space<vmem>>, %arg13: memref<392x128xf32, #tpu.memory_space<vmem>>, %arg14: memref<200x128xf32, #tpu.memory_space<vmem>>, %arg15: memref<50x128xf32, #tpu.memory_space<vmem>>) attributes {dimension_semantics = [#tpu.dimension_semantics<arbitrary>], iteration_bounds = array<i64: 1>, scalar_prefetch = 0 : i64, scratch_operands = 3 : i64, tpu.core_type = #tpu.core_type<tc>, window_params = [{pipeline_mode = #tpu.pipeline_mode<synchronous>, transform_indices = @transform_0, window_bounds = array<i64: 1568, 128>}, {pipeline_mode = #tpu.pipeline_mode<synchronous>, transform_indices = @transform_1, window_bounds = array<i64: 128, 128>}, {pipeline_mode = #tpu.pipeline_mode<synchronous>, transform_indices = @transform_2, window_bounds = array<i64: 1, 128>}, {pipeline_mode = #tpu.pipeline_mode<synchronous>, transform_indices = @transform_3, window_bounds = array<i64: 25, 128, 128>}, {pipeline_mode = #tpu.pipeline_mode<synchronous>, transform_indices = @transform_4, window_bounds = array<i64: 1, 128>}, {pipeline_mode = #tpu.pipeline_mode<synchronous>, transform_indices = @transform_5, window_bounds = array<i64: 25, 128, 256>}, {pipeline_mode = #tpu.pipeline_mode<synchronous>, transform_indices = @transform_6, window_bounds = array<i64: 1, 256>}, {pipeline_mode = #tpu.pipeline_mode<synchronous>, transform_indices = @transform_7, window_bounds = array<i64: 256, 128>}, {pipeline_mode = #tpu.pipeline_mode<synchronous>, transform_indices = @transform_8, window_bounds = array<i64: 1, 128>}, {pipeline_mode = #tpu.pipeline_mode<synchronous>, transform_indices = @transform_9, window_bounds = array<i64: 128, 128>}, {pipeline_mode = #tpu.pipeline_mode<synchronous>, transform_indices = @transform_10, window_bounds = array<i64: 1, 128>}, {pipeline_mode = #tpu.pipeline_mode<synchronous>, transform_indices = @transform_11, window_bounds = array<i64: 2, 128>}]} {
    %c0 = arith.constant 0 : index
    %c0_0 = arith.constant 0 : index
    %0 = vector.load %arg1[%c0, %c0_0] : memref<1568x128xbf16, #tpu.memory_space<vmem>>, vector<392x128xbf16>
    %c0_1 = arith.constant 0 : index
    %c0_2 = arith.constant 0 : index
    %1 = vector.load %arg2[%c0_1, %c0_2] : memref<128x128xbf16, #tpu.memory_space<vmem>>, vector<128x128xbf16>
    %cst = arith.constant dense<0.000000e+00> : vector<392x128xf32>
    %2 = tpu.matmul %0, %1, %cst {dimension_numbers = #tpu.dot_dimension_numbers<[1], [0], [0], [1], [0, 0, 1, 1], [], []>} : vector<392x128xbf16>, vector<128x128xbf16>, vector<392x128xf32> -> vector<392x128xf32>
    %c0_3 = arith.constant 0 : index
    %c0_4 = arith.constant 0 : index
    %3 = vector.load %arg3[%c0_3, %c0_4] : memref<1x128xf32, #tpu.memory_space<vmem>>, vector<1x128xf32>
    %4 = vector.broadcast %3 : vector<1x128xf32> to vector<392x128xf32>
    %5 = arith.addf %2, %4 : vector<392x128xf32>
    %cst_5 = arith.constant 0.000000e+00 : f32
    %6 = vector.broadcast %cst_5 : f32 to vector<392x128xf32>
    %7 = arith.maximumf %5, %6 : vector<392x128xf32>
    %c392 = arith.constant 392 : index
    %c0_6 = arith.constant 0 : index
    %8 = vector.load %arg1[%c392, %c0_6] : memref<1568x128xbf16, #tpu.memory_space<vmem>>, vector<392x128xbf16>
    %c0_7 = arith.constant 0 : index
    %c0_8 = arith.constant 0 : index
    %9 = vector.load %arg2[%c0_7, %c0_8] : memref<128x128xbf16, #tpu.memory_space<vmem>>, vector<128x128xbf16>
    %cst_9 = arith.constant dense<0.000000e+00> : vector<392x128xf32>
    %10 = tpu.matmul %8, %9, %cst_9 {dimension_numbers = #tpu.dot_dimension_numbers<[1], [0], [0], [1], [0, 0, 1, 1], [], []>} : vector<392x128xbf16>, vector<128x128xbf16>, vector<392x128xf32> -> vector<392x128xf32>
    %c0_10 = arith.constant 0 : index
    %c0_11 = arith.constant 0 : index
    %11 = vector.load %arg3[%c0_10, %c0_11] : memref<1x128xf32, #tpu.memory_space<vmem>>, vector<1x128xf32>
    %12 = vector.broadcast %11 : vector<1x128xf32> to vector<392x128xf32>
    %13 = arith.addf %10, %12 : vector<392x128xf32>
    %cst_12 = arith.constant 0.000000e+00 : f32
    %14 = vector.broadcast %cst_12 : f32 to vector<392x128xf32>
    %15 = arith.maximumf %13, %14 : vector<392x128xf32>
    %16 = arith.maximumf %7, %15 : vector<392x128xf32>
    %c784 = arith.constant 784 : index
    %c0_13 = arith.constant 0 : index
    %17 = vector.load %arg1[%c784, %c0_13] : memref<1568x128xbf16, #tpu.memory_space<vmem>>, vector<392x128xbf16>
    %c0_14 = arith.constant 0 : index
    %c0_15 = arith.constant 0 : index
    %18 = vector.load %arg2[%c0_14, %c0_15] : memref<128x128xbf16, #tpu.memory_space<vmem>>, vector<128x128xbf16>
    %cst_16 = arith.constant dense<0.000000e+00> : vector<392x128xf32>
    %19 = tpu.matmul %17, %18, %cst_16 {dimension_numbers = #tpu.dot_dimension_numbers<[1], [0], [0], [1], [0, 0, 1, 1], [], []>} : vector<392x128xbf16>, vector<128x128xbf16>, vector<392x128xf32> -> vector<392x128xf32>
    %c0_17 = arith.constant 0 : index
    %c0_18 = arith.constant 0 : index
    %20 = vector.load %arg3[%c0_17, %c0_18] : memref<1x128xf32, #tpu.memory_space<vmem>>, vector<1x128xf32>
    %21 = vector.broadcast %20 : vector<1x128xf32> to vector<392x128xf32>
    %22 = arith.addf %19, %21 : vector<392x128xf32>
    %cst_19 = arith.constant 0.000000e+00 : f32
    %23 = vector.broadcast %cst_19 : f32 to vector<392x128xf32>
    %24 = arith.maximumf %22, %23 : vector<392x128xf32>
    %25 = arith.maximumf %16, %24 : vector<392x128xf32>
    %c1176 = arith.constant 1176 : index
    %c0_20 = arith.constant 0 : index
    %26 = vector.load %arg1[%c1176, %c0_20] : memref<1568x128xbf16, #tpu.memory_space<vmem>>, vector<392x128xbf16>
    %c0_21 = arith.constant 0 : index
    %c0_22 = arith.constant 0 : index
    %27 = vector.load %arg2[%c0_21, %c0_22] : memref<128x128xbf16, #tpu.memory_space<vmem>>, vector<128x128xbf16>
    %cst_23 = arith.constant dense<0.000000e+00> : vector<392x128xf32>
    %28 = tpu.matmul %26, %27, %cst_23 {dimension_numbers = #tpu.dot_dimension_numbers<[1], [0], [0], [1], [0, 0, 1, 1], [], []>} : vector<392x128xbf16>, vector<128x128xbf16>, vector<392x128xf32> -> vector<392x128xf32>
    %c0_24 = arith.constant 0 : index
    %c0_25 = arith.constant 0 : index
    %29 = vector.load %arg3[%c0_24, %c0_25] : memref<1x128xf32, #tpu.memory_space<vmem>>, vector<1x128xf32>
    %30 = vector.broadcast %29 : vector<1x128xf32> to vector<392x128xf32>
    %31 = arith.addf %28, %30 : vector<392x128xf32>
    %cst_26 = arith.constant 0.000000e+00 : f32
    %32 = vector.broadcast %cst_26 : f32 to vector<392x128xf32>
    %33 = arith.maximumf %31, %32 : vector<392x128xf32>
    %34 = arith.maximumf %25, %33 : vector<392x128xf32>
    %c0_27 = arith.constant 0 : index
    %c0_28 = arith.constant 0 : index
    %35 = vector.load %arg13[%c0_27, %c0_28] : memref<392x128xf32, #tpu.memory_space<vmem>>, vector<392x128xf32>
    tpu.vector_store %arg13[%c0_27, %c0_28], %34 {strides = array<i32>} : memref<392x128xf32, #tpu.memory_space<vmem>>, vector<392x128xf32>,
    %c0_i32 = arith.constant 0 : i32
    %c10_i32 = arith.constant 10 : i32
    %36 = arith.addi %c0_i32, %c10_i32 : i32
    %c1_i32 = arith.constant 1 : i32
    scf.for %arg16 = %c0_i32 to %36 step %c1_i32  : i32 {
      %cst_265 = arith.constant 0.000000e+00 : f32
      %449 = vector.broadcast %cst_265 : f32 to vector<10x128xf32>
      %c0_i32_266 = arith.constant 0 : i32
      %450 = arith.addi %arg16, %c0_i32_266 : i32
      %c14_i32 = arith.constant 14 : i32
      %451 = arith.muli %450, %c14_i32 : i32
      %c0_i32_267 = arith.constant 0 : i32
      %452 = arith.addi %c0_i32_267, %451 : i32
      %453 = arith.index_cast %452 : i32 to index
      %c0_268 = arith.constant 0 : index
      %454 = vector.load %arg13[%453, %c0_268] : memref<392x128xf32, #tpu.memory_space<vmem>>, vector<14x128xf32>
      %455 = vector.extract_strided_slice %454 {offsets = [0, 0], sizes = [10, 128], strides = [1, 1]} : vector<14x128xf32> to vector<10x128xf32>
      %456 = arith.truncf %455 : vector<10x128xf32> to vector<10x128xbf16>
      %c0_269 = arith.constant 0 : index
      %c0_270 = arith.constant 0 : index
      %c0_271 = arith.constant 0 : index
      %457 = vector.load %arg4[%c0_269, %c0_270, %c0_271] : memref<25x128x128xbf16, #tpu.memory_space<vmem>>, vector<1x128x128xbf16>
      %458 = vector.shape_cast %457 : vector<1x128x128xbf16> to vector<128x128xbf16>
      %cst_272 = arith.constant dense<0.000000e+00> : vector<10x128xf32>
      %459 = tpu.matmul %456, %458, %cst_272 {dimension_numbers = #tpu.dot_dimension_numbers<[1], [0], [0], [1], [0, 0, 1, 1], [], []>} : vector<10x128xbf16>, vector<128x128xbf16>, vector<10x128xf32> -> vector<10x128xf32>
      %460 = arith.addf %449, %459 : vector<10x128xf32>
      %461 = vector.extract_strided_slice %454 {offsets = [1, 0], sizes = [10, 128], strides = [1, 1]} : vector<14x128xf32> to vector<10x128xf32>
      %462 = arith.truncf %461 : vector<10x128xf32> to vector<10x128xbf16>
      %c1_273 = arith.constant 1 : index
      %c0_274 = arith.constant 0 : index
      %c0_275 = arith.constant 0 : index
      %463 = vector.load %arg4[%c1_273, %c0_274, %c0_275] : memref<25x128x128xbf16, #tpu.memory_space<vmem>>, vector<1x128x128xbf16>
      %464 = vector.shape_cast %463 : vector<1x128x128xbf16> to vector<128x128xbf16>
      %cst_276 = arith.constant dense<0.000000e+00> : vector<10x128xf32>
      %465 = tpu.matmul %462, %464, %cst_276 {dimension_numbers = #tpu.dot_dimension_numbers<[1], [0], [0], [1], [0, 0, 1, 1], [], []>} : vector<10x128xbf16>, vector<128x128xbf16>, vector<10x128xf32> -> vector<10x128xf32>
      %466 = arith.addf %460, %465 : vector<10x128xf32>
      %467 = vector.extract_strided_slice %454 {offsets = [2, 0], sizes = [10, 128], strides = [1, 1]} : vector<14x128xf32> to vector<10x128xf32>
      %468 = arith.truncf %467 : vector<10x128xf32> to vector<10x128xbf16>
      %c2_277 = arith.constant 2 : index
      %c0_278 = arith.constant 0 : index
      %c0_279 = arith.constant 0 : index
      %469 = vector.load %arg4[%c2_277, %c0_278, %c0_279] : memref<25x128x128xbf16, #tpu.memory_space<vmem>>, vector<1x128x128xbf16>
      %470 = vector.shape_cast %469 : vector<1x128x128xbf16> to vector<128x128xbf16>
      %cst_280 = arith.constant dense<0.000000e+00> : vector<10x128xf32>
      %471 = tpu.matmul %468, %470, %cst_280 {dimension_numbers = #tpu.dot_dimension_numbers<[1], [0], [0], [1], [0, 0, 1, 1], [], []>} : vector<10x128xbf16>, vector<128x128xbf16>, vector<10x128xf32> -> vector<10x128xf32>
      %472 = arith.addf %466, %471 : vector<10x128xf32>
      %473 = vector.extract_strided_slice %454 {offsets = [3, 0], sizes = [10, 128], strides = [1, 1]} : vector<14x128xf32> to vector<10x128xf32>
      %474 = arith.truncf %473 : vector<10x128xf32> to vector<10x128xbf16>
      %c3_281 = arith.constant 3 : index
      %c0_282 = arith.constant 0 : index
      %c0_283 = arith.constant 0 : index
      %475 = vector.load %arg4[%c3_281, %c0_282, %c0_283] : memref<25x128x128xbf16, #tpu.memory_space<vmem>>, vector<1x128x128xbf16>
      %476 = vector.shape_cast %475 : vector<1x128x128xbf16> to vector<128x128xbf16>
      %cst_284 = arith.constant dense<0.000000e+00> : vector<10x128xf32>
      %477 = tpu.matmul %474, %476, %cst_284 {dimension_numbers = #tpu.dot_dimension_numbers<[1], [0], [0], [1], [0, 0, 1, 1], [], []>} : vector<10x128xbf16>, vector<128x128xbf16>, vector<10x128xf32> -> vector<10x128xf32>
      %478 = arith.addf %472, %477 : vector<10x128xf32>
      %479 = vector.extract_strided_slice %454 {offsets = [4, 0], sizes = [10, 128], strides = [1, 1]} : vector<14x128xf32> to vector<10x128xf32>
      %480 = arith.truncf %479 : vector<10x128xf32> to vector<10x128xbf16>
      %c4_285 = arith.constant 4 : index
      %c0_286 = arith.constant 0 : index
      %c0_287 = arith.constant 0 : index
      %481 = vector.load %arg4[%c4_285, %c0_286, %c0_287] : memref<25x128x128xbf16, #tpu.memory_space<vmem>>, vector<1x128x128xbf16>
      %482 = vector.shape_cast %481 : vector<1x128x128xbf16> to vector<128x128xbf16>
      %cst_288 = arith.constant dense<0.000000e+00> : vector<10x128xf32>
      %483 = tpu.matmul %480, %482, %cst_288 {dimension_numbers = #tpu.dot_dimension_numbers<[1], [0], [0], [1], [0, 0, 1, 1], [], []>} : vector<10x128xbf16>, vector<128x128xbf16>, vector<10x128xf32> -> vector<10x128xf32>
      %484 = arith.addf %478, %483 : vector<10x128xf32>
      %c1_i32_289 = arith.constant 1 : i32
      %485 = arith.addi %arg16, %c1_i32_289 : i32
      %c14_i32_290 = arith.constant 14 : i32
      %486 = arith.muli %485, %c14_i32_290 : i32
      %c0_i32_291 = arith.constant 0 : i32
      %487 = arith.addi %c0_i32_291, %486 : i32
      %488 = arith.index_cast %487 : i32 to index
      %c0_292 = arith.constant 0 : index
      %489 = vector.load %arg13[%488, %c0_292] : memref<392x128xf32, #tpu.memory_space<vmem>>, vector<14x128xf32>
      %490 = vector.extract_strided_slice %489 {offsets = [0, 0], sizes = [10, 128], strides = [1, 1]} : vector<14x128xf32> to vector<10x128xf32>
      %491 = arith.truncf %490 : vector<10x128xf32> to vector<10x128xbf16>
      %c5_293 = arith.constant 5 : index
      %c0_294 = arith.constant 0 : index
      %c0_295 = arith.constant 0 : index
      %492 = vector.load %arg4[%c5_293, %c0_294, %c0_295] : memref<25x128x128xbf16, #tpu.memory_space<vmem>>, vector<1x128x128xbf16>
      %493 = vector.shape_cast %492 : vector<1x128x128xbf16> to vector<128x128xbf16>
      %cst_296 = arith.constant dense<0.000000e+00> : vector<10x128xf32>
      %494 = tpu.matmul %491, %493, %cst_296 {dimension_numbers = #tpu.dot_dimension_numbers<[1], [0], [0], [1], [0, 0, 1, 1], [], []>} : vector<10x128xbf16>, vector<128x128xbf16>, vector<10x128xf32> -> vector<10x128xf32>
      %495 = arith.addf %484, %494 : vector<10x128xf32>
      %496 = vector.extract_strided_slice %489 {offsets = [1, 0], sizes = [10, 128], strides = [1, 1]} : vector<14x128xf32> to vector<10x128xf32>
      %497 = arith.truncf %496 : vector<10x128xf32> to vector<10x128xbf16>
      %c6_297 = arith.constant 6 : index
      %c0_298 = arith.constant 0 : index
      %c0_299 = arith.constant 0 : index
      %498 = vector.load %arg4[%c6_297, %c0_298, %c0_299] : memref<25x128x128xbf16, #tpu.memory_space<vmem>>, vector<1x128x128xbf16>
      %499 = vector.shape_cast %498 : vector<1x128x128xbf16> to vector<128x128xbf16>
      %cst_300 = arith.constant dense<0.000000e+00> : vector<10x128xf32>
      %500 = tpu.matmul %497, %499, %cst_300 {dimension_numbers = #tpu.dot_dimension_numbers<[1], [0], [0], [1], [0, 0, 1, 1], [], []>} : vector<10x128xbf16>, vector<128x128xbf16>, vector<10x128xf32> -> vector<10x128xf32>
      %501 = arith.addf %495, %500 : vector<10x128xf32>
      %502 = vector.extract_strided_slice %489 {offsets = [2, 0], sizes = [10, 128], strides = [1, 1]} : vector<14x128xf32> to vector<10x128xf32>
      %503 = arith.truncf %502 : vector<10x128xf32> to vector<10x128xbf16>
      %c7_301 = arith.constant 7 : index
      %c0_302 = arith.constant 0 : index
      %c0_303 = arith.constant 0 : index
      %504 = vector.load %arg4[%c7_301, %c0_302, %c0_303] : memref<25x128x128xbf16, #tpu.memory_space<vmem>>, vector<1x128x128xbf16>
      %505 = vector.shape_cast %504 : vector<1x128x128xbf16> to vector<128x128xbf16>
      %cst_304 = arith.constant dense<0.000000e+00> : vector<10x128xf32>
      %506 = tpu.matmul %503, %505, %cst_304 {dimension_numbers = #tpu.dot_dimension_numbers<[1], [0], [0], [1], [0, 0, 1, 1], [], []>} : vector<10x128xbf16>, vector<128x128xbf16>, vector<10x128xf32> -> vector<10x128xf32>
      %507 = arith.addf %501, %506 : vector<10x128xf32>
      %508 = vector.extract_strided_slice %489 {offsets = [3, 0], sizes = [10, 128], strides = [1, 1]} : vector<14x128xf32> to vector<10x128xf32>
      %509 = arith.truncf %508 : vector<10x128xf32> to vector<10x128xbf16>
      %c8_305 = arith.constant 8 : index
      %c0_306 = arith.constant 0 : index
      %c0_307 = arith.constant 0 : index
      %510 = vector.load %arg4[%c8_305, %c0_306, %c0_307] : memref<25x128x128xbf16, #tpu.memory_space<vmem>>, vector<1x128x128xbf16>
      %511 = vector.shape_cast %510 : vector<1x128x128xbf16> to vector<128x128xbf16>
      %cst_308 = arith.constant dense<0.000000e+00> : vector<10x128xf32>
      %512 = tpu.matmul %509, %511, %cst_308 {dimension_numbers = #tpu.dot_dimension_numbers<[1], [0], [0], [1], [0, 0, 1, 1], [], []>} : vector<10x128xbf16>, vector<128x128xbf16>, vector<10x128xf32> -> vector<10x128xf32>
      %513 = arith.addf %507, %512 : vector<10x128xf32>
      %514 = vector.extract_strided_slice %489 {offsets = [4, 0], sizes = [10, 128], strides = [1, 1]} : vector<14x128xf32> to vector<10x128xf32>
      %515 = arith.truncf %514 : vector<10x128xf32> to vector<10x128xbf16>
      %c9_309 = arith.constant 9 : index
      %c0_310 = arith.constant 0 : index
      %c0_311 = arith.constant 0 : index
      %516 = vector.load %arg4[%c9_309, %c0_310, %c0_311] : memref<25x128x128xbf16, #tpu.memory_space<vmem>>, vector<1x128x128xbf16>
      %517 = vector.shape_cast %516 : vector<1x128x128xbf16> to vector<128x128xbf16>
      %cst_312 = arith.constant dense<0.000000e+00> : vector<10x128xf32>
      %518 = tpu.matmul %515, %517, %cst_312 {dimension_numbers = #tpu.dot_dimension_numbers<[1], [0], [0], [1], [0, 0, 1, 1], [], []>} : vector<10x128xbf16>, vector<128x128xbf16>, vector<10x128xf32> -> vector<10x128xf32>
      %519 = arith.addf %513, %518 : vector<10x128xf32>
      %c2_i32 = arith.constant 2 : i32
      %520 = arith.addi %arg16, %c2_i32 : i32
      %c14_i32_313 = arith.constant 14 : i32
      %521 = arith.muli %520, %c14_i32_313 : i32
      %c0_i32_314 = arith.constant 0 : i32
      %522 = arith.addi %c0_i32_314, %521 : i32
      %523 = arith.index_cast %522 : i32 to index
      %c0_315 = arith.constant 0 : index
      %524 = vector.load %arg13[%523, %c0_315] : memref<392x128xf32, #tpu.memory_space<vmem>>, vector<14x128xf32>
      %525 = vector.extract_strided_slice %524 {offsets = [0, 0], sizes = [10, 128], strides = [1, 1]} : vector<14x128xf32> to vector<10x128xf32>
      %526 = arith.truncf %525 : vector<10x128xf32> to vector<10x128xbf16>
      %c10_316 = arith.constant 10 : index
      %c0_317 = arith.constant 0 : index
      %c0_318 = arith.constant 0 : index
      %527 = vector.load %arg4[%c10_316, %c0_317, %c0_318] : memref<25x128x128xbf16, #tpu.memory_space<vmem>>, vector<1x128x128xbf16>
      %528 = vector.shape_cast %527 : vector<1x128x128xbf16> to vector<128x128xbf16>
      %cst_319 = arith.constant dense<0.000000e+00> : vector<10x128xf32>
      %529 = tpu.matmul %526, %528, %cst_319 {dimension_numbers = #tpu.dot_dimension_numbers<[1], [0], [0], [1], [0, 0, 1, 1], [], []>} : vector<10x128xbf16>, vector<128x128xbf16>, vector<10x128xf32> -> vector<10x128xf32>
      %530 = arith.addf %519, %529 : vector<10x128xf32>
      %531 = vector.extract_strided_slice %524 {offsets = [1, 0], sizes = [10, 128], strides = [1, 1]} : vector<14x128xf32> to vector<10x128xf32>
      %532 = arith.truncf %531 : vector<10x128xf32> to vector<10x128xbf16>
      %c11_320 = arith.constant 11 : index
      %c0_321 = arith.constant 0 : index
      %c0_322 = arith.constant 0 : index
      %533 = vector.load %arg4[%c11_320, %c0_321, %c0_322] : memref<25x128x128xbf16, #tpu.memory_space<vmem>>, vector<1x128x128xbf16>
      %534 = vector.shape_cast %533 : vector<1x128x128xbf16> to vector<128x128xbf16>
      %cst_323 = arith.constant dense<0.000000e+00> : vector<10x128xf32>
      %535 = tpu.matmul %532, %534, %cst_323 {dimension_numbers = #tpu.dot_dimension_numbers<[1], [0], [0], [1], [0, 0, 1, 1], [], []>} : vector<10x128xbf16>, vector<128x128xbf16>, vector<10x128xf32> -> vector<10x128xf32>
      %536 = arith.addf %530, %535 : vector<10x128xf32>
      %537 = vector.extract_strided_slice %524 {offsets = [2, 0], sizes = [10, 128], strides = [1, 1]} : vector<14x128xf32> to vector<10x128xf32>
      %538 = arith.truncf %537 : vector<10x128xf32> to vector<10x128xbf16>
      %c12_324 = arith.constant 12 : index
      %c0_325 = arith.constant 0 : index
      %c0_326 = arith.constant 0 : index
      %539 = vector.load %arg4[%c12_324, %c0_325, %c0_326] : memref<25x128x128xbf16, #tpu.memory_space<vmem>>, vector<1x128x128xbf16>
      %540 = vector.shape_cast %539 : vector<1x128x128xbf16> to vector<128x128xbf16>
      %cst_327 = arith.constant dense<0.000000e+00> : vector<10x128xf32>
      %541 = tpu.matmul %538, %540, %cst_327 {dimension_numbers = #tpu.dot_dimension_numbers<[1], [0], [0], [1], [0, 0, 1, 1], [], []>} : vector<10x128xbf16>, vector<128x128xbf16>, vector<10x128xf32> -> vector<10x128xf32>
      %542 = arith.addf %536, %541 : vector<10x128xf32>
      %543 = vector.extract_strided_slice %524 {offsets = [3, 0], sizes = [10, 128], strides = [1, 1]} : vector<14x128xf32> to vector<10x128xf32>
      %544 = arith.truncf %543 : vector<10x128xf32> to vector<10x128xbf16>
      %c13_328 = arith.constant 13 : index
      %c0_329 = arith.constant 0 : index
      %c0_330 = arith.constant 0 : index
      %545 = vector.load %arg4[%c13_328, %c0_329, %c0_330] : memref<25x128x128xbf16, #tpu.memory_space<vmem>>, vector<1x128x128xbf16>
      %546 = vector.shape_cast %545 : vector<1x128x128xbf16> to vector<128x128xbf16>
      %cst_331 = arith.constant dense<0.000000e+00> : vector<10x128xf32>
      %547 = tpu.matmul %544, %546, %cst_331 {dimension_numbers = #tpu.dot_dimension_numbers<[1], [0], [0], [1], [0, 0, 1, 1], [], []>} : vector<10x128xbf16>, vector<128x128xbf16>, vector<10x128xf32> -> vector<10x128xf32>
      %548 = arith.addf %542, %547 : vector<10x128xf32>
      %549 = vector.extract_strided_slice %524 {offsets = [4, 0], sizes = [10, 128], strides = [1, 1]} : vector<14x128xf32> to vector<10x128xf32>
      %550 = arith.truncf %549 : vector<10x128xf32> to vector<10x128xbf16>
      %c14_332 = arith.constant 14 : index
      %c0_333 = arith.constant 0 : index
      %c0_334 = arith.constant 0 : index
      %551 = vector.load %arg4[%c14_332, %c0_333, %c0_334] : memref<25x128x128xbf16, #tpu.memory_space<vmem>>, vector<1x128x128xbf16>
      %552 = vector.shape_cast %551 : vector<1x128x128xbf16> to vector<128x128xbf16>
      %cst_335 = arith.constant dense<0.000000e+00> : vector<10x128xf32>
      %553 = tpu.matmul %550, %552, %cst_335 {dimension_numbers = #tpu.dot_dimension_numbers<[1], [0], [0], [1], [0, 0, 1, 1], [], []>} : vector<10x128xbf16>, vector<128x128xbf16>, vector<10x128xf32> -> vector<10x128xf32>
      %554 = arith.addf %548, %553 : vector<10x128xf32>
      %c3_i32 = arith.constant 3 : i32
      %555 = arith.addi %arg16, %c3_i32 : i32
      %c14_i32_336 = arith.constant 14 : i32
      %556 = arith.muli %555, %c14_i32_336 : i32
      %c0_i32_337 = arith.constant 0 : i32
      %557 = arith.addi %c0_i32_337, %556 : i32
      %558 = arith.index_cast %557 : i32 to index
      %c0_338 = arith.constant 0 : index
      %559 = vector.load %arg13[%558, %c0_338] : memref<392x128xf32, #tpu.memory_space<vmem>>, vector<14x128xf32>
      %560 = vector.extract_strided_slice %559 {offsets = [0, 0], sizes = [10, 128], strides = [1, 1]} : vector<14x128xf32> to vector<10x128xf32>
      %561 = arith.truncf %560 : vector<10x128xf32> to vector<10x128xbf16>
      %c15_339 = arith.constant 15 : index
      %c0_340 = arith.constant 0 : index
      %c0_341 = arith.constant 0 : index
      %562 = vector.load %arg4[%c15_339, %c0_340, %c0_341] : memref<25x128x128xbf16, #tpu.memory_space<vmem>>, vector<1x128x128xbf16>
      %563 = vector.shape_cast %562 : vector<1x128x128xbf16> to vector<128x128xbf16>
      %cst_342 = arith.constant dense<0.000000e+00> : vector<10x128xf32>
      %564 = tpu.matmul %561, %563, %cst_342 {dimension_numbers = #tpu.dot_dimension_numbers<[1], [0], [0], [1], [0, 0, 1, 1], [], []>} : vector<10x128xbf16>, vector<128x128xbf16>, vector<10x128xf32> -> vector<10x128xf32>
      %565 = arith.addf %554, %564 : vector<10x128xf32>
      %566 = vector.extract_strided_slice %559 {offsets = [1, 0], sizes = [10, 128], strides = [1, 1]} : vector<14x128xf32> to vector<10x128xf32>
      %567 = arith.truncf %566 : vector<10x128xf32> to vector<10x128xbf16>
      %c16_343 = arith.constant 16 : index
      %c0_344 = arith.constant 0 : index
      %c0_345 = arith.constant 0 : index
      %568 = vector.load %arg4[%c16_343, %c0_344, %c0_345] : memref<25x128x128xbf16, #tpu.memory_space<vmem>>, vector<1x128x128xbf16>
      %569 = vector.shape_cast %568 : vector<1x128x128xbf16> to vector<128x128xbf16>
      %cst_346 = arith.constant dense<0.000000e+00> : vector<10x128xf32>
      %570 = tpu.matmul %567, %569, %cst_346 {dimension_numbers = #tpu.dot_dimension_numbers<[1], [0], [0], [1], [0, 0, 1, 1], [], []>} : vector<10x128xbf16>, vector<128x128xbf16>, vector<10x128xf32> -> vector<10x128xf32>
      %571 = arith.addf %565, %570 : vector<10x128xf32>
      %572 = vector.extract_strided_slice %559 {offsets = [2, 0], sizes = [10, 128], strides = [1, 1]} : vector<14x128xf32> to vector<10x128xf32>
      %573 = arith.truncf %572 : vector<10x128xf32> to vector<10x128xbf16>
      %c17_347 = arith.constant 17 : index
      %c0_348 = arith.constant 0 : index
      %c0_349 = arith.constant 0 : index
      %574 = vector.load %arg4[%c17_347, %c0_348, %c0_349] : memref<25x128x128xbf16, #tpu.memory_space<vmem>>, vector<1x128x128xbf16>
      %575 = vector.shape_cast %574 : vector<1x128x128xbf16> to vector<128x128xbf16>
      %cst_350 = arith.constant dense<0.000000e+00> : vector<10x128xf32>
      %576 = tpu.matmul %573, %575, %cst_350 {dimension_numbers = #tpu.dot_dimension_numbers<[1], [0], [0], [1], [0, 0, 1, 1], [], []>} : vector<10x128xbf16>, vector<128x128xbf16>, vector<10x128xf32> -> vector<10x128xf32>
      %577 = arith.addf %571, %576 : vector<10x128xf32>
      %578 = vector.extract_strided_slice %559 {offsets = [3, 0], sizes = [10, 128], strides = [1, 1]} : vector<14x128xf32> to vector<10x128xf32>
      %579 = arith.truncf %578 : vector<10x128xf32> to vector<10x128xbf16>
      %c18_351 = arith.constant 18 : index
      %c0_352 = arith.constant 0 : index
      %c0_353 = arith.constant 0 : index
      %580 = vector.load %arg4[%c18_351, %c0_352, %c0_353] : memref<25x128x128xbf16, #tpu.memory_space<vmem>>, vector<1x128x128xbf16>
      %581 = vector.shape_cast %580 : vector<1x128x128xbf16> to vector<128x128xbf16>
      %cst_354 = arith.constant dense<0.000000e+00> : vector<10x128xf32>
      %582 = tpu.matmul %579, %581, %cst_354 {dimension_numbers = #tpu.dot_dimension_numbers<[1], [0], [0], [1], [0, 0, 1, 1], [], []>} : vector<10x128xbf16>, vector<128x128xbf16>, vector<10x128xf32> -> vector<10x128xf32>
      %583 = arith.addf %577, %582 : vector<10x128xf32>
      %584 = vector.extract_strided_slice %559 {offsets = [4, 0], sizes = [10, 128], strides = [1, 1]} : vector<14x128xf32> to vector<10x128xf32>
      %585 = arith.truncf %584 : vector<10x128xf32> to vector<10x128xbf16>
      %c19_355 = arith.constant 19 : index
      %c0_356 = arith.constant 0 : index
      %c0_357 = arith.constant 0 : index
      %586 = vector.load %arg4[%c19_355, %c0_356, %c0_357] : memref<25x128x128xbf16, #tpu.memory_space<vmem>>, vector<1x128x128xbf16>
      %587 = vector.shape_cast %586 : vector<1x128x128xbf16> to vector<128x128xbf16>
      %cst_358 = arith.constant dense<0.000000e+00> : vector<10x128xf32>
      %588 = tpu.matmul %585, %587, %cst_358 {dimension_numbers = #tpu.dot_dimension_numbers<[1], [0], [0], [1], [0, 0, 1, 1], [], []>} : vector<10x128xbf16>, vector<128x128xbf16>, vector<10x128xf32> -> vector<10x128xf32>
      %589 = arith.addf %583, %588 : vector<10x128xf32>
      %c4_i32 = arith.constant 4 : i32
      %590 = arith.addi %arg16, %c4_i32 : i32
      %c14_i32_359 = arith.constant 14 : i32
      %591 = arith.muli %590, %c14_i32_359 : i32
      %c0_i32_360 = arith.constant 0 : i32
      %592 = arith.addi %c0_i32_360, %591 : i32
      %593 = arith.index_cast %592 : i32 to index
      %c0_361 = arith.constant 0 : index
      %594 = vector.load %arg13[%593, %c0_361] : memref<392x128xf32, #tpu.memory_space<vmem>>, vector<14x128xf32>
      %595 = vector.extract_strided_slice %594 {offsets = [0, 0], sizes = [10, 128], strides = [1, 1]} : vector<14x128xf32> to vector<10x128xf32>
      %596 = arith.truncf %595 : vector<10x128xf32> to vector<10x128xbf16>
      %c20_362 = arith.constant 20 : index
      %c0_363 = arith.constant 0 : index
      %c0_364 = arith.constant 0 : index
      %597 = vector.load %arg4[%c20_362, %c0_363, %c0_364] : memref<25x128x128xbf16, #tpu.memory_space<vmem>>, vector<1x128x128xbf16>
      %598 = vector.shape_cast %597 : vector<1x128x128xbf16> to vector<128x128xbf16>
      %cst_365 = arith.constant dense<0.000000e+00> : vector<10x128xf32>
      %599 = tpu.matmul %596, %598, %cst_365 {dimension_numbers = #tpu.dot_dimension_numbers<[1], [0], [0], [1], [0, 0, 1, 1], [], []>} : vector<10x128xbf16>, vector<128x128xbf16>, vector<10x128xf32> -> vector<10x128xf32>
      %600 = arith.addf %589, %599 : vector<10x128xf32>
      %601 = vector.extract_strided_slice %594 {offsets = [1, 0], sizes = [10, 128], strides = [1, 1]} : vector<14x128xf32> to vector<10x128xf32>
      %602 = arith.truncf %601 : vector<10x128xf32> to vector<10x128xbf16>
      %c21_366 = arith.constant 21 : index
      %c0_367 = arith.constant 0 : index
      %c0_368 = arith.constant 0 : index
      %603 = vector.load %arg4[%c21_366, %c0_367, %c0_368] : memref<25x128x128xbf16, #tpu.memory_space<vmem>>, vector<1x128x128xbf16>
      %604 = vector.shape_cast %603 : vector<1x128x128xbf16> to vector<128x128xbf16>
      %cst_369 = arith.constant dense<0.000000e+00> : vector<10x128xf32>
      %605 = tpu.matmul %602, %604, %cst_369 {dimension_numbers = #tpu.dot_dimension_numbers<[1], [0], [0], [1], [0, 0, 1, 1], [], []>} : vector<10x128xbf16>, vector<128x128xbf16>, vector<10x128xf32> -> vector<10x128xf32>
      %606 = arith.addf %600, %605 : vector<10x128xf32>
      %607 = vector.extract_strided_slice %594 {offsets = [2, 0], sizes = [10, 128], strides = [1, 1]} : vector<14x128xf32> to vector<10x128xf32>
      %608 = arith.truncf %607 : vector<10x128xf32> to vector<10x128xbf16>
      %c22_370 = arith.constant 22 : index
      %c0_371 = arith.constant 0 : index
      %c0_372 = arith.constant 0 : index
      %609 = vector.load %arg4[%c22_370, %c0_371, %c0_372] : memref<25x128x128xbf16, #tpu.memory_space<vmem>>, vector<1x128x128xbf16>
      %610 = vector.shape_cast %609 : vector<1x128x128xbf16> to vector<128x128xbf16>
      %cst_373 = arith.constant dense<0.000000e+00> : vector<10x128xf32>
      %611 = tpu.matmul %608, %610, %cst_373 {dimension_numbers = #tpu.dot_dimension_numbers<[1], [0], [0], [1], [0, 0, 1, 1], [], []>} : vector<10x128xbf16>, vector<128x128xbf16>, vector<10x128xf32> -> vector<10x128xf32>
      %612 = arith.addf %606, %611 : vector<10x128xf32>
      %613 = vector.extract_strided_slice %594 {offsets = [3, 0], sizes = [10, 128], strides = [1, 1]} : vector<14x128xf32> to vector<10x128xf32>
      %614 = arith.truncf %613 : vector<10x128xf32> to vector<10x128xbf16>
      %c23_374 = arith.constant 23 : index
      %c0_375 = arith.constant 0 : index
      %c0_376 = arith.constant 0 : index
      %615 = vector.load %arg4[%c23_374, %c0_375, %c0_376] : memref<25x128x128xbf16, #tpu.memory_space<vmem>>, vector<1x128x128xbf16>
      %616 = vector.shape_cast %615 : vector<1x128x128xbf16> to vector<128x128xbf16>
      %cst_377 = arith.constant dense<0.000000e+00> : vector<10x128xf32>
      %617 = tpu.matmul %614, %616, %cst_377 {dimension_numbers = #tpu.dot_dimension_numbers<[1], [0], [0], [1], [0, 0, 1, 1], [], []>} : vector<10x128xbf16>, vector<128x128xbf16>, vector<10x128xf32> -> vector<10x128xf32>
      %618 = arith.addf %612, %617 : vector<10x128xf32>
      %619 = vector.extract_strided_slice %594 {offsets = [4, 0], sizes = [10, 128], strides = [1, 1]} : vector<14x128xf32> to vector<10x128xf32>
      %620 = arith.truncf %619 : vector<10x128xf32> to vector<10x128xbf16>
      %c24_378 = arith.constant 24 : index
      %c0_379 = arith.constant 0 : index
      %c0_380 = arith.constant 0 : index
      %621 = vector.load %arg4[%c24_378, %c0_379, %c0_380] : memref<25x128x128xbf16, #tpu.memory_space<vmem>>, vector<1x128x128xbf16>
      %622 = vector.shape_cast %621 : vector<1x128x128xbf16> to vector<128x128xbf16>
      %cst_381 = arith.constant dense<0.000000e+00> : vector<10x128xf32>
      %623 = tpu.matmul %620, %622, %cst_381 {dimension_numbers = #tpu.dot_dimension_numbers<[1], [0], [0], [1], [0, 0, 1, 1], [], []>} : vector<10x128xbf16>, vector<128x128xbf16>, vector<10x128xf32> -> vector<10x128xf32>
      %624 = arith.addf %618, %623 : vector<10x128xf32>
      %c0_382 = arith.constant 0 : index
      %c0_383 = arith.constant 0 : index
      %625 = vector.load %arg5[%c0_382, %c0_383] : memref<1x128xf32, #tpu.memory_space<vmem>>, vector<1x128xf32>
      %626 = vector.broadcast %625 : vector<1x128xf32> to vector<10x128xf32>
      %627 = arith.addf %624, %626 : vector<10x128xf32>
      %cst_384 = arith.constant 0.000000e+00 : f32
      %628 = vector.broadcast %cst_384 : f32 to vector<10x128xf32>
      %629 = arith.maximumf %627, %628 : vector<10x128xf32>
      %c10_i32_385 = arith.constant 10 : i32
      %630 = arith.muli %arg16, %c10_i32_385 : i32
      %c0_i32_386 = arith.constant 0 : i32
      %631 = arith.addi %c0_i32_386, %630 : i32
      %632 = arith.index_cast %631 : i32 to index
      %c0_387 = arith.constant 0 : index
      %633 = vector.load %arg14[%632, %c0_387] : memref<200x128xf32, #tpu.memory_space<vmem>>, vector<10x128xf32>
      tpu.vector_store %arg14[%632, %c0_387], %629 {strides = array<i32>} : memref<200x128xf32, #tpu.memory_space<vmem>>, vector<10x128xf32>,
    }
    %c10_i32_29 = arith.constant 10 : i32
    %c0_i32_30 = arith.constant 0 : i32
    %c10_i32_31 = arith.constant 10 : i32
    %37 = arith.addi %c0_i32_30, %c10_i32_31 : i32
    %c1_i32_32 = arith.constant 1 : i32
    scf.for %arg16 = %c0_i32_30 to %37 step %c1_i32_32  : i32 {
      %cst_265 = arith.constant 0.000000e+00 : f32
      %449 = vector.broadcast %cst_265 : f32 to vector<10x128xf32>
      %c0_i32_266 = arith.constant 0 : i32
      %450 = arith.addi %arg16, %c0_i32_266 : i32
      %c14_i32 = arith.constant 14 : i32
      %451 = arith.muli %450, %c14_i32 : i32
      %c196_i32 = arith.constant 196 : i32
      %452 = arith.addi %c196_i32, %451 : i32
      %453 = arith.index_cast %452 : i32 to index
      %c0_267 = arith.constant 0 : index
      %454 = vector.load %arg13[%453, %c0_267] : memref<392x128xf32, #tpu.memory_space<vmem>>, vector<14x128xf32>
      %455 = vector.extract_strided_slice %454 {offsets = [0, 0], sizes = [10, 128], strides = [1, 1]} : vector<14x128xf32> to vector<10x128xf32>
      %456 = arith.truncf %455 : vector<10x128xf32> to vector<10x128xbf16>
      %c0_268 = arith.constant 0 : index
      %c0_269 = arith.constant 0 : index
      %c0_270 = arith.constant 0 : index
      %457 = vector.load %arg4[%c0_268, %c0_269, %c0_270] : memref<25x128x128xbf16, #tpu.memory_space<vmem>>, vector<1x128x128xbf16>
      %458 = vector.shape_cast %457 : vector<1x128x128xbf16> to vector<128x128xbf16>
      %cst_271 = arith.constant dense<0.000000e+00> : vector<10x128xf32>
      %459 = tpu.matmul %456, %458, %cst_271 {dimension_numbers = #tpu.dot_dimension_numbers<[1], [0], [0], [1], [0, 0, 1, 1], [], []>} : vector<10x128xbf16>, vector<128x128xbf16>, vector<10x128xf32> -> vector<10x128xf32>
      %460 = arith.addf %449, %459 : vector<10x128xf32>
      %461 = vector.extract_strided_slice %454 {offsets = [1, 0], sizes = [10, 128], strides = [1, 1]} : vector<14x128xf32> to vector<10x128xf32>
      %462 = arith.truncf %461 : vector<10x128xf32> to vector<10x128xbf16>
      %c1_272 = arith.constant 1 : index
      %c0_273 = arith.constant 0 : index
      %c0_274 = arith.constant 0 : index
      %463 = vector.load %arg4[%c1_272, %c0_273, %c0_274] : memref<25x128x128xbf16, #tpu.memory_space<vmem>>, vector<1x128x128xbf16>
      %464 = vector.shape_cast %463 : vector<1x128x128xbf16> to vector<128x128xbf16>
      %cst_275 = arith.constant dense<0.000000e+00> : vector<10x128xf32>
      %465 = tpu.matmul %462, %464, %cst_275 {dimension_numbers = #tpu.dot_dimension_numbers<[1], [0], [0], [1], [0, 0, 1, 1], [], []>} : vector<10x128xbf16>, vector<128x128xbf16>, vector<10x128xf32> -> vector<10x128xf32>
      %466 = arith.addf %460, %465 : vector<10x128xf32>
      %467 = vector.extract_strided_slice %454 {offsets = [2, 0], sizes = [10, 128], strides = [1, 1]} : vector<14x128xf32> to vector<10x128xf32>
      %468 = arith.truncf %467 : vector<10x128xf32> to vector<10x128xbf16>
      %c2_276 = arith.constant 2 : index
      %c0_277 = arith.constant 0 : index
      %c0_278 = arith.constant 0 : index
      %469 = vector.load %arg4[%c2_276, %c0_277, %c0_278] : memref<25x128x128xbf16, #tpu.memory_space<vmem>>, vector<1x128x128xbf16>
      %470 = vector.shape_cast %469 : vector<1x128x128xbf16> to vector<128x128xbf16>
      %cst_279 = arith.constant dense<0.000000e+00> : vector<10x128xf32>
      %471 = tpu.matmul %468, %470, %cst_279 {dimension_numbers = #tpu.dot_dimension_numbers<[1], [0], [0], [1], [0, 0, 1, 1], [], []>} : vector<10x128xbf16>, vector<128x128xbf16>, vector<10x128xf32> -> vector<10x128xf32>
      %472 = arith.addf %466, %471 : vector<10x128xf32>
      %473 = vector.extract_strided_slice %454 {offsets = [3, 0], sizes = [10, 128], strides = [1, 1]} : vector<14x128xf32> to vector<10x128xf32>
      %474 = arith.truncf %473 : vector<10x128xf32> to vector<10x128xbf16>
      %c3_280 = arith.constant 3 : index
      %c0_281 = arith.constant 0 : index
      %c0_282 = arith.constant 0 : index
      %475 = vector.load %arg4[%c3_280, %c0_281, %c0_282] : memref<25x128x128xbf16, #tpu.memory_space<vmem>>, vector<1x128x128xbf16>
      %476 = vector.shape_cast %475 : vector<1x128x128xbf16> to vector<128x128xbf16>
      %cst_283 = arith.constant dense<0.000000e+00> : vector<10x128xf32>
      %477 = tpu.matmul %474, %476, %cst_283 {dimension_numbers = #tpu.dot_dimension_numbers<[1], [0], [0], [1], [0, 0, 1, 1], [], []>} : vector<10x128xbf16>, vector<128x128xbf16>, vector<10x128xf32> -> vector<10x128xf32>
      %478 = arith.addf %472, %477 : vector<10x128xf32>
      %479 = vector.extract_strided_slice %454 {offsets = [4, 0], sizes = [10, 128], strides = [1, 1]} : vector<14x128xf32> to vector<10x128xf32>
      %480 = arith.truncf %479 : vector<10x128xf32> to vector<10x128xbf16>
      %c4_284 = arith.constant 4 : index
      %c0_285 = arith.constant 0 : index
      %c0_286 = arith.constant 0 : index
      %481 = vector.load %arg4[%c4_284, %c0_285, %c0_286] : memref<25x128x128xbf16, #tpu.memory_space<vmem>>, vector<1x128x128xbf16>
      %482 = vector.shape_cast %481 : vector<1x128x128xbf16> to vector<128x128xbf16>
      %cst_287 = arith.constant dense<0.000000e+00> : vector<10x128xf32>
      %483 = tpu.matmul %480, %482, %cst_287 {dimension_numbers = #tpu.dot_dimension_numbers<[1], [0], [0], [1], [0, 0, 1, 1], [], []>} : vector<10x128xbf16>, vector<128x128xbf16>, vector<10x128xf32> -> vector<10x128xf32>
      %484 = arith.addf %478, %483 : vector<10x128xf32>
      %c1_i32_288 = arith.constant 1 : i32
      %485 = arith.addi %arg16, %c1_i32_288 : i32
      %c14_i32_289 = arith.constant 14 : i32
      %486 = arith.muli %485, %c14_i32_289 : i32
      %c196_i32_290 = arith.constant 196 : i32
      %487 = arith.addi %c196_i32_290, %486 : i32
      %488 = arith.index_cast %487 : i32 to index
      %c0_291 = arith.constant 0 : index
      %489 = vector.load %arg13[%488, %c0_291] : memref<392x128xf32, #tpu.memory_space<vmem>>, vector<14x128xf32>
      %490 = vector.extract_strided_slice %489 {offsets = [0, 0], sizes = [10, 128], strides = [1, 1]} : vector<14x128xf32> to vector<10x128xf32>
      %491 = arith.truncf %490 : vector<10x128xf32> to vector<10x128xbf16>
      %c5_292 = arith.constant 5 : index
      %c0_293 = arith.constant 0 : index
      %c0_294 = arith.constant 0 : index
      %492 = vector.load %arg4[%c5_292, %c0_293, %c0_294] : memref<25x128x128xbf16, #tpu.memory_space<vmem>>, vector<1x128x128xbf16>
      %493 = vector.shape_cast %492 : vector<1x128x128xbf16> to vector<128x128xbf16>
      %cst_295 = arith.constant dense<0.000000e+00> : vector<10x128xf32>
      %494 = tpu.matmul %491, %493, %cst_295 {dimension_numbers = #tpu.dot_dimension_numbers<[1], [0], [0], [1], [0, 0, 1, 1], [], []>} : vector<10x128xbf16>, vector<128x128xbf16>, vector<10x128xf32> -> vector<10x128xf32>
      %495 = arith.addf %484, %494 : vector<10x128xf32>
      %496 = vector.extract_strided_slice %489 {offsets = [1, 0], sizes = [10, 128], strides = [1, 1]} : vector<14x128xf32> to vector<10x128xf32>
      %497 = arith.truncf %496 : vector<10x128xf32> to vector<10x128xbf16>
      %c6_296 = arith.constant 6 : index
      %c0_297 = arith.constant 0 : index
      %c0_298 = arith.constant 0 : index
      %498 = vector.load %arg4[%c6_296, %c0_297, %c0_298] : memref<25x128x128xbf16, #tpu.memory_space<vmem>>, vector<1x128x128xbf16>
      %499 = vector.shape_cast %498 : vector<1x128x128xbf16> to vector<128x128xbf16>
      %cst_299 = arith.constant dense<0.000000e+00> : vector<10x128xf32>
      %500 = tpu.matmul %497, %499, %cst_299 {dimension_numbers = #tpu.dot_dimension_numbers<[1], [0], [0], [1], [0, 0, 1, 1], [], []>} : vector<10x128xbf16>, vector<128x128xbf16>, vector<10x128xf32> -> vector<10x128xf32>
      %501 = arith.addf %495, %500 : vector<10x128xf32>
      %502 = vector.extract_strided_slice %489 {offsets = [2, 0], sizes = [10, 128], strides = [1, 1]} : vector<14x128xf32> to vector<10x128xf32>
      %503 = arith.truncf %502 : vector<10x128xf32> to vector<10x128xbf16>
      %c7_300 = arith.constant 7 : index
      %c0_301 = arith.constant 0 : index
      %c0_302 = arith.constant 0 : index
      %504 = vector.load %arg4[%c7_300, %c0_301, %c0_302] : memref<25x128x128xbf16, #tpu.memory_space<vmem>>, vector<1x128x128xbf16>
      %505 = vector.shape_cast %504 : vector<1x128x128xbf16> to vector<128x128xbf16>
      %cst_303 = arith.constant dense<0.000000e+00> : vector<10x128xf32>
      %506 = tpu.matmul %503, %505, %cst_303 {dimension_numbers = #tpu.dot_dimension_numbers<[1], [0], [0], [1], [0, 0, 1, 1], [], []>} : vector<10x128xbf16>, vector<128x128xbf16>, vector<10x128xf32> -> vector<10x128xf32>
      %507 = arith.addf %501, %506 : vector<10x128xf32>
      %508 = vector.extract_strided_slice %489 {offsets = [3, 0], sizes = [10, 128], strides = [1, 1]} : vector<14x128xf32> to vector<10x128xf32>
      %509 = arith.truncf %508 : vector<10x128xf32> to vector<10x128xbf16>
      %c8_304 = arith.constant 8 : index
      %c0_305 = arith.constant 0 : index
      %c0_306 = arith.constant 0 : index
      %510 = vector.load %arg4[%c8_304, %c0_305, %c0_306] : memref<25x128x128xbf16, #tpu.memory_space<vmem>>, vector<1x128x128xbf16>
      %511 = vector.shape_cast %510 : vector<1x128x128xbf16> to vector<128x128xbf16>
      %cst_307 = arith.constant dense<0.000000e+00> : vector<10x128xf32>
      %512 = tpu.matmul %509, %511, %cst_307 {dimension_numbers = #tpu.dot_dimension_numbers<[1], [0], [0], [1], [0, 0, 1, 1], [], []>} : vector<10x128xbf16>, vector<128x128xbf16>, vector<10x128xf32> -> vector<10x128xf32>
      %513 = arith.addf %507, %512 : vector<10x128xf32>
      %514 = vector.extract_strided_slice %489 {offsets = [4, 0], sizes = [10, 128], strides = [1, 1]} : vector<14x128xf32> to vector<10x128xf32>
      %515 = arith.truncf %514 : vector<10x128xf32> to vector<10x128xbf16>
      %c9_308 = arith.constant 9 : index
      %c0_309 = arith.constant 0 : index
      %c0_310 = arith.constant 0 : index
      %516 = vector.load %arg4[%c9_308, %c0_309, %c0_310] : memref<25x128x128xbf16, #tpu.memory_space<vmem>>, vector<1x128x128xbf16>
      %517 = vector.shape_cast %516 : vector<1x128x128xbf16> to vector<128x128xbf16>
      %cst_311 = arith.constant dense<0.000000e+00> : vector<10x128xf32>
      %518 = tpu.matmul %515, %517, %cst_311 {dimension_numbers = #tpu.dot_dimension_numbers<[1], [0], [0], [1], [0, 0, 1, 1], [], []>} : vector<10x128xbf16>, vector<128x128xbf16>, vector<10x128xf32> -> vector<10x128xf32>
      %519 = arith.addf %513, %518 : vector<10x128xf32>
      %c2_i32 = arith.constant 2 : i32
      %520 = arith.addi %arg16, %c2_i32 : i32
      %c14_i32_312 = arith.constant 14 : i32
      %521 = arith.muli %520, %c14_i32_312 : i32
      %c196_i32_313 = arith.constant 196 : i32
      %522 = arith.addi %c196_i32_313, %521 : i32
      %523 = arith.index_cast %522 : i32 to index
      %c0_314 = arith.constant 0 : index
      %524 = vector.load %arg13[%523, %c0_314] : memref<392x128xf32, #tpu.memory_space<vmem>>, vector<14x128xf32>
      %525 = vector.extract_strided_slice %524 {offsets = [0, 0], sizes = [10, 128], strides = [1, 1]} : vector<14x128xf32> to vector<10x128xf32>
      %526 = arith.truncf %525 : vector<10x128xf32> to vector<10x128xbf16>
      %c10_315 = arith.constant 10 : index
      %c0_316 = arith.constant 0 : index
      %c0_317 = arith.constant 0 : index
      %527 = vector.load %arg4[%c10_315, %c0_316, %c0_317] : memref<25x128x128xbf16, #tpu.memory_space<vmem>>, vector<1x128x128xbf16>
      %528 = vector.shape_cast %527 : vector<1x128x128xbf16> to vector<128x128xbf16>
      %cst_318 = arith.constant dense<0.000000e+00> : vector<10x128xf32>
      %529 = tpu.matmul %526, %528, %cst_318 {dimension_numbers = #tpu.dot_dimension_numbers<[1], [0], [0], [1], [0, 0, 1, 1], [], []>} : vector<10x128xbf16>, vector<128x128xbf16>, vector<10x128xf32> -> vector<10x128xf32>
      %530 = arith.addf %519, %529 : vector<10x128xf32>
      %531 = vector.extract_strided_slice %524 {offsets = [1, 0], sizes = [10, 128], strides = [1, 1]} : vector<14x128xf32> to vector<10x128xf32>
      %532 = arith.truncf %531 : vector<10x128xf32> to vector<10x128xbf16>
      %c11_319 = arith.constant 11 : index
      %c0_320 = arith.constant 0 : index
      %c0_321 = arith.constant 0 : index
      %533 = vector.load %arg4[%c11_319, %c0_320, %c0_321] : memref<25x128x128xbf16, #tpu.memory_space<vmem>>, vector<1x128x128xbf16>
      %534 = vector.shape_cast %533 : vector<1x128x128xbf16> to vector<128x128xbf16>
      %cst_322 = arith.constant dense<0.000000e+00> : vector<10x128xf32>
      %535 = tpu.matmul %532, %534, %cst_322 {dimension_numbers = #tpu.dot_dimension_numbers<[1], [0], [0], [1], [0, 0, 1, 1], [], []>} : vector<10x128xbf16>, vector<128x128xbf16>, vector<10x128xf32> -> vector<10x128xf32>
      %536 = arith.addf %530, %535 : vector<10x128xf32>
      %537 = vector.extract_strided_slice %524 {offsets = [2, 0], sizes = [10, 128], strides = [1, 1]} : vector<14x128xf32> to vector<10x128xf32>
      %538 = arith.truncf %537 : vector<10x128xf32> to vector<10x128xbf16>
      %c12_323 = arith.constant 12 : index
      %c0_324 = arith.constant 0 : index
      %c0_325 = arith.constant 0 : index
      %539 = vector.load %arg4[%c12_323, %c0_324, %c0_325] : memref<25x128x128xbf16, #tpu.memory_space<vmem>>, vector<1x128x128xbf16>
      %540 = vector.shape_cast %539 : vector<1x128x128xbf16> to vector<128x128xbf16>
      %cst_326 = arith.constant dense<0.000000e+00> : vector<10x128xf32>
      %541 = tpu.matmul %538, %540, %cst_326 {dimension_numbers = #tpu.dot_dimension_numbers<[1], [0], [0], [1], [0, 0, 1, 1], [], []>} : vector<10x128xbf16>, vector<128x128xbf16>, vector<10x128xf32> -> vector<10x128xf32>
      %542 = arith.addf %536, %541 : vector<10x128xf32>
      %543 = vector.extract_strided_slice %524 {offsets = [3, 0], sizes = [10, 128], strides = [1, 1]} : vector<14x128xf32> to vector<10x128xf32>
      %544 = arith.truncf %543 : vector<10x128xf32> to vector<10x128xbf16>
      %c13_327 = arith.constant 13 : index
      %c0_328 = arith.constant 0 : index
      %c0_329 = arith.constant 0 : index
      %545 = vector.load %arg4[%c13_327, %c0_328, %c0_329] : memref<25x128x128xbf16, #tpu.memory_space<vmem>>, vector<1x128x128xbf16>
      %546 = vector.shape_cast %545 : vector<1x128x128xbf16> to vector<128x128xbf16>
      %cst_330 = arith.constant dense<0.000000e+00> : vector<10x128xf32>
      %547 = tpu.matmul %544, %546, %cst_330 {dimension_numbers = #tpu.dot_dimension_numbers<[1], [0], [0], [1], [0, 0, 1, 1], [], []>} : vector<10x128xbf16>, vector<128x128xbf16>, vector<10x128xf32> -> vector<10x128xf32>
      %548 = arith.addf %542, %547 : vector<10x128xf32>
      %549 = vector.extract_strided_slice %524 {offsets = [4, 0], sizes = [10, 128], strides = [1, 1]} : vector<14x128xf32> to vector<10x128xf32>
      %550 = arith.truncf %549 : vector<10x128xf32> to vector<10x128xbf16>
      %c14_331 = arith.constant 14 : index
      %c0_332 = arith.constant 0 : index
      %c0_333 = arith.constant 0 : index
      %551 = vector.load %arg4[%c14_331, %c0_332, %c0_333] : memref<25x128x128xbf16, #tpu.memory_space<vmem>>, vector<1x128x128xbf16>
      %552 = vector.shape_cast %551 : vector<1x128x128xbf16> to vector<128x128xbf16>
      %cst_334 = arith.constant dense<0.000000e+00> : vector<10x128xf32>
      %553 = tpu.matmul %550, %552, %cst_334 {dimension_numbers = #tpu.dot_dimension_numbers<[1], [0], [0], [1], [0, 0, 1, 1], [], []>} : vector<10x128xbf16>, vector<128x128xbf16>, vector<10x128xf32> -> vector<10x128xf32>
      %554 = arith.addf %548, %553 : vector<10x128xf32>
      %c3_i32 = arith.constant 3 : i32
      %555 = arith.addi %arg16, %c3_i32 : i32
      %c14_i32_335 = arith.constant 14 : i32
      %556 = arith.muli %555, %c14_i32_335 : i32
      %c196_i32_336 = arith.constant 196 : i32
      %557 = arith.addi %c196_i32_336, %556 : i32
      %558 = arith.index_cast %557 : i32 to index
      %c0_337 = arith.constant 0 : index
      %559 = vector.load %arg13[%558, %c0_337] : memref<392x128xf32, #tpu.memory_space<vmem>>, vector<14x128xf32>
      %560 = vector.extract_strided_slice %559 {offsets = [0, 0], sizes = [10, 128], strides = [1, 1]} : vector<14x128xf32> to vector<10x128xf32>
      %561 = arith.truncf %560 : vector<10x128xf32> to vector<10x128xbf16>
      %c15_338 = arith.constant 15 : index
      %c0_339 = arith.constant 0 : index
      %c0_340 = arith.constant 0 : index
      %562 = vector.load %arg4[%c15_338, %c0_339, %c0_340] : memref<25x128x128xbf16, #tpu.memory_space<vmem>>, vector<1x128x128xbf16>
      %563 = vector.shape_cast %562 : vector<1x128x128xbf16> to vector<128x128xbf16>
      %cst_341 = arith.constant dense<0.000000e+00> : vector<10x128xf32>
      %564 = tpu.matmul %561, %563, %cst_341 {dimension_numbers = #tpu.dot_dimension_numbers<[1], [0], [0], [1], [0, 0, 1, 1], [], []>} : vector<10x128xbf16>, vector<128x128xbf16>, vector<10x128xf32> -> vector<10x128xf32>
      %565 = arith.addf %554, %564 : vector<10x128xf32>
      %566 = vector.extract_strided_slice %559 {offsets = [1, 0], sizes = [10, 128], strides = [1, 1]} : vector<14x128xf32> to vector<10x128xf32>
      %567 = arith.truncf %566 : vector<10x128xf32> to vector<10x128xbf16>
      %c16_342 = arith.constant 16 : index
      %c0_343 = arith.constant 0 : index
      %c0_344 = arith.constant 0 : index
      %568 = vector.load %arg4[%c16_342, %c0_343, %c0_344] : memref<25x128x128xbf16, #tpu.memory_space<vmem>>, vector<1x128x128xbf16>
      %569 = vector.shape_cast %568 : vector<1x128x128xbf16> to vector<128x128xbf16>
      %cst_345 = arith.constant dense<0.000000e+00> : vector<10x128xf32>
      %570 = tpu.matmul %567, %569, %cst_345 {dimension_numbers = #tpu.dot_dimension_numbers<[1], [0], [0], [1], [0, 0, 1, 1], [], []>} : vector<10x128xbf16>, vector<128x128xbf16>, vector<10x128xf32> -> vector<10x128xf32>
      %571 = arith.addf %565, %570 : vector<10x128xf32>
      %572 = vector.extract_strided_slice %559 {offsets = [2, 0], sizes = [10, 128], strides = [1, 1]} : vector<14x128xf32> to vector<10x128xf32>
      %573 = arith.truncf %572 : vector<10x128xf32> to vector<10x128xbf16>
      %c17_346 = arith.constant 17 : index
      %c0_347 = arith.constant 0 : index
      %c0_348 = arith.constant 0 : index
      %574 = vector.load %arg4[%c17_346, %c0_347, %c0_348] : memref<25x128x128xbf16, #tpu.memory_space<vmem>>, vector<1x128x128xbf16>
      %575 = vector.shape_cast %574 : vector<1x128x128xbf16> to vector<128x128xbf16>
      %cst_349 = arith.constant dense<0.000000e+00> : vector<10x128xf32>
      %576 = tpu.matmul %573, %575, %cst_349 {dimension_numbers = #tpu.dot_dimension_numbers<[1], [0], [0], [1], [0, 0, 1, 1], [], []>} : vector<10x128xbf16>, vector<128x128xbf16>, vector<10x128xf32> -> vector<10x128xf32>
      %577 = arith.addf %571, %576 : vector<10x128xf32>
      %578 = vector.extract_strided_slice %559 {offsets = [3, 0], sizes = [10, 128], strides = [1, 1]} : vector<14x128xf32> to vector<10x128xf32>
      %579 = arith.truncf %578 : vector<10x128xf32> to vector<10x128xbf16>
      %c18_350 = arith.constant 18 : index
      %c0_351 = arith.constant 0 : index
      %c0_352 = arith.constant 0 : index
      %580 = vector.load %arg4[%c18_350, %c0_351, %c0_352] : memref<25x128x128xbf16, #tpu.memory_space<vmem>>, vector<1x128x128xbf16>
      %581 = vector.shape_cast %580 : vector<1x128x128xbf16> to vector<128x128xbf16>
      %cst_353 = arith.constant dense<0.000000e+00> : vector<10x128xf32>
      %582 = tpu.matmul %579, %581, %cst_353 {dimension_numbers = #tpu.dot_dimension_numbers<[1], [0], [0], [1], [0, 0, 1, 1], [], []>} : vector<10x128xbf16>, vector<128x128xbf16>, vector<10x128xf32> -> vector<10x128xf32>
      %583 = arith.addf %577, %582 : vector<10x128xf32>
      %584 = vector.extract_strided_slice %559 {offsets = [4, 0], sizes = [10, 128], strides = [1, 1]} : vector<14x128xf32> to vector<10x128xf32>
      %585 = arith.truncf %584 : vector<10x128xf32> to vector<10x128xbf16>
      %c19_354 = arith.constant 19 : index
      %c0_355 = arith.constant 0 : index
      %c0_356 = arith.constant 0 : index
      %586 = vector.load %arg4[%c19_354, %c0_355, %c0_356] : memref<25x128x128xbf16, #tpu.memory_space<vmem>>, vector<1x128x128xbf16>
      %587 = vector.shape_cast %586 : vector<1x128x128xbf16> to vector<128x128xbf16>
      %cst_357 = arith.constant dense<0.000000e+00> : vector<10x128xf32>
      %588 = tpu.matmul %585, %587, %cst_357 {dimension_numbers = #tpu.dot_dimension_numbers<[1], [0], [0], [1], [0, 0, 1, 1], [], []>} : vector<10x128xbf16>, vector<128x128xbf16>, vector<10x128xf32> -> vector<10x128xf32>
      %589 = arith.addf %583, %588 : vector<10x128xf32>
      %c4_i32 = arith.constant 4 : i32
      %590 = arith.addi %arg16, %c4_i32 : i32
      %c14_i32_358 = arith.constant 14 : i32
      %591 = arith.muli %590, %c14_i32_358 : i32
      %c196_i32_359 = arith.constant 196 : i32
      %592 = arith.addi %c196_i32_359, %591 : i32
      %593 = arith.index_cast %592 : i32 to index
      %c0_360 = arith.constant 0 : index
      %594 = vector.load %arg13[%593, %c0_360] : memref<392x128xf32, #tpu.memory_space<vmem>>, vector<14x128xf32>
      %595 = vector.extract_strided_slice %594 {offsets = [0, 0], sizes = [10, 128], strides = [1, 1]} : vector<14x128xf32> to vector<10x128xf32>
      %596 = arith.truncf %595 : vector<10x128xf32> to vector<10x128xbf16>
      %c20_361 = arith.constant 20 : index
      %c0_362 = arith.constant 0 : index
      %c0_363 = arith.constant 0 : index
      %597 = vector.load %arg4[%c20_361, %c0_362, %c0_363] : memref<25x128x128xbf16, #tpu.memory_space<vmem>>, vector<1x128x128xbf16>
      %598 = vector.shape_cast %597 : vector<1x128x128xbf16> to vector<128x128xbf16>
      %cst_364 = arith.constant dense<0.000000e+00> : vector<10x128xf32>
      %599 = tpu.matmul %596, %598, %cst_364 {dimension_numbers = #tpu.dot_dimension_numbers<[1], [0], [0], [1], [0, 0, 1, 1], [], []>} : vector<10x128xbf16>, vector<128x128xbf16>, vector<10x128xf32> -> vector<10x128xf32>
      %600 = arith.addf %589, %599 : vector<10x128xf32>
      %601 = vector.extract_strided_slice %594 {offsets = [1, 0], sizes = [10, 128], strides = [1, 1]} : vector<14x128xf32> to vector<10x128xf32>
      %602 = arith.truncf %601 : vector<10x128xf32> to vector<10x128xbf16>
      %c21_365 = arith.constant 21 : index
      %c0_366 = arith.constant 0 : index
      %c0_367 = arith.constant 0 : index
      %603 = vector.load %arg4[%c21_365, %c0_366, %c0_367] : memref<25x128x128xbf16, #tpu.memory_space<vmem>>, vector<1x128x128xbf16>
      %604 = vector.shape_cast %603 : vector<1x128x128xbf16> to vector<128x128xbf16>
      %cst_368 = arith.constant dense<0.000000e+00> : vector<10x128xf32>
      %605 = tpu.matmul %602, %604, %cst_368 {dimension_numbers = #tpu.dot_dimension_numbers<[1], [0], [0], [1], [0, 0, 1, 1], [], []>} : vector<10x128xbf16>, vector<128x128xbf16>, vector<10x128xf32> -> vector<10x128xf32>
      %606 = arith.addf %600, %605 : vector<10x128xf32>
      %607 = vector.extract_strided_slice %594 {offsets = [2, 0], sizes = [10, 128], strides = [1, 1]} : vector<14x128xf32> to vector<10x128xf32>
      %608 = arith.truncf %607 : vector<10x128xf32> to vector<10x128xbf16>
      %c22_369 = arith.constant 22 : index
      %c0_370 = arith.constant 0 : index
      %c0_371 = arith.constant 0 : index
      %609 = vector.load %arg4[%c22_369, %c0_370, %c0_371] : memref<25x128x128xbf16, #tpu.memory_space<vmem>>, vector<1x128x128xbf16>
      %610 = vector.shape_cast %609 : vector<1x128x128xbf16> to vector<128x128xbf16>
      %cst_372 = arith.constant dense<0.000000e+00> : vector<10x128xf32>
      %611 = tpu.matmul %608, %610, %cst_372 {dimension_numbers = #tpu.dot_dimension_numbers<[1], [0], [0], [1], [0, 0, 1, 1], [], []>} : vector<10x128xbf16>, vector<128x128xbf16>, vector<10x128xf32> -> vector<10x128xf32>
      %612 = arith.addf %606, %611 : vector<10x128xf32>
      %613 = vector.extract_strided_slice %594 {offsets = [3, 0], sizes = [10, 128], strides = [1, 1]} : vector<14x128xf32> to vector<10x128xf32>
      %614 = arith.truncf %613 : vector<10x128xf32> to vector<10x128xbf16>
      %c23_373 = arith.constant 23 : index
      %c0_374 = arith.constant 0 : index
      %c0_375 = arith.constant 0 : index
      %615 = vector.load %arg4[%c23_373, %c0_374, %c0_375] : memref<25x128x128xbf16, #tpu.memory_space<vmem>>, vector<1x128x128xbf16>
      %616 = vector.shape_cast %615 : vector<1x128x128xbf16> to vector<128x128xbf16>
      %cst_376 = arith.constant dense<0.000000e+00> : vector<10x128xf32>
      %617 = tpu.matmul %614, %616, %cst_376 {dimension_numbers = #tpu.dot_dimension_numbers<[1], [0], [0], [1], [0, 0, 1, 1], [], []>} : vector<10x128xbf16>, vector<128x128xbf16>, vector<10x128xf32> -> vector<10x128xf32>
      %618 = arith.addf %612, %617 : vector<10x128xf32>
      %619 = vector.extract_strided_slice %594 {offsets = [4, 0], sizes = [10, 128], strides = [1, 1]} : vector<14x128xf32> to vector<10x128xf32>
      %620 = arith.truncf %619 : vector<10x128xf32> to vector<10x128xbf16>
      %c24_377 = arith.constant 24 : index
      %c0_378 = arith.constant 0 : index
      %c0_379 = arith.constant 0 : index
      %621 = vector.load %arg4[%c24_377, %c0_378, %c0_379] : memref<25x128x128xbf16, #tpu.memory_space<vmem>>, vector<1x128x128xbf16>
      %622 = vector.shape_cast %621 : vector<1x128x128xbf16> to vector<128x128xbf16>
      %cst_380 = arith.constant dense<0.000000e+00> : vector<10x128xf32>
      %623 = tpu.matmul %620, %622, %cst_380 {dimension_numbers = #tpu.dot_dimension_numbers<[1], [0], [0], [1], [0, 0, 1, 1], [], []>} : vector<10x128xbf16>, vector<128x128xbf16>, vector<10x128xf32> -> vector<10x128xf32>
      %624 = arith.addf %618, %623 : vector<10x128xf32>
      %c0_381 = arith.constant 0 : index
      %c0_382 = arith.constant 0 : index
      %625 = vector.load %arg5[%c0_381, %c0_382] : memref<1x128xf32, #tpu.memory_space<vmem>>, vector<1x128xf32>
      %626 = vector.broadcast %625 : vector<1x128xf32> to vector<10x128xf32>
      %627 = arith.addf %624, %626 : vector<10x128xf32>
      %cst_383 = arith.constant 0.000000e+00 : f32
      %628 = vector.broadcast %cst_383 : f32 to vector<10x128xf32>
      %629 = arith.maximumf %627, %628 : vector<10x128xf32>
      %c10_i32_384 = arith.constant 10 : i32
      %630 = arith.muli %arg16, %c10_i32_384 : i32
      %c100_i32 = arith.constant 100 : i32
      %631 = arith.addi %c100_i32, %630 : i32
      %632 = arith.index_cast %631 : i32 to index
      %c0_385 = arith.constant 0 : index
      %633 = vector.load %arg14[%632, %c0_385] : memref<200x128xf32, #tpu.memory_space<vmem>>, vector<10x128xf32>
      tpu.vector_store %arg14[%632, %c0_385], %629 {strides = array<i32>} : memref<200x128xf32, #tpu.memory_space<vmem>>, vector<10x128xf32>,
    }
    %c10_i32_33 = arith.constant 10 : i32
    %c0_34 = arith.constant 0 : index
    %c0_35 = arith.constant 0 : index
    %38 = vector.load %arg14[%c0_34, %c0_35] : memref<200x128xf32, #tpu.memory_space<vmem>>, vector<20x128xf32>
    %39 = vector.extract_strided_slice %38 {offsets = [0, 0], sizes = [10, 128], strides = [1, 1]} : vector<20x128xf32> to vector<10x128xf32>
    %40 = vector.extract_strided_slice %38 {offsets = [10, 0], sizes = [10, 128], strides = [1, 1]} : vector<20x128xf32> to vector<10x128xf32>
    %41 = arith.maximumf %39, %40 : vector<10x128xf32>
    %42 = vector.extract_strided_slice %41 {offsets = [0, 0], sizes = [1, 128], strides = [1, 1]} : vector<10x128xf32> to vector<1x128xf32>
    %43 = vector.extract_strided_slice %41 {offsets = [1, 0], sizes = [1, 128], strides = [1, 1]} : vector<10x128xf32> to vector<1x128xf32>
    %44 = arith.maximumf %42, %43 : vector<1x128xf32>
    %c0_36 = arith.constant 0 : index
    %c0_37 = arith.constant 0 : index
    %45 = vector.load %arg15[%c0_36, %c0_37] : memref<50x128xf32, #tpu.memory_space<vmem>>, vector<1x128xf32>
    tpu.vector_store %arg15[%c0_36, %c0_37], %44 {strides = array<i32>} : memref<50x128xf32, #tpu.memory_space<vmem>>, vector<1x128xf32>,
    %46 = vector.extract_strided_slice %41 {offsets = [2, 0], sizes = [1, 128], strides = [1, 1]} : vector<10x128xf32> to vector<1x128xf32>
    %47 = vector.extract_strided_slice %41 {offsets = [3, 0], sizes = [1, 128], strides = [1, 1]} : vector<10x128xf32> to vector<1x128xf32>
    %48 = arith.maximumf %46, %47 : vector<1x128xf32>
    %c2 = arith.constant 2 : index
    %c0_38 = arith.constant 0 : index
    %49 = vector.load %arg15[%c2, %c0_38] : memref<50x128xf32, #tpu.memory_space<vmem>>, vector<1x128xf32>
    tpu.vector_store %arg15[%c2, %c0_38], %48 {strides = array<i32>} : memref<50x128xf32, #tpu.memory_space<vmem>>, vector<1x128xf32>,
    %50 = vector.extract_strided_slice %41 {offsets = [4, 0], sizes = [1, 128], strides = [1, 1]} : vector<10x128xf32> to vector<1x128xf32>
    %51 = vector.extract_strided_slice %41 {offsets = [5, 0], sizes = [1, 128], strides = [1, 1]} : vector<10x128xf32> to vector<1x128xf32>
    %52 = arith.maximumf %50, %51 : vector<1x128xf32>
    %c4 = arith.constant 4 : index
    %c0_39 = arith.constant 0 : index
    %53 = vector.load %arg15[%c4, %c0_39] : memref<50x128xf32, #tpu.memory_space<vmem>>, vector<1x128xf32>
    tpu.vector_store %arg15[%c4, %c0_39], %52 {strides = array<i32>} : memref<50x128xf32, #tpu.memory_space<vmem>>, vector<1x128xf32>,
    %54 = vector.extract_strided_slice %41 {offsets = [6, 0], sizes = [1, 128], strides = [1, 1]} : vector<10x128xf32> to vector<1x128xf32>
    %55 = vector.extract_strided_slice %41 {offsets = [7, 0], sizes = [1, 128], strides = [1, 1]} : vector<10x128xf32> to vector<1x128xf32>
    %56 = arith.maximumf %54, %55 : vector<1x128xf32>
    %c6 = arith.constant 6 : index
    %c0_40 = arith.constant 0 : index
    %57 = vector.load %arg15[%c6, %c0_40] : memref<50x128xf32, #tpu.memory_space<vmem>>, vector<1x128xf32>
    tpu.vector_store %arg15[%c6, %c0_40], %56 {strides = array<i32>} : memref<50x128xf32, #tpu.memory_space<vmem>>, vector<1x128xf32>,
    %58 = vector.extract_strided_slice %41 {offsets = [8, 0], sizes = [1, 128], strides = [1, 1]} : vector<10x128xf32> to vector<1x128xf32>
    %59 = vector.extract_strided_slice %41 {offsets = [9, 0], sizes = [1, 128], strides = [1, 1]} : vector<10x128xf32> to vector<1x128xf32>
    %60 = arith.maximumf %58, %59 : vector<1x128xf32>
    %c8 = arith.constant 8 : index
    %c0_41 = arith.constant 0 : index
    %61 = vector.load %arg15[%c8, %c0_41] : memref<50x128xf32, #tpu.memory_space<vmem>>, vector<1x128xf32>
    tpu.vector_store %arg15[%c8, %c0_41], %60 {strides = array<i32>} : memref<50x128xf32, #tpu.memory_space<vmem>>, vector<1x128xf32>,
    %c20 = arith.constant 20 : index
    %c0_42 = arith.constant 0 : index
    %62 = vector.load %arg14[%c20, %c0_42] : memref<200x128xf32, #tpu.memory_space<vmem>>, vector<20x128xf32>
    %63 = vector.extract_strided_slice %62 {offsets = [0, 0], sizes = [10, 128], strides = [1, 1]} : vector<20x128xf32> to vector<10x128xf32>
    %64 = vector.extract_strided_slice %62 {offsets = [10, 0], sizes = [10, 128], strides = [1, 1]} : vector<20x128xf32> to vector<10x128xf32>
    %65 = arith.maximumf %63, %64 : vector<10x128xf32>
    %66 = vector.extract_strided_slice %65 {offsets = [0, 0], sizes = [1, 128], strides = [1, 1]} : vector<10x128xf32> to vector<1x128xf32>
    %67 = vector.extract_strided_slice %65 {offsets = [1, 0], sizes = [1, 128], strides = [1, 1]} : vector<10x128xf32> to vector<1x128xf32>
    %68 = arith.maximumf %66, %67 : vector<1x128xf32>
    %c10 = arith.constant 10 : index
    %c0_43 = arith.constant 0 : index
    %69 = vector.load %arg15[%c10, %c0_43] : memref<50x128xf32, #tpu.memory_space<vmem>>, vector<1x128xf32>
    tpu.vector_store %arg15[%c10, %c0_43], %68 {strides = array<i32>} : memref<50x128xf32, #tpu.memory_space<vmem>>, vector<1x128xf32>,
    %70 = vector.extract_strided_slice %65 {offsets = [2, 0], sizes = [1, 128], strides = [1, 1]} : vector<10x128xf32> to vector<1x128xf32>
    %71 = vector.extract_strided_slice %65 {offsets = [3, 0], sizes = [1, 128], strides = [1, 1]} : vector<10x128xf32> to vector<1x128xf32>
    %72 = arith.maximumf %70, %71 : vector<1x128xf32>
    %c12 = arith.constant 12 : index
    %c0_44 = arith.constant 0 : index
    %73 = vector.load %arg15[%c12, %c0_44] : memref<50x128xf32, #tpu.memory_space<vmem>>, vector<1x128xf32>
    tpu.vector_store %arg15[%c12, %c0_44], %72 {strides = array<i32>} : memref<50x128xf32, #tpu.memory_space<vmem>>, vector<1x128xf32>,
    %74 = vector.extract_strided_slice %65 {offsets = [4, 0], sizes = [1, 128], strides = [1, 1]} : vector<10x128xf32> to vector<1x128xf32>
    %75 = vector.extract_strided_slice %65 {offsets = [5, 0], sizes = [1, 128], strides = [1, 1]} : vector<10x128xf32> to vector<1x128xf32>
    %76 = arith.maximumf %74, %75 : vector<1x128xf32>
    %c14 = arith.constant 14 : index
    %c0_45 = arith.constant 0 : index
    %77 = vector.load %arg15[%c14, %c0_45] : memref<50x128xf32, #tpu.memory_space<vmem>>, vector<1x128xf32>
    tpu.vector_store %arg15[%c14, %c0_45], %76 {strides = array<i32>} : memref<50x128xf32, #tpu.memory_space<vmem>>, vector<1x128xf32>,
    %78 = vector.extract_strided_slice %65 {offsets = [6, 0], sizes = [1, 128], strides = [1, 1]} : vector<10x128xf32> to vector<1x128xf32>
    %79 = vector.extract_strided_slice %65 {offsets = [7, 0], sizes = [1, 128], strides = [1, 1]} : vector<10x128xf32> to vector<1x128xf32>
    %80 = arith.maximumf %78, %79 : vector<1x128xf32>
    %c16 = arith.constant 16 : index
    %c0_46 = arith.constant 0 : index
    %81 = vector.load %arg15[%c16, %c0_46] : memref<50x128xf32, #tpu.memory_space<vmem>>, vector<1x128xf32>
    tpu.vector_store %arg15[%c16, %c0_46], %80 {strides = array<i32>} : memref<50x128xf32, #tpu.memory_space<vmem>>, vector<1x128xf32>,
    %82 = vector.extract_strided_slice %65 {offsets = [8, 0], sizes = [1, 128], strides = [1, 1]} : vector<10x128xf32> to vector<1x128xf32>
    %83 = vector.extract_strided_slice %65 {offsets = [9, 0], sizes = [1, 128], strides = [1, 1]} : vector<10x128xf32> to vector<1x128xf32>
    %84 = arith.maximumf %82, %83 : vector<1x128xf32>
    %c18 = arith.constant 18 : index
    %c0_47 = arith.constant 0 : index
    %85 = vector.load %arg15[%c18, %c0_47] : memref<50x128xf32, #tpu.memory_space<vmem>>, vector<1x128xf32>
    tpu.vector_store %arg15[%c18, %c0_47], %84 {strides = array<i32>} : memref<50x128xf32, #tpu.memory_space<vmem>>, vector<1x128xf32>,
    %c40 = arith.constant 40 : index
    %c0_48 = arith.constant 0 : index
    %86 = vector.load %arg14[%c40, %c0_48] : memref<200x128xf32, #tpu.memory_space<vmem>>, vector<20x128xf32>
    %87 = vector.extract_strided_slice %86 {offsets = [0, 0], sizes = [10, 128], strides = [1, 1]} : vector<20x128xf32> to vector<10x128xf32>
    %88 = vector.extract_strided_slice %86 {offsets = [10, 0], sizes = [10, 128], strides = [1, 1]} : vector<20x128xf32> to vector<10x128xf32>
    %89 = arith.maximumf %87, %88 : vector<10x128xf32>
    %90 = vector.extract_strided_slice %89 {offsets = [0, 0], sizes = [1, 128], strides = [1, 1]} : vector<10x128xf32> to vector<1x128xf32>
    %91 = vector.extract_strided_slice %89 {offsets = [1, 0], sizes = [1, 128], strides = [1, 1]} : vector<10x128xf32> to vector<1x128xf32>
    %92 = arith.maximumf %90, %91 : vector<1x128xf32>
    %c20_49 = arith.constant 20 : index
    %c0_50 = arith.constant 0 : index
    %93 = vector.load %arg15[%c20_49, %c0_50] : memref<50x128xf32, #tpu.memory_space<vmem>>, vector<1x128xf32>
    tpu.vector_store %arg15[%c20_49, %c0_50], %92 {strides = array<i32>} : memref<50x128xf32, #tpu.memory_space<vmem>>, vector<1x128xf32>,
    %94 = vector.extract_strided_slice %89 {offsets = [2, 0], sizes = [1, 128], strides = [1, 1]} : vector<10x128xf32> to vector<1x128xf32>
    %95 = vector.extract_strided_slice %89 {offsets = [3, 0], sizes = [1, 128], strides = [1, 1]} : vector<10x128xf32> to vector<1x128xf32>
    %96 = arith.maximumf %94, %95 : vector<1x128xf32>
    %c22 = arith.constant 22 : index
    %c0_51 = arith.constant 0 : index
    %97 = vector.load %arg15[%c22, %c0_51] : memref<50x128xf32, #tpu.memory_space<vmem>>, vector<1x128xf32>
    tpu.vector_store %arg15[%c22, %c0_51], %96 {strides = array<i32>} : memref<50x128xf32, #tpu.memory_space<vmem>>, vector<1x128xf32>,
    %98 = vector.extract_strided_slice %89 {offsets = [4, 0], sizes = [1, 128], strides = [1, 1]} : vector<10x128xf32> to vector<1x128xf32>
    %99 = vector.extract_strided_slice %89 {offsets = [5, 0], sizes = [1, 128], strides = [1, 1]} : vector<10x128xf32> to vector<1x128xf32>
    %100 = arith.maximumf %98, %99 : vector<1x128xf32>
    %c24 = arith.constant 24 : index
    %c0_52 = arith.constant 0 : index
    %101 = vector.load %arg15[%c24, %c0_52] : memref<50x128xf32, #tpu.memory_space<vmem>>, vector<1x128xf32>
    tpu.vector_store %arg15[%c24, %c0_52], %100 {strides = array<i32>} : memref<50x128xf32, #tpu.memory_space<vmem>>, vector<1x128xf32>,
    %102 = vector.extract_strided_slice %89 {offsets = [6, 0], sizes = [1, 128], strides = [1, 1]} : vector<10x128xf32> to vector<1x128xf32>
    %103 = vector.extract_strided_slice %89 {offsets = [7, 0], sizes = [1, 128], strides = [1, 1]} : vector<10x128xf32> to vector<1x128xf32>
    %104 = arith.maximumf %102, %103 : vector<1x128xf32>
    %c26 = arith.constant 26 : index
    %c0_53 = arith.constant 0 : index
    %105 = vector.load %arg15[%c26, %c0_53] : memref<50x128xf32, #tpu.memory_space<vmem>>, vector<1x128xf32>
    tpu.vector_store %arg15[%c26, %c0_53], %104 {strides = array<i32>} : memref<50x128xf32, #tpu.memory_space<vmem>>, vector<1x128xf32>,
    %106 = vector.extract_strided_slice %89 {offsets = [8, 0], sizes = [1, 128], strides = [1, 1]} : vector<10x128xf32> to vector<1x128xf32>
    %107 = vector.extract_strided_slice %89 {offsets = [9, 0], sizes = [1, 128], strides = [1, 1]} : vector<10x128xf32> to vector<1x128xf32>
    %108 = arith.maximumf %106, %107 : vector<1x128xf32>
    %c28 = arith.constant 28 : index
    %c0_54 = arith.constant 0 : index
    %109 = vector.load %arg15[%c28, %c0_54] : memref<50x128xf32, #tpu.memory_space<vmem>>, vector<1x128xf32>
    tpu.vector_store %arg15[%c28, %c0_54], %108 {strides = array<i32>} : memref<50x128xf32, #tpu.memory_space<vmem>>, vector<1x128xf32>,
    %c60 = arith.constant 60 : index
    %c0_55 = arith.constant 0 : index
    %110 = vector.load %arg14[%c60, %c0_55] : memref<200x128xf32, #tpu.memory_space<vmem>>, vector<20x128xf32>
    %111 = vector.extract_strided_slice %110 {offsets = [0, 0], sizes = [10, 128], strides = [1, 1]} : vector<20x128xf32> to vector<10x128xf32>
    %112 = vector.extract_strided_slice %110 {offsets = [10, 0], sizes = [10, 128], strides = [1, 1]} : vector<20x128xf32> to vector<10x128xf32>
    %113 = arith.maximumf %111, %112 : vector<10x128xf32>
    %114 = vector.extract_strided_slice %113 {offsets = [0, 0], sizes = [1, 128], strides = [1, 1]} : vector<10x128xf32> to vector<1x128xf32>
    %115 = vector.extract_strided_slice %113 {offsets = [1, 0], sizes = [1, 128], strides = [1, 1]} : vector<10x128xf32> to vector<1x128xf32>
    %116 = arith.maximumf %114, %115 : vector<1x128xf32>
    %c30 = arith.constant 30 : index
    %c0_56 = arith.constant 0 : index
    %117 = vector.load %arg15[%c30, %c0_56] : memref<50x128xf32, #tpu.memory_space<vmem>>, vector<1x128xf32>
    tpu.vector_store %arg15[%c30, %c0_56], %116 {strides = array<i32>} : memref<50x128xf32, #tpu.memory_space<vmem>>, vector<1x128xf32>,
    %118 = vector.extract_strided_slice %113 {offsets = [2, 0], sizes = [1, 128], strides = [1, 1]} : vector<10x128xf32> to vector<1x128xf32>
    %119 = vector.extract_strided_slice %113 {offsets = [3, 0], sizes = [1, 128], strides = [1, 1]} : vector<10x128xf32> to vector<1x128xf32>
    %120 = arith.maximumf %118, %119 : vector<1x128xf32>
    %c32 = arith.constant 32 : index
    %c0_57 = arith.constant 0 : index
    %121 = vector.load %arg15[%c32, %c0_57] : memref<50x128xf32, #tpu.memory_space<vmem>>, vector<1x128xf32>
    tpu.vector_store %arg15[%c32, %c0_57], %120 {strides = array<i32>} : memref<50x128xf32, #tpu.memory_space<vmem>>, vector<1x128xf32>,
    %122 = vector.extract_strided_slice %113 {offsets = [4, 0], sizes = [1, 128], strides = [1, 1]} : vector<10x128xf32> to vector<1x128xf32>
    %123 = vector.extract_strided_slice %113 {offsets = [5, 0], sizes = [1, 128], strides = [1, 1]} : vector<10x128xf32> to vector<1x128xf32>
    %124 = arith.maximumf %122, %123 : vector<1x128xf32>
    %c34 = arith.constant 34 : index
    %c0_58 = arith.constant 0 : index
    %125 = vector.load %arg15[%c34, %c0_58] : memref<50x128xf32, #tpu.memory_space<vmem>>, vector<1x128xf32>
    tpu.vector_store %arg15[%c34, %c0_58], %124 {strides = array<i32>} : memref<50x128xf32, #tpu.memory_space<vmem>>, vector<1x128xf32>,
    %126 = vector.extract_strided_slice %113 {offsets = [6, 0], sizes = [1, 128], strides = [1, 1]} : vector<10x128xf32> to vector<1x128xf32>
    %127 = vector.extract_strided_slice %113 {offsets = [7, 0], sizes = [1, 128], strides = [1, 1]} : vector<10x128xf32> to vector<1x128xf32>
    %128 = arith.maximumf %126, %127 : vector<1x128xf32>
    %c36 = arith.constant 36 : index
    %c0_59 = arith.constant 0 : index
    %129 = vector.load %arg15[%c36, %c0_59] : memref<50x128xf32, #tpu.memory_space<vmem>>, vector<1x128xf32>
    tpu.vector_store %arg15[%c36, %c0_59], %128 {strides = array<i32>} : memref<50x128xf32, #tpu.memory_space<vmem>>, vector<1x128xf32>,
    %130 = vector.extract_strided_slice %113 {offsets = [8, 0], sizes = [1, 128], strides = [1, 1]} : vector<10x128xf32> to vector<1x128xf32>
    %131 = vector.extract_strided_slice %113 {offsets = [9, 0], sizes = [1, 128], strides = [1, 1]} : vector<10x128xf32> to vector<1x128xf32>
    %132 = arith.maximumf %130, %131 : vector<1x128xf32>
    %c38 = arith.constant 38 : index
    %c0_60 = arith.constant 0 : index
    %133 = vector.load %arg15[%c38, %c0_60] : memref<50x128xf32, #tpu.memory_space<vmem>>, vector<1x128xf32>
    tpu.vector_store %arg15[%c38, %c0_60], %132 {strides = array<i32>} : memref<50x128xf32, #tpu.memory_space<vmem>>, vector<1x128xf32>,
    %c80 = arith.constant 80 : index
    %c0_61 = arith.constant 0 : index
    %134 = vector.load %arg14[%c80, %c0_61] : memref<200x128xf32, #tpu.memory_space<vmem>>, vector<20x128xf32>
    %135 = vector.extract_strided_slice %134 {offsets = [0, 0], sizes = [10, 128], strides = [1, 1]} : vector<20x128xf32> to vector<10x128xf32>
    %136 = vector.extract_strided_slice %134 {offsets = [10, 0], sizes = [10, 128], strides = [1, 1]} : vector<20x128xf32> to vector<10x128xf32>
    %137 = arith.maximumf %135, %136 : vector<10x128xf32>
    %138 = vector.extract_strided_slice %137 {offsets = [0, 0], sizes = [1, 128], strides = [1, 1]} : vector<10x128xf32> to vector<1x128xf32>
    %139 = vector.extract_strided_slice %137 {offsets = [1, 0], sizes = [1, 128], strides = [1, 1]} : vector<10x128xf32> to vector<1x128xf32>
    %140 = arith.maximumf %138, %139 : vector<1x128xf32>
    %c40_62 = arith.constant 40 : index
    %c0_63 = arith.constant 0 : index
    %141 = vector.load %arg15[%c40_62, %c0_63] : memref<50x128xf32, #tpu.memory_space<vmem>>, vector<1x128xf32>
    tpu.vector_store %arg15[%c40_62, %c0_63], %140 {strides = array<i32>} : memref<50x128xf32, #tpu.memory_space<vmem>>, vector<1x128xf32>,
    %142 = vector.extract_strided_slice %137 {offsets = [2, 0], sizes = [1, 128], strides = [1, 1]} : vector<10x128xf32> to vector<1x128xf32>
    %143 = vector.extract_strided_slice %137 {offsets = [3, 0], sizes = [1, 128], strides = [1, 1]} : vector<10x128xf32> to vector<1x128xf32>
    %144 = arith.maximumf %142, %143 : vector<1x128xf32>
    %c42 = arith.constant 42 : index
    %c0_64 = arith.constant 0 : index
    %145 = vector.load %arg15[%c42, %c0_64] : memref<50x128xf32, #tpu.memory_space<vmem>>, vector<1x128xf32>
    tpu.vector_store %arg15[%c42, %c0_64], %144 {strides = array<i32>} : memref<50x128xf32, #tpu.memory_space<vmem>>, vector<1x128xf32>,
    %146 = vector.extract_strided_slice %137 {offsets = [4, 0], sizes = [1, 128], strides = [1, 1]} : vector<10x128xf32> to vector<1x128xf32>
    %147 = vector.extract_strided_slice %137 {offsets = [5, 0], sizes = [1, 128], strides = [1, 1]} : vector<10x128xf32> to vector<1x128xf32>
    %148 = arith.maximumf %146, %147 : vector<1x128xf32>
    %c44 = arith.constant 44 : index
    %c0_65 = arith.constant 0 : index
    %149 = vector.load %arg15[%c44, %c0_65] : memref<50x128xf32, #tpu.memory_space<vmem>>, vector<1x128xf32>
    tpu.vector_store %arg15[%c44, %c0_65], %148 {strides = array<i32>} : memref<50x128xf32, #tpu.memory_space<vmem>>, vector<1x128xf32>,
    %150 = vector.extract_strided_slice %137 {offsets = [6, 0], sizes = [1, 128], strides = [1, 1]} : vector<10x128xf32> to vector<1x128xf32>
    %151 = vector.extract_strided_slice %137 {offsets = [7, 0], sizes = [1, 128], strides = [1, 1]} : vector<10x128xf32> to vector<1x128xf32>
    %152 = arith.maximumf %150, %151 : vector<1x128xf32>
    %c46 = arith.constant 46 : index
    %c0_66 = arith.constant 0 : index
    %153 = vector.load %arg15[%c46, %c0_66] : memref<50x128xf32, #tpu.memory_space<vmem>>, vector<1x128xf32>
    tpu.vector_store %arg15[%c46, %c0_66], %152 {strides = array<i32>} : memref<50x128xf32, #tpu.memory_space<vmem>>, vector<1x128xf32>,
    %154 = vector.extract_strided_slice %137 {offsets = [8, 0], sizes = [1, 128], strides = [1, 1]} : vector<10x128xf32> to vector<1x128xf32>
    %155 = vector.extract_strided_slice %137 {offsets = [9, 0], sizes = [1, 128], strides = [1, 1]} : vector<10x128xf32> to vector<1x128xf32>
    %156 = arith.maximumf %154, %155 : vector<1x128xf32>
    %c48 = arith.constant 48 : index
    %c0_67 = arith.constant 0 : index
    %157 = vector.load %arg15[%c48, %c0_67] : memref<50x128xf32, #tpu.memory_space<vmem>>, vector<1x128xf32>
    tpu.vector_store %arg15[%c48, %c0_67], %156 {strides = array<i32>} : memref<50x128xf32, #tpu.memory_space<vmem>>, vector<1x128xf32>,
    %c100 = arith.constant 100 : index
    %c0_68 = arith.constant 0 : index
    %158 = vector.load %arg14[%c100, %c0_68] : memref<200x128xf32, #tpu.memory_space<vmem>>, vector<20x128xf32>
    %159 = vector.extract_strided_slice %158 {offsets = [0, 0], sizes = [10, 128], strides = [1, 1]} : vector<20x128xf32> to vector<10x128xf32>
    %160 = vector.extract_strided_slice %158 {offsets = [10, 0], sizes = [10, 128], strides = [1, 1]} : vector<20x128xf32> to vector<10x128xf32>
    %161 = arith.maximumf %159, %160 : vector<10x128xf32>
    %162 = vector.extract_strided_slice %161 {offsets = [0, 0], sizes = [1, 128], strides = [1, 1]} : vector<10x128xf32> to vector<1x128xf32>
    %163 = vector.extract_strided_slice %161 {offsets = [1, 0], sizes = [1, 128], strides = [1, 1]} : vector<10x128xf32> to vector<1x128xf32>
    %164 = arith.maximumf %162, %163 : vector<1x128xf32>
    %c1 = arith.constant 1 : index
    %c0_69 = arith.constant 0 : index
    %165 = vector.load %arg15[%c1, %c0_69] : memref<50x128xf32, #tpu.memory_space<vmem>>, vector<1x128xf32>
    tpu.vector_store %arg15[%c1, %c0_69], %164 {strides = array<i32>} : memref<50x128xf32, #tpu.memory_space<vmem>>, vector<1x128xf32>,
    %166 = vector.extract_strided_slice %161 {offsets = [2, 0], sizes = [1, 128], strides = [1, 1]} : vector<10x128xf32> to vector<1x128xf32>
    %167 = vector.extract_strided_slice %161 {offsets = [3, 0], sizes = [1, 128], strides = [1, 1]} : vector<10x128xf32> to vector<1x128xf32>
    %168 = arith.maximumf %166, %167 : vector<1x128xf32>
    %c3 = arith.constant 3 : index
    %c0_70 = arith.constant 0 : index
    %169 = vector.load %arg15[%c3, %c0_70] : memref<50x128xf32, #tpu.memory_space<vmem>>, vector<1x128xf32>
    tpu.vector_store %arg15[%c3, %c0_70], %168 {strides = array<i32>} : memref<50x128xf32, #tpu.memory_space<vmem>>, vector<1x128xf32>,
    %170 = vector.extract_strided_slice %161 {offsets = [4, 0], sizes = [1, 128], strides = [1, 1]} : vector<10x128xf32> to vector<1x128xf32>
    %171 = vector.extract_strided_slice %161 {offsets = [5, 0], sizes = [1, 128], strides = [1, 1]} : vector<10x128xf32> to vector<1x128xf32>
    %172 = arith.maximumf %170, %171 : vector<1x128xf32>
    %c5 = arith.constant 5 : index
    %c0_71 = arith.constant 0 : index
    %173 = vector.load %arg15[%c5, %c0_71] : memref<50x128xf32, #tpu.memory_space<vmem>>, vector<1x128xf32>
    tpu.vector_store %arg15[%c5, %c0_71], %172 {strides = array<i32>} : memref<50x128xf32, #tpu.memory_space<vmem>>, vector<1x128xf32>,
    %174 = vector.extract_strided_slice %161 {offsets = [6, 0], sizes = [1, 128], strides = [1, 1]} : vector<10x128xf32> to vector<1x128xf32>
    %175 = vector.extract_strided_slice %161 {offsets = [7, 0], sizes = [1, 128], strides = [1, 1]} : vector<10x128xf32> to vector<1x128xf32>
    %176 = arith.maximumf %174, %175 : vector<1x128xf32>
    %c7 = arith.constant 7 : index
    %c0_72 = arith.constant 0 : index
    %177 = vector.load %arg15[%c7, %c0_72] : memref<50x128xf32, #tpu.memory_space<vmem>>, vector<1x128xf32>
    tpu.vector_store %arg15[%c7, %c0_72], %176 {strides = array<i32>} : memref<50x128xf32, #tpu.memory_space<vmem>>, vector<1x128xf32>,
    %178 = vector.extract_strided_slice %161 {offsets = [8, 0], sizes = [1, 128], strides = [1, 1]} : vector<10x128xf32> to vector<1x128xf32>
    %179 = vector.extract_strided_slice %161 {offsets = [9, 0], sizes = [1, 128], strides = [1, 1]} : vector<10x128xf32> to vector<1x128xf32>
    %180 = arith.maximumf %178, %179 : vector<1x128xf32>
    %c9 = arith.constant 9 : index
    %c0_73 = arith.constant 0 : index
    %181 = vector.load %arg15[%c9, %c0_73] : memref<50x128xf32, #tpu.memory_space<vmem>>, vector<1x128xf32>
    tpu.vector_store %arg15[%c9, %c0_73], %180 {strides = array<i32>} : memref<50x128xf32, #tpu.memory_space<vmem>>, vector<1x128xf32>,
    %c120 = arith.constant 120 : index
    %c0_74 = arith.constant 0 : index
    %182 = vector.load %arg14[%c120, %c0_74] : memref<200x128xf32, #tpu.memory_space<vmem>>, vector<20x128xf32>
    %183 = vector.extract_strided_slice %182 {offsets = [0, 0], sizes = [10, 128], strides = [1, 1]} : vector<20x128xf32> to vector<10x128xf32>
    %184 = vector.extract_strided_slice %182 {offsets = [10, 0], sizes = [10, 128], strides = [1, 1]} : vector<20x128xf32> to vector<10x128xf32>
    %185 = arith.maximumf %183, %184 : vector<10x128xf32>
    %186 = vector.extract_strided_slice %185 {offsets = [0, 0], sizes = [1, 128], strides = [1, 1]} : vector<10x128xf32> to vector<1x128xf32>
    %187 = vector.extract_strided_slice %185 {offsets = [1, 0], sizes = [1, 128], strides = [1, 1]} : vector<10x128xf32> to vector<1x128xf32>
    %188 = arith.maximumf %186, %187 : vector<1x128xf32>
    %c11 = arith.constant 11 : index
    %c0_75 = arith.constant 0 : index
    %189 = vector.load %arg15[%c11, %c0_75] : memref<50x128xf32, #tpu.memory_space<vmem>>, vector<1x128xf32>
    tpu.vector_store %arg15[%c11, %c0_75], %188 {strides = array<i32>} : memref<50x128xf32, #tpu.memory_space<vmem>>, vector<1x128xf32>,
    %190 = vector.extract_strided_slice %185 {offsets = [2, 0], sizes = [1, 128], strides = [1, 1]} : vector<10x128xf32> to vector<1x128xf32>
    %191 = vector.extract_strided_slice %185 {offsets = [3, 0], sizes = [1, 128], strides = [1, 1]} : vector<10x128xf32> to vector<1x128xf32>
    %192 = arith.maximumf %190, %191 : vector<1x128xf32>
    %c13 = arith.constant 13 : index
    %c0_76 = arith.constant 0 : index
    %193 = vector.load %arg15[%c13, %c0_76] : memref<50x128xf32, #tpu.memory_space<vmem>>, vector<1x128xf32>
    tpu.vector_store %arg15[%c13, %c0_76], %192 {strides = array<i32>} : memref<50x128xf32, #tpu.memory_space<vmem>>, vector<1x128xf32>,
    %194 = vector.extract_strided_slice %185 {offsets = [4, 0], sizes = [1, 128], strides = [1, 1]} : vector<10x128xf32> to vector<1x128xf32>
    %195 = vector.extract_strided_slice %185 {offsets = [5, 0], sizes = [1, 128], strides = [1, 1]} : vector<10x128xf32> to vector<1x128xf32>
    %196 = arith.maximumf %194, %195 : vector<1x128xf32>
    %c15 = arith.constant 15 : index
    %c0_77 = arith.constant 0 : index
    %197 = vector.load %arg15[%c15, %c0_77] : memref<50x128xf32, #tpu.memory_space<vmem>>, vector<1x128xf32>
    tpu.vector_store %arg15[%c15, %c0_77], %196 {strides = array<i32>} : memref<50x128xf32, #tpu.memory_space<vmem>>, vector<1x128xf32>,
    %198 = vector.extract_strided_slice %185 {offsets = [6, 0], sizes = [1, 128], strides = [1, 1]} : vector<10x128xf32> to vector<1x128xf32>
    %199 = vector.extract_strided_slice %185 {offsets = [7, 0], sizes = [1, 128], strides = [1, 1]} : vector<10x128xf32> to vector<1x128xf32>
    %200 = arith.maximumf %198, %199 : vector<1x128xf32>
    %c17 = arith.constant 17 : index
    %c0_78 = arith.constant 0 : index
    %201 = vector.load %arg15[%c17, %c0_78] : memref<50x128xf32, #tpu.memory_space<vmem>>, vector<1x128xf32>
    tpu.vector_store %arg15[%c17, %c0_78], %200 {strides = array<i32>} : memref<50x128xf32, #tpu.memory_space<vmem>>, vector<1x128xf32>,
    %202 = vector.extract_strided_slice %185 {offsets = [8, 0], sizes = [1, 128], strides = [1, 1]} : vector<10x128xf32> to vector<1x128xf32>
    %203 = vector.extract_strided_slice %185 {offsets = [9, 0], sizes = [1, 128], strides = [1, 1]} : vector<10x128xf32> to vector<1x128xf32>
    %204 = arith.maximumf %202, %203 : vector<1x128xf32>
    %c19 = arith.constant 19 : index
    %c0_79 = arith.constant 0 : index
    %205 = vector.load %arg15[%c19, %c0_79] : memref<50x128xf32, #tpu.memory_space<vmem>>, vector<1x128xf32>
    tpu.vector_store %arg15[%c19, %c0_79], %204 {strides = array<i32>} : memref<50x128xf32, #tpu.memory_space<vmem>>, vector<1x128xf32>,
    %c140 = arith.constant 140 : index
    %c0_80 = arith.constant 0 : index
    %206 = vector.load %arg14[%c140, %c0_80] : memref<200x128xf32, #tpu.memory_space<vmem>>, vector<20x128xf32>
    %207 = vector.extract_strided_slice %206 {offsets = [0, 0], sizes = [10, 128], strides = [1, 1]} : vector<20x128xf32> to vector<10x128xf32>
    %208 = vector.extract_strided_slice %206 {offsets = [10, 0], sizes = [10, 128], strides = [1, 1]} : vector<20x128xf32> to vector<10x128xf32>
    %209 = arith.maximumf %207, %208 : vector<10x128xf32>
    %210 = vector.extract_strided_slice %209 {offsets = [0, 0], sizes = [1, 128], strides = [1, 1]} : vector<10x128xf32> to vector<1x128xf32>
    %211 = vector.extract_strided_slice %209 {offsets = [1, 0], sizes = [1, 128], strides = [1, 1]} : vector<10x128xf32> to vector<1x128xf32>
    %212 = arith.maximumf %210, %211 : vector<1x128xf32>
    %c21 = arith.constant 21 : index
    %c0_81 = arith.constant 0 : index
    %213 = vector.load %arg15[%c21, %c0_81] : memref<50x128xf32, #tpu.memory_space<vmem>>, vector<1x128xf32>
    tpu.vector_store %arg15[%c21, %c0_81], %212 {strides = array<i32>} : memref<50x128xf32, #tpu.memory_space<vmem>>, vector<1x128xf32>,
    %214 = vector.extract_strided_slice %209 {offsets = [2, 0], sizes = [1, 128], strides = [1, 1]} : vector<10x128xf32> to vector<1x128xf32>
    %215 = vector.extract_strided_slice %209 {offsets = [3, 0], sizes = [1, 128], strides = [1, 1]} : vector<10x128xf32> to vector<1x128xf32>
    %216 = arith.maximumf %214, %215 : vector<1x128xf32>
    %c23 = arith.constant 23 : index
    %c0_82 = arith.constant 0 : index
    %217 = vector.load %arg15[%c23, %c0_82] : memref<50x128xf32, #tpu.memory_space<vmem>>, vector<1x128xf32>
    tpu.vector_store %arg15[%c23, %c0_82], %216 {strides = array<i32>} : memref<50x128xf32, #tpu.memory_space<vmem>>, vector<1x128xf32>,
    %218 = vector.extract_strided_slice %209 {offsets = [4, 0], sizes = [1, 128], strides = [1, 1]} : vector<10x128xf32> to vector<1x128xf32>
    %219 = vector.extract_strided_slice %209 {offsets = [5, 0], sizes = [1, 128], strides = [1, 1]} : vector<10x128xf32> to vector<1x128xf32>
    %220 = arith.maximumf %218, %219 : vector<1x128xf32>
    %c25 = arith.constant 25 : index
    %c0_83 = arith.constant 0 : index
    %221 = vector.load %arg15[%c25, %c0_83] : memref<50x128xf32, #tpu.memory_space<vmem>>, vector<1x128xf32>
    tpu.vector_store %arg15[%c25, %c0_83], %220 {strides = array<i32>} : memref<50x128xf32, #tpu.memory_space<vmem>>, vector<1x128xf32>,
    %222 = vector.extract_strided_slice %209 {offsets = [6, 0], sizes = [1, 128], strides = [1, 1]} : vector<10x128xf32> to vector<1x128xf32>
    %223 = vector.extract_strided_slice %209 {offsets = [7, 0], sizes = [1, 128], strides = [1, 1]} : vector<10x128xf32> to vector<1x128xf32>
    %224 = arith.maximumf %222, %223 : vector<1x128xf32>
    %c27 = arith.constant 27 : index
    %c0_84 = arith.constant 0 : index
    %225 = vector.load %arg15[%c27, %c0_84] : memref<50x128xf32, #tpu.memory_space<vmem>>, vector<1x128xf32>
    tpu.vector_store %arg15[%c27, %c0_84], %224 {strides = array<i32>} : memref<50x128xf32, #tpu.memory_space<vmem>>, vector<1x128xf32>,
    %226 = vector.extract_strided_slice %209 {offsets = [8, 0], sizes = [1, 128], strides = [1, 1]} : vector<10x128xf32> to vector<1x128xf32>
    %227 = vector.extract_strided_slice %209 {offsets = [9, 0], sizes = [1, 128], strides = [1, 1]} : vector<10x128xf32> to vector<1x128xf32>
    %228 = arith.maximumf %226, %227 : vector<1x128xf32>
    %c29 = arith.constant 29 : index
    %c0_85 = arith.constant 0 : index
    %229 = vector.load %arg15[%c29, %c0_85] : memref<50x128xf32, #tpu.memory_space<vmem>>, vector<1x128xf32>
    tpu.vector_store %arg15[%c29, %c0_85], %228 {strides = array<i32>} : memref<50x128xf32, #tpu.memory_space<vmem>>, vector<1x128xf32>,
    %c160 = arith.constant 160 : index
    %c0_86 = arith.constant 0 : index
    %230 = vector.load %arg14[%c160, %c0_86] : memref<200x128xf32, #tpu.memory_space<vmem>>, vector<20x128xf32>
    %231 = vector.extract_strided_slice %230 {offsets = [0, 0], sizes = [10, 128], strides = [1, 1]} : vector<20x128xf32> to vector<10x128xf32>
    %232 = vector.extract_strided_slice %230 {offsets = [10, 0], sizes = [10, 128], strides = [1, 1]} : vector<20x128xf32> to vector<10x128xf32>
    %233 = arith.maximumf %231, %232 : vector<10x128xf32>
    %234 = vector.extract_strided_slice %233 {offsets = [0, 0], sizes = [1, 128], strides = [1, 1]} : vector<10x128xf32> to vector<1x128xf32>
    %235 = vector.extract_strided_slice %233 {offsets = [1, 0], sizes = [1, 128], strides = [1, 1]} : vector<10x128xf32> to vector<1x128xf32>
    %236 = arith.maximumf %234, %235 : vector<1x128xf32>
    %c31 = arith.constant 31 : index
    %c0_87 = arith.constant 0 : index
    %237 = vector.load %arg15[%c31, %c0_87] : memref<50x128xf32, #tpu.memory_space<vmem>>, vector<1x128xf32>
    tpu.vector_store %arg15[%c31, %c0_87], %236 {strides = array<i32>} : memref<50x128xf32, #tpu.memory_space<vmem>>, vector<1x128xf32>,
    %238 = vector.extract_strided_slice %233 {offsets = [2, 0], sizes = [1, 128], strides = [1, 1]} : vector<10x128xf32> to vector<1x128xf32>
    %239 = vector.extract_strided_slice %233 {offsets = [3, 0], sizes = [1, 128], strides = [1, 1]} : vector<10x128xf32> to vector<1x128xf32>
    %240 = arith.maximumf %238, %239 : vector<1x128xf32>
    %c33 = arith.constant 33 : index
    %c0_88 = arith.constant 0 : index
    %241 = vector.load %arg15[%c33, %c0_88] : memref<50x128xf32, #tpu.memory_space<vmem>>, vector<1x128xf32>
    tpu.vector_store %arg15[%c33, %c0_88], %240 {strides = array<i32>} : memref<50x128xf32, #tpu.memory_space<vmem>>, vector<1x128xf32>,
    %242 = vector.extract_strided_slice %233 {offsets = [4, 0], sizes = [1, 128], strides = [1, 1]} : vector<10x128xf32> to vector<1x128xf32>
    %243 = vector.extract_strided_slice %233 {offsets = [5, 0], sizes = [1, 128], strides = [1, 1]} : vector<10x128xf32> to vector<1x128xf32>
    %244 = arith.maximumf %242, %243 : vector<1x128xf32>
    %c35 = arith.constant 35 : index
    %c0_89 = arith.constant 0 : index
    %245 = vector.load %arg15[%c35, %c0_89] : memref<50x128xf32, #tpu.memory_space<vmem>>, vector<1x128xf32>
    tpu.vector_store %arg15[%c35, %c0_89], %244 {strides = array<i32>} : memref<50x128xf32, #tpu.memory_space<vmem>>, vector<1x128xf32>,
    %246 = vector.extract_strided_slice %233 {offsets = [6, 0], sizes = [1, 128], strides = [1, 1]} : vector<10x128xf32> to vector<1x128xf32>
    %247 = vector.extract_strided_slice %233 {offsets = [7, 0], sizes = [1, 128], strides = [1, 1]} : vector<10x128xf32> to vector<1x128xf32>
    %248 = arith.maximumf %246, %247 : vector<1x128xf32>
    %c37 = arith.constant 37 : index
    %c0_90 = arith.constant 0 : index
    %249 = vector.load %arg15[%c37, %c0_90] : memref<50x128xf32, #tpu.memory_space<vmem>>, vector<1x128xf32>
    tpu.vector_store %arg15[%c37, %c0_90], %248 {strides = array<i32>} : memref<50x128xf32, #tpu.memory_space<vmem>>, vector<1x128xf32>,
    %250 = vector.extract_strided_slice %233 {offsets = [8, 0], sizes = [1, 128], strides = [1, 1]} : vector<10x128xf32> to vector<1x128xf32>
    %251 = vector.extract_strided_slice %233 {offsets = [9, 0], sizes = [1, 128], strides = [1, 1]} : vector<10x128xf32> to vector<1x128xf32>
    %252 = arith.maximumf %250, %251 : vector<1x128xf32>
    %c39 = arith.constant 39 : index
    %c0_91 = arith.constant 0 : index
    %253 = vector.load %arg15[%c39, %c0_91] : memref<50x128xf32, #tpu.memory_space<vmem>>, vector<1x128xf32>
    tpu.vector_store %arg15[%c39, %c0_91], %252 {strides = array<i32>} : memref<50x128xf32, #tpu.memory_space<vmem>>, vector<1x128xf32>,
    %c180 = arith.constant 180 : index
    %c0_92 = arith.constant 0 : index
    %254 = vector.load %arg14[%c180, %c0_92] : memref<200x128xf32, #tpu.memory_space<vmem>>, vector<20x128xf32>
    %255 = vector.extract_strided_slice %254 {offsets = [0, 0], sizes = [10, 128], strides = [1, 1]} : vector<20x128xf32> to vector<10x128xf32>
    %256 = vector.extract_strided_slice %254 {offsets = [10, 0], sizes = [10, 128], strides = [1, 1]} : vector<20x128xf32> to vector<10x128xf32>
    %257 = arith.maximumf %255, %256 : vector<10x128xf32>
    %258 = vector.extract_strided_slice %257 {offsets = [0, 0], sizes = [1, 128], strides = [1, 1]} : vector<10x128xf32> to vector<1x128xf32>
    %259 = vector.extract_strided_slice %257 {offsets = [1, 0], sizes = [1, 128], strides = [1, 1]} : vector<10x128xf32> to vector<1x128xf32>
    %260 = arith.maximumf %258, %259 : vector<1x128xf32>
    %c41 = arith.constant 41 : index
    %c0_93 = arith.constant 0 : index
    %261 = vector.load %arg15[%c41, %c0_93] : memref<50x128xf32, #tpu.memory_space<vmem>>, vector<1x128xf32>
    tpu.vector_store %arg15[%c41, %c0_93], %260 {strides = array<i32>} : memref<50x128xf32, #tpu.memory_space<vmem>>, vector<1x128xf32>,
    %262 = vector.extract_strided_slice %257 {offsets = [2, 0], sizes = [1, 128], strides = [1, 1]} : vector<10x128xf32> to vector<1x128xf32>
    %263 = vector.extract_strided_slice %257 {offsets = [3, 0], sizes = [1, 128], strides = [1, 1]} : vector<10x128xf32> to vector<1x128xf32>
    %264 = arith.maximumf %262, %263 : vector<1x128xf32>
    %c43 = arith.constant 43 : index
    %c0_94 = arith.constant 0 : index
    %265 = vector.load %arg15[%c43, %c0_94] : memref<50x128xf32, #tpu.memory_space<vmem>>, vector<1x128xf32>
    tpu.vector_store %arg15[%c43, %c0_94], %264 {strides = array<i32>} : memref<50x128xf32, #tpu.memory_space<vmem>>, vector<1x128xf32>,
    %266 = vector.extract_strided_slice %257 {offsets = [4, 0], sizes = [1, 128], strides = [1, 1]} : vector<10x128xf32> to vector<1x128xf32>
    %267 = vector.extract_strided_slice %257 {offsets = [5, 0], sizes = [1, 128], strides = [1, 1]} : vector<10x128xf32> to vector<1x128xf32>
    %268 = arith.maximumf %266, %267 : vector<1x128xf32>
    %c45 = arith.constant 45 : index
    %c0_95 = arith.constant 0 : index
    %269 = vector.load %arg15[%c45, %c0_95] : memref<50x128xf32, #tpu.memory_space<vmem>>, vector<1x128xf32>
    tpu.vector_store %arg15[%c45, %c0_95], %268 {strides = array<i32>} : memref<50x128xf32, #tpu.memory_space<vmem>>, vector<1x128xf32>,
    %270 = vector.extract_strided_slice %257 {offsets = [6, 0], sizes = [1, 128], strides = [1, 1]} : vector<10x128xf32> to vector<1x128xf32>
    %271 = vector.extract_strided_slice %257 {offsets = [7, 0], sizes = [1, 128], strides = [1, 1]} : vector<10x128xf32> to vector<1x128xf32>
    %272 = arith.maximumf %270, %271 : vector<1x128xf32>
    %c47 = arith.constant 47 : index
    %c0_96 = arith.constant 0 : index
    %273 = vector.load %arg15[%c47, %c0_96] : memref<50x128xf32, #tpu.memory_space<vmem>>, vector<1x128xf32>
    tpu.vector_store %arg15[%c47, %c0_96], %272 {strides = array<i32>} : memref<50x128xf32, #tpu.memory_space<vmem>>, vector<1x128xf32>,
    %274 = vector.extract_strided_slice %257 {offsets = [8, 0], sizes = [1, 128], strides = [1, 1]} : vector<10x128xf32> to vector<1x128xf32>
    %275 = vector.extract_strided_slice %257 {offsets = [9, 0], sizes = [1, 128], strides = [1, 1]} : vector<10x128xf32> to vector<1x128xf32>
    %276 = arith.maximumf %274, %275 : vector<1x128xf32>
    %c49 = arith.constant 49 : index
    %c0_97 = arith.constant 0 : index
    %277 = vector.load %arg15[%c49, %c0_97] : memref<50x128xf32, #tpu.memory_space<vmem>>, vector<1x128xf32>
    tpu.vector_store %arg15[%c49, %c0_97], %276 {strides = array<i32>} : memref<50x128xf32, #tpu.memory_space<vmem>>, vector<1x128xf32>,
    %cst_98 = arith.constant 0.000000e+00 : f32
    %278 = vector.broadcast %cst_98 : f32 to vector<2x256xf32>
    %c0_99 = arith.constant 0 : index
    %c0_100 = arith.constant 0 : index
    %279 = vector.load %arg15[%c0_99, %c0_100] : memref<50x128xf32, #tpu.memory_space<vmem>>, vector<2x128xf32>
    %280 = arith.truncf %279 : vector<2x128xf32> to vector<2x128xbf16>
    %c0_101 = arith.constant 0 : index
    %c0_102 = arith.constant 0 : index
    %c0_103 = arith.constant 0 : index
    %281 = vector.load %arg6[%c0_101, %c0_102, %c0_103] : memref<25x128x256xbf16, #tpu.memory_space<vmem>>, vector<1x128x256xbf16>
    %282 = vector.shape_cast %281 : vector<1x128x256xbf16> to vector<128x256xbf16>
    %cst_104 = arith.constant dense<0.000000e+00> : vector<2x256xf32>
    %283 = tpu.matmul %280, %282, %cst_104 {dimension_numbers = #tpu.dot_dimension_numbers<[1], [0], [0], [1], [0, 0, 1, 1], [], []>} : vector<2x128xbf16>, vector<128x256xbf16>, vector<2x256xf32> -> vector<2x256xf32>
    %284 = arith.addf %278, %283 : vector<2x256xf32>
    %c2_105 = arith.constant 2 : index
    %c0_106 = arith.constant 0 : index
    %285 = vector.load %arg15[%c2_105, %c0_106] : memref<50x128xf32, #tpu.memory_space<vmem>>, vector<2x128xf32>
    %286 = arith.truncf %285 : vector<2x128xf32> to vector<2x128xbf16>
    %c1_107 = arith.constant 1 : index
    %c0_108 = arith.constant 0 : index
    %c0_109 = arith.constant 0 : index
    %287 = vector.load %arg6[%c1_107, %c0_108, %c0_109] : memref<25x128x256xbf16, #tpu.memory_space<vmem>>, vector<1x128x256xbf16>
    %288 = vector.shape_cast %287 : vector<1x128x256xbf16> to vector<128x256xbf16>
    %cst_110 = arith.constant dense<0.000000e+00> : vector<2x256xf32>
    %289 = tpu.matmul %286, %288, %cst_110 {dimension_numbers = #tpu.dot_dimension_numbers<[1], [0], [0], [1], [0, 0, 1, 1], [], []>} : vector<2x128xbf16>, vector<128x256xbf16>, vector<2x256xf32> -> vector<2x256xf32>
    %290 = arith.addf %284, %289 : vector<2x256xf32>
    %c4_111 = arith.constant 4 : index
    %c0_112 = arith.constant 0 : index
    %291 = vector.load %arg15[%c4_111, %c0_112] : memref<50x128xf32, #tpu.memory_space<vmem>>, vector<2x128xf32>
    %292 = arith.truncf %291 : vector<2x128xf32> to vector<2x128xbf16>
    %c2_113 = arith.constant 2 : index
    %c0_114 = arith.constant 0 : index
    %c0_115 = arith.constant 0 : index
    %293 = vector.load %arg6[%c2_113, %c0_114, %c0_115] : memref<25x128x256xbf16, #tpu.memory_space<vmem>>, vector<1x128x256xbf16>
    %294 = vector.shape_cast %293 : vector<1x128x256xbf16> to vector<128x256xbf16>
    %cst_116 = arith.constant dense<0.000000e+00> : vector<2x256xf32>
    %295 = tpu.matmul %292, %294, %cst_116 {dimension_numbers = #tpu.dot_dimension_numbers<[1], [0], [0], [1], [0, 0, 1, 1], [], []>} : vector<2x128xbf16>, vector<128x256xbf16>, vector<2x256xf32> -> vector<2x256xf32>
    %296 = arith.addf %290, %295 : vector<2x256xf32>
    %c6_117 = arith.constant 6 : index
    %c0_118 = arith.constant 0 : index
    %297 = vector.load %arg15[%c6_117, %c0_118] : memref<50x128xf32, #tpu.memory_space<vmem>>, vector<2x128xf32>
    %298 = arith.truncf %297 : vector<2x128xf32> to vector<2x128xbf16>
    %c3_119 = arith.constant 3 : index
    %c0_120 = arith.constant 0 : index
    %c0_121 = arith.constant 0 : index
    %299 = vector.load %arg6[%c3_119, %c0_120, %c0_121] : memref<25x128x256xbf16, #tpu.memory_space<vmem>>, vector<1x128x256xbf16>
    %300 = vector.shape_cast %299 : vector<1x128x256xbf16> to vector<128x256xbf16>
    %cst_122 = arith.constant dense<0.000000e+00> : vector<2x256xf32>
    %301 = tpu.matmul %298, %300, %cst_122 {dimension_numbers = #tpu.dot_dimension_numbers<[1], [0], [0], [1], [0, 0, 1, 1], [], []>} : vector<2x128xbf16>, vector<128x256xbf16>, vector<2x256xf32> -> vector<2x256xf32>
    %302 = arith.addf %296, %301 : vector<2x256xf32>
    %c8_123 = arith.constant 8 : index
    %c0_124 = arith.constant 0 : index
    %303 = vector.load %arg15[%c8_123, %c0_124] : memref<50x128xf32, #tpu.memory_space<vmem>>, vector<2x128xf32>
    %304 = arith.truncf %303 : vector<2x128xf32> to vector<2x128xbf16>
    %c4_125 = arith.constant 4 : index
    %c0_126 = arith.constant 0 : index
    %c0_127 = arith.constant 0 : index
    %305 = vector.load %arg6[%c4_125, %c0_126, %c0_127] : memref<25x128x256xbf16, #tpu.memory_space<vmem>>, vector<1x128x256xbf16>
    %306 = vector.shape_cast %305 : vector<1x128x256xbf16> to vector<128x256xbf16>
    %cst_128 = arith.constant dense<0.000000e+00> : vector<2x256xf32>
    %307 = tpu.matmul %304, %306, %cst_128 {dimension_numbers = #tpu.dot_dimension_numbers<[1], [0], [0], [1], [0, 0, 1, 1], [], []>} : vector<2x128xbf16>, vector<128x256xbf16>, vector<2x256xf32> -> vector<2x256xf32>
    %308 = arith.addf %302, %307 : vector<2x256xf32>
    %c10_129 = arith.constant 10 : index
    %c0_130 = arith.constant 0 : index
    %309 = vector.load %arg15[%c10_129, %c0_130] : memref<50x128xf32, #tpu.memory_space<vmem>>, vector<2x128xf32>
    %310 = arith.truncf %309 : vector<2x128xf32> to vector<2x128xbf16>
    %c5_131 = arith.constant 5 : index
    %c0_132 = arith.constant 0 : index
    %c0_133 = arith.constant 0 : index
    %311 = vector.load %arg6[%c5_131, %c0_132, %c0_133] : memref<25x128x256xbf16, #tpu.memory_space<vmem>>, vector<1x128x256xbf16>
    %312 = vector.shape_cast %311 : vector<1x128x256xbf16> to vector<128x256xbf16>
    %cst_134 = arith.constant dense<0.000000e+00> : vector<2x256xf32>
    %313 = tpu.matmul %310, %312, %cst_134 {dimension_numbers = #tpu.dot_dimension_numbers<[1], [0], [0], [1], [0, 0, 1, 1], [], []>} : vector<2x128xbf16>, vector<128x256xbf16>, vector<2x256xf32> -> vector<2x256xf32>
    %314 = arith.addf %308, %313 : vector<2x256xf32>
    %c12_135 = arith.constant 12 : index
    %c0_136 = arith.constant 0 : index
    %315 = vector.load %arg15[%c12_135, %c0_136] : memref<50x128xf32, #tpu.memory_space<vmem>>, vector<2x128xf32>
    %316 = arith.truncf %315 : vector<2x128xf32> to vector<2x128xbf16>
    %c6_137 = arith.constant 6 : index
    %c0_138 = arith.constant 0 : index
    %c0_139 = arith.constant 0 : index
    %317 = vector.load %arg6[%c6_137, %c0_138, %c0_139] : memref<25x128x256xbf16, #tpu.memory_space<vmem>>, vector<1x128x256xbf16>
    %318 = vector.shape_cast %317 : vector<1x128x256xbf16> to vector<128x256xbf16>
    %cst_140 = arith.constant dense<0.000000e+00> : vector<2x256xf32>
    %319 = tpu.matmul %316, %318, %cst_140 {dimension_numbers = #tpu.dot_dimension_numbers<[1], [0], [0], [1], [0, 0, 1, 1], [], []>} : vector<2x128xbf16>, vector<128x256xbf16>, vector<2x256xf32> -> vector<2x256xf32>
    %320 = arith.addf %314, %319 : vector<2x256xf32>
    %c14_141 = arith.constant 14 : index
    %c0_142 = arith.constant 0 : index
    %321 = vector.load %arg15[%c14_141, %c0_142] : memref<50x128xf32, #tpu.memory_space<vmem>>, vector<2x128xf32>
    %322 = arith.truncf %321 : vector<2x128xf32> to vector<2x128xbf16>
    %c7_143 = arith.constant 7 : index
    %c0_144 = arith.constant 0 : index
    %c0_145 = arith.constant 0 : index
    %323 = vector.load %arg6[%c7_143, %c0_144, %c0_145] : memref<25x128x256xbf16, #tpu.memory_space<vmem>>, vector<1x128x256xbf16>
    %324 = vector.shape_cast %323 : vector<1x128x256xbf16> to vector<128x256xbf16>
    %cst_146 = arith.constant dense<0.000000e+00> : vector<2x256xf32>
    %325 = tpu.matmul %322, %324, %cst_146 {dimension_numbers = #tpu.dot_dimension_numbers<[1], [0], [0], [1], [0, 0, 1, 1], [], []>} : vector<2x128xbf16>, vector<128x256xbf16>, vector<2x256xf32> -> vector<2x256xf32>
    %326 = arith.addf %320, %325 : vector<2x256xf32>
    %c16_147 = arith.constant 16 : index
    %c0_148 = arith.constant 0 : index
    %327 = vector.load %arg15[%c16_147, %c0_148] : memref<50x128xf32, #tpu.memory_space<vmem>>, vector<2x128xf32>
    %328 = arith.truncf %327 : vector<2x128xf32> to vector<2x128xbf16>
    %c8_149 = arith.constant 8 : index
    %c0_150 = arith.constant 0 : index
    %c0_151 = arith.constant 0 : index
    %329 = vector.load %arg6[%c8_149, %c0_150, %c0_151] : memref<25x128x256xbf16, #tpu.memory_space<vmem>>, vector<1x128x256xbf16>
    %330 = vector.shape_cast %329 : vector<1x128x256xbf16> to vector<128x256xbf16>
    %cst_152 = arith.constant dense<0.000000e+00> : vector<2x256xf32>
    %331 = tpu.matmul %328, %330, %cst_152 {dimension_numbers = #tpu.dot_dimension_numbers<[1], [0], [0], [1], [0, 0, 1, 1], [], []>} : vector<2x128xbf16>, vector<128x256xbf16>, vector<2x256xf32> -> vector<2x256xf32>
    %332 = arith.addf %326, %331 : vector<2x256xf32>
    %c18_153 = arith.constant 18 : index
    %c0_154 = arith.constant 0 : index
    %333 = vector.load %arg15[%c18_153, %c0_154] : memref<50x128xf32, #tpu.memory_space<vmem>>, vector<2x128xf32>
    %334 = arith.truncf %333 : vector<2x128xf32> to vector<2x128xbf16>
    %c9_155 = arith.constant 9 : index
    %c0_156 = arith.constant 0 : index
    %c0_157 = arith.constant 0 : index
    %335 = vector.load %arg6[%c9_155, %c0_156, %c0_157] : memref<25x128x256xbf16, #tpu.memory_space<vmem>>, vector<1x128x256xbf16>
    %336 = vector.shape_cast %335 : vector<1x128x256xbf16> to vector<128x256xbf16>
    %cst_158 = arith.constant dense<0.000000e+00> : vector<2x256xf32>
    %337 = tpu.matmul %334, %336, %cst_158 {dimension_numbers = #tpu.dot_dimension_numbers<[1], [0], [0], [1], [0, 0, 1, 1], [], []>} : vector<2x128xbf16>, vector<128x256xbf16>, vector<2x256xf32> -> vector<2x256xf32>
    %338 = arith.addf %332, %337 : vector<2x256xf32>
    %c20_159 = arith.constant 20 : index
    %c0_160 = arith.constant 0 : index
    %339 = vector.load %arg15[%c20_159, %c0_160] : memref<50x128xf32, #tpu.memory_space<vmem>>, vector<2x128xf32>
    %340 = arith.truncf %339 : vector<2x128xf32> to vector<2x128xbf16>
    %c10_161 = arith.constant 10 : index
    %c0_162 = arith.constant 0 : index
    %c0_163 = arith.constant 0 : index
    %341 = vector.load %arg6[%c10_161, %c0_162, %c0_163] : memref<25x128x256xbf16, #tpu.memory_space<vmem>>, vector<1x128x256xbf16>
    %342 = vector.shape_cast %341 : vector<1x128x256xbf16> to vector<128x256xbf16>
    %cst_164 = arith.constant dense<0.000000e+00> : vector<2x256xf32>
    %343 = tpu.matmul %340, %342, %cst_164 {dimension_numbers = #tpu.dot_dimension_numbers<[1], [0], [0], [1], [0, 0, 1, 1], [], []>} : vector<2x128xbf16>, vector<128x256xbf16>, vector<2x256xf32> -> vector<2x256xf32>
    %344 = arith.addf %338, %343 : vector<2x256xf32>
    %c22_165 = arith.constant 22 : index
    %c0_166 = arith.constant 0 : index
    %345 = vector.load %arg15[%c22_165, %c0_166] : memref<50x128xf32, #tpu.memory_space<vmem>>, vector<2x128xf32>
    %346 = arith.truncf %345 : vector<2x128xf32> to vector<2x128xbf16>
    %c11_167 = arith.constant 11 : index
    %c0_168 = arith.constant 0 : index
    %c0_169 = arith.constant 0 : index
    %347 = vector.load %arg6[%c11_167, %c0_168, %c0_169] : memref<25x128x256xbf16, #tpu.memory_space<vmem>>, vector<1x128x256xbf16>
    %348 = vector.shape_cast %347 : vector<1x128x256xbf16> to vector<128x256xbf16>
    %cst_170 = arith.constant dense<0.000000e+00> : vector<2x256xf32>
    %349 = tpu.matmul %346, %348, %cst_170 {dimension_numbers = #tpu.dot_dimension_numbers<[1], [0], [0], [1], [0, 0, 1, 1], [], []>} : vector<2x128xbf16>, vector<128x256xbf16>, vector<2x256xf32> -> vector<2x256xf32>
    %350 = arith.addf %344, %349 : vector<2x256xf32>
    %c24_171 = arith.constant 24 : index
    %c0_172 = arith.constant 0 : index
    %351 = vector.load %arg15[%c24_171, %c0_172] : memref<50x128xf32, #tpu.memory_space<vmem>>, vector<2x128xf32>
    %352 = arith.truncf %351 : vector<2x128xf32> to vector<2x128xbf16>
    %c12_173 = arith.constant 12 : index
    %c0_174 = arith.constant 0 : index
    %c0_175 = arith.constant 0 : index
    %353 = vector.load %arg6[%c12_173, %c0_174, %c0_175] : memref<25x128x256xbf16, #tpu.memory_space<vmem>>, vector<1x128x256xbf16>
    %354 = vector.shape_cast %353 : vector<1x128x256xbf16> to vector<128x256xbf16>
    %cst_176 = arith.constant dense<0.000000e+00> : vector<2x256xf32>
    %355 = tpu.matmul %352, %354, %cst_176 {dimension_numbers = #tpu.dot_dimension_numbers<[1], [0], [0], [1], [0, 0, 1, 1], [], []>} : vector<2x128xbf16>, vector<128x256xbf16>, vector<2x256xf32> -> vector<2x256xf32>
    %356 = arith.addf %350, %355 : vector<2x256xf32>
    %c26_177 = arith.constant 26 : index
    %c0_178 = arith.constant 0 : index
    %357 = vector.load %arg15[%c26_177, %c0_178] : memref<50x128xf32, #tpu.memory_space<vmem>>, vector<2x128xf32>
    %358 = arith.truncf %357 : vector<2x128xf32> to vector<2x128xbf16>
    %c13_179 = arith.constant 13 : index
    %c0_180 = arith.constant 0 : index
    %c0_181 = arith.constant 0 : index
    %359 = vector.load %arg6[%c13_179, %c0_180, %c0_181] : memref<25x128x256xbf16, #tpu.memory_space<vmem>>, vector<1x128x256xbf16>
    %360 = vector.shape_cast %359 : vector<1x128x256xbf16> to vector<128x256xbf16>
    %cst_182 = arith.constant dense<0.000000e+00> : vector<2x256xf32>
    %361 = tpu.matmul %358, %360, %cst_182 {dimension_numbers = #tpu.dot_dimension_numbers<[1], [0], [0], [1], [0, 0, 1, 1], [], []>} : vector<2x128xbf16>, vector<128x256xbf16>, vector<2x256xf32> -> vector<2x256xf32>
    %362 = arith.addf %356, %361 : vector<2x256xf32>
    %c28_183 = arith.constant 28 : index
    %c0_184 = arith.constant 0 : index
    %363 = vector.load %arg15[%c28_183, %c0_184] : memref<50x128xf32, #tpu.memory_space<vmem>>, vector<2x128xf32>
    %364 = arith.truncf %363 : vector<2x128xf32> to vector<2x128xbf16>
    %c14_185 = arith.constant 14 : index
    %c0_186 = arith.constant 0 : index
    %c0_187 = arith.constant 0 : index
    %365 = vector.load %arg6[%c14_185, %c0_186, %c0_187] : memref<25x128x256xbf16, #tpu.memory_space<vmem>>, vector<1x128x256xbf16>
    %366 = vector.shape_cast %365 : vector<1x128x256xbf16> to vector<128x256xbf16>
    %cst_188 = arith.constant dense<0.000000e+00> : vector<2x256xf32>
    %367 = tpu.matmul %364, %366, %cst_188 {dimension_numbers = #tpu.dot_dimension_numbers<[1], [0], [0], [1], [0, 0, 1, 1], [], []>} : vector<2x128xbf16>, vector<128x256xbf16>, vector<2x256xf32> -> vector<2x256xf32>
    %368 = arith.addf %362, %367 : vector<2x256xf32>
    %c30_189 = arith.constant 30 : index
    %c0_190 = arith.constant 0 : index
    %369 = vector.load %arg15[%c30_189, %c0_190] : memref<50x128xf32, #tpu.memory_space<vmem>>, vector<2x128xf32>
    %370 = arith.truncf %369 : vector<2x128xf32> to vector<2x128xbf16>
    %c15_191 = arith.constant 15 : index
    %c0_192 = arith.constant 0 : index
    %c0_193 = arith.constant 0 : index
    %371 = vector.load %arg6[%c15_191, %c0_192, %c0_193] : memref<25x128x256xbf16, #tpu.memory_space<vmem>>, vector<1x128x256xbf16>
    %372 = vector.shape_cast %371 : vector<1x128x256xbf16> to vector<128x256xbf16>
    %cst_194 = arith.constant dense<0.000000e+00> : vector<2x256xf32>
    %373 = tpu.matmul %370, %372, %cst_194 {dimension_numbers = #tpu.dot_dimension_numbers<[1], [0], [0], [1], [0, 0, 1, 1], [], []>} : vector<2x128xbf16>, vector<128x256xbf16>, vector<2x256xf32> -> vector<2x256xf32>
    %374 = arith.addf %368, %373 : vector<2x256xf32>
    %c32_195 = arith.constant 32 : index
    %c0_196 = arith.constant 0 : index
    %375 = vector.load %arg15[%c32_195, %c0_196] : memref<50x128xf32, #tpu.memory_space<vmem>>, vector<2x128xf32>
    %376 = arith.truncf %375 : vector<2x128xf32> to vector<2x128xbf16>
    %c16_197 = arith.constant 16 : index
    %c0_198 = arith.constant 0 : index
    %c0_199 = arith.constant 0 : index
    %377 = vector.load %arg6[%c16_197, %c0_198, %c0_199] : memref<25x128x256xbf16, #tpu.memory_space<vmem>>, vector<1x128x256xbf16>
    %378 = vector.shape_cast %377 : vector<1x128x256xbf16> to vector<128x256xbf16>
    %cst_200 = arith.constant dense<0.000000e+00> : vector<2x256xf32>
    %379 = tpu.matmul %376, %378, %cst_200 {dimension_numbers = #tpu.dot_dimension_numbers<[1], [0], [0], [1], [0, 0, 1, 1], [], []>} : vector<2x128xbf16>, vector<128x256xbf16>, vector<2x256xf32> -> vector<2x256xf32>
    %380 = arith.addf %374, %379 : vector<2x256xf32>
    %c34_201 = arith.constant 34 : index
    %c0_202 = arith.constant 0 : index
    %381 = vector.load %arg15[%c34_201, %c0_202] : memref<50x128xf32, #tpu.memory_space<vmem>>, vector<2x128xf32>
    %382 = arith.truncf %381 : vector<2x128xf32> to vector<2x128xbf16>
    %c17_203 = arith.constant 17 : index
    %c0_204 = arith.constant 0 : index
    %c0_205 = arith.constant 0 : index
    %383 = vector.load %arg6[%c17_203, %c0_204, %c0_205] : memref<25x128x256xbf16, #tpu.memory_space<vmem>>, vector<1x128x256xbf16>
    %384 = vector.shape_cast %383 : vector<1x128x256xbf16> to vector<128x256xbf16>
    %cst_206 = arith.constant dense<0.000000e+00> : vector<2x256xf32>
    %385 = tpu.matmul %382, %384, %cst_206 {dimension_numbers = #tpu.dot_dimension_numbers<[1], [0], [0], [1], [0, 0, 1, 1], [], []>} : vector<2x128xbf16>, vector<128x256xbf16>, vector<2x256xf32> -> vector<2x256xf32>
    %386 = arith.addf %380, %385 : vector<2x256xf32>
    %c36_207 = arith.constant 36 : index
    %c0_208 = arith.constant 0 : index
    %387 = vector.load %arg15[%c36_207, %c0_208] : memref<50x128xf32, #tpu.memory_space<vmem>>, vector<2x128xf32>
    %388 = arith.truncf %387 : vector<2x128xf32> to vector<2x128xbf16>
    %c18_209 = arith.constant 18 : index
    %c0_210 = arith.constant 0 : index
    %c0_211 = arith.constant 0 : index
    %389 = vector.load %arg6[%c18_209, %c0_210, %c0_211] : memref<25x128x256xbf16, #tpu.memory_space<vmem>>, vector<1x128x256xbf16>
    %390 = vector.shape_cast %389 : vector<1x128x256xbf16> to vector<128x256xbf16>
    %cst_212 = arith.constant dense<0.000000e+00> : vector<2x256xf32>
    %391 = tpu.matmul %388, %390, %cst_212 {dimension_numbers = #tpu.dot_dimension_numbers<[1], [0], [0], [1], [0, 0, 1, 1], [], []>} : vector<2x128xbf16>, vector<128x256xbf16>, vector<2x256xf32> -> vector<2x256xf32>
    %392 = arith.addf %386, %391 : vector<2x256xf32>
    %c38_213 = arith.constant 38 : index
    %c0_214 = arith.constant 0 : index
    %393 = vector.load %arg15[%c38_213, %c0_214] : memref<50x128xf32, #tpu.memory_space<vmem>>, vector<2x128xf32>
    %394 = arith.truncf %393 : vector<2x128xf32> to vector<2x128xbf16>
    %c19_215 = arith.constant 19 : index
    %c0_216 = arith.constant 0 : index
    %c0_217 = arith.constant 0 : index
    %395 = vector.load %arg6[%c19_215, %c0_216, %c0_217] : memref<25x128x256xbf16, #tpu.memory_space<vmem>>, vector<1x128x256xbf16>
    %396 = vector.shape_cast %395 : vector<1x128x256xbf16> to vector<128x256xbf16>
    %cst_218 = arith.constant dense<0.000000e+00> : vector<2x256xf32>
    %397 = tpu.matmul %394, %396, %cst_218 {dimension_numbers = #tpu.dot_dimension_numbers<[1], [0], [0], [1], [0, 0, 1, 1], [], []>} : vector<2x128xbf16>, vector<128x256xbf16>, vector<2x256xf32> -> vector<2x256xf32>
    %398 = arith.addf %392, %397 : vector<2x256xf32>
    %c40_219 = arith.constant 40 : index
    %c0_220 = arith.constant 0 : index
    %399 = vector.load %arg15[%c40_219, %c0_220] : memref<50x128xf32, #tpu.memory_space<vmem>>, vector<2x128xf32>
    %400 = arith.truncf %399 : vector<2x128xf32> to vector<2x128xbf16>
    %c20_221 = arith.constant 20 : index
    %c0_222 = arith.constant 0 : index
    %c0_223 = arith.constant 0 : index
    %401 = vector.load %arg6[%c20_221, %c0_222, %c0_223] : memref<25x128x256xbf16, #tpu.memory_space<vmem>>, vector<1x128x256xbf16>
    %402 = vector.shape_cast %401 : vector<1x128x256xbf16> to vector<128x256xbf16>
    %cst_224 = arith.constant dense<0.000000e+00> : vector<2x256xf32>
    %403 = tpu.matmul %400, %402, %cst_224 {dimension_numbers = #tpu.dot_dimension_numbers<[1], [0], [0], [1], [0, 0, 1, 1], [], []>} : vector<2x128xbf16>, vector<128x256xbf16>, vector<2x256xf32> -> vector<2x256xf32>
    %404 = arith.addf %398, %403 : vector<2x256xf32>
    %c42_225 = arith.constant 42 : index
    %c0_226 = arith.constant 0 : index
    %405 = vector.load %arg15[%c42_225, %c0_226] : memref<50x128xf32, #tpu.memory_space<vmem>>, vector<2x128xf32>
    %406 = arith.truncf %405 : vector<2x128xf32> to vector<2x128xbf16>
    %c21_227 = arith.constant 21 : index
    %c0_228 = arith.constant 0 : index
    %c0_229 = arith.constant 0 : index
    %407 = vector.load %arg6[%c21_227, %c0_228, %c0_229] : memref<25x128x256xbf16, #tpu.memory_space<vmem>>, vector<1x128x256xbf16>
    %408 = vector.shape_cast %407 : vector<1x128x256xbf16> to vector<128x256xbf16>
    %cst_230 = arith.constant dense<0.000000e+00> : vector<2x256xf32>
    %409 = tpu.matmul %406, %408, %cst_230 {dimension_numbers = #tpu.dot_dimension_numbers<[1], [0], [0], [1], [0, 0, 1, 1], [], []>} : vector<2x128xbf16>, vector<128x256xbf16>, vector<2x256xf32> -> vector<2x256xf32>
    %410 = arith.addf %404, %409 : vector<2x256xf32>
    %c44_231 = arith.constant 44 : index
    %c0_232 = arith.constant 0 : index
    %411 = vector.load %arg15[%c44_231, %c0_232] : memref<50x128xf32, #tpu.memory_space<vmem>>, vector<2x128xf32>
    %412 = arith.truncf %411 : vector<2x128xf32> to vector<2x128xbf16>
    %c22_233 = arith.constant 22 : index
    %c0_234 = arith.constant 0 : index
    %c0_235 = arith.constant 0 : index
    %413 = vector.load %arg6[%c22_233, %c0_234, %c0_235] : memref<25x128x256xbf16, #tpu.memory_space<vmem>>, vector<1x128x256xbf16>
    %414 = vector.shape_cast %413 : vector<1x128x256xbf16> to vector<128x256xbf16>
    %cst_236 = arith.constant dense<0.000000e+00> : vector<2x256xf32>
    %415 = tpu.matmul %412, %414, %cst_236 {dimension_numbers = #tpu.dot_dimension_numbers<[1], [0], [0], [1], [0, 0, 1, 1], [], []>} : vector<2x128xbf16>, vector<128x256xbf16>, vector<2x256xf32> -> vector<2x256xf32>
    %416 = arith.addf %410, %415 : vector<2x256xf32>
    %c46_237 = arith.constant 46 : index
    %c0_238 = arith.constant 0 : index
    %417 = vector.load %arg15[%c46_237, %c0_238] : memref<50x128xf32, #tpu.memory_space<vmem>>, vector<2x128xf32>
    %418 = arith.truncf %417 : vector<2x128xf32> to vector<2x128xbf16>
    %c23_239 = arith.constant 23 : index
    %c0_240 = arith.constant 0 : index
    %c0_241 = arith.constant 0 : index
    %419 = vector.load %arg6[%c23_239, %c0_240, %c0_241] : memref<25x128x256xbf16, #tpu.memory_space<vmem>>, vector<1x128x256xbf16>
    %420 = vector.shape_cast %419 : vector<1x128x256xbf16> to vector<128x256xbf16>
    %cst_242 = arith.constant dense<0.000000e+00> : vector<2x256xf32>
    %421 = tpu.matmul %418, %420, %cst_242 {dimension_numbers = #tpu.dot_dimension_numbers<[1], [0], [0], [1], [0, 0, 1, 1], [], []>} : vector<2x128xbf16>, vector<128x256xbf16>, vector<2x256xf32> -> vector<2x256xf32>
    %422 = arith.addf %416, %421 : vector<2x256xf32>
    %c48_243 = arith.constant 48 : index
    %c0_244 = arith.constant 0 : index
    %423 = vector.load %arg15[%c48_243, %c0_244] : memref<50x128xf32, #tpu.memory_space<vmem>>, vector<2x128xf32>
    %424 = arith.truncf %423 : vector<2x128xf32> to vector<2x128xbf16>
    %c24_245 = arith.constant 24 : index
    %c0_246 = arith.constant 0 : index
    %c0_247 = arith.constant 0 : index
    %425 = vector.load %arg6[%c24_245, %c0_246, %c0_247] : memref<25x128x256xbf16, #tpu.memory_space<vmem>>, vector<1x128x256xbf16>
    %426 = vector.shape_cast %425 : vector<1x128x256xbf16> to vector<128x256xbf16>
    %cst_248 = arith.constant dense<0.000000e+00> : vector<2x256xf32>
    %427 = tpu.matmul %424, %426, %cst_248 {dimension_numbers = #tpu.dot_dimension_numbers<[1], [0], [0], [1], [0, 0, 1, 1], [], []>} : vector<2x128xbf16>, vector<128x256xbf16>, vector<2x256xf32> -> vector<2x256xf32>
    %428 = arith.addf %422, %427 : vector<2x256xf32>
    %c0_249 = arith.constant 0 : index
    %c0_250 = arith.constant 0 : index
    %429 = vector.load %arg7[%c0_249, %c0_250] : memref<1x256xf32, #tpu.memory_space<vmem>>, vector<1x256xf32>
    %430 = vector.broadcast %429 : vector<1x256xf32> to vector<2x256xf32>
    %431 = arith.addf %428, %430 : vector<2x256xf32>
    %cst_251 = arith.constant 0.000000e+00 : f32
    %432 = vector.broadcast %cst_251 : f32 to vector<2x256xf32>
    %433 = arith.maximumf %431, %432 : vector<2x256xf32>
    %434 = arith.truncf %433 : vector<2x256xf32> to vector<2x256xbf16>
    %c0_252 = arith.constant 0 : index
    %c0_253 = arith.constant 0 : index
    %435 = vector.load %arg8[%c0_252, %c0_253] : memref<256x128xbf16, #tpu.memory_space<vmem>>, vector<256x128xbf16>
    %cst_254 = arith.constant dense<0.000000e+00> : vector<2x128xf32>
    %436 = tpu.matmul %434, %435, %cst_254 {dimension_numbers = #tpu.dot_dimension_numbers<[1], [0], [0], [1], [0, 0, 1, 1], [], []>} : vector<2x256xbf16>, vector<256x128xbf16>, vector<2x128xf32> -> vector<2x128xf32>
    %c0_255 = arith.constant 0 : index
    %c0_256 = arith.constant 0 : index
    %437 = vector.load %arg9[%c0_255, %c0_256] : memref<1x128xf32, #tpu.memory_space<vmem>>, vector<1x128xf32>
    %438 = vector.broadcast %437 : vector<1x128xf32> to vector<2x128xf32>
    %439 = arith.addf %436, %438 : vector<2x128xf32>
    %cst_257 = arith.constant 0.000000e+00 : f32
    %440 = vector.broadcast %cst_257 : f32 to vector<2x128xf32>
    %441 = arith.maximumf %439, %440 : vector<2x128xf32>
    %442 = arith.truncf %441 : vector<2x128xf32> to vector<2x128xbf16>
    %c0_258 = arith.constant 0 : index
    %c0_259 = arith.constant 0 : index
    %443 = vector.load %arg10[%c0_258, %c0_259] : memref<128x128xbf16, #tpu.memory_space<vmem>>, vector<128x128xbf16>
    %cst_260 = arith.constant dense<0.000000e+00> : vector<2x128xf32>
    %444 = tpu.matmul %442, %443, %cst_260 {dimension_numbers = #tpu.dot_dimension_numbers<[1], [0], [0], [1], [0, 0, 1, 1], [], []>} : vector<2x128xbf16>, vector<128x128xbf16>, vector<2x128xf32> -> vector<2x128xf32>
    %c0_261 = arith.constant 0 : index
    %c0_262 = arith.constant 0 : index
    %445 = vector.load %arg11[%c0_261, %c0_262] : memref<1x128xf32, #tpu.memory_space<vmem>>, vector<1x128xf32>
    %446 = vector.broadcast %445 : vector<1x128xf32> to vector<2x128xf32>
    %447 = arith.addf %444, %446 : vector<2x128xf32>
    %c0_263 = arith.constant 0 : index
    %c0_264 = arith.constant 0 : index
    %448 = vector.load %arg12[%c0_263, %c0_264] : memref<2x128xf32, #tpu.memory_space<vmem>>, vector<2x128xf32>
    tpu.vector_store %arg12[%c0_263, %c0_264], %447 {strides = array<i32>} : memref<2x128xf32, #tpu.memory_space<vmem>>, vector<2x128xf32>,
    return
  }
  func.func @transform_0(%arg0: i32) -> (i32, i32) {
    %c0_i32 = arith.constant 0 : i32
    %c0_i32_0 = arith.constant 0 : i32
    %c0_i32_1 = arith.constant 0 : i32
    return %c0_i32, %c0_i32_0 : i32, i32
  }
  func.func @transform_1(%arg0: i32) -> (i32, i32) {
    %c0_i32 = arith.constant 0 : i32
    %c0_i32_0 = arith.constant 0 : i32
    %c0_i32_1 = arith.constant 0 : i32
    return %c0_i32, %c0_i32_0 : i32, i32
  }
  func.func @transform_2(%arg0: i32) -> (i32, i32) {
    %c0_i32 = arith.constant 0 : i32
    %c0_i32_0 = arith.constant 0 : i32
    %c0_i32_1 = arith.constant 0 : i32
    return %c0_i32, %c0_i32_0 : i32, i32
  }
  func.func @transform_3(%arg0: i32) -> (i32, i32, i32) {
    %c0_i32 = arith.constant 0 : i32
    %c0_i32_0 = arith.constant 0 : i32
    %c0_i32_1 = arith.constant 0 : i32
    %c0_i32_2 = arith.constant 0 : i32
    return %c0_i32, %c0_i32_0, %c0_i32_1 : i32, i32, i32
  }
  func.func @transform_4(%arg0: i32) -> (i32, i32) {
    %c0_i32 = arith.constant 0 : i32
    %c0_i32_0 = arith.constant 0 : i32
    %c0_i32_1 = arith.constant 0 : i32
    return %c0_i32, %c0_i32_0 : i32, i32
  }
  func.func @transform_5(%arg0: i32) -> (i32, i32, i32) {
    %c0_i32 = arith.constant 0 : i32
    %c0_i32_0 = arith.constant 0 : i32
    %c0_i32_1 = arith.constant 0 : i32
    %c0_i32_2 = arith.constant 0 : i32
    return %c0_i32, %c0_i32_0, %c0_i32_1 : i32, i32, i32
  }
  func.func @transform_6(%arg0: i32) -> (i32, i32) {
    %c0_i32 = arith.constant 0 : i32
    %c0_i32_0 = arith.constant 0 : i32
    %c0_i32_1 = arith.constant 0 : i32
    return %c0_i32, %c0_i32_0 : i32, i32
  }
  func.func @transform_7(%arg0: i32) -> (i32, i32) {
    %c0_i32 = arith.constant 0 : i32
    %c0_i32_0 = arith.constant 0 : i32
    %c0_i32_1 = arith.constant 0 : i32
    return %c0_i32, %c0_i32_0 : i32, i32
  }
  func.func @transform_8(%arg0: i32) -> (i32, i32) {
    %c0_i32 = arith.constant 0 : i32
    %c0_i32_0 = arith.constant 0 : i32
    %c0_i32_1 = arith.constant 0 : i32
    return %c0_i32, %c0_i32_0 : i32, i32
  }
  func.func @transform_9(%arg0: i32) -> (i32, i32) {
    %c0_i32 = arith.constant 0 : i32
    %c0_i32_0 = arith.constant 0 : i32
    %c0_i32_1 = arith.constant 0 : i32
    return %c0_i32, %c0_i32_0 : i32, i32
  }
  func.func @transform_10(%arg0: i32) -> (i32, i32) {
    %c0_i32 = arith.constant 0 : i32
    %c0_i32_0 = arith.constant 0 : i32
    %c0_i32_1 = arith.constant 0 : i32
    return %c0_i32, %c0_i32_0 : i32, i32
  }
  func.func @transform_11(%arg0: i32) -> (i32, i32) {
    %c0_i32 = arith.constant 0 : i32
    %c0_i32_0 = arith.constant 0 : i32
    %c0_i32_1 = arith.constant 0 : i32
    return %c0_i32, %c0_i32_0 : i32, i32
  }
}

</mosaic_0001>

<bundles_post_ra>
// kernel: _forward_logits.1
= control target key start
LH: loop header
LB: loop body
LE: loop exit
PB: predicated region body
PF: predicated region fallthrough
CT: control target
= control target key end

     0   :  { %16 = vsyncpa [#allocation6], 0  ;;  %v21695_v1 = vmov 0.0   ;;  %vm17449_vm0 = vmmov 0   ;;  %s21683_s0 = inlined_call_operand.vmem [shape: bf16[1568,128], index: 0, kind: input, shape index: {}]   ;;  %s21684_s1 = inlined_call_operand.vmem [shape: bf16[128,128], index: 1, kind: input, shape index: {}]   ;;  %s21685_s2 = inlined_call_operand.vmem [shape: f32[1,128], index: 2, kind: input, shape index: {}]   ;;  %s21686_s3 = inlined_call_operand.vmem [shape: bf16[25,128,128], index: 3, kind: input, shape index: {}]   ;;  %s21687_s4 = inlined_call_operand.vmem [shape: f32[1,128], index: 4, kind: input, shape index: {}]   ;;  %s21688_s5 = inlined_call_operand.vmem [shape: bf16[25,128,256], index: 5, kind: input, shape index: {}]   ;;  %s21689_s6 = inlined_call_operand.vmem [shape: f32[1,256], index: 6, kind: input, shape index: {}]   ;;  %s21690_s7 = inlined_call_operand.vmem [shape: bf16[256,128], index: 7, kind: input, shape index: {}]   ;;  %s21691_s8 = inlined_call_operand.vmem [shape: f32[1,128], index: 8, kind: input, shape index: {}]   ;;  %s21692_s9 = inlined_call_operand.vmem [shape: bf16[128,128], index: 9, kind: input, shape index: {}]   ;;  %s21693_s10 = inlined_call_operand.vmem [shape: f32[1,128], index: 10, kind: input, shape index: {}]   ;;  %s21694_s11 = inlined_call_operand.hbm [shape: f32[2,128], index: 11, kind: output, shape index: {}]  }
   0x1   :  { %v16276_v0 = vld [vmem:[%s21684_s1 + $0x38] sm:$0xff]   ;;  %14768 = vmatprep.subr.bf16.mxu0 %v21695_v1  ;;  %14884 = vmatprep.subr.bf16.mxu1 %v21695_v1  ;;  %v16277_v2 = vld [vmem:[%s21684_s1 + $0x30] sm:$0xff]   ;;  %v16278_v3 = vld [vmem:[%s21684_s1 + $0x28] sm:$0xff]  }
   0x2   :  { %14769 = vmatpush3.bf16.msra.mxu0 %v16276_v0  ;;  %14885 = vmatpush3.bf16.msra.mxu1 %v16276_v0  ;;  %v16279_v4 = vld [vmem:[%s21684_s1 + $0x20] sm:$0xff]   ;;  %v16280_v5 = vld [vmem:[%s21684_s1 + $0x18] sm:$0xff]   ;;  %v16281_v6 = vld [vmem:[%s21684_s1 + $0x10] sm:$0xff]  }
   0x3   :  { %14770 = vmatprep.subr.bf16.mxu0 %v21695_v1  ;;  %14886 = vmatprep.subr.bf16.mxu1 %v21695_v1  ;;  %v16282_v7 = vld [vmem:[%s21684_s1 + $0x8] sm:$0xff]   ;;  %v16283_v8 = vld [vmem:[%s21684_s1] sm:$0xff]   ;;  %v16288_v13 = vld [vmem:[%s21683_s0 + $0x10] sm:$0xff]  }
   0x4   :  { %14784 = vmatprep.mubr.msk.bf16.mxu0 %vm17449_vm0, %v21695_v1  ;;  %14900 = vmatprep.mubr.msk.bf16.mxu1 %vm17449_vm0, %v21695_v1  ;;  %v16284_v9 = vld [vmem:[%s21683_s0] sm:$0xff]   ;;  %v16286_v11 = vld [vmem:[%s21683_s0 + $0x8] sm:$0xff]   ;;  %v16289_v14 = vld [vmem:[%s21683_s0 + $0xd4] sm:$0xff]  }
   0x5   :  { %v16285_v10 = vld [vmem:[%s21683_s0 + $0xc4] sm:$0xff]   ;;  %v16287_v12 = vld [vmem:[%s21683_s0 + $0xcc] sm:$0xff]   ;;  %v16290_v15 = vld [vmem:[%s21683_s0 + $0x18] sm:$0xff]  }
   0x6   :  { %14771 = vmatpush3.bf16.msra.mxu0 %v16277_v2  ;;  %14887 = vmatpush3.bf16.msra.mxu1 %v16277_v2  ;;  %v16291_v16 = vld [vmem:[%s21683_s0 + $0xdc] sm:$0xff]   ;;  %v16293_v18 = vld [vmem:[%s21683_s0 + $0xe4] sm:$0xff]   ;;  %v16295_v20 = vld [vmem:[%s21683_s0 + $0xec] sm:$0xff]  }
   0x7   :  { %14772 = vmatprep.subr.bf16.mxu0 %v21695_v1  ;;  %14888 = vmatprep.subr.bf16.mxu1 %v21695_v1  ;;  %v16292_v17 = vld [vmem:[%s21683_s0 + $0x20] sm:$0xff]   ;;  %v16294_v19 = vld [vmem:[%s21683_s0 + $0x28] sm:$0xff]   ;;  %v16296_v21 = vld [vmem:[%s21683_s0 + $0x30] sm:$0xff]  }
   0x8   :  { %v16297_v22 = vld [vmem:[%s21683_s0 + $0xf4] sm:$0xff]   ;;  %v16299_v24 = vld [vmem:[%s21683_s0 + $0xfc] sm:$0xff]   ;;  %v16301_v26 = vld [vmem:[%s21683_s0 + $0x104] sm:$0xff]  }
   0x9   :  { %v16298_v23 = vld [vmem:[%s21683_s0 + $0x38] sm:$0xff]   ;;  %v16300_v25 = vld [vmem:[%s21683_s0 + $0x40] sm:$0xff]   ;;  %v16302_v27 = vld [vmem:[%s21683_s0 + $0x48] sm:$0xff]  }
   0xa   :  { %14773 = vmatpush3.bf16.msra.mxu0 %v16278_v3  ;;  %14889 = vmatpush3.bf16.msra.mxu1 %v16278_v3  ;;  %v16303_v28 = vld [vmem:[%s21683_s0 + $0x10c] sm:$0xff]   ;;  %v16305_v30 = vld [vmem:[%s21683_s0 + $0x114] sm:$0xff]   ;;  %v16307_v32 = vld [vmem:[%s21683_s0 + $0x11c] sm:$0xff]  }
   0xb   :  { %14774 = vmatprep.subr.bf16.mxu0 %v21695_v1  ;;  %14890 = vmatprep.subr.bf16.mxu1 %v21695_v1  ;;  %v16304_v29 = vld [vmem:[%s21683_s0 + $0x50] sm:$0xff]   ;;  %v16306_v31 = vld [vmem:[%s21683_s0 + $0x58] sm:$0xff]   ;;  %v16308_v33 = vld [vmem:[%s21683_s0 + $0x60] sm:$0xff]  }
   0xc   :  { %v16309_v34 = vld [vmem:[%s21683_s0 + $0x124] sm:$0xff]   ;;  %v16311_v36 = vld [vmem:[%s21683_s0 + $0x12c] sm:$0xff]   ;;  %v16313_v38 = vld [vmem:[%s21683_s0 + $0x134] sm:$0xff]  }
   0xd   :  { %v16310_v35 = vld [vmem:[%s21683_s0 + $0x68] sm:$0xff]   ;;  %v16312_v37 = vld [vmem:[%s21683_s0 + $0x70] sm:$0xff]   ;;  %v16314_v39 = vld [vmem:[%s21683_s0 + $0x78] sm:$0xff]  }
   0xe   :  { %14775 = vmatpush3.bf16.msra.mxu0 %v16279_v4  ;;  %14891 = vmatpush3.bf16.msra.mxu1 %v16279_v4  ;;  %v16315_v40 = vld [vmem:[%s21683_s0 + $0x13c] sm:$0xff]   ;;  %v16317_v42 = vld [vmem:[%s21683_s0 + $0x144] sm:$0xff]   ;;  %v16319_v44 = vld [vmem:[%s21683_s0 + $0x14c] sm:$0xff]  }
   0xf   :  { %14776 = vmatprep.subr.bf16.mxu0 %v21695_v1  ;;  %14892 = vmatprep.subr.bf16.mxu1 %v21695_v1  ;;  %v16316_v41 = vld [vmem:[%s21683_s0 + $0x80] sm:$0xff]   ;;  %v16318_v43 = vld [vmem:[%s21683_s0 + $0x88] sm:$0xff]   ;;  %v16320_v45 = vld [vmem:[%s21683_s0 + $0x90] sm:$0xff]  }
  0x10   :  { %v16321_v46 = vld [vmem:[%s21683_s0 + $0x154] sm:$0xff]   ;;  %v16323_v48 = vld [vmem:[%s21683_s0 + $0x15c] sm:$0xff]   ;;  %v16325_v50 = vld [vmem:[%s21683_s0 + $0x164] sm:$0xff]  }
  0x11   :  { %v16322_v47 = vld [vmem:[%s21683_s0 + $0x98] sm:$0xff]   ;;  %v16324_v49 = vld [vmem:[%s21683_s0 + $0xa0] sm:$0xff]   ;;  %v16326_v51 = vld [vmem:[%s21683_s0 + $0xa8] sm:$0xff]  }
  0x12   :  { %14777 = vmatpush3.bf16.msra.mxu0 %v16280_v5  ;;  %14893 = vmatpush3.bf16.msra.mxu1 %v16280_v5  ;;  %v16327_v52 = vld [vmem:[%s21683_s0 + $0x16c] sm:$0xff]   ;;  %v16329_v54 = vld [vmem:[%s21683_s0 + $0x174] sm:$0xff]   ;;  %v16331_v56 = vld [vmem:[%s21683_s0 + $0x17c] sm:$0xff]  }
  0x13   :  { %14778 = vmatprep.subr.bf16.mxu0 %v21695_v1  ;;  %14894 = vmatprep.subr.bf16.mxu1 %v21695_v1  ;;  %v16328_v53 = vld [vmem:[%s21683_s0 + $0xb0] sm:$0xff]   ;;  %v16330_v55 = vld [vmem:[%s21683_s0 + $0xb8] sm:$0xff]   ;;  %v16332_v57 = vld [vmem:[%s21683_s0 + $0xc0] ss:$0 sps:$4 sm:$0xff]  }
  0x14   :  { %v16333_v58 = vld [vmem:[%s21683_s0 + $0x184] ss:$0 sps:$4 sm:$0xff]   ;;  %v17825_v59 = vld [vmem:[%s21685_s2] ss:$0 sm:$0xff] }
  0x16   :  { %14779 = vmatpush3.bf16.msra.mxu0 %v16281_v6  ;;  %14895 = vmatpush3.bf16.msra.mxu1 %v16281_v6 }
  0x17   :  { %14780 = vmatprep.subr.bf16.mxu0 %v21695_v1  ;;  %14896 = vmatprep.subr.bf16.mxu1 %v21695_v1 }
  0x1a   :  { %14781 = vmatpush3.bf16.msra.mxu0 %v16282_v7  ;;  %14897 = vmatpush3.bf16.msra.mxu1 %v16282_v7 }
  0x1b   :  { %14782 = vmatprep.subr.bf16.mxu0 %v21695_v1  ;;  %14898 = vmatprep.subr.bf16.mxu1 %v21695_v1 }
  0x1e   :  { %14783 = vmatpush3.bf16.msra.mxu0 %v16283_v8  ;;  %14899 = vmatpush3.bf16.msra.mxu1 %v16283_v8 }
  0x1f   :  { %15000 = vmatprep.subr.bf16.mxu0 %v21695_v1  ;;  %15116 = vmatprep.subr.bf16.mxu1 %v21695_v1 }
  0x21   :  { %14785 = vmatmul.mubr.bf16.vlgmr.msra.gmra.mxu0 %v16284_v9  ;;  %14901 = vmatmul.mubr.bf16.vlgmr.msra.gmra.mxu1 %v16285_v10 }
  0x22   :  { %15001 = vmatpush3.bf16.msra.mxu0 %v16276_v0  ;;  %15117 = vmatpush3.bf16.msra.mxu1 %v16276_v0 }
  0x23   :  { %14788 = vmatprep.mubr.msk.bf16.mxu0 %vm17449_vm0, %v21695_v1  ;;  %14904 = vmatprep.mubr.msk.bf16.mxu1 %vm17449_vm0, %v21695_v1 }
  0x24   :  { %15002 = vmatprep.subr.bf16.mxu0 %v21695_v1  ;;  %15118 = vmatprep.subr.bf16.mxu1 %v21695_v1 }
  0x26   :  { %15003 = vmatpush3.bf16.msra.mxu0 %v16277_v2  ;;  %15119 = vmatpush3.bf16.msra.mxu1 %v16277_v2 }
  0x27   :  { %15004 = vmatprep.subr.bf16.mxu0 %v21695_v1  ;;  %15120 = vmatprep.subr.bf16.mxu1 %v21695_v1 }
  0x29   :  { %14789 = vmatmul.mubr.bf16.gmra.mxu0 %v16286_v11  ;;  %14905 = vmatmul.mubr.bf16.gmra.mxu1 %v16287_v12 }
  0x2a   :  { %14792 = vmatprep.mubr.msk.bf16.mxu0 %vm17449_vm0, %v21695_v1  ;;  %14908 = vmatprep.mubr.msk.bf16.mxu1 %vm17449_vm0, %v21695_v1 }
  0x2b   :  { %15005 = vmatpush3.bf16.msra.mxu0 %v16278_v3  ;;  %15121 = vmatpush3.bf16.msra.mxu1 %v16278_v3 }
  0x2c   :  { %15006 = vmatprep.subr.bf16.mxu0 %v21695_v1  ;;  %15122 = vmatprep.subr.bf16.mxu1 %v21695_v1 }
  0x2f   :  { %15007 = vmatpush3.bf16.msra.mxu0 %v16279_v4  ;;  %15123 = vmatpush3.bf16.msra.mxu1 %v16279_v4 }
  0x30   :  { %15008 = vmatprep.subr.bf16.mxu0 %v21695_v1  ;;  %15124 = vmatprep.subr.bf16.mxu1 %v21695_v1 }
  0x31   :  { %14793 = vmatmul.mubr.bf16.gmra.mxu0 %v16288_v13  ;;  %14909 = vmatmul.mubr.bf16.gmra.mxu1 %v16289_v14 }
  0x32   :  { %14796 = vmatprep.mubr.msk.bf16.mxu0 %vm17449_vm0, %v21695_v1  ;;  %14912 = vmatprep.mubr.msk.bf16.mxu1 %vm17449_vm0, %v21695_v1 }
  0x33   :  { %15009 = vmatpush3.bf16.msra.mxu0 %v16280_v5  ;;  %15125 = vmatpush3.bf16.msra.mxu1 %v16280_v5 }
  0x34   :  { %15010 = vmatprep.subr.bf16.mxu0 %v21695_v1  ;;  %15126 = vmatprep.subr.bf16.mxu1 %v21695_v1 }
  0x37   :  { %15011 = vmatpush3.bf16.msra.mxu0 %v16281_v6  ;;  %15127 = vmatpush3.bf16.msra.mxu1 %v16281_v6 }
  0x38   :  { %15012 = vmatprep.subr.bf16.mxu0 %v21695_v1  ;;  %15128 = vmatprep.subr.bf16.mxu1 %v21695_v1 }
  0x39   :  { %14797 = vmatmul.mubr.bf16.gmra.mxu0 %v16290_v15  ;;  %14913 = vmatmul.mubr.bf16.gmra.mxu1 %v16291_v16 }
  0x3a   :  { %14800 = vmatprep.mubr.msk.bf16.mxu0 %vm17449_vm0, %v21695_v1  ;;  %14916 = vmatprep.mubr.msk.bf16.mxu1 %vm17449_vm0, %v21695_v1 }
  0x3b   :  { %15013 = vmatpush3.bf16.msra.mxu0 %v16282_v7  ;;  %15129 = vmatpush3.bf16.msra.mxu1 %v16282_v7  ;;  %v16334_v7 = vld [vmem:[%s21683_s0 + $0x188] sm:$0xff]  }
  0x3c   :  { %15014 = vmatprep.subr.bf16.mxu0 %v21695_v1  ;;  %15130 = vmatprep.subr.bf16.mxu1 %v21695_v1 }
  0x3f   :  { %15015 = vmatpush3.bf16.msra.mxu0 %v16283_v8  ;;  %15131 = vmatpush3.bf16.msra.mxu1 %v16283_v8  ;;  %v16335_v8 = vld [vmem:[%s21683_s0 + $0x24c] sm:$0xff]  }
  0x41   :  { %14801 = vmatmul.mubr.bf16.gmra.mxu0 %v16292_v17  ;;  %14917 = vmatmul.mubr.bf16.gmra.mxu1 %v16293_v18 }
  0x42   :  { %14804 = vmatprep.mubr.msk.bf16.mxu0 %vm17449_vm0, %v21695_v1  ;;  %14920 = vmatprep.mubr.msk.bf16.mxu1 %vm17449_vm0, %v21695_v1 }
  0x49   :  { %14805 = vmatmul.mubr.bf16.gmra.mxu0 %v16294_v19  ;;  %14921 = vmatmul.mubr.bf16.gmra.mxu1 %v16295_v20 }
  0x4a   :  { %14808 = vmatprep.mubr.msk.bf16.mxu0 %vm17449_vm0, %v21695_v1  ;;  %14924 = vmatprep.mubr.msk.bf16.mxu1 %vm17449_vm0, %v21695_v1 }
  0x51   :  { %14809 = vmatmul.mubr.bf16.gmra.mxu0 %v16296_v21  ;;  %14925 = vmatmul.mubr.bf16.gmra.mxu1 %v16297_v22 }
  0x52   :  { %14812 = vmatprep.mubr.msk.bf16.mxu0 %vm17449_vm0, %v21695_v1  ;;  %14928 = vmatprep.mubr.msk.bf16.mxu1 %vm17449_vm0, %v21695_v1 }
  0x59   :  { %14813 = vmatmul.mubr.bf16.gmra.mxu0 %v16298_v23  ;;  %14929 = vmatmul.mubr.bf16.gmra.mxu1 %v16299_v24 }
  0x5a   :  { %14816 = vmatprep.mubr.msk.bf16.mxu0 %vm17449_vm0, %v21695_v1  ;;  %14932 = vmatprep.mubr.msk.bf16.mxu1 %vm17449_vm0, %v21695_v1 }
  0x61   :  { %14817 = vmatmul.mubr.bf16.gmra.mxu0 %v16300_v25  ;;  %14933 = vmatmul.mubr.bf16.gmra.mxu1 %v16301_v26 }
  0x62   :  { %14820 = vmatprep.mubr.msk.bf16.mxu0 %vm17449_vm0, %v21695_v1  ;;  %14936 = vmatprep.mubr.msk.bf16.mxu1 %vm17449_vm0, %v21695_v1 }
  0x69   :  { %14821 = vmatmul.mubr.bf16.gmra.mxu0 %v16302_v27  ;;  %14937 = vmatmul.mubr.bf16.gmra.mxu1 %v16303_v28  ;;  %v16336_v27 = vld [vmem:[%s21683_s0 + $0x190] sm:$0xff]  }
  0x6a   :  { %14824 = vmatprep.mubr.msk.bf16.mxu0 %vm17449_vm0, %v21695_v1  ;;  %14940 = vmatprep.mubr.msk.bf16.mxu1 %vm17449_vm0, %v21695_v1  ;;  %v16337_v28 = vld [vmem:[%s21683_s0 + $0x254] sm:$0xff]  }
  0x71   :  { %14825 = vmatmul.mubr.bf16.gmra.mxu0 %v16304_v29  ;;  %14941 = vmatmul.mubr.bf16.gmra.mxu1 %v16305_v30 }
  0x72   :  { %14828 = vmatprep.mubr.msk.bf16.mxu0 %vm17449_vm0, %v21695_v1  ;;  %14944 = vmatprep.mubr.msk.bf16.mxu1 %vm17449_vm0, %v21695_v1 }
  0x79   :  { %14829 = vmatmul.mubr.bf16.gmra.mxu0 %v16306_v31  ;;  %14945 = vmatmul.mubr.bf16.gmra.mxu1 %v16307_v32 }
  0x7a   :  { %14832 = vmatprep.mubr.msk.bf16.mxu0 %vm17449_vm0, %v21695_v1  ;;  %14948 = vmatprep.mubr.msk.bf16.mxu1 %vm17449_vm0, %v21695_v1 }
  0x81   :  { %14833 = vmatmul.mubr.bf16.gmra.mxu0 %v16308_v33  ;;  %14949 = vmatmul.mubr.bf16.gmra.mxu1 %v16309_v34 }
  0x82   :  { %14836 = vmatprep.mubr.msk.bf16.mxu0 %vm17449_vm0, %v21695_v1  ;;  %14952 = vmatprep.mubr.msk.bf16.mxu1 %vm17449_vm0, %v21695_v1 }
  0x89   :  { %14837 = vmatmul.mubr.bf16.gmra.mxu0 %v16310_v35  ;;  %14953 = vmatmul.mubr.bf16.gmra.mxu1 %v16311_v36 }
  0x8a   :  { %14840 = vmatprep.mubr.msk.bf16.mxu0 %vm17449_vm0, %v21695_v1  ;;  %14956 = vmatprep.mubr.msk.bf16.mxu1 %vm17449_vm0, %v21695_v1 }
  0x91   :  { %14841 = vmatmul.mubr.bf16.gmra.mxu0 %v16312_v37  ;;  %14957 = vmatmul.mubr.bf16.gmra.mxu1 %v16313_v38 }
  0x92   :  { %14844 = vmatprep.mubr.msk.bf16.mxu0 %vm17449_vm0, %v21695_v1  ;;  %14960 = vmatprep.mubr.msk.bf16.mxu1 %vm17449_vm0, %v21695_v1 }
  0x99   :  { %14845 = vmatmul.mubr.bf16.gmra.mxu0 %v16314_v39  ;;  %14961 = vmatmul.mubr.bf16.gmra.mxu1 %v16315_v40 }
  0x9a   :  { %14848 = vmatprep.mubr.msk.bf16.mxu0 %vm17449_vm0, %v21695_v1  ;;  %14964 = vmatprep.mubr.msk.bf16.mxu1 %vm17449_vm0, %v21695_v1 }
  0xa1   :  { %14849 = vmatmul.mubr.bf16.gmra.mxu0 %v16316_v41  ;;  %14965 = vmatmul.mubr.bf16.gmra.mxu1 %v16317_v42 }
  0xa2   :  { %14852 = vmatprep.mubr.msk.bf16.mxu0 %vm17449_vm0, %v21695_v1  ;;  %14968 = vmatprep.mubr.msk.bf16.mxu1 %vm17449_vm0, %v21695_v1 }
  0xa9   :  { %14853 = vmatmul.mubr.bf16.gmra.mxu0 %v16318_v43  ;;  %14969 = vmatmul.mubr.bf16.gmra.mxu1 %v16319_v44 }
  0xaa   :  { %14856 = vmatprep.mubr.msk.bf16.mxu0 %vm17449_vm0, %v21695_v1  ;;  %14972 = vmatprep.mubr.msk.bf16.mxu1 %vm17449_vm0, %v21695_v1 }
  0xb1   :  { %14857 = vmatmul.mubr.bf16.gmra.mxu0 %v16320_v45  ;;  %14973 = vmatmul.mubr.bf16.gmra.mxu1 %v16321_v46 }
  0xb2   :  { %14860 = vmatprep.mubr.msk.bf16.mxu0 %vm17449_vm0, %v21695_v1  ;;  %14976 = vmatprep.mubr.msk.bf16.mxu1 %vm17449_vm0, %v21695_v1 }
  0xb9   :  { %14861 = vmatmul.mubr.bf16.gmra.mxu0 %v16322_v47  ;;  %14977 = vmatmul.mubr.bf16.gmra.mxu1 %v16323_v48  ;;  %v16338_v47 = vld [vmem:[%s21683_s0 + $0x198] sm:$0xff]  }
  0xba   :  { %14864 = vmatprep.mubr.msk.bf16.mxu0 %vm17449_vm0, %v21695_v1  ;;  %14980 = vmatprep.mubr.msk.bf16.mxu1 %vm17449_vm0, %v21695_v1  ;;  %v16339_v48 = vld [vmem:[%s21683_s0 + $0x25c] sm:$0xff]  }
  0xc1   :  { %14865 = vmatmul.mubr.bf16.gmra.mxu0 %v16324_v49  ;;  %14981 = vmatmul.mubr.bf16.gmra.mxu1 %v16325_v50 }
  0xc2   :  { %14868 = vmatprep.mubr.msk.bf16.mxu0 %vm17449_vm0, %v21695_v1  ;;  %14984 = vmatprep.mubr.msk.bf16.mxu1 %vm17449_vm0, %v21695_v1 }
  0xc9   :  { %14869 = vmatmul.mubr.bf16.gmra.mxu0 %v16326_v51  ;;  %14985 = vmatmul.mubr.bf16.gmra.mxu1 %v16327_v52 }
  0xca   :  { %14872 = vmatprep.mubr.msk.bf16.mxu0 %vm17449_vm0, %v21695_v1  ;;  %14988 = vmatprep.mubr.msk.bf16.mxu1 %vm17449_vm0, %v21695_v1 }
  0xd1   :  { %14873 = vmatmul.mubr.bf16.gmra.mxu0 %v16328_v53  ;;  %14989 = vmatmul.mubr.bf16.gmra.mxu1 %v16329_v54 }
  0xd2   :  { %14876 = vmatprep.mubr.msk.bf16.mxu0 %vm17449_vm0, %v21695_v1  ;;  %14992 = vmatprep.mubr.msk.bf16.mxu1 %vm17449_vm0, %v21695_v1 }
  0xd9   :  { %14877 = vmatmul.mubr.bf16.gmra.mxu0 %v16330_v55  ;;  %14993 = vmatmul.mubr.bf16.gmra.mxu1 %v16331_v56 }
  0xda   :  { %14880 = vmatprep.mubr.msk.bf16.mxu0 %vm17449_vm0, %v21695_v1  ;;  %14996 = vmatprep.mubr.msk.bf16.mxu1 %vm17449_vm0, %v21695_v1 }
  0xe1   :  { %v342_v60 = vpop.f32.mrf.mxu0  ;;  %14881 = vmatmul.mubr.bf16.gmra.mxu0 %v16332_v57  ;;  %v820_v61 = vpop.f32.mrf.mxu1  ;;  %14997 = vmatmul.mubr.bf16.gmra.mxu1 %v16333_v58 }
  0xe2   :  { %v343_v62 = vadd.f32 %v17825_v59, %v342_v60  ;;  %v821_v63 = vadd.f32 %v17825_v59, %v820_v61  ;;  %15016 = vmatprep.mubr.msk.bf16.mxu0 %vm17449_vm0, %v21695_v1  ;;  %15132 = vmatprep.mubr.msk.bf16.mxu1 %vm17449_vm0, %v21695_v1 }
  0xe3   :  { %v14786_v0 = vpop.f32.mrf.mxu0  ;;  %v14902_v2 = vpop.f32.mrf.mxu1 }
  0xe4   :  { %v540_v3 = vmax.f32 %v343_v62, 0.0  ;;  %v1018_v4 = vmax.f32 %v821_v63, 0.0 }
  0xe5   :  { %v345_v5 = vpop.f32.mrf.mxu0  ;;  %v823_v6 = vpop.f32.mrf.mxu1 }
  0xe6   :  { %v17839_v9 = vmax.f32 %v540_v3, %v1018_v4  ;;  %v346_v10 = vadd.f32 %v17825_v59, %v345_v5  ;;  %v824_v11 = vadd.f32 %v17825_v59, %v823_v6  ;;  %v16340_v5 = vld [vmem:[%s21683_s0 + $0x1a0] sm:$0xff]  }
  0xe7   :  { %v14787_v12 = vpop.f32.mrf.mxu0  ;;  %v14903_v13 = vpop.f32.mrf.mxu1  ;;  %v16341_v6 = vld [vmem:[%s21683_s0 + $0x264] sm:$0xff]  }
  0xe8   :  { %v541_v14 = vmax.f32 %v346_v10, 0.0  ;;  %v1019_v15 = vmax.f32 %v824_v11, 0.0 }
  0xe9   :  { %v350_v16 = vpop.f32.mrf.mxu0  ;;  %v828_v17 = vpop.f32.mrf.mxu1  ;;  %15017 = vmatmul.mubr.bf16.vlgmr.msra.gmra.mxu0 %v16334_v7  ;;  %15133 = vmatmul.mubr.bf16.vlgmr.msra.gmra.mxu1 %v16335_v8 }
  0xea   :  { %v17843_v18 = vmax.f32 %v541_v14, %v1019_v15  ;;  %v351_v19 = vadd.f32 %v17825_v59, %v350_v16  ;;  %v829_v20 = vadd.f32 %v17825_v59, %v828_v17  ;;  %15020 = vmatprep.mubr.msk.bf16.mxu0 %vm17449_vm0, %v21695_v1  ;;  %15136 = vmatprep.mubr.msk.bf16.mxu1 %vm17449_vm0, %v21695_v1 }
  0xeb   :  { %v14790_v21 = vpop.f32.mrf.mxu0  ;;  %v14906_v22 = vpop.f32.mrf.mxu1 }
  0xec   :  { %v542_v23 = vmax.f32 %v351_v19, 0.0  ;;  %v1020_v24 = vmax.f32 %v829_v20, 0.0 }
  0xed   :  { %v353_v25 = vpop.f32.mrf.mxu0  ;;  %v831_v26 = vpop.f32.mrf.mxu1 }
  0xee   :  { %v17857_v29 = vmax.f32 %v542_v23, %v1020_v24  ;;  %v354_v30 = vadd.f32 %v17825_v59, %v353_v25  ;;  %v832_v31 = vadd.f32 %v17825_v59, %v831_v26 }
  0xef   :  { %v14791_v32 = vpop.f32.mrf.mxu0  ;;  %v14907_v33 = vpop.f32.mrf.mxu1 }
  0xf0   :  { %v543_v34 = vmax.f32 %v354_v30, 0.0  ;;  %v1021_v35 = vmax.f32 %v832_v31, 0.0 }
  0xf1   :  { %v358_v36 = vpop.f32.mrf.mxu0  ;;  %v836_v37 = vpop.f32.mrf.mxu1  ;;  %15021 = vmatmul.mubr.bf16.gmra.mxu0 %v16336_v27  ;;  %15137 = vmatmul.mubr.bf16.gmra.mxu1 %v16337_v28  ;;  %v16342_v27 = vld [vmem:[%s21683_s0 + $0x1a8] sm:$0xff]  }
  0xf2   :  { %v17861_v38 = vmax.f32 %v543_v34, %v1021_v35  ;;  %v359_v39 = vadd.f32 %v17825_v59, %v358_v36  ;;  %v837_v40 = vadd.f32 %v17825_v59, %v836_v37  ;;  %15024 = vmatprep.mubr.msk.bf16.mxu0 %vm17449_vm0, %v21695_v1  ;;  %15140 = vmatprep.mubr.msk.bf16.mxu1 %vm17449_vm0, %v21695_v1  ;;  %v16343_v28 = vld [vmem:[%s21683_s0 + $0x26c] sm:$0xff]  }
  0xf3   :  { %v14794_v41 = vpop.f32.mrf.mxu0  ;;  %v14910_v42 = vpop.f32.mrf.mxu1 }
  0xf4   :  { %v544_v43 = vmax.f32 %v359_v39, 0.0  ;;  %v1022_v44 = vmax.f32 %v837_v40, 0.0 }
  0xf5   :  { %v361_v45 = vpop.f32.mrf.mxu0  ;;  %v839_v46 = vpop.f32.mrf.mxu1 }
  0xf6   :  { %v17875_v49 = vmax.f32 %v544_v43, %v1022_v44  ;;  %v362_v50 = vadd.f32 %v17825_v59, %v361_v45  ;;  %v840_v51 = vadd.f32 %v17825_v59, %v839_v46 }
  0xf7   :  { %v14795_v52 = vpop.f32.mrf.mxu0  ;;  %v14911_v53 = vpop.f32.mrf.mxu1 }
  0xf8   :  { %v545_v54 = vmax.f32 %v362_v50, 0.0  ;;  %v1023_v55 = vmax.f32 %v840_v51, 0.0  ;;  %v16344_v50 = vld [vmem:[%s21683_s0 + $0x1b0] sm:$0xff]  }
  0xf9   :  { %v366_v56 = vpop.f32.mrf.mxu0  ;;  %v844_v57 = vpop.f32.mrf.mxu1  ;;  %15025 = vmatmul.mubr.bf16.gmra.mxu0 %v16338_v47  ;;  %15141 = vmatmul.mubr.bf16.gmra.mxu1 %v16339_v48  ;;  %v16345_v51 = vld [vmem:[%s21683_s0 + $0x274] sm:$0xff]  }
  0xfa   :  { %v17879_v58 = vmax.f32 %v545_v54, %v1023_v55  ;;  %v367_v60 = vadd.f32 %v17825_v59, %v366_v56  ;;  %v845_v61 = vadd.f32 %v17825_v59, %v844_v57  ;;  %15028 = vmatprep.mubr.msk.bf16.mxu0 %vm17449_vm0, %v21695_v1  ;;  %15144 = vmatprep.mubr.msk.bf16.mxu1 %vm17449_vm0, %v21695_v1 }
  0xfb   :  { %v14798_v62 = vpop.f32.mrf.mxu0  ;;  %v14914_v63 = vpop.f32.mrf.mxu1 }
  0xfc   :  { %v546_v0 = vmax.f32 %v367_v60, 0.0  ;;  %v1024_v2 = vmax.f32 %v845_v61, 0.0 }
  0xfd   :  { %v369_v3 = vpop.f32.mrf.mxu0  ;;  %v847_v4 = vpop.f32.mrf.mxu1 }
  0xfe   :  { %v17893_v7 = vmax.f32 %v546_v0, %v1024_v2  ;;  %v370_v8 = vadd.f32 %v17825_v59, %v369_v3  ;;  %v848_v10 = vadd.f32 %v17825_v59, %v847_v4 }
  0xff   :  { %v14799_v11 = vpop.f32.mrf.mxu0  ;;  %v14915_v12 = vpop.f32.mrf.mxu1 }
 0x100   :  { %v547_v13 = vmax.f32 %v370_v8, 0.0  ;;  %v1025_v14 = vmax.f32 %v848_v10, 0.0  ;;  %v16346_v11 = vld [vmem:[%s21683_s0 + $0x1b8] sm:$0xff]  }
 0x101   :  { %v374_v15 = vpop.f32.mrf.mxu0  ;;  %v852_v16 = vpop.f32.mrf.mxu1  ;;  %15029 = vmatmul.mubr.bf16.gmra.mxu0 %v16340_v5  ;;  %15145 = vmatmul.mubr.bf16.gmra.mxu1 %v16341_v6  ;;  %v16347_v12 = vld [vmem:[%s21683_s0 + $0x27c] sm:$0xff]  }
 0x102   :  { %v17897_v17 = vmax.f32 %v547_v13, %v1025_v14  ;;  %v375_v19 = vadd.f32 %v17825_v59, %v374_v15  ;;  %v853_v20 = vadd.f32 %v17825_v59, %v852_v16  ;;  %15032 = vmatprep.mubr.msk.bf16.mxu0 %vm17449_vm0, %v21695_v1  ;;  %15148 = vmatprep.mubr.msk.bf16.mxu1 %vm17449_vm0, %v21695_v1 }
 0x103   :  { %v14802_v21 = vpop.f32.mrf.mxu0  ;;  %v14918_v22 = vpop.f32.mrf.mxu1 }
 0x104   :  { %v548_v23 = vmax.f32 %v375_v19, 0.0  ;;  %v1026_v24 = vmax.f32 %v853_v20, 0.0 }
 0x105   :  { %v377_v25 = vpop.f32.mrf.mxu0  ;;  %v855_v26 = vpop.f32.mrf.mxu1 }
 0x106   :  { %v17911_v30 = vmax.f32 %v548_v23, %v1026_v24  ;;  %v378_v31 = vadd.f32 %v17825_v59, %v377_v25  ;;  %v856_v32 = vadd.f32 %v17825_v59, %v855_v26 }
 0x107   :  { %v14803_v33 = vpop.f32.mrf.mxu0  ;;  %v14919_v34 = vpop.f32.mrf.mxu1 }
 0x108   :  { %v549_v35 = vmax.f32 %v378_v31, 0.0  ;;  %v1027_v36 = vmax.f32 %v856_v32, 0.0 }
 0x109   :  { %v382_v37 = vpop.f32.mrf.mxu0  ;;  %v860_v39 = vpop.f32.mrf.mxu1  ;;  %15033 = vmatmul.mubr.bf16.gmra.mxu0 %v16342_v27  ;;  %15149 = vmatmul.mubr.bf16.gmra.mxu1 %v16343_v28 }
 0x10a   :  { %v17915_v40 = vmax.f32 %v549_v35, %v1027_v36  ;;  %v383_v41 = vadd.f32 %v17825_v59, %v382_v37  ;;  %v861_v42 = vadd.f32 %v17825_v59, %v860_v39  ;;  %15036 = vmatprep.mubr.msk.bf16.mxu0 %vm17449_vm0, %v21695_v1  ;;  %15152 = vmatprep.mubr.msk.bf16.mxu1 %vm17449_vm0, %v21695_v1  ;;  %v16348_v35 = vld [vmem:[%s21683_s0 + $0x1c0] sm:$0xff]  }
 0x10b   :  { %v14806_v43 = vpop.f32.mrf.mxu0  ;;  %v14922_v44 = vpop.f32.mrf.mxu1  ;;  %v16349_v36 = vld [vmem:[%s21683_s0 + $0x284] sm:$0xff]  }
 0x10c   :  { %v550_v45 = vmax.f32 %v383_v41, 0.0  ;;  %v1028_v46 = vmax.f32 %v861_v42, 0.0 }
 0x10d   :  { %v385_v47 = vpop.f32.mrf.mxu0  ;;  %v863_v48 = vpop.f32.mrf.mxu1 }
 0x10e   :  { %v17929_v52 = vmax.f32 %v550_v45, %v1028_v46  ;;  %v386_v53 = vadd.f32 %v17825_v59, %v385_v47  ;;  %v864_v54 = vadd.f32 %v17825_v59, %v863_v48 }
 0x10f   :  { %v14807_v55 = vpop.f32.mrf.mxu0  ;;  %v14923_v56 = vpop.f32.mrf.mxu1 }
 0x110   :  { %v551_v57 = vmax.f32 %v386_v53, 0.0  ;;  %v1029_v60 = vmax.f32 %v864_v54, 0.0 }
 0x111   :  { %v390_v61 = vpop.f32.mrf.mxu0  ;;  %v868_v62 = vpop.f32.mrf.mxu1  ;;  %15037 = vmatmul.mubr.bf16.gmra.mxu0 %v16344_v50  ;;  %15153 = vmatmul.mubr.bf16.gmra.mxu1 %v16345_v51 }
 0x112   :  { %v17933_v63 = vmax.f32 %v551_v57, %v1029_v60  ;;  %v391_v0 = vadd.f32 %v17825_v59, %v390_v61  ;;  %v869_v2 = vadd.f32 %v17825_v59, %v868_v62  ;;  %15040 = vmatprep.mubr.msk.bf16.mxu0 %vm17449_vm0, %v21695_v1  ;;  %15156 = vmatprep.mubr.msk.bf16.mxu1 %vm17449_vm0, %v21695_v1  ;;  %v16350_v61 = vld [vmem:[%s21683_s0 + $0x1c8] sm:$0xff]  }
 0x113   :  { %v14810_v3 = vpop.f32.mrf.mxu0  ;;  %v14926_v4 = vpop.f32.mrf.mxu1  ;;  %v16351_v62 = vld [vmem:[%s21683_s0 + $0x28c] sm:$0xff]  }
 0x114   :  { %v552_v5 = vmax.f32 %v391_v0, 0.0  ;;  %v1030_v6 = vmax.f32 %v869_v2, 0.0 }
 0x115   :  { %v393_v8 = vpop.f32.mrf.mxu0  ;;  %v871_v10 = vpop.f32.mrf.mxu1 }
 0x116   :  { %v17947_v13 = vmax.f32 %v552_v5, %v1030_v6  ;;  %v394_v14 = vadd.f32 %v17825_v59, %v393_v8  ;;  %v872_v15 = vadd.f32 %v17825_v59, %v871_v10 }
 0x117   :  { %v14811_v16 = vpop.f32.mrf.mxu0  ;;  %v14927_v19 = vpop.f32.mrf.mxu1 }
 0x118   :  { %v553_v20 = vmax.f32 %v394_v14, 0.0  ;;  %v1031_v21 = vmax.f32 %v872_v15, 0.0 }
 0x119   :  { %v398_v22 = vpop.f32.mrf.mxu0  ;;  %v876_v23 = vpop.f32.mrf.mxu1  ;;  %15041 = vmatmul.mubr.bf16.gmra.mxu0 %v16346_v11  ;;  %15157 = vmatmul.mubr.bf16.gmra.mxu1 %v16347_v12 }
 0x11a   :  { %v17951_v24 = vmax.f32 %v553_v20, %v1031_v21  ;;  %v399_v25 = vadd.f32 %v17825_v59, %v398_v22  ;;  %v877_v26 = vadd.f32 %v17825_v59, %v876_v23  ;;  %15044 = vmatprep.mubr.msk.bf16.mxu0 %vm17449_vm0, %v21695_v1  ;;  %15160 = vmatprep.mubr.msk.bf16.mxu1 %vm17449_vm0, %v21695_v1 }
 0x11b   :  { %v14814_v27 = vpop.f32.mrf.mxu0  ;;  %v14930_v28 = vpop.f32.mrf.mxu1 }
 0x11c   :  { %v554_v31 = vmax.f32 %v399_v25, 0.0  ;;  %v1032_v32 = vmax.f32 %v877_v26, 0.0  ;;  %v16352_v25 = vld [vmem:[%s21683_s0 + $0x1d0] sm:$0xff]  }
 0x11d   :  { %v401_v33 = vpop.f32.mrf.mxu0  ;;  %v879_v34 = vpop.f32.mrf.mxu1  ;;  %v16353_v26 = vld [vmem:[%s21683_s0 + $0x294] sm:$0xff]  }
 0x11e   :  { %v17965_v37 = vmax.f32 %v554_v31, %v1032_v32  ;;  %v402_v39 = vadd.f32 %v17825_v59, %v401_v33  ;;  %v880_v41 = vadd.f32 %v17825_v59, %v879_v34 }
 0x11f   :  { %v14815_v42 = vpop.f32.mrf.mxu0  ;;  %v14931_v43 = vpop.f32.mrf.mxu1 }
 0x120   :  { %v555_v44 = vmax.f32 %v402_v39, 0.0  ;;  %v1033_v45 = vmax.f32 %v880_v41, 0.0 }
 0x121   :  { %v406_v46 = vpop.f32.mrf.mxu0  ;;  %v884_v47 = vpop.f32.mrf.mxu1  ;;  %15045 = vmatmul.mubr.bf16.gmra.mxu0 %v16348_v35  ;;  %15161 = vmatmul.mubr.bf16.gmra.mxu1 %v16349_v36 }
 0x122   :  { %v17969_v48 = vmax.f32 %v555_v44, %v1033_v45  ;;  %v407_v50 = vadd.f32 %v17825_v59, %v406_v46  ;;  %v885_v51 = vadd.f32 %v17825_v59, %v884_v47  ;;  %15048 = vmatprep.mubr.msk.bf16.mxu0 %vm17449_vm0, %v21695_v1  ;;  %15164 = vmatprep.mubr.msk.bf16.mxu1 %vm17449_vm0, %v21695_v1 }
 0x123   :  { %v14818_v53 = vpop.f32.mrf.mxu0  ;;  %v14934_v54 = vpop.f32.mrf.mxu1 }
 0x124   :  { %v556_v55 = vmax.f32 %v407_v50, 0.0  ;;  %v1034_v56 = vmax.f32 %v885_v51, 0.0  ;;  %v16354_v53 = vld [vmem:[%s21683_s0 + $0x1d8] sm:$0xff]  }
 0x125   :  { %v409_v57 = vpop.f32.mrf.mxu0  ;;  %v887_v60 = vpop.f32.mrf.mxu1  ;;  %v16355_v54 = vld [vmem:[%s21683_s0 + $0x29c] sm:$0xff]  }
 0x126   :  { %v17983_v0 = vmax.f32 %v556_v55, %v1034_v56  ;;  %v410_v2 = vadd.f32 %v17825_v59, %v409_v57  ;;  %v888_v3 = vadd.f32 %v17825_v59, %v887_v60 }
 0x127   :  { %v14819_v4 = vpop.f32.mrf.mxu0  ;;  %v14935_v5 = vpop.f32.mrf.mxu1 }
 0x128   :  { %v557_v6 = vmax.f32 %v410_v2, 0.0  ;;  %v1035_v8 = vmax.f32 %v888_v3, 0.0 }
 0x129   :  { %v414_v10 = vpop.f32.mrf.mxu0  ;;  %v892_v11 = vpop.f32.mrf.mxu1  ;;  %15049 = vmatmul.mubr.bf16.gmra.mxu0 %v16350_v61  ;;  %15165 = vmatmul.mubr.bf16.gmra.mxu1 %v16351_v62 }
 0x12a   :  { %v17987_v12 = vmax.f32 %v557_v6, %v1035_v8  ;;  %v415_v14 = vadd.f32 %v17825_v59, %v414_v10  ;;  %v893_v15 = vadd.f32 %v17825_v59, %v892_v11  ;;  %15052 = vmatprep.mubr.msk.bf16.mxu0 %vm17449_vm0, %v21695_v1  ;;  %15168 = vmatprep.mubr.msk.bf16.mxu1 %vm17449_vm0, %v21695_v1 }
 0x12b   :  { %v14822_v16 = vpop.f32.mrf.mxu0  ;;  %v14938_v19 = vpop.f32.mrf.mxu1 }
 0x12c   :  { %v558_v20 = vmax.f32 %v415_v14, 0.0  ;;  %v1036_v21 = vmax.f32 %v893_v15, 0.0 }
 0x12d   :  { %v417_v22 = vpop.f32.mrf.mxu0  ;;  %v895_v23 = vpop.f32.mrf.mxu1 }
 0x12e   :  { %v18001_v27 = vmax.f32 %v558_v20, %v1036_v21  ;;  %v418_v28 = vadd.f32 %v17825_v59, %v417_v22  ;;  %v896_v31 = vadd.f32 %v17825_v59, %v895_v23  ;;  %v16356_v20 = vld [vmem:[%s21683_s0 + $0x1e0] sm:$0xff]  }
 0x12f   :  { %v14823_v32 = vpop.f32.mrf.mxu0  ;;  %v14939_v33 = vpop.f32.mrf.mxu1  ;;  %v16357_v21 = vld [vmem:[%s21683_s0 + $0x2a4] sm:$0xff]  }
 0x130   :  { %v559_v34 = vmax.f32 %v418_v28, 0.0  ;;  %v1037_v35 = vmax.f32 %v896_v31, 0.0 }
 0x131   :  { %v422_v36 = vpop.f32.mrf.mxu0  ;;  %v900_v39 = vpop.f32.mrf.mxu1  ;;  %15053 = vmatmul.mubr.bf16.gmra.mxu0 %v16352_v25  ;;  %15169 = vmatmul.mubr.bf16.gmra.mxu1 %v16353_v26 }
 0x132   :  { %v18005_v41 = vmax.f32 %v559_v34, %v1037_v35  ;;  %v423_v42 = vadd.f32 %v17825_v59, %v422_v36  ;;  %v901_v43 = vadd.f32 %v17825_v59, %v900_v39  ;;  %15056 = vmatprep.mubr.msk.bf16.mxu0 %vm17449_vm0, %v21695_v1  ;;  %15172 = vmatprep.mubr.msk.bf16.mxu1 %vm17449_vm0, %v21695_v1 }
 0x133   :  { %v14826_v44 = vpop.f32.mrf.mxu0  ;;  %v14942_v45 = vpop.f32.mrf.mxu1 }
 0x134   :  { %v560_v46 = vmax.f32 %v423_v42, 0.0  ;;  %v1038_v47 = vmax.f32 %v901_v43, 0.0 }
 0x135   :  { %v425_v50 = vpop.f32.mrf.mxu0  ;;  %v903_v51 = vpop.f32.mrf.mxu1 }
 0x136   :  { %v18019_v55 = vmax.f32 %v560_v46, %v1038_v47  ;;  %v426_v56 = vadd.f32 %v17825_v59, %v425_v50  ;;  %v904_v57 = vadd.f32 %v17825_v59, %v903_v51  ;;  %v16358_v50 = vld [vmem:[%s21683_s0 + $0x1e8] sm:$0xff]  }
 0x137   :  { %v14827_v60 = vpop.f32.mrf.mxu0  ;;  %v14943_v61 = vpop.f32.mrf.mxu1  ;;  %v16359_v51 = vld [vmem:[%s21683_s0 + $0x2ac] sm:$0xff]  }
 0x138   :  { %v561_v62 = vmax.f32 %v426_v56, 0.0  ;;  %v1039_v2 = vmax.f32 %v904_v57, 0.0 }
 0x139   :  { %v430_v3 = vpop.f32.mrf.mxu0  ;;  %v908_v4 = vpop.f32.mrf.mxu1  ;;  %15057 = vmatmul.mubr.bf16.gmra.mxu0 %v16354_v53  ;;  %15173 = vmatmul.mubr.bf16.gmra.mxu1 %v16355_v54 }
 0x13a   :  { %v18023_v5 = vmax.f32 %v561_v62, %v1039_v2  ;;  %v431_v6 = vadd.f32 %v17825_v59, %v430_v3  ;;  %v909_v8 = vadd.f32 %v17825_v59, %v908_v4  ;;  %15060 = vmatprep.mubr.msk.bf16.mxu0 %vm17449_vm0, %v21695_v1  ;;  %15176 = vmatprep.mubr.msk.bf16.mxu1 %vm17449_vm0, %v21695_v1 }
 0x13b   :  { %v14830_v10 = vpop.f32.mrf.mxu0  ;;  %v14946_v11 = vpop.f32.mrf.mxu1 }
 0x13c   :  { %v562_v14 = vmax.f32 %v431_v6, 0.0  ;;  %v1040_v15 = vmax.f32 %v909_v8, 0.0 }
 0x13d   :  { %v433_v16 = vpop.f32.mrf.mxu0  ;;  %v911_v19 = vpop.f32.mrf.mxu1 }
 0x13e   :  { %v18037_v22 = vmax.f32 %v562_v14, %v1040_v15  ;;  %v434_v23 = vadd.f32 %v17825_v59, %v433_v16  ;;  %v912_v25 = vadd.f32 %v17825_v59, %v911_v19 }
 0x13f   :  { %v14831_v26 = vpop.f32.mrf.mxu0  ;;  %v14947_v28 = vpop.f32.mrf.mxu1 }
 0x140   :  { %v563_v31 = vmax.f32 %v434_v23, 0.0  ;;  %v1041_v32 = vmax.f32 %v912_v25, 0.0 }
 0x141   :  { %v438_v33 = vpop.f32.mrf.mxu0  ;;  %v916_v34 = vpop.f32.mrf.mxu1  ;;  %15061 = vmatmul.mubr.bf16.gmra.mxu0 %v16356_v20  ;;  %15177 = vmatmul.mubr.bf16.gmra.mxu1 %v16357_v21  ;;  %v16360_v20 = vld [vmem:[%s21683_s0 + $0x1f0] sm:$0xff]  }
 0x142   :  { %v18041_v35 = vmax.f32 %v563_v31, %v1041_v32  ;;  %v439_v36 = vadd.f32 %v17825_v59, %v438_v33  ;;  %v917_v39 = vadd.f32 %v17825_v59, %v916_v34  ;;  %15064 = vmatprep.mubr.msk.bf16.mxu0 %vm17449_vm0, %v21695_v1  ;;  %15180 = vmatprep.mubr.msk.bf16.mxu1 %vm17449_vm0, %v21695_v1  ;;  %v16361_v21 = vld [vmem:[%s21683_s0 + $0x2b4] sm:$0xff]  }
 0x143   :  { %v14834_v42 = vpop.f32.mrf.mxu0  ;;  %v14950_v43 = vpop.f32.mrf.mxu1 }
 0x144   :  { %v564_v44 = vmax.f32 %v439_v36, 0.0  ;;  %v1042_v45 = vmax.f32 %v917_v39, 0.0 }
 0x145   :  { %v441_v46 = vpop.f32.mrf.mxu0  ;;  %v919_v47 = vpop.f32.mrf.mxu1 }
 0x146   :  { %v18055_v53 = vmax.f32 %v564_v44, %v1042_v45  ;;  %v442_v54 = vadd.f32 %v17825_v59, %v441_v46  ;;  %v920_v56 = vadd.f32 %v17825_v59, %v919_v47 }
 0x147   :  { %v14835_v57 = vpop.f32.mrf.mxu0  ;;  %v14951_v60 = vpop.f32.mrf.mxu1 }
 0x148   :  { %v565_v61 = vmax.f32 %v442_v54, 0.0  ;;  %v1043_v62 = vmax.f32 %v920_v56, 0.0  ;;  %v16362_v54 = vld [vmem:[%s21683_s0 + $0x1f8] sm:$0xff]  }
 0x149   :  { %v446_v2 = vpop.f32.mrf.mxu0  ;;  %v924_v3 = vpop.f32.mrf.mxu1  ;;  %15065 = vmatmul.mubr.bf16.gmra.mxu0 %v16358_v50  ;;  %15181 = vmatmul.mubr.bf16.gmra.mxu1 %v16359_v51  ;;  %v16363_v56 = vld [vmem:[%s21683_s0 + $0x2bc] sm:$0xff]  }
 0x14a   :  { %v18059_v4 = vmax.f32 %v565_v61, %v1043_v62  ;;  %v447_v6 = vadd.f32 %v17825_v59, %v446_v2  ;;  %v925_v8 = vadd.f32 %v17825_v59, %v924_v3  ;;  %15068 = vmatprep.mubr.msk.bf16.mxu0 %vm17449_vm0, %v21695_v1  ;;  %15184 = vmatprep.mubr.msk.bf16.mxu1 %vm17449_vm0, %v21695_v1 }
 0x14b   :  { %v14838_v10 = vpop.f32.mrf.mxu0  ;;  %v14954_v11 = vpop.f32.mrf.mxu1 }
 0x14c   :  { %v566_v14 = vmax.f32 %v447_v6, 0.0  ;;  %v1044_v15 = vmax.f32 %v925_v8, 0.0 }
 0x14d   :  { %v449_v16 = vpop.f32.mrf.mxu0  ;;  %v927_v19 = vpop.f32.mrf.mxu1 }
 0x14e   :  { %v18073_v23 = vmax.f32 %v566_v14, %v1044_v15  ;;  %v450_v25 = vadd.f32 %v17825_v59, %v449_v16  ;;  %v928_v26 = vadd.f32 %v17825_v59, %v927_v19 }
 0x14f   :  { %v14839_v28 = vpop.f32.mrf.mxu0  ;;  %v14955_v31 = vpop.f32.mrf.mxu1 }
 0x150   :  { %v567_v32 = vmax.f32 %v450_v25, 0.0  ;;  %v1045_v33 = vmax.f32 %v928_v26, 0.0  ;;  %v16364_v28 = vld [vmem:[%s21683_s0 + $0x200] sm:$0xff]  }
 0x151   :  { %v454_v34 = vpop.f32.mrf.mxu0  ;;  %v932_v36 = vpop.f32.mrf.mxu1  ;;  %15069 = vmatmul.mubr.bf16.gmra.mxu0 %v16360_v20  ;;  %15185 = vmatmul.mubr.bf16.gmra.mxu1 %v16361_v21  ;;  %v16365_v31 = vld [vmem:[%s21683_s0 + $0x2c4] sm:$0xff]  }
 0x152   :  { %v18077_v39 = vmax.f32 %v567_v32, %v1045_v33  ;;  %v455_v42 = vadd.f32 %v17825_v59, %v454_v34  ;;  %v933_v43 = vadd.f32 %v17825_v59, %v932_v36  ;;  %15072 = vmatprep.mubr.msk.bf16.mxu0 %vm17449_vm0, %v21695_v1  ;;  %15188 = vmatprep.mubr.msk.bf16.mxu1 %vm17449_vm0, %v21695_v1 }
 0x153   :  { %v14842_v44 = vpop.f32.mrf.mxu0  ;;  %v14958_v45 = vpop.f32.mrf.mxu1 }
 0x154   :  { %v568_v46 = vmax.f32 %v455_v42, 0.0  ;;  %v1046_v47 = vmax.f32 %v933_v43, 0.0 }
 0x155   :  { %v457_v50 = vpop.f32.mrf.mxu0  ;;  %v935_v51 = vpop.f32.mrf.mxu1 }
 0x156   :  { %v18091_v57 = vmax.f32 %v568_v46, %v1046_v47  ;;  %v458_v60 = vadd.f32 %v17825_v59, %v457_v50  ;;  %v936_v61 = vadd.f32 %v17825_v59, %v935_v51 }
 0x157   :  { %v14843_v62 = vpop.f32.mrf.mxu0  ;;  %v14959_v2 = vpop.f32.mrf.mxu1 }
 0x158   :  { %v569_v3 = vmax.f32 %v458_v60, 0.0  ;;  %v1047_v6 = vmax.f32 %v936_v61, 0.0 }
 0x159   :  { %v462_v8 = vpop.f32.mrf.mxu0  ;;  %v940_v10 = vpop.f32.mrf.mxu1  ;;  %15073 = vmatmul.mubr.bf16.gmra.mxu0 %v16362_v54  ;;  %15189 = vmatmul.mubr.bf16.gmra.mxu1 %v16363_v56 }
 0x15a   :  { %v18095_v11 = vmax.f32 %v569_v3, %v1047_v6  ;;  %v463_v14 = vadd.f32 %v17825_v59, %v462_v8  ;;  %v941_v15 = vadd.f32 %v17825_v59, %v940_v10  ;;  %15076 = vmatprep.mubr.msk.bf16.mxu0 %vm17449_vm0, %v21695_v1  ;;  %15192 = vmatprep.mubr.msk.bf16.mxu1 %vm17449_vm0, %v21695_v1  ;;  %v16366_v3 = vld [vmem:[%s21683_s0 + $0x208] sm:$0xff]  }
 0x15b   :  { %v14846_v16 = vpop.f32.mrf.mxu0  ;;  %v14962_v19 = vpop.f32.mrf.mxu1  ;;  %v16367_v6 = vld [vmem:[%s21683_s0 + $0x2cc] sm:$0xff]  }
 0x15c   :  { %v570_v20 = vmax.f32 %v463_v14, 0.0  ;;  %v1048_v21 = vmax.f32 %v941_v15, 0.0 }
 0x15d   :  { %v465_v25 = vpop.f32.mrf.mxu0  ;;  %v943_v26 = vpop.f32.mrf.mxu1 }
 0x15e   :  { %v18109_v32 = vmax.f32 %v570_v20, %v1048_v21  ;;  %v466_v33 = vadd.f32 %v17825_v59, %v465_v25  ;;  %v944_v34 = vadd.f32 %v17825_v59, %v943_v26 }
 0x15f   :  { %v14847_v36 = vpop.f32.mrf.mxu0  ;;  %v14963_v42 = vpop.f32.mrf.mxu1 }
 0x160   :  { %v571_v43 = vmax.f32 %v466_v33, 0.0  ;;  %v1049_v44 = vmax.f32 %v944_v34, 0.0 }
 0x161   :  { %v470_v45 = vpop.f32.mrf.mxu0  ;;  %v948_v46 = vpop.f32.mrf.mxu1  ;;  %15077 = vmatmul.mubr.bf16.gmra.mxu0 %v16364_v28  ;;  %15193 = vmatmul.mubr.bf16.gmra.mxu1 %v16365_v31 }
 0x162   :  { %v18113_v47 = vmax.f32 %v571_v43, %v1049_v44  ;;  %v471_v50 = vadd.f32 %v17825_v59, %v470_v45  ;;  %v949_v51 = vadd.f32 %v17825_v59, %v948_v46  ;;  %15080 = vmatprep.mubr.msk.bf16.mxu0 %vm17449_vm0, %v21695_v1  ;;  %15196 = vmatprep.mubr.msk.bf16.mxu1 %vm17449_vm0, %v21695_v1  ;;  %v16368_v45 = vld [vmem:[%s21683_s0 + $0x210] sm:$0xff]  }
 0x163   :  { %v14850_v54 = vpop.f32.mrf.mxu0  ;;  %v14966_v56 = vpop.f32.mrf.mxu1  ;;  %v16369_v46 = vld [vmem:[%s21683_s0 + $0x2d4] sm:$0xff]  }
 0x164   :  { %v572_v60 = vmax.f32 %v471_v50, 0.0  ;;  %v1050_v61 = vmax.f32 %v949_v51, 0.0 }
 0x165   :  { %v473_v62 = vpop.f32.mrf.mxu0  ;;  %v951_v2 = vpop.f32.mrf.mxu1 }
 0x166   :  { %v18127_v8 = vmax.f32 %v572_v60, %v1050_v61  ;;  %v474_v10 = vadd.f32 %v17825_v59, %v473_v62  ;;  %v952_v14 = vadd.f32 %v17825_v59, %v951_v2 }
 0x167   :  { %v14851_v15 = vpop.f32.mrf.mxu0  ;;  %v14967_v16 = vpop.f32.mrf.mxu1 }
 0x168   :  { %v573_v19 = vmax.f32 %v474_v10, 0.0  ;;  %v1051_v20 = vmax.f32 %v952_v14, 0.0 }
 0x169   :  { %v478_v21 = vpop.f32.mrf.mxu0  ;;  %v956_v25 = vpop.f32.mrf.mxu1  ;;  %15081 = vmatmul.mubr.bf16.gmra.mxu0 %v16366_v3  ;;  %15197 = vmatmul.mubr.bf16.gmra.mxu1 %v16367_v6 }
 0x16a   :  { %v18131_v26 = vmax.f32 %v573_v19, %v1051_v20  ;;  %v479_v28 = vadd.f32 %v17825_v59, %v478_v21  ;;  %v957_v31 = vadd.f32 %v17825_v59, %v956_v25  ;;  %15084 = vmatprep.mubr.msk.bf16.mxu0 %vm17449_vm0, %v21695_v1  ;;  %15200 = vmatprep.mubr.msk.bf16.mxu1 %vm17449_vm0, %v21695_v1 }
 0x16b   :  { %v14854_v33 = vpop.f32.mrf.mxu0  ;;  %v14970_v34 = vpop.f32.mrf.mxu1 }
 0x16c   :  { %v574_v36 = vmax.f32 %v479_v28, 0.0  ;;  %v1052_v42 = vmax.f32 %v957_v31, 0.0  ;;  %v16370_v28 = vld [vmem:[%s21683_s0 + $0x218] sm:$0xff]  }
 0x16d   :  { %v481_v43 = vpop.f32.mrf.mxu0  ;;  %v959_v44 = vpop.f32.mrf.mxu1  ;;  %v16371_v31 = vld [vmem:[%s21683_s0 + $0x2dc] sm:$0xff]  }
 0x16e   :  { %v18145_v50 = vmax.f32 %v574_v36, %v1052_v42  ;;  %v482_v51 = vadd.f32 %v17825_v59, %v481_v43  ;;  %v960_v54 = vadd.f32 %v17825_v59, %v959_v44 }
 0x16f   :  { %v14855_v56 = vpop.f32.mrf.mxu0  ;;  %v14971_v60 = vpop.f32.mrf.mxu1 }
 0x170   :  { %v575_v61 = vmax.f32 %v482_v51, 0.0  ;;  %v1053_v62 = vmax.f32 %v960_v54, 0.0 }
 0x171   :  { %v486_v2 = vpop.f32.mrf.mxu0  ;;  %v964_v3 = vpop.f32.mrf.mxu1  ;;  %15085 = vmatmul.mubr.bf16.gmra.mxu0 %v16368_v45  ;;  %15201 = vmatmul.mubr.bf16.gmra.mxu1 %v16369_v46 }
 0x172   :  { %v18149_v6 = vmax.f32 %v575_v61, %v1053_v62  ;;  %v487_v10 = vadd.f32 %v17825_v59, %v486_v2  ;;  %v965_v14 = vadd.f32 %v17825_v59, %v964_v3  ;;  %15088 = vmatprep.mubr.msk.bf16.mxu0 %vm17449_vm0, %v21695_v1  ;;  %15204 = vmatprep.mubr.msk.bf16.mxu1 %vm17449_vm0, %v21695_v1 }
 0x173   :  { %v14858_v15 = vpop.f32.mrf.mxu0  ;;  %v14974_v16 = vpop.f32.mrf.mxu1 }
 0x174   :  { %v576_v19 = vmax.f32 %v487_v10, 0.0  ;;  %v1054_v20 = vmax.f32 %v965_v14, 0.0  ;;  %v16372_v15 = vld [vmem:[%s21683_s0 + $0x220] sm:$0xff]  }
 0x175   :  { %v489_v21 = vpop.f32.mrf.mxu0  ;;  %v967_v25 = vpop.f32.mrf.mxu1  ;;  %v16373_v16 = vld [vmem:[%s21683_s0 + $0x2e4] sm:$0xff]  }
 0x176   :  { %v18163_v33 = vmax.f32 %v576_v19, %v1054_v20  ;;  %v490_v34 = vadd.f32 %v17825_v59, %v489_v21  ;;  %v968_v36 = vadd.f32 %v17825_v59, %v967_v25 }
 0x177   :  { %v14859_v42 = vpop.f32.mrf.mxu0  ;;  %v14975_v43 = vpop.f32.mrf.mxu1 }
 0x178   :  { %v577_v44 = vmax.f32 %v490_v34, 0.0  ;;  %v1055_v45 = vmax.f32 %v968_v36, 0.0 }
 0x179   :  { %v494_v46 = vpop.f32.mrf.mxu0  ;;  %v972_v51 = vpop.f32.mrf.mxu1  ;;  %15089 = vmatmul.mubr.bf16.gmra.mxu0 %v16370_v28  ;;  %15205 = vmatmul.mubr.bf16.gmra.mxu1 %v16371_v31 }
 0x17a   :  { %v18167_v54 = vmax.f32 %v577_v44, %v1055_v45  ;;  %v495_v56 = vadd.f32 %v17825_v59, %v494_v46  ;;  %v973_v60 = vadd.f32 %v17825_v59, %v972_v51  ;;  %15092 = vmatprep.mubr.msk.bf16.mxu0 %vm17449_vm0, %v21695_v1  ;;  %15208 = vmatprep.mubr.msk.bf16.mxu1 %vm17449_vm0, %v21695_v1 }
 0x17b   :  { %v14862_v61 = vpop.f32.mrf.mxu0  ;;  %v14978_v62 = vpop.f32.mrf.mxu1 }
 0x17c   :  { %v578_v2 = vmax.f32 %v495_v56, 0.0  ;;  %v1056_v3 = vmax.f32 %v973_v60, 0.0 }
 0x17d   :  { %v497_v10 = vpop.f32.mrf.mxu0  ;;  %v975_v14 = vpop.f32.mrf.mxu1 }
 0x17e   :  { %v18181_v19 = vmax.f32 %v578_v2, %v1056_v3  ;;  %v498_v20 = vadd.f32 %v17825_v59, %v497_v10  ;;  %v976_v21 = vadd.f32 %v17825_v59, %v975_v14  ;;  %v16374_v2 = vld [vmem:[%s21683_s0 + $0x228] sm:$0xff]  }
 0x17f   :  { %v14863_v25 = vpop.f32.mrf.mxu0  ;;  %v14979_v28 = vpop.f32.mrf.mxu1  ;;  %v16375_v3 = vld [vmem:[%s21683_s0 + $0x2ec] sm:$0xff]  }
 0x180   :  { %v579_v31 = vmax.f32 %v498_v20, 0.0  ;;  %v1057_v34 = vmax.f32 %v976_v21, 0.0 }
 0x181   :  { %v502_v36 = vpop.f32.mrf.mxu0  ;;  %v980_v42 = vpop.f32.mrf.mxu1  ;;  %15093 = vmatmul.mubr.bf16.gmra.mxu0 %v16372_v15  ;;  %15209 = vmatmul.mubr.bf16.gmra.mxu1 %v16373_v16 }
 0x182   :  { %v18185_v43 = vmax.f32 %v579_v31, %v1057_v34  ;;  %v503_v44 = vadd.f32 %v17825_v59, %v502_v36  ;;  %v981_v45 = vadd.f32 %v17825_v59, %v980_v42  ;;  %15096 = vmatprep.mubr.msk.bf16.mxu0 %vm17449_vm0, %v21695_v1  ;;  %15212 = vmatprep.mubr.msk.bf16.mxu1 %vm17449_vm0, %v21695_v1 }
 0x183   :  { %v14866_v46 = vpop.f32.mrf.mxu0  ;;  %v14982_v51 = vpop.f32.mrf.mxu1 }
 0x184   :  { %v580_v56 = vmax.f32 %v503_v44, 0.0  ;;  %v1058_v60 = vmax.f32 %v981_v45, 0.0 }
 0x185   :  { %v505_v61 = vpop.f32.mrf.mxu0  ;;  %v983_v62 = vpop.f32.mrf.mxu1 }
 0x186   :  { %v18199_v10 = vmax.f32 %v580_v56, %v1058_v60  ;;  %v506_v14 = vadd.f32 %v17825_v59, %v505_v61  ;;  %v984_v15 = vadd.f32 %v17825_v59, %v983_v62  ;;  %v16376_v61 = vld [vmem:[%s21683_s0 + $0x230] sm:$0xff]  }
 0x187   :  { %v14867_v16 = vpop.f32.mrf.mxu0  ;;  %v14983_v20 = vpop.f32.mrf.mxu1 }
 0x188   :  { %v581_v21 = vmax.f32 %v506_v14, 0.0  ;;  %v1059_v25 = vmax.f32 %v984_v15, 0.0 }
 0x189   :  { %v510_v28 = vpop.f32.mrf.mxu0  ;;  %v988_v31 = vpop.f32.mrf.mxu1  ;;  %15097 = vmatmul.mubr.bf16.gmra.mxu0 %v16374_v2  ;;  %15213 = vmatmul.mubr.bf16.gmra.mxu1 %v16375_v3  ;;  %v18222_v2 = vld [vmem:[%s21685_s2] ss:$0 sm:$0xff] }
 0x18a   :  { %v18203_v34 = vmax.f32 %v581_v21, %v1059_v25  ;;  %v511_v36 = vadd.f32 %v17825_v59, %v510_v28  ;;  %v989_v42 = vadd.f32 %v17825_v59, %v988_v31  ;;  %15100 = vmatprep.mubr.msk.bf16.mxu0 %vm17449_vm0, %v21695_v1  ;;  %15216 = vmatprep.mubr.msk.bf16.mxu1 %vm17449_vm0, %v21695_v1  ;;  %v16377_v59 = vld [vmem:[%s21683_s0 + $0x2f4] sm:$0xff]  }
 0x18b   :  { %v14870_v44 = vpop.f32.mrf.mxu0  ;;  %v14986_v45 = vpop.f32.mrf.mxu1 }
 0x18c   :  { %v582_v46 = vmax.f32 %v511_v36, 0.0  ;;  %v1060_v51 = vmax.f32 %v989_v42, 0.0 }
 0x18d   :  { %v513_v56 = vpop.f32.mrf.mxu0  ;;  %v991_v60 = vpop.f32.mrf.mxu1 }
 0x18e   :  { %v18217_v62 = vmax.f32 %v582_v46, %v1060_v51  ;;  %v514_v3 = vadd.f32 %v18222_v2, %v513_v56  ;;  %v992_v14 = vadd.f32 %v18222_v2, %v991_v60 }
 0x18f   :  { %v14871_v15 = vpop.f32.mrf.mxu0  ;;  %v14987_v16 = vpop.f32.mrf.mxu1 }
 0x190   :  { %v583_v20 = vmax.f32 %v514_v3, 0.0  ;;  %v1061_v21 = vmax.f32 %v992_v14, 0.0 }
 0x191   :  { %v518_v25 = vpop.f32.mrf.mxu0  ;;  %v996_v28 = vpop.f32.mrf.mxu1  ;;  %15101 = vmatmul.mubr.bf16.gmra.mxu0 %v16376_v61  ;;  %15217 = vmatmul.mubr.bf16.gmra.mxu1 %v16377_v59  ;;  %v16378_v61 = vld [vmem:[%s21683_s0 + $0x238] sm:$0xff]  }
 0x192   :  { %v18226_v31 = vmax.f32 %v583_v20, %v1061_v21  ;;  %v519_v36 = vadd.f32 %v18222_v2, %v518_v25  ;;  %v997_v42 = vadd.f32 %v18222_v2, %v996_v28  ;;  %15104 = vmatprep.mubr.msk.bf16.mxu0 %vm17449_vm0, %v21695_v1  ;;  %15220 = vmatprep.mubr.msk.bf16.mxu1 %vm17449_vm0, %v21695_v1  ;;  %v16379_v59 = vld [vmem:[%s21683_s0 + $0x2fc] sm:$0xff]  }
 0x193   :  { %v14874_v44 = vpop.f32.mrf.mxu0  ;;  %v14990_v45 = vpop.f32.mrf.mxu1 }
 0x194   :  { %v584_v46 = vmax.f32 %v519_v36, 0.0  ;;  %v1062_v51 = vmax.f32 %v997_v42, 0.0 }
 0x195   :  { %v521_v56 = vpop.f32.mrf.mxu0  ;;  %v999_v60 = vpop.f32.mrf.mxu1 }
 0x196   :  { %v18240_v3 = vmax.f32 %v584_v46, %v1062_v51  ;;  %v522_v14 = vadd.f32 %v18222_v2, %v521_v56  ;;  %v1000_v15 = vadd.f32 %v18222_v2, %v999_v60 }
 0x197   :  { %v14875_v16 = vpop.f32.mrf.mxu0  ;;  %v14991_v20 = vpop.f32.mrf.mxu1 }
 0x198   :  { %21698 = vst [vmem:[#allocation8_spill] sm:$0xff] %v18240_v3  ;;  %v585_v21 = vmax.f32 %v522_v14, 0.0  ;;  %v1063_v25 = vmax.f32 %v1000_v15, 0.0 }
 0x199   :  { %v526_v28 = vpop.f32.mrf.mxu0  ;;  %v1004_v36 = vpop.f32.mrf.mxu1  ;;  %15105 = vmatmul.mubr.bf16.gmra.mxu0 %v16378_v61  ;;  %15221 = vmatmul.mubr.bf16.gmra.mxu1 %v16379_v59  ;;  %v16380_v61 = vld [vmem:[%s21683_s0 + $0x240] sm:$0xff]  }
 0x19a   :  { %v18244_v42 = vmax.f32 %v585_v21, %v1063_v25  ;;  %v527_v44 = vadd.f32 %v18222_v2, %v526_v28  ;;  %v1005_v45 = vadd.f32 %v18222_v2, %v1004_v36  ;;  %15108 = vmatprep.mubr.msk.bf16.mxu0 %vm17449_vm0, %v21695_v1  ;;  %15224 = vmatprep.mubr.msk.bf16.mxu1 %vm17449_vm0, %v21695_v1  ;;  %v16381_v59 = vld [vmem:[%s21683_s0 + $0x304] sm:$0xff]  }
 0x19b   :  { %v14878_v46 = vpop.f32.mrf.mxu0  ;;  %v14994_v51 = vpop.f32.mrf.mxu1 }
 0x19c   :  { %21699 = vst [vmem:[#allocation9_spill] sm:$0xff] %v18244_v42  ;;  %v586_v56 = vmax.f32 %v527_v44, 0.0  ;;  %v1064_v60 = vmax.f32 %v1005_v45, 0.0 }
 0x19d   :  { %v529_v14 = vpop.f32.mrf.mxu0  ;;  %v1007_v15 = vpop.f32.mrf.mxu1 }
 0x19e   :  { %v18258_v16 = vmax.f32 %v586_v56, %v1064_v60  ;;  %v530_v20 = vadd.f32 %v18222_v2, %v529_v14  ;;  %v1008_v21 = vadd.f32 %v18222_v2, %v1007_v15  ;;  %v21702_v56 = vmov 0.0  }
 0x19f   :  { %v14879_v25 = vpop.f32.mrf.mxu0  ;;  %v14995_v28 = vpop.f32.mrf.mxu1 }
 0x1a0   :  { %21700 = vst [vmem:[#allocation10_spill] sm:$0xff] %v18258_v16  ;;  %v587_v36 = vmax.f32 %v530_v20, 0.0  ;;  %v1065_v44 = vmax.f32 %v1008_v21, 0.0 }
 0x1a1   :  { %v534_v45 = vpop.f32.mrf.mxu0  ;;  %v1012_v46 = vpop.f32.mrf.mxu1  ;;  %15109 = vmatmul.mubr.bf16.gmra.mxu0 %v16380_v61  ;;  %15225 = vmatmul.mubr.bf16.gmra.mxu1 %v16381_v59  ;;  %v16382_v61 = vld [vmem:[%s21683_s0 + $0x248] ss:$0 sps:$4 sm:$0xff]   ;;  %v16383_v59 = vld [vmem:[%s21683_s0 + $0x30c] ss:$0 sps:$4 sm:$0xff]  }
 0x1a2   :  { %v18262_v51 = vmax.f32 %v587_v36, %v1065_v44  ;;  %v535_v1 = vadd.f32 %v18222_v2, %v534_v45  ;;  %v1013_v42 = vadd.f32 %v18222_v2, %v1012_v46  ;;  %15112 = vmatprep.mubr.msk.bf16.mxu0 %vm17449_vm0, %v21702_v56  ;;  %15228 = vmatprep.mubr.msk.bf16.mxu1 %vm17449_vm0, %v21702_v56 }
 0x1a3   :  { %v14882_v60 = vpop.f32.mrf.mxu0  ;;  %v14998_v14 = vpop.f32.mrf.mxu1 }
 0x1a4   :  { %21701 = vst [vmem:[#allocation11_spill] sm:$0xff] %v18262_v51  ;;  %v588_v15 = vmax.f32 %v535_v1, 0.0  ;;  %v1066_v20 = vmax.f32 %v1013_v42, 0.0 }
 0x1a5   :  { %v537_v21 = vpop.f32.mrf.mxu0  ;;  %v1015_v25 = vpop.f32.mrf.mxu1 }
 0x1a6   :  { %v18276_v28 = vmax.f32 %v588_v15, %v1066_v20 }
 0x1a7   :  { %v14883_v36 = vpop.f32.mrf.mxu0  ;;  %v14999_v44 = vpop.f32.mrf.mxu1 }
 0x1a8   :  { %21703 = vst [vmem:[#allocation12_spill] sm:$0xff] %v18276_v28 }
 0x1a9   :  { %v1347_v45 = vpop.f32.mrf.mxu0  ;;  %15113 = vmatmul.mubr.bf16.gmra.mxu0 %v16382_v61  ;;  %v1874_v46 = vpop.f32.mrf.mxu1  ;;  %15229 = vmatmul.mubr.bf16.gmra.mxu1 %v16383_v59 }
 0x1aa   :  { %v1348_v1 = vadd.f32 %v18222_v2, %v1347_v45  ;;  %v1875_v42 = vadd.f32 %v18222_v2, %v1874_v46 }
 0x1ab   :  { %v15018_v56 = vpop.f32.mrf.mxu0  ;;  %v15134_v60 = vpop.f32.mrf.mxu1 }
 0x1ac   :  { %v1545_v14 = vmax.f32 %v1348_v1, 0.0  ;;  %v2072_v21 = vmax.f32 %v1875_v42, 0.0 }
 0x1ad   :  { %v1350_v25 = vpop.f32.mrf.mxu0  ;;  %v1877_v51 = vpop.f32.mrf.mxu1 }
 0x1ae   :  { %v1594_v16 = vmax.f32 %v17839_v9, %v1545_v14  ;;  %v1351_v15 = vadd.f32 %v18222_v2, %v1350_v25  ;;  %v1878_v20 = vadd.f32 %v18222_v2, %v1877_v51 }
 0x1af   :  { %v15019_v36 = vpop.f32.mrf.mxu0  ;;  %v15135_v61 = vpop.f32.mrf.mxu1 }
 0x1b0   :  { %v2121_v44 = vmax.f32 %v1594_v16, %v2072_v21  ;;  %v1546_v59 = vmax.f32 %v1351_v15, 0.0  ;;  %v2073_v56 = vmax.f32 %v1878_v20, 0.0 }
 0x1b1   :  { %v1355_v28 = vpop.f32.mrf.mxu0  ;;  %v1882_v45 = vpop.f32.mrf.mxu1 }
 0x1b2   :  { %2170 = vst [vmem:[#allocation2] sm:$0xff] %v2121_v44  ;;  %v1595_v46 = vmax.f32 %v17843_v18, %v1546_v59  ;;  %v1356_v1 = vadd.f32 %v18222_v2, %v1355_v28  ;;  %v1883_v42 = vadd.f32 %v18222_v2, %v1882_v45 }
 0x1b3   :  { %v15022_v60 = vpop.f32.mrf.mxu0  ;;  %v15138_v9 = vpop.f32.mrf.mxu1 }
 0x1b4   :  { %v2122_v14 = vmax.f32 %v1595_v46, %v2073_v56  ;;  %v1547_v25 = vmax.f32 %v1356_v1, 0.0  ;;  %v2074_v3 = vmax.f32 %v1883_v42, 0.0 }
 0x1b5   :  { %v1358_v51 = vpop.f32.mrf.mxu0  ;;  %v1885_v36 = vpop.f32.mrf.mxu1 }
 0x1b6   :  { %2171 = vst [vmem:[#allocation2 + $0x8] sm:$0xff] %v2122_v14  ;;  %v1596_v16 = vmax.f32 %v17857_v29, %v1547_v25  ;;  %v1359_v21 = vadd.f32 %v18222_v2, %v1358_v51  ;;  %v1886_v15 = vadd.f32 %v18222_v2, %v1885_v36 }
 0x1b7   :  { %v15023_v18 = vpop.f32.mrf.mxu0  ;;  %v15139_v20 = vpop.f32.mrf.mxu1 }
 0x1b8   :  { %v2123_v61 = vmax.f32 %v1596_v16, %v2074_v3  ;;  %v1548_v28 = vmax.f32 %v1359_v21, 0.0  ;;  %v2075_v46 = vmax.f32 %v1886_v15, 0.0 }
 0x1b9   :  { %v1363_v44 = vpop.f32.mrf.mxu0  ;;  %v1890_v59 = vpop.f32.mrf.mxu1 }
 0x1ba   :  { %2172 = vst [vmem:[#allocation2 + $0x10] sm:$0xff] %v2123_v61  ;;  %v1597_v45 = vmax.f32 %v17861_v38, %v1548_v28  ;;  %v1364_v56 = vadd.f32 %v18222_v2, %v1363_v44  ;;  %v1891_v1 = vadd.f32 %v18222_v2, %v1890_v59 }
 0x1bb   :  { %v15026_v42 = vpop.f32.mrf.mxu0  ;;  %v15142_v29 = vpop.f32.mrf.mxu1 }
 0x1bc   :  { %v2124_v60 = vmax.f32 %v1597_v45, %v2075_v46  ;;  %v1549_v9 = vmax.f32 %v1364_v56, 0.0  ;;  %v2076_v14 = vmax.f32 %v1891_v1, 0.0 }
 0x1bd   :  { %v1366_v25 = vpop.f32.mrf.mxu0  ;;  %v1893_v51 = vpop.f32.mrf.mxu1 }
 0x1be   :  { %2173 = vst [vmem:[#allocation2 + $0x18] sm:$0xff] %v2124_v60  ;;  %v1598_v3 = vmax.f32 %v17875_v49, %v1549_v9  ;;  %v1367_v36 = vadd.f32 %v18222_v2, %v1366_v25  ;;  %v1894_v16 = vadd.f32 %v18222_v2, %v1893_v51 }
 0x1bf   :  { %v15027_v38 = vpop.f32.mrf.mxu0  ;;  %v15143_v21 = vpop.f32.mrf.mxu1 }
 0x1c0   :  { %v2125_v15 = vmax.f32 %v1598_v3, %v2076_v14  ;;  %v1550_v18 = vmax.f32 %v1367_v36, 0.0  ;;  %v2077_v44 = vmax.f32 %v1894_v16, 0.0 }
 0x1c1   :  { %v1371_v20 = vpop.f32.mrf.mxu0  ;;  %v1898_v61 = vpop.f32.mrf.mxu1 }
 0x1c2   :  { %2174 = vst [vmem:[#allocation2 + $0x20] sm:$0xff] %v2125_v15  ;;  %v1599_v28 = vmax.f32 %v17879_v58, %v1550_v18  ;;  %v1372_v59 = vadd.f32 %v18222_v2, %v1371_v20  ;;  %v1899_v45 = vadd.f32 %v18222_v2, %v1898_v61 }
 0x1c3   :  { %v15030_v46 = vpop.f32.mrf.mxu0  ;;  %v15146_v49 = vpop.f32.mrf.mxu1 }
 0x1c4   :  { %v2126_v56 = vmax.f32 %v1599_v28, %v2077_v44  ;;  %v1551_v1 = vmax.f32 %v1372_v59, 0.0  ;;  %v2078_v42 = vmax.f32 %v1899_v45, 0.0 }
 0x1c5   :  { %v1374_v29 = vpop.f32.mrf.mxu0  ;;  %v1901_v60 = vpop.f32.mrf.mxu1 }
 0x1c6   :  { %2175 = vst [vmem:[#allocation2 + $0x28] sm:$0xff] %v2126_v56  ;;  %v1600_v9 = vmax.f32 %v17893_v7, %v1551_v1  ;;  %v1375_v14 = vadd.f32 %v18222_v2, %v1374_v29  ;;  %v1902_v25 = vadd.f32 %v18222_v2, %v1901_v60 }
 0x1c7   :  { %v15031_v58 = vpop.f32.mrf.mxu0  ;;  %v15147_v51 = vpop.f32.mrf.mxu1 }
 0x1c8   :  { %v2127_v3 = vmax.f32 %v1600_v9, %v2078_v42  ;;  %v1552_v36 = vmax.f32 %v1375_v14, 0.0  ;;  %v2079_v15 = vmax.f32 %v1902_v25, 0.0 }
 0x1c9   :  { %v1379_v16 = vpop.f32.mrf.mxu0  ;;  %v1906_v38 = vpop.f32.mrf.mxu1 }
 0x1ca   :  { %2176 = vst [vmem:[#allocation2 + $0x30] sm:$0xff] %v2127_v3  ;;  %v1601_v21 = vmax.f32 %v17897_v17, %v1552_v36  ;;  %v1380_v18 = vadd.f32 %v18222_v2, %v1379_v16  ;;  %v1907_v20 = vadd.f32 %v18222_v2, %v1906_v38 }
 0x1cb   :  { %v15034_v61 = vpop.f32.mrf.mxu0  ;;  %v15150_v7 = vpop.f32.mrf.mxu1 }
 0x1cc   :  { %v2128_v28 = vmax.f32 %v1601_v21, %v2079_v15  ;;  %v1553_v44 = vmax.f32 %v1380_v18, 0.0  ;;  %v2080_v59 = vmax.f32 %v1907_v20, 0.0 }
 0x1cd   :  { %v1382_v45 = vpop.f32.mrf.mxu0  ;;  %v1909_v46 = vpop.f32.mrf.mxu1 }
 0x1ce   :  { %2177 = vst [vmem:[#allocation2 + $0x38] sm:$0xff] %v2128_v28  ;;  %v1602_v49 = vmax.f32 %v17911_v30, %v1553_v44  ;;  %v1383_v56 = vadd.f32 %v18222_v2, %v1382_v45  ;;  %v1910_v1 = vadd.f32 %v18222_v2, %v1909_v46 }
 0x1cf   :  { %v15035_v17 = vpop.f32.mrf.mxu0  ;;  %v15151_v42 = vpop.f32.mrf.mxu1 }
 0x1d0   :  { %v2129_v29 = vmax.f32 %v1602_v49, %v2080_v59  ;;  %v1554_v60 = vmax.f32 %v1383_v56, 0.0  ;;  %v2081_v58 = vmax.f32 %v1910_v1, 0.0 }
 0x1d1   :  { %v1387_v9 = vpop.f32.mrf.mxu0  ;;  %v1914_v14 = vpop.f32.mrf.mxu1 }
 0x1d2   :  { %2178 = vst [vmem:[#allocation2 + $0x40] sm:$0xff] %v2129_v29  ;;  %v1603_v25 = vmax.f32 %v17915_v40, %v1554_v60  ;;  %v1388_v51 = vadd.f32 %v18222_v2, %v1387_v9  ;;  %v1915_v3 = vadd.f32 %v18222_v2, %v1914_v14 }
 0x1d3   :  { %v15038_v36 = vpop.f32.mrf.mxu0  ;;  %v15154_v30 = vpop.f32.mrf.mxu1 }
 0x1d4   :  { %v2130_v16 = vmax.f32 %v1603_v25, %v2081_v58  ;;  %v1555_v38 = vmax.f32 %v1388_v51, 0.0  ;;  %v2082_v21 = vmax.f32 %v1915_v3, 0.0 }
 0x1d5   :  { %v1390_v15 = vpop.f32.mrf.mxu0  ;;  %v1917_v18 = vpop.f32.mrf.mxu1 }
 0x1d6   :  { %2179 = vst [vmem:[#allocation2 + $0x48] sm:$0xff] %v2130_v16  ;;  %v1604_v20 = vmax.f32 %v17929_v52, %v1555_v38  ;;  %v1391_v61 = vadd.f32 %v18222_v2, %v1390_v15  ;;  %v1918_v7 = vadd.f32 %v18222_v2, %v1917_v18 }
 0x1d7   :  { %v15039_v40 = vpop.f32.mrf.mxu0  ;;  %v15155_v28 = vpop.f32.mrf.mxu1 }
 0x1d8   :  { %v2131_v44 = vmax.f32 %v1604_v20, %v2082_v21  ;;  %v1556_v59 = vmax.f32 %v1391_v61, 0.0  ;;  %v2083_v56 = vmax.f32 %v1918_v7, 0.0 }
 0x1d9   :  { %v1395_v45 = vpop.f32.mrf.mxu0  ;;  %v1922_v46 = vpop.f32.mrf.mxu1 }
 0x1da   :  { %2180 = vst [vmem:[#allocation2 + $0x50] sm:$0xff] %v2131_v44  ;;  %v1605_v49 = vmax.f32 %v17933_v63, %v1556_v59  ;;  %v1396_v1 = vadd.f32 %v18222_v2, %v1395_v45  ;;  %v1923_v17 = vadd.f32 %v18222_v2, %v1922_v46 }
 0x1db   :  { %v15042_v42 = vpop.f32.mrf.mxu0  ;;  %v15158_v52 = vpop.f32.mrf.mxu1 }
 0x1dc   :  { %v2132_v29 = vmax.f32 %v1605_v49, %v2083_v56  ;;  %v1557_v60 = vmax.f32 %v1396_v1, 0.0  ;;  %v2084_v9 = vmax.f32 %v1923_v17, 0.0 }
 0x1dd   :  { %v1398_v14 = vpop.f32.mrf.mxu0  ;;  %v1925_v25 = vpop.f32.mrf.mxu1 }
 0x1de   :  { %2181 = vst [vmem:[#allocation2 + $0x58] sm:$0xff] %v2132_v29  ;;  %v1606_v58 = vmax.f32 %v17947_v13, %v1557_v60  ;;  %v1399_v51 = vadd.f32 %v18222_v2, %v1398_v14  ;;  %v1926_v3 = vadd.f32 %v18222_v2, %v1925_v25 }
 0x1df   :  { %v15043_v63 = vpop.f32.mrf.mxu0  ;;  %v15159_v36 = vpop.f32.mrf.mxu1 }
 0x1e0   :  { %v2133_v30 = vmax.f32 %v1606_v58, %v2084_v9  ;;  %v1558_v16 = vmax.f32 %v1399_v51, 0.0  ;;  %v2085_v18 = vmax.f32 %v1926_v3, 0.0 }
 0x1e1   :  { %v1403_v38 = vpop.f32.mrf.mxu0  ;;  %v1930_v21 = vpop.f32.mrf.mxu1 }
 0x1e2   :  { %2182 = vst [vmem:[#allocation2 + $0x60] sm:$0xff] %v2133_v30  ;;  %v1607_v15 = vmax.f32 %v17951_v24, %v1558_v16  ;;  %v1404_v20 = vadd.f32 %v18222_v2, %v1403_v38  ;;  %v1931_v61 = vadd.f32 %v18222_v2, %v1930_v21 }
 0x1e3   :  { %v15046_v7 = vpop.f32.mrf.mxu0  ;;  %v15162_v13 = vpop.f32.mrf.mxu1 }
 0x1e4   :  { %v2134_v40 = vmax.f32 %v1607_v15, %v2085_v18  ;;  %v1559_v28 = vmax.f32 %v1404_v20, 0.0  ;;  %v2086_v44 = vmax.f32 %v1931_v61, 0.0 }
 0x1e5   :  { %v1406_v59 = vpop.f32.mrf.mxu0  ;;  %v1933_v45 = vpop.f32.mrf.mxu1 }
 0x1e6   :  { %2183 = vst [vmem:[#allocation2 + $0x68] sm:$0xff] %v2134_v40  ;;  %v1608_v46 = vmax.f32 %v17965_v37, %v1559_v28  ;;  %v1407_v49 = vadd.f32 %v18222_v2, %v1406_v59  ;;  %v1934_v56 = vadd.f32 %v18222_v2, %v1933_v45 }
 0x1e7   :  { %v15047_v24 = vpop.f32.mrf.mxu0  ;;  %v15163_v1 = vpop.f32.mrf.mxu1 }
 0x1e8   :  { %v2135_v17 = vmax.f32 %v1608_v46, %v2086_v44  ;;  %v1560_v42 = vmax.f32 %v1407_v49, 0.0  ;;  %v2087_v9 = vmax.f32 %v1934_v56, 0.0 }
 0x1e9   :  { %v1411_v52 = vpop.f32.mrf.mxu0  ;;  %v1938_v29 = vpop.f32.mrf.mxu1 }
 0x1ea   :  { %2184 = vst [vmem:[#allocation2 + $0x70] sm:$0xff] %v2135_v17  ;;  %v1609_v60 = vmax.f32 %v17969_v48, %v1560_v42  ;;  %v1412_v14 = vadd.f32 %v18222_v2, %v1411_v52  ;;  %v1939_v25 = vadd.f32 %v18222_v2, %v1938_v29 }
 0x1eb   :  { %v15050_v58 = vpop.f32.mrf.mxu0  ;;  %v15166_v37 = vpop.f32.mrf.mxu1 }
 0x1ec   :  { %v2136_v51 = vmax.f32 %v1609_v60, %v2087_v9  ;;  %v1561_v3 = vmax.f32 %v1412_v14, 0.0  ;;  %v2088_v63 = vmax.f32 %v1939_v25, 0.0 }
 0x1ed   :  { %v1414_v36 = vpop.f32.mrf.mxu0  ;;  %v1941_v30 = vpop.f32.mrf.mxu1 }
 0x1ee   :  { %2185 = vst [vmem:[#allocation2 + $0x78] sm:$0xff] %v2136_v51  ;;  %v1610_v16 = vmax.f32 %v17983_v0, %v1561_v3  ;;  %v1415_v38 = vadd.f32 %v18222_v2, %v1414_v36  ;;  %v1942_v21 = vadd.f32 %v18222_v2, %v1941_v30 }
 0x1ef   :  { %v15051_v48 = vpop.f32.mrf.mxu0  ;;  %v15167_v15 = vpop.f32.mrf.mxu1 }
 0x1f0   :  { %v2137_v18 = vmax.f32 %v1610_v16, %v2088_v63  ;;  %v1562_v20 = vmax.f32 %v1415_v38, 0.0  ;;  %v2089_v40 = vmax.f32 %v1942_v21, 0.0 }
 0x1f1   :  { %v1419_v61 = vpop.f32.mrf.mxu0  ;;  %v1946_v7 = vpop.f32.mrf.mxu1 }
 0x1f2   :  { %2186 = vst [vmem:[#allocation2 + $0x80] sm:$0xff] %v2137_v18  ;;  %v1611_v13 = vmax.f32 %v17987_v12, %v1562_v20  ;;  %v1420_v28 = vadd.f32 %v18222_v2, %v1419_v61  ;;  %v1947_v44 = vadd.f32 %v18222_v2, %v1946_v7 }
 0x1f3   :  { %v15054_v59 = vpop.f32.mrf.mxu0  ;;  %v15170_v0 = vpop.f32.mrf.mxu1 }
 0x1f4   :  { %v2138_v45 = vmax.f32 %v1611_v13, %v2089_v40  ;;  %v1563_v46 = vmax.f32 %v1420_v28, 0.0  ;;  %v2090_v49 = vmax.f32 %v1947_v44, 0.0 }
 0x1f5   :  { %v1422_v56 = vpop.f32.mrf.mxu0  ;;  %v1949_v24 = vpop.f32.mrf.mxu1 }
 0x1f6   :  { %2187 = vst [vmem:[#allocation2 + $0x88] sm:$0xff] %v2138_v45  ;;  %v1612_v1 = vmax.f32 %v18001_v27, %v1563_v46  ;;  %v1423_v17 = vadd.f32 %v18222_v2, %v1422_v56  ;;  %v1950_v42 = vadd.f32 %v18222_v2, %v1949_v24 }
 0x1f7   :  { %v15055_v12 = vpop.f32.mrf.mxu0  ;;  %v15171_v52 = vpop.f32.mrf.mxu1 }
 0x1f8   :  { %v2139_v29 = vmax.f32 %v1612_v1, %v2090_v49  ;;  %v1564_v60 = vmax.f32 %v1423_v17, 0.0  ;;  %v2091_v58 = vmax.f32 %v1950_v42, 0.0 }
 0x1f9   :  { %v1427_v9 = vpop.f32.mrf.mxu0  ;;  %v1954_v14 = vpop.f32.mrf.mxu1 }
 0x1fa   :  { %2188 = vst [vmem:[#allocation2 + $0x90] sm:$0xff] %v2139_v29  ;;  %v1613_v25 = vmax.f32 %v18005_v41, %v1564_v60  ;;  %v1428_v37 = vadd.f32 %v18222_v2, %v1427_v9  ;;  %v1955_v51 = vadd.f32 %v18222_v2, %v1954_v14 }
 0x1fb   :  { %v15058_v3 = vpop.f32.mrf.mxu0  ;;  %v15174_v27 = vpop.f32.mrf.mxu1 }
 0x1fc   :  { %v2140_v63 = vmax.f32 %v1613_v25, %v2091_v58  ;;  %v1565_v36 = vmax.f32 %v1428_v37, 0.0  ;;  %v2092_v30 = vmax.f32 %v1955_v51, 0.0 }
 0x1fd   :  { %v1430_v16 = vpop.f32.mrf.mxu0  ;;  %v1957_v38 = vpop.f32.mrf.mxu1 }
 0x1fe   :  { %2189 = vst [vmem:[#allocation2 + $0x98] sm:$0xff] %v2140_v63  ;;  %v1614_v21 = vmax.f32 %v18019_v55, %v1565_v36  ;;  %v1431_v48 = vadd.f32 %v18222_v2, %v1430_v16  ;;  %v1958_v15 = vadd.f32 %v18222_v2, %v1957_v38 }
 0x1ff   :  { %v15059_v41 = vpop.f32.mrf.mxu0  ;;  %v15175_v18 = vpop.f32.mrf.mxu1 }
 0x200   :  { %v2141_v20 = vmax.f32 %v1614_v21, %v2092_v30  ;;  %v1566_v61 = vmax.f32 %v1431_v48, 0.0  ;;  %v2093_v28 = vmax.f32 %v1958_v15, 0.0 }
 0x201   :  { %v1435_v7 = vpop.f32.mrf.mxu0  ;;  %v1962_v13 = vpop.f32.mrf.mxu1 }
 0x202   :  { %2190 = vst [vmem:[#allocation2 + $0xa0] sm:$0xff] %v2141_v20  ;;  %v1615_v40 = vmax.f32 %v18023_v5, %v1566_v61  ;;  %v1436_v44 = vadd.f32 %v18222_v2, %v1435_v7  ;;  %v1963_v59 = vadd.f32 %v18222_v2, %v1962_v13 }
 0x203   :  { %v15062_v0 = vpop.f32.mrf.mxu0  ;;  %v15178_v55 = vpop.f32.mrf.mxu1 }
 0x204   :  { %v2142_v45 = vmax.f32 %v1615_v40, %v2093_v28  ;;  %v1567_v46 = vmax.f32 %v1436_v44, 0.0  ;;  %v2094_v49 = vmax.f32 %v1963_v59, 0.0 }
 0x205   :  { %v1438_v56 = vpop.f32.mrf.mxu0  ;;  %v1965_v24 = vpop.f32.mrf.mxu1 }
 0x206   :  { %2191 = vst [vmem:[#allocation2 + $0xa8] sm:$0xff] %v2142_v45  ;;  %v1616_v1 = vmax.f32 %v18037_v22, %v1567_v46  ;;  %v1439_v17 = vadd.f32 %v18222_v2, %v1438_v56  ;;  %v1966_v42 = vadd.f32 %v18222_v2, %v1965_v24 }
 0x207   :  { %v15063_v5 = vpop.f32.mrf.mxu0  ;;  %v15179_v12 = vpop.f32.mrf.mxu1 }
 0x208   :  { %v2143_v52 = vmax.f32 %v1616_v1, %v2094_v49  ;;  %v1568_v29 = vmax.f32 %v1439_v17, 0.0  ;;  %v2095_v25 = vmax.f32 %v1966_v42, 0.0 }
 0x209   :  { %v1443_v60 = vpop.f32.mrf.mxu0  ;;  %v1970_v9 = vpop.f32.mrf.mxu1 }
 0x20a   :  { %2192 = vst [vmem:[#allocation2 + $0xb0] sm:$0xff] %v2143_v52  ;;  %v1617_v14 = vmax.f32 %v18041_v35, %v1568_v29  ;;  %v1444_v58 = vadd.f32 %v18222_v2, %v1443_v60  ;;  %v1971_v37 = vadd.f32 %v18222_v2, %v1970_v9 }
 0x20b   :  { %v15066_v51 = vpop.f32.mrf.mxu0  ;;  %v15182_v22 = vpop.f32.mrf.mxu1 }
 0x20c   :  { %v2144_v3 = vmax.f32 %v1617_v14, %v2095_v25  ;;  %v1569_v27 = vmax.f32 %v1444_v58, 0.0  ;;  %v2096_v63 = vmax.f32 %v1971_v37, 0.0 }
 0x20d   :  { %v1446_v36 = vpop.f32.mrf.mxu0  ;;  %v1973_v30 = vpop.f32.mrf.mxu1 }
 0x20e   :  { %2193 = vst [vmem:[#allocation2 + $0xb8] sm:$0xff] %v2144_v3  ;;  %v1618_v16 = vmax.f32 %v18055_v53, %v1569_v27  ;;  %v1447_v38 = vadd.f32 %v18222_v2, %v1446_v36  ;;  %v1974_v21 = vadd.f32 %v18222_v2, %v1973_v30 }
 0x20f   :  { %v15067_v35 = vpop.f32.mrf.mxu0  ;;  %v15183_v48 = vpop.f32.mrf.mxu1 }
 0x210   :  { %v2145_v15 = vmax.f32 %v1618_v16, %v2096_v63  ;;  %v1570_v41 = vmax.f32 %v1447_v38, 0.0  ;;  %v2097_v7 = vmax.f32 %v1974_v21, 0.0 }
 0x211   :  { %v1451_v18 = vpop.f32.mrf.mxu0  ;;  %v1978_v20 = vpop.f32.mrf.mxu1 }
 0x212   :  { %2194 = vst [vmem:[#allocation2 + $0xc0] sm:$0xff] %v2145_v15  ;;  %v1619_v61 = vmax.f32 %v18059_v4, %v1570_v41  ;;  %v1452_v13 = vadd.f32 %v18222_v2, %v1451_v18  ;;  %v1979_v40 = vadd.f32 %v18222_v2, %v1978_v20 }
 0x213   :  { %v15070_v28 = vpop.f32.mrf.mxu0  ;;  %v15186_v53 = vpop.f32.mrf.mxu1 }
 0x214   :  { %v2146_v44 = vmax.f32 %v1619_v61, %v2097_v7  ;;  %v1571_v59 = vmax.f32 %v1452_v13, 0.0  ;;  %v2098_v0 = vmax.f32 %v1979_v40, 0.0 }
 0x215   :  { %v1454_v55 = vpop.f32.mrf.mxu0  ;;  %v1981_v45 = vpop.f32.mrf.mxu1 }
 0x216   :  { %2195 = vst [vmem:[#allocation2 + $0xc8] sm:$0xff] %v2146_v44  ;;  %v1620_v46 = vmax.f32 %v18073_v23, %v1571_v59  ;;  %v1455_v49 = vadd.f32 %v18222_v2, %v1454_v55  ;;  %v1982_v56 = vadd.f32 %v18222_v2, %v1981_v45 }
 0x217   :  { %v15071_v4 = vpop.f32.mrf.mxu0  ;;  %v15187_v24 = vpop.f32.mrf.mxu1 }
 0x218   :  { %v2147_v1 = vmax.f32 %v1620_v46, %v2098_v0  ;;  %v1572_v17 = vmax.f32 %v1455_v49, 0.0  ;;  %v2099_v52 = vmax.f32 %v1982_v56, 0.0 }
 0x219   :  { %v1459_v42 = vpop.f32.mrf.mxu0  ;;  %v1986_v5 = vpop.f32.mrf.mxu1 }
 0x21a   :  { %2196 = vst [vmem:[#allocation2 + $0xd0] sm:$0xff] %v2147_v1  ;;  %v1621_v12 = vmax.f32 %v18077_v39, %v1572_v17  ;;  %v1460_v29 = vadd.f32 %v18222_v2, %v1459_v42  ;;  %v1987_v60 = vadd.f32 %v18222_v2, %v1986_v5 }
 0x21b   :  { %v15074_v9 = vpop.f32.mrf.mxu0  ;;  %v15190_v23 = vpop.f32.mrf.mxu1 }
 0x21c   :  { %v2148_v14 = vmax.f32 %v1621_v12, %v2099_v52  ;;  %v1573_v25 = vmax.f32 %v1460_v29, 0.0  ;;  %v2100_v58 = vmax.f32 %v1987_v60, 0.0 }
 0x21d   :  { %v1462_v37 = vpop.f32.mrf.mxu0  ;;  %v1989_v51 = vpop.f32.mrf.mxu1 }
 0x21e   :  { %2197 = vst [vmem:[#allocation2 + $0xd8] sm:$0xff] %v2148_v14  ;;  %v1622_v22 = vmax.f32 %v18091_v57, %v1573_v25  ;;  %v1463_v3 = vadd.f32 %v18222_v2, %v1462_v37  ;;  %v1990_v27 = vadd.f32 %v18222_v2, %v1989_v51 }
 0x21f   :  { %v15075_v39 = vpop.f32.mrf.mxu0  ;;  %v15191_v63 = vpop.f32.mrf.mxu1 }
 0x220   :  { %v2149_v36 = vmax.f32 %v1622_v22, %v2100_v58  ;;  %v1574_v30 = vmax.f32 %v1463_v3, 0.0  ;;  %v2101_v35 = vmax.f32 %v1990_v27, 0.0 }
 0x221   :  { %v1467_v16 = vpop.f32.mrf.mxu0  ;;  %v1994_v38 = vpop.f32.mrf.mxu1 }
 0x222   :  { %2198 = vst [vmem:[#allocation2 + $0xe0] sm:$0xff] %v2149_v36  ;;  %v1623_v21 = vmax.f32 %v18095_v11, %v1574_v30  ;;  %v1468_v48 = vadd.f32 %v18222_v2, %v1467_v16  ;;  %v1995_v15 = vadd.f32 %v18222_v2, %v1994_v38 }
 0x223   :  { %v15078_v41 = vpop.f32.mrf.mxu0  ;;  %v15194_v57 = vpop.f32.mrf.mxu1 }
 0x224   :  { %v2150_v18 = vmax.f32 %v1623_v21, %v2101_v35  ;;  %v1575_v20 = vmax.f32 %v1468_v48, 0.0  ;;  %v2102_v61 = vmax.f32 %v1995_v15, 0.0 }
 0x225   :  { %v1470_v7 = vpop.f32.mrf.mxu0  ;;  %v1997_v13 = vpop.f32.mrf.mxu1 }
 0x226   :  { %2199 = vst [vmem:[#allocation2 + $0xe8] sm:$0xff] %v2150_v18  ;;  %v1624_v40 = vmax.f32 %v18109_v32, %v1575_v20  ;;  %v1471_v28 = vadd.f32 %v18222_v2, %v1470_v7  ;;  %v1998_v53 = vadd.f32 %v18222_v2, %v1997_v13 }
 0x227   :  { %v15079_v11 = vpop.f32.mrf.mxu0  ;;  %v15195_v44 = vpop.f32.mrf.mxu1 }
 0x228   :  { %v2151_v59 = vmax.f32 %v1624_v40, %v2102_v61  ;;  %v1576_v0 = vmax.f32 %v1471_v28, 0.0  ;;  %v2103_v49 = vmax.f32 %v1998_v53, 0.0 }
 0x229   :  { %v1475_v55 = vpop.f32.mrf.mxu0  ;;  %v2002_v45 = vpop.f32.mrf.mxu1 }
 0x22a   :  { %2200 = vst [vmem:[#allocation2 + $0xf0] sm:$0xff] %v2151_v59  ;;  %v1625_v46 = vmax.f32 %v18113_v47, %v1576_v0  ;;  %v1476_v56 = vadd.f32 %v18222_v2, %v1475_v55  ;;  %v2003_v4 = vadd.f32 %v18222_v2, %v2002_v45 }
 0x22b   :  { %v15082_v24 = vpop.f32.mrf.mxu0  ;;  %v15198_v32 = vpop.f32.mrf.mxu1 }
 0x22c   :  { %v2152_v1 = vmax.f32 %v1625_v46, %v2103_v49  ;;  %v1577_v17 = vmax.f32 %v1476_v56, 0.0  ;;  %v2104_v42 = vmax.f32 %v2003_v4, 0.0 }
 0x22d   :  { %v1478_v5 = vpop.f32.mrf.mxu0  ;;  %v2005_v12 = vpop.f32.mrf.mxu1 }
 0x22e   :  { %2201 = vst [vmem:[#allocation2 + $0xf8] sm:$0xff] %v2152_v1  ;;  %v1626_v52 = vmax.f32 %v18127_v8, %v1577_v17  ;;  %v1479_v29 = vadd.f32 %v18222_v2, %v1478_v5  ;;  %v2006_v60 = vadd.f32 %v18222_v2, %v2005_v12 }
 0x22f   :  { %v15083_v47 = vpop.f32.mrf.mxu0  ;;  %v15199_v9 = vpop.f32.mrf.mxu1 }
 0x230   :  { %v2153_v23 = vmax.f32 %v1626_v52, %v2104_v42  ;;  %v1578_v14 = vmax.f32 %v1479_v29, 0.0  ;;  %v2105_v51 = vmax.f32 %v2006_v60, 0.0 }
 0x231   :  { %v1483_v25 = vpop.f32.mrf.mxu0  ;;  %v2010_v58 = vpop.f32.mrf.mxu1 }
 0x232   :  { %2202 = vst [vmem:[#allocation2 + $0x100] sm:$0xff] %v2153_v23  ;;  %v1627_v37 = vmax.f32 %v18131_v26, %v1578_v14  ;;  %v1484_v22 = vadd.f32 %v18222_v2, %v1483_v25  ;;  %v2011_v3 = vadd.f32 %v18222_v2, %v2010_v58 }
 0x233   :  { %v15086_v27 = vpop.f32.mrf.mxu0  ;;  %v15202_v8 = vpop.f32.mrf.mxu1 }
 0x234   :  { %v2154_v39 = vmax.f32 %v1627_v37, %v2105_v51  ;;  %v1579_v63 = vmax.f32 %v1484_v22, 0.0  ;;  %v2106_v36 = vmax.f32 %v2011_v3, 0.0  ;;  %v18401_v8 = vld [vmem:[%s21685_s2] ss:$0 sm:$0xff]  ;;  %s18430_s2 = smov 0  }
 0x235   :  { %v1486_v30 = vpop.f32.mrf.mxu0  ;;  %v2013_v16 = vpop.f32.mrf.mxu1 }
 0x236   :  { %2203 = vst [vmem:[#allocation2 + $0x108] sm:$0xff] %v2154_v39  ;;  %v1628_v38 = vmax.f32 %v18145_v50, %v1579_v63  ;;  %v1487_v21 = vadd.f32 %v18222_v2, %v1486_v30  ;;  %v2014_v35 = vadd.f32 %v18222_v2, %v2013_v16 }
 0x237   :  { %v15087_v26 = vpop.f32.mrf.mxu0  ;;  %v15203_v48 = vpop.f32.mrf.mxu1 }
 0x238   :  { %v2155_v15 = vmax.f32 %v1628_v38, %v2106_v36  ;;  %v1580_v41 = vmax.f32 %v1487_v21, 0.0  ;;  %v2107_v61 = vmax.f32 %v2014_v35, 0.0 }
 0x239   :  { %v1491_v57 = vpop.f32.mrf.mxu0  ;;  %v2018_v18 = vpop.f32.mrf.mxu1 }
 0x23a   :  { %2204 = vst [vmem:[#allocation2 + $0x110] sm:$0xff] %v2155_v15  ;;  %v1629_v20 = vmax.f32 %v18149_v6, %v1580_v41  ;;  %v1492_v7 = vadd.f32 %v18222_v2, %v1491_v57  ;;  %v2019_v13 = vadd.f32 %v18222_v2, %v2018_v18 }
 0x23b   :  { %v15090_v40 = vpop.f32.mrf.mxu0  ;;  %v15206_v50 = vpop.f32.mrf.mxu1 }
 0x23c   :  { %v2156_v28 = vmax.f32 %v1629_v20, %v2107_v61  ;;  %v1581_v53 = vmax.f32 %v1492_v7, 0.0  ;;  %v2108_v11 = vmax.f32 %v2019_v13, 0.0 }
 0x23d   :  { %v1494_v44 = vpop.f32.mrf.mxu0  ;;  %v2021_v59 = vpop.f32.mrf.mxu1 }
 0x23e   :  { %2205 = vst [vmem:[#allocation2 + $0x118] sm:$0xff] %v2156_v28  ;;  %v1630_v0 = vmax.f32 %v18163_v33, %v1581_v53  ;;  %v1495_v55 = vadd.f32 %v18222_v2, %v1494_v44  ;;  %v2022_v45 = vadd.f32 %v18222_v2, %v2021_v59 }
 0x23f   :  { %v15091_v6 = vpop.f32.mrf.mxu0  ;;  %v15207_v46 = vpop.f32.mrf.mxu1 }
 0x240   :  { %v2157_v49 = vmax.f32 %v1630_v0, %v2108_v11  ;;  %v1582_v56 = vmax.f32 %v1495_v55, 0.0  ;;  %v2109_v1 = vmax.f32 %v2022_v45, 0.0 }
 0x241   :  { %v1499_v4 = vpop.f32.mrf.mxu0  ;;  %v2026_v24 = vpop.f32.mrf.mxu1 }
 0x242   :  { %2206 = vst [vmem:[#allocation2 + $0x120] sm:$0xff] %v2157_v49  ;;  %v1631_v32 = vmax.f32 %v18167_v54, %v1582_v56  ;;  %v1500_v17 = vadd.f32 %v18222_v2, %v1499_v4  ;;  %v2027_v42 = vadd.f32 %v18222_v2, %v2026_v24 }
 0x243   :  { %v15094_v5 = vpop.f32.mrf.mxu0  ;;  %v15210_v33 = vpop.f32.mrf.mxu1 }
 0x244   :  { %v2158_v12 = vmax.f32 %v1631_v32, %v2109_v1  ;;  %v1583_v52 = vmax.f32 %v1500_v17, 0.0  ;;  %v2110_v29 = vmax.f32 %v2027_v42, 0.0 }
 0x245   :  { %v1502_v60 = vpop.f32.mrf.mxu0  ;;  %v2029_v47 = vpop.f32.mrf.mxu1 }
 0x246   :  { %2207 = vst [vmem:[#allocation2 + $0x128] sm:$0xff] %v2158_v12  ;;  %v1632_v9 = vmax.f32 %v18181_v19, %v1583_v52  ;;  %v1503_v23 = vadd.f32 %v18222_v2, %v1502_v60  ;;  %v2030_v14 = vadd.f32 %v18222_v2, %v2029_v47  ;;  %v21704_v60 = vld [vmem:[#allocation8_spill] sm:$0xff] }
 0x247   :  { %v15095_v54 = vpop.f32.mrf.mxu0  ;;  %v15211_v25 = vpop.f32.mrf.mxu1 }
 0x248   :  { %v2159_v58 = vmax.f32 %v1632_v9, %v2110_v29  ;;  %v1584_v37 = vmax.f32 %v1503_v23, 0.0  ;;  %v2111_v27 = vmax.f32 %v2030_v14, 0.0 }
 0x249   :  { %v1507_v51 = vpop.f32.mrf.mxu0  ;;  %v2034_v22 = vpop.f32.mrf.mxu1 }
 0x24a   :  { %2208 = vst [vmem:[#allocation2 + $0x130] sm:$0xff] %v2159_v58  ;;  %v1633_v3 = vmax.f32 %v18185_v43, %v1584_v37  ;;  %v1508_v19 = vadd.f32 %v18401_v8, %v1507_v51  ;;  %v2035_v39 = vadd.f32 %v18401_v8, %v2034_v22  ;;  %v21705_v51 = vld [vmem:[#allocation9_spill] sm:$0xff] }
 0x24b   :  { %v15098_v2 = vpop.f32.mrf.mxu0  ;;  %v15214_v63 = vpop.f32.mrf.mxu1 }
 0x24c   :  { %v2160_v36 = vmax.f32 %v1633_v3, %v2111_v27  ;;  %v1585_v30 = vmax.f32 %v1508_v19, 0.0  ;;  %v2112_v16 = vmax.f32 %v2035_v39, 0.0 }
 0x24d   :  { %v1510_v38 = vpop.f32.mrf.mxu0  ;;  %v2037_v21 = vpop.f32.mrf.mxu1 }
 0x24e   :  { %2209 = vst [vmem:[#allocation2 + $0x138] sm:$0xff] %v2160_v36  ;;  %v1634_v43 = vmax.f32 %v18199_v10, %v1585_v30  ;;  %v1511_v35 = vadd.f32 %v18401_v8, %v1510_v38  ;;  %v2038_v26 = vadd.f32 %v18401_v8, %v2037_v21  ;;  %v21706_v21 = vld [vmem:[#allocation10_spill] sm:$0xff] }
 0x24f   :  { %v15099_v48 = vpop.f32.mrf.mxu0  ;;  %v15215_v15 = vpop.f32.mrf.mxu1 }
 0x250   :  { %v2161_v41 = vmax.f32 %v1634_v43, %v2112_v16  ;;  %v1586_v57 = vmax.f32 %v1511_v35, 0.0  ;;  %v2113_v7 = vmax.f32 %v2038_v26, 0.0 }
 0x251   :  { %v1515_v18 = vpop.f32.mrf.mxu0  ;;  %v2042_v20 = vpop.f32.mrf.mxu1 }
 0x252   :  { %2210 = vst [vmem:[#allocation2 + $0x140] sm:$0xff] %v2161_v41  ;;  %v1635_v61 = vmax.f32 %v18203_v34, %v1586_v57  ;;  %v1516_v13 = vadd.f32 %v18401_v8, %v1515_v18  ;;  %v2043_v40 = vadd.f32 %v18401_v8, %v2042_v20 }
 0x253   :  { %v15102_v50 = vpop.f32.mrf.mxu0  ;;  %v15218_v10 = vpop.f32.mrf.mxu1 }
 0x254   :  { %v2162_v28 = vmax.f32 %v1635_v61, %v2113_v7  ;;  %v1587_v53 = vmax.f32 %v1516_v13, 0.0  ;;  %v2114_v11 = vmax.f32 %v2043_v40, 0.0  ;;  %v21707_v61 = vld [vmem:[#allocation11_spill] sm:$0xff] }
 0x255   :  { %v1518_v44 = vpop.f32.mrf.mxu0  ;;  %v2045_v59 = vpop.f32.mrf.mxu1 }
 0x256   :  { %2211 = vst [vmem:[#allocation2 + $0x148] sm:$0xff] %v2162_v28  ;;  %v1636_v0 = vmax.f32 %v18217_v62, %v1587_v53  ;;  %v1519_v55 = vadd.f32 %v18401_v8, %v1518_v44  ;;  %v2046_v45 = vadd.f32 %v18401_v8, %v2045_v59 }
 0x257   :  { %v15103_v34 = vpop.f32.mrf.mxu0  ;;  %v15219_v6 = vpop.f32.mrf.mxu1 }
 0x258   :  { %v2163_v46 = vmax.f32 %v1636_v0, %v2114_v11  ;;  %v1588_v49 = vmax.f32 %v1519_v55, 0.0  ;;  %v2115_v32 = vmax.f32 %v2046_v45, 0.0  ;;  %v21708_v55 = vld [vmem:[#allocation12_spill] sm:$0xff] }
 0x259   :  { %v1523_v56 = vpop.f32.mrf.mxu0  ;;  %v2050_v4 = vpop.f32.mrf.mxu1 }
 0x25a   :  { %2212 = vst [vmem:[#allocation2 + $0x150] sm:$0xff] %v2163_v46  ;;  %v1637_v24 = vmax.f32 %v18226_v31, %v1588_v49  ;;  %v1524_v1 = vadd.f32 %v18401_v8, %v1523_v56  ;;  %v2051_v17 = vadd.f32 %v18401_v8, %v2050_v4 }
 0x25b   :  { %v15106_v42 = vpop.f32.mrf.mxu0  ;;  %v15222_v62 = vpop.f32.mrf.mxu1 }
 0x25c   :  { %v2164_v5 = vmax.f32 %v1637_v24, %v2115_v32  ;;  %v1589_v33 = vmax.f32 %v1524_v1, 0.0  ;;  %v2116_v12 = vmax.f32 %v2051_v17, 0.0 }
 0x25d   :  { %v1526_v52 = vpop.f32.mrf.mxu0  ;;  %v2053_v29 = vpop.f32.mrf.mxu1 }
 0x25e   :  { %2213 = vst [vmem:[#allocation2 + $0x158] sm:$0xff] %v2164_v5  ;;  %v1638_v47 = vmax.f32 %v21704_v60, %v1589_v33  ;;  %v1527_v9 = vadd.f32 %v18401_v8, %v1526_v52  ;;  %v2054_v23 = vadd.f32 %v18401_v8, %v2053_v29 }
 0x25f   :  { %v15107_v31 = vpop.f32.mrf.mxu0  ;;  %v15223_v14 = vpop.f32.mrf.mxu1 }
 0x260   :  { %v2165_v54 = vmax.f32 %v1638_v47, %v2116_v12  ;;  %v1590_v25 = vmax.f32 %v1527_v9, 0.0  ;;  %v2117_v3 = vmax.f32 %v2054_v23, 0.0 }
 0x261   :  { %v1531_v58 = vpop.f32.mrf.mxu0  ;;  %v2058_v37 = vpop.f32.mrf.mxu1 }
 0x262   :  { %2214 = vst [vmem:[#allocation2 + $0x160] sm:$0xff] %v2165_v54  ;;  %v1639_v22 = vmax.f32 %v21705_v51, %v1590_v25  ;;  %v1532_v27 = vadd.f32 %v18401_v8, %v1531_v58  ;;  %v2059_v19 = vadd.f32 %v18401_v8, %v2058_v37 }
 0x263   :  { %v15110_v39 = vpop.f32.mrf.mxu0  ;;  %v15226_v2 = vpop.f32.mrf.mxu1 }
 0x264   :  { %v2166_v63 = vmax.f32 %v1639_v22, %v2117_v3  ;;  %v1591_v36 = vmax.f32 %v1532_v27, 0.0  ;;  %v2118_v30 = vmax.f32 %v2059_v19, 0.0 }
 0x265   :  { %v1534_v16 = vpop.f32.mrf.mxu0  ;;  %v2061_v38 = vpop.f32.mrf.mxu1 }
 0x266   :  { %2215 = vst [vmem:[#allocation2 + $0x168] sm:$0xff] %v2166_v63  ;;  %v1640_v43 = vmax.f32 %v21706_v21, %v1591_v36  ;;  %v1535_v35 = vadd.f32 %v18401_v8, %v1534_v16  ;;  %v2062_v26 = vadd.f32 %v18401_v8, %v2061_v38 }
 0x267   :  { %v15111_v48 = vpop.f32.mrf.mxu0  ;;  %v15227_v15 = vpop.f32.mrf.mxu1 }
 0x268   :  { %v2167_v41 = vmax.f32 %v1640_v43, %v2118_v30  ;;  %v1592_v57 = vmax.f32 %v1535_v35, 0.0  ;;  %v2119_v13 = vmax.f32 %v2062_v26, 0.0 }
 0x269   :  { %v1539_v18 = vpop.f32.mrf.mxu0  ;;  %v2066_v20 = vpop.f32.mrf.mxu1 }
 0x26a   :  { %2216 = vst [vmem:[#allocation2 + $0x170] sm:$0xff] %v2167_v41  ;;  %v1641_v7 = vmax.f32 %v21707_v61, %v1592_v57  ;;  %v1540_v40 = vadd.f32 %v18401_v8, %v1539_v18  ;;  %v2067_v50 = vadd.f32 %v18401_v8, %v2066_v20 }
 0x26b   :  { %v15114_v10 = vpop.f32.mrf.mxu0  ;;  %v15230_v28 = vpop.f32.mrf.mxu1 }
 0x26c   :  { %v2168_v53 = vmax.f32 %v1641_v7, %v2119_v13  ;;  %v1593_v11 = vmax.f32 %v1540_v40, 0.0  ;;  %v2120_v44 = vmax.f32 %v2067_v50, 0.0 }
 0x26d   :  { %v1542_v59 = vpop.f32.mrf.mxu0  ;;  %v2069_v0 = vpop.f32.mrf.mxu1 }
 0x26e   :  { %2217 = vst [vmem:[#allocation2 + $0x178] sm:$0xff] %v2168_v53  ;;  %v1642_v45 = vmax.f32 %v21708_v55, %v1593_v11 }
 0x26f   :  { %v15115_v34 = vpop.f32.mrf.mxu0  ;;  %v15231_v6 = vpop.f32.mrf.mxu1 }
 0x270   :  { %v2169_v46 = vmax.f32 %v1642_v45, %v2120_v44 }
 0x272   :  { %2218 = vst [vmem:[#allocation2 + $0x180] sm:$0xff] %v2169_v46 }
 0x273 LB: > { %v16386_v8 = vld [vmem:[%s21686_s3 + $0x78] sm:$0xff]   ;;  %v17450_v49 = vmov 0.0   ;;  %v16388_v4 = vld [vmem:[%s21686_s3 + $0x70] sm:$0xff]   ;;  %vm17451_vm1 = vmmov 0   ;;  %v16390_v32 = vld [vmem:[%s21686_s3 + $0x68] sm:$0xff]   ;;  %s2225_s30 = smul.u32 14, %s17442_s2  ;;  %s17442_s2 = sphi %s18430_s2, %s2224_s2  }
 0x274   : > { %15232 = vmatprep.subr.bf16.mxu0 %v17450_v49  ;;  %15252 = vmatprep.subr.bf16.mxu1 %v17450_v49  ;;  %v16387_v56 = vld [vmem:[%s21686_s3 + $0x38] sm:$0xff]   ;;  %v16389_v24 = vld [vmem:[%s21686_s3 + $0x30] sm:$0xff]   ;;  %v16391_v1 = vld [vmem:[%s21686_s3 + $0x28] sm:$0xff]   ;;  %s5045_s1 = smul.u32 10, %s17442_s2  ;;  %s2224_s2 = sadd.s32 1, %s17442_s2  }
 0x275   : > { %15233 = vmatpush3.bf16.msra.mxu0 %v16386_v8  ;;  %15248 = vmatprep.mubr.msk.bf16.mxu0 %vm17451_vm1, %v17450_v49  ;;  %v16392_v17 = vld [vmem:[%s21686_s3 + $0x60] sm:$0xff]   ;;  %v16394_v62 = vld [vmem:[%s21686_s3 + $0x58] sm:$0xff]   ;;  %s18480_s18 = scalar_lea.vmem [#allocation2], %s2225_s30  ;;  %v16396_v29 = vld [vmem:[%s21686_s3 + $0x50] sm:$0xff]   ;;  %p2221_p0 = scmp.ge.s32.totalorder %s2224_s2, 10  }
 0x276   : > { %15253 = vmatpush3.bf16.msra.mxu1 %v16387_v56  ;;  %15234 = vmatprep.subr.bf16.mxu0 %v17450_v49  ;;  %v16393_v42 = vld [vmem:[%s21686_s3 + $0x20] sm:$0xff]   ;;  %v16395_v5 = vld [vmem:[%s21686_s3 + $0x18] sm:$0xff]   ;;  %v16397_v60 = vld [vmem:[%s21686_s3 + $0x10] sm:$0xff]   ;;  %s5046_s19 = scalar_lea.vmem [#allocation3], %s5045_s1  ;;  %s19366_s20 = smov (%p2221_p0), 0  }
 0x277   : > { %15254 = vmatprep.subr.bf16.mxu1 %v17450_v49  ;;  %15268 = vmatprep.mubr.msk.bf16.mxu1 %vm17451_vm1, %v17450_v49  ;;  %v16398_v47 = vld [vmem:[%s21686_s3 + $0x48] sm:$0xff]   ;;  %v16400_v54 = vld [vmem:[%s21686_s3 + $0x40] sm:$0xff]   ;;  %v16402_v37 = vld [vmem:[%s21686_s3 + $0xb8] sm:$0xff]  }
 0x278   : > { %v16399_v23 = vld [vmem:[%s21686_s3 + $0x8] sm:$0xff]   ;;  %v16401_v25 = vld [vmem:[%s21686_s3] sm:$0xff]   ;;  %v16403_v51 = vld [vmem:[%s21686_s3 + $0xf8] sm:$0xff]  }
 0x279   : > { %15235 = vmatpush3.bf16.msra.mxu0 %v16388_v4  ;;  %v2227_v33 = vld [vmem:[%s18480_s18] sm:$0xff]  ;;  %v2228_v12 = vld [vmem:[%s18480_s18 + $0x8] sm:$0x3f]  ;;  %v16404_v22 = vld [vmem:[%s21686_s3 + $0xb0] sm:$0xff]  }
 0x27a   : > { %15255 = vmatpush3.bf16.msra.mxu1 %v16389_v24  ;;  %15236 = vmatprep.subr.bf16.mxu0 %v17450_v49  ;;  %v18484_v52 = vpack.c.bf16 %v2228_v12, %v2227_v33  ;;  %v16405_v3 = vld [vmem:[%s21686_s3 + $0xf0] sm:$0xff]   ;;  %v16406_v27 = vld [vmem:[%s21686_s3 + $0xa8] sm:$0xff]   ;;  %v16408_v39 = vld [vmem:[%s21686_s3 + $0xa0] sm:$0xff]  }
 0x27b   : > { %15256 = vmatprep.subr.bf16.mxu1 %v17450_v49  ;;  %v16407_v19 = vld [vmem:[%s21686_s3 + $0xe8] sm:$0xff]   ;;  %v16409_v2 = vld [vmem:[%s21686_s3 + $0xe0] sm:$0xff]   ;;  %v16410_v63 = vld [vmem:[%s21686_s3 + $0x98] sm:$0xff]  }
 0x27c   : > { %v2266_v9 = vshll.u32 %v18484_v52, 16  ;;  %v2264_v31 = vshrl.u32 %v18484_v52, 16  ;;  %v16411_v36 = vld [vmem:[%s21686_s3 + $0xd8] sm:$0xff]   ;;  %v16412_v30 = vld [vmem:[%s21686_s3 + $0x90] sm:$0xff]   ;;  %v16414_v38 = vld [vmem:[%s21686_s3 + $0x88] sm:$0xff]   ;;  %v2467_v15 = vrot.slane %v18484_v52, 1 }
 0x27d   : > { %15237 = vmatpush3.bf16.msra.mxu0 %v16390_v32  ;;  %v16413_v16 = vld [vmem:[%s21686_s3 + $0xd0] sm:$0xff]   ;;  %v16415_v21 = vld [vmem:[%s21686_s3 + $0xc8] sm:$0xff]   ;;  %v16416_v35 = vld [vmem:[%s21686_s3 + $0x80] sm:$0xff]   ;;  %v2689_v6 = vrot.slane %v18484_v52, 2 }
 0x27e   : > { %15257 = vmatpush3.bf16.msra.mxu1 %v16391_v1  ;;  %15238 = vmatprep.subr.bf16.mxu0 %v17450_v49  ;;  %v2268_v14 = vrot.slane %v2266_v9, 1  ;;  %v2577_v43 = vrot.slane %v2264_v31, 1  ;;  %v2578_v26 = vrot.slane %v2266_v9, 2  ;;  %v16417_v48 = vld [vmem:[%s21686_s3 + $0xc0] sm:$0xff]   ;;  %v16418_v41 = vld [vmem:[%s21686_s3 + $0x138] sm:$0xff]   ;;  %v16420_v20 = vld [vmem:[%s21686_s3 + $0x130] sm:$0xff]  }
 0x27f   : > { %15258 = vmatprep.subr.bf16.mxu1 %v17450_v49  ;;  %v16419_v18 = vld [vmem:[%s21686_s3 + $0x178] sm:$0xff]   ;;  %v16421_v61 = vld [vmem:[%s21686_s3 + $0x170] sm:$0xff]   ;;  %v16422_v7 = vld [vmem:[%s21686_s3 + $0x128] sm:$0xff]  }
 0x280   : > { %v2269_v58 = vor.u32 %v2268_v14, %v2264_v31  ;;  %v2579_v57 = vor.u32 %v2578_v26, %v2577_v43  ;;  %v16423_v13 = vld [vmem:[%s21686_s3 + $0x168] sm:$0xff]   ;;  %v16424_v40 = vld [vmem:[%s21686_s3 + $0x120] sm:$0xff]   ;;  %v16426_v10 = vld [vmem:[%s21686_s3 + $0x118] sm:$0xff]  }
 0x281   : > { %15239 = vmatpush3.bf16.msra.mxu0 %v16392_v17  ;;  %v16425_v50 = vld [vmem:[%s21686_s3 + $0x160] sm:$0xff]   ;;  %v16427_v28 = vld [vmem:[%s21686_s3 + $0x158] sm:$0xff]   ;;  %v16428_v53 = vld [vmem:[%s21686_s3 + $0x110] sm:$0xff]  }
 0x282   : > { %15259 = vmatpush3.bf16.msra.mxu1 %v16393_v42  ;;  %15240 = vmatprep.subr.bf16.mxu0 %v17450_v49  ;;  %v16429_v11 = vld [vmem:[%s21686_s3 + $0x150] sm:$0xff]   ;;  %v16430_v44 = vld [vmem:[%s21686_s3 + $0x108] sm:$0xff]   ;;  %v16432_v0 = vld [vmem:[%s21686_s3 + $0x100] sm:$0xff]  }
 0x283   : > { %15260 = vmatprep.subr.bf16.mxu1 %v17450_v49  ;;  %v16431_v59 = vld [vmem:[%s21686_s3 + $0x148] sm:$0xff]   ;;  %v16433_v55 = vld [vmem:[%s21686_s3 + $0x140] sm:$0xff]   ;;  %v12260_v34 = vld [vmem:[%s18480_s18 + $0x16] sm:$0x3f] }
 0x284   : > { %v12259_v45 = vld [vmem:[%s18480_s18 + $0xe] sm:$0xff]  ;;  %v16434_v46 = vld [vmem:[%s21686_s3 + $0x1b8] sm:$0xff]   ;;  %v16440_v17 = vld [vmem:[%s21686_s3 + $0x1a0] sm:$0xff]  }
 0x285   : > { %15241 = vmatpush3.bf16.msra.mxu0 %v16394_v62  ;;  %v18660_v8 = vpack.c.bf16 %v12260_v34, %v12259_v45  ;;  %v16435_v56 = vld [vmem:[%s21686_s3 + $0x1f8] sm:$0xff]   ;;  %v16436_v4 = vld [vmem:[%s21686_s3 + $0x1b0] sm:$0xff]   ;;  %v16438_v32 = vld [vmem:[%s21686_s3 + $0x1a8] sm:$0xff]  }
 0x286   : > { %15261 = vmatpush3.bf16.msra.mxu1 %v16395_v5  ;;  %15242 = vmatprep.subr.bf16.mxu0 %v17450_v49  ;;  %v16437_v24 = vld [vmem:[%s21686_s3 + $0x1f0] sm:$0xff]   ;;  %v16439_v1 = vld [vmem:[%s21686_s3 + $0x1e8] sm:$0xff]   ;;  %v16441_v42 = vld [vmem:[%s21686_s3 + $0x1e0] sm:$0xff]  }
 0x287   : > { %15262 = vmatprep.subr.bf16.mxu1 %v17450_v49  ;;  %v16442_v62 = vld [vmem:[%s21686_s3 + $0x198] sm:$0xff]   ;;  %v16444_v33 = vld [vmem:[%s21686_s3 + $0x190] sm:$0xff]   ;;  %v16449_v31 = vld [vmem:[%s21686_s3 + $0x1c0] sm:$0xff]  }
 0x288   : > { %v16443_v5 = vld [vmem:[%s21686_s3 + $0x1d8] sm:$0xff]   ;;  %v16445_v12 = vld [vmem:[%s21686_s3 + $0x1d0] sm:$0xff]   ;;  %v16464_v43 = vld [vmem:[%s21686_s3 + $0x200] sm:$0xff]  }
 0x289   : > { %15243 = vmatpush3.bf16.msra.mxu0 %v16396_v29  ;;  %v16446_v29 = vld [vmem:[%s21686_s3 + $0x188] sm:$0xff]   ;;  %v16480_v45 = vld [vmem:[%s21686_s3 + $0x280] sm:$0xff]  }
 0x28a   : > { %15263 = vmatpush3.bf16.msra.mxu1 %v16397_v60  ;;  %15244 = vmatprep.subr.bf16.mxu0 %v17450_v49  ;;  %v16447_v60 = vld [vmem:[%s21686_s3 + $0x1c8] sm:$0xff]  }
 0x28b   : > { %15264 = vmatprep.subr.bf16.mxu1 %v17450_v49 }
 0x28d   : > { %15245 = vmatpush3.bf16.msra.mxu0 %v16398_v47  ;;  %v2914_v47 = vshrl.u32 %v18660_v8, 16 }
 0x28e   : > { %15265 = vmatpush3.bf16.msra.mxu1 %v16399_v23  ;;  %15246 = vmatprep.subr.bf16.mxu0 %v17450_v49  ;;  %v16448_v23 = vld [vmem:[%s21686_s3 + $0x180] sm:$0xff]  }
 0x28f   : > { %15266 = vmatprep.subr.bf16.mxu1 %v17450_v49 }
 0x291   : > { %15247 = vmatpush3.bf16.msra.mxu0 %v16400_v54  ;;  %v16450_v54 = vld [vmem:[%s21686_s3 + $0x238] sm:$0xff]  }
 0x292   : > { %15267 = vmatpush3.bf16.msra.mxu1 %v16401_v25  ;;  %15272 = vmatprep.subr.bf16.mxu0 %v17450_v49  ;;  %v3030_v25 = vrot.slane %v18660_v8, 1 }
 0x293   : > { %15292 = vmatprep.subr.bf16.mxu1 %v17450_v49 }
 0x294   : > { %15249 = vmatmul.mubr.bf16.vlgmr.msra.gmra.mxu0 %v2269_v58  ;;  %v16451_v58 = vld [vmem:[%s21686_s3 + $0x278] sm:$0xff]  }
 0x295   : > { %15269 = vmatmul.mubr.bf16.vlgmr.msra.gmra.mxu1 %v18484_v52  ;;  %15273 = vmatpush3.bf16.msra.mxu0 %v16402_v37  ;;  %v2916_v52 = vshll.u32 %v18660_v8, 16  ;;  %v16452_v37 = vld [vmem:[%s21686_s3 + $0x230] sm:$0xff]  }
 0x296   : > { %15293 = vmatpush3.bf16.msra.mxu1 %v16403_v51  ;;  %15274 = vmatprep.subr.bf16.mxu0 %v17450_v49  ;;  %v16453_v51 = vld [vmem:[%s21686_s3 + $0x270] sm:$0xff]  }
 0x297   : > { %15294 = vmatprep.subr.bf16.mxu1 %v17450_v49  ;;  %15288 = vmatprep.mubr.msk.bf16.mxu0 %vm17451_vm1, %v17450_v49  ;;  %v2918_v9 = vrot.slane %v2916_v52, 1 }
 0x298   : > { %15308 = vmatprep.mubr.msk.bf16.mxu1 %vm17451_vm1, %v17450_v49 }
 0x299   : > { %15275 = vmatpush3.bf16.msra.mxu0 %v16404_v22  ;;  %v2919_v14 = vor.u32 %v2918_v9, %v2914_v47  ;;  %v16454_v22 = vld [vmem:[%s21686_s3 + $0x228] sm:$0xff]  }
 0x29a   : > { %15295 = vmatpush3.bf16.msra.mxu1 %v16405_v3  ;;  %15276 = vmatprep.subr.bf16.mxu0 %v17450_v49  ;;  %v16455_v3 = vld [vmem:[%s21686_s3 + $0x268] sm:$0xff]  }
 0x29b   : > { %15296 = vmatprep.subr.bf16.mxu1 %v17450_v49 }
 0x29d   : > { %15277 = vmatpush3.bf16.msra.mxu0 %v16406_v27  ;;  %v16456_v27 = vld [vmem:[%s21686_s3 + $0x220] sm:$0xff]  }
 0x29e   : > { %15297 = vmatpush3.bf16.msra.mxu1 %v16407_v19  ;;  %15278 = vmatprep.subr.bf16.mxu0 %v17450_v49  ;;  %v16457_v19 = vld [vmem:[%s21686_s3 + $0x260] sm:$0xff]  }
 0x29f   : > { %15298 = vmatprep.subr.bf16.mxu1 %v17450_v49 }
 0x2a1   : > { %15279 = vmatpush3.bf16.msra.mxu0 %v16408_v39  ;;  %v16458_v39 = vld [vmem:[%s21686_s3 + $0x218] sm:$0xff]  }
 0x2a2   : > { %15299 = vmatpush3.bf16.msra.mxu1 %v16409_v2  ;;  %15280 = vmatprep.subr.bf16.mxu0 %v17450_v49  ;;  %v16459_v2 = vld [vmem:[%s21686_s3 + $0x258] sm:$0xff]  }
 0x2a3   : > { %15300 = vmatprep.subr.bf16.mxu1 %v17450_v49 }
 0x2a5   : > { %15281 = vmatpush3.bf16.msra.mxu0 %v16410_v63  ;;  %v16460_v63 = vld [vmem:[%s21686_s3 + $0x210] sm:$0xff]  }
 0x2a6   : > { %15301 = vmatpush3.bf16.msra.mxu1 %v16411_v36  ;;  %15282 = vmatprep.subr.bf16.mxu0 %v17450_v49  ;;  %v16461_v36 = vld [vmem:[%s21686_s3 + $0x250] sm:$0xff]  }
 0x2a7   : > { %15302 = vmatprep.subr.bf16.mxu1 %v17450_v49 }
 0x2a9   : > { %15283 = vmatpush3.bf16.msra.mxu0 %v16412_v30  ;;  %v16462_v30 = vld [vmem:[%s21686_s3 + $0x208] sm:$0xff]  }
 0x2aa   : > { %15303 = vmatpush3.bf16.msra.mxu1 %v16413_v16  ;;  %15284 = vmatprep.subr.bf16.mxu0 %v17450_v49  ;;  %v3140_v16 = vrot.slane %v2914_v47, 1  ;;  %v16496_v47 = vld [vmem:[%s21686_s3 + $0x300] sm:$0xff]  }
 0x2ab   : > { %15304 = vmatprep.subr.bf16.mxu1 %v17450_v49 }
 0x2ad   : > { %15285 = vmatpush3.bf16.msra.mxu0 %v16414_v38  ;;  %v16463_v38 = vld [vmem:[%s21686_s3 + $0x248] sm:$0xff]  }
 0x2ae   : > { %15305 = vmatpush3.bf16.msra.mxu1 %v16415_v21  ;;  %15286 = vmatprep.subr.bf16.mxu0 %v17450_v49  ;;  %v3141_v21 = vrot.slane %v2916_v52, 2  ;;  %v16493_v52 = vld [vmem:[%s21686_s3 + $0x350] sm:$0xff]  }
 0x2af   : > { %15306 = vmatprep.subr.bf16.mxu1 %v17450_v49 }
 0x2b0   : > { %v3142_v26 = vor.u32 %v3141_v21, %v3140_v16 }
 0x2b1   : > { %15287 = vmatpush3.bf16.msra.mxu0 %v16416_v35  ;;  %v16465_v35 = vld [vmem:[%s21686_s3 + $0x240] sm:$0xff]  }
 0x2b2   : > { %15307 = vmatpush3.bf16.msra.mxu1 %v16417_v48  ;;  %15312 = vmatprep.subr.bf16.mxu0 %v17450_v49  ;;  %v16466_v48 = vld [vmem:[%s21686_s3 + $0x2b8] sm:$0xff]  }
 0x2b3   : > { %15332 = vmatprep.subr.bf16.mxu1 %v17450_v49 }
 0x2b4   : > { %15289 = vmatmul.mubr.bf16.vlgmr.msra.gmra.mxu0 %v2467_v15  ;;  %v3252_v15 = vrot.slane %v18660_v8, 2 }
 0x2b5   : > { %15313 = vmatpush3.bf16.msra.mxu0 %v16418_v41  ;;  %15309 = vmatmul.mubr.bf16.vlgmr.msra.gmra.mxu1 %v2579_v57  ;;  %v16467_v41 = vld [vmem:[%s21686_s3 + $0x2f8] sm:$0xff]   ;;  %v16468_v57 = vld [vmem:[%s21686_s3 + $0x2b0] sm:$0xff]  }
 0x2b6   : > { %15333 = vmatpush3.bf16.msra.mxu1 %v16419_v18  ;;  %15314 = vmatprep.subr.bf16.mxu0 %v17450_v49  ;;  %v16469_v18 = vld [vmem:[%s21686_s3 + $0x2f0] sm:$0xff]  }
 0x2b7   : > { %15334 = vmatprep.subr.bf16.mxu1 %v17450_v49  ;;  %15328 = vmatprep.mubr.msk.bf16.mxu0 %vm17451_vm1, %v17450_v49 }
 0x2b8   : > { %15348 = vmatprep.mubr.msk.bf16.mxu1 %vm17451_vm1, %v17450_v49 }
 0x2b9   : > { %15315 = vmatpush3.bf16.msra.mxu0 %v16420_v20  ;;  %v16470_v20 = vld [vmem:[%s21686_s3 + $0x2a8] sm:$0xff]  }
 0x2ba   : > { %15335 = vmatpush3.bf16.msra.mxu1 %v16421_v61  ;;  %15316 = vmatprep.subr.bf16.mxu0 %v17450_v49  ;;  %v16471_v61 = vld [vmem:[%s21686_s3 + $0x2e8] sm:$0xff]  }
 0x2bb   : > { %15336 = vmatprep.subr.bf16.mxu1 %v17450_v49 }
 0x2bd   : > { %15317 = vmatpush3.bf16.msra.mxu0 %v16422_v7  ;;  %v16472_v7 = vld [vmem:[%s21686_s3 + $0x2a0] sm:$0xff]  }
 0x2be   : > { %15337 = vmatpush3.bf16.msra.mxu1 %v16423_v13  ;;  %15318 = vmatprep.subr.bf16.mxu0 %v17450_v49  ;;  %v16473_v13 = vld [vmem:[%s21686_s3 + $0x2e0] sm:$0xff]  }
 0x2bf   : > { %15338 = vmatprep.subr.bf16.mxu1 %v17450_v49 }
 0x2c1   : > { %15319 = vmatpush3.bf16.msra.mxu0 %v16424_v40  ;;  %v16474_v40 = vld [vmem:[%s21686_s3 + $0x298] sm:$0xff]  }
 0x2c2   : > { %15339 = vmatpush3.bf16.msra.mxu1 %v16425_v50  ;;  %15320 = vmatprep.subr.bf16.mxu0 %v17450_v49  ;;  %v16475_v50 = vld [vmem:[%s21686_s3 + $0x2d8] sm:$0xff]  }
 0x2c3   : > { %15340 = vmatprep.subr.bf16.mxu1 %v17450_v49 }
 0x2c5   : > { %15321 = vmatpush3.bf16.msra.mxu0 %v16426_v10  ;;  %v12381_v10 = vld [vmem:[%s18480_s18 + $0x1c] sm:$0xff] }
 0x2c6   : > { %15341 = vmatpush3.bf16.msra.mxu1 %v16427_v28  ;;  %15322 = vmatprep.subr.bf16.mxu0 %v17450_v49  ;;  %v12382_v28 = vld [vmem:[%s18480_s18 + $0x24] sm:$0x3f] }
 0x2c7   : > { %15342 = vmatprep.subr.bf16.mxu1 %v17450_v49 }
 0x2c9   : > { %15323 = vmatpush3.bf16.msra.mxu0 %v16428_v53  ;;  %v16476_v53 = vld [vmem:[%s21686_s3 + $0x290] sm:$0xff]  }
 0x2ca   : > { %15343 = vmatpush3.bf16.msra.mxu1 %v16429_v11  ;;  %15324 = vmatprep.subr.bf16.mxu0 %v17450_v49  ;;  %v18849_v11 = vpack.c.bf16 %v12382_v28, %v12381_v10  ;;  %v16515_v28 = vld [vmem:[%s21686_s3 + $0x478] sm:$0xff]  }
 0x2cb   : > { %15344 = vmatprep.subr.bf16.mxu1 %v17450_v49 }
 0x2cc   : > { %v3477_v34 = vshrl.u32 %v18849_v11, 16 }
 0x2cd   : > { %15325 = vmatpush3.bf16.msra.mxu0 %v16430_v44  ;;  %v16477_v44 = vld [vmem:[%s21686_s3 + $0x2d0] sm:$0xff]  }
 0x2ce   : > { %15345 = vmatpush3.bf16.msra.mxu1 %v16431_v59  ;;  %15326 = vmatprep.subr.bf16.mxu0 %v17450_v49  ;;  %v16478_v59 = vld [vmem:[%s21686_s3 + $0x288] sm:$0xff]   ;;  %v3703_v9 = vrot.slane %v3477_v34, 1 }
 0x2cf   : > { %15346 = vmatprep.subr.bf16.mxu1 %v17450_v49 }
 0x2d1   : > { %15327 = vmatpush3.bf16.msra.mxu0 %v16432_v0  ;;  %v3479_v0 = vshll.u32 %v18849_v11, 16 }
 0x2d2   : > { %15347 = vmatpush3.bf16.msra.mxu1 %v16433_v55  ;;  %15352 = vmatprep.subr.bf16.mxu0 %v17450_v49  ;;  %v16479_v55 = vld [vmem:[%s21686_s3 + $0x2c8] sm:$0xff]  }
 0x2d3   : > { %15372 = vmatprep.subr.bf16.mxu1 %v17450_v49 }
 0x2d4   : > { %15329 = vmatmul.mubr.bf16.vlgmr.msra.gmra.mxu0 %v2689_v6  ;;  %v3481_v6 = vrot.slane %v3479_v0, 1 }
 0x2d5   : > { %15353 = vmatpush3.bf16.msra.mxu0 %v16434_v46  ;;  %15349 = vmatmul.mubr.bf16.vlgmr.msra.gmra.mxu1 %v18660_v8  ;;  %v16481_v46 = vld [vmem:[%s21686_s3 + $0x2c0] sm:$0xff]   ;;  %v16482_v8 = vld [vmem:[%s21686_s3 + $0x338] sm:$0xff]  }
 0x2d6   : > { %15373 = vmatpush3.bf16.msra.mxu1 %v16435_v56  ;;  %15354 = vmatprep.subr.bf16.mxu0 %v17450_v49  ;;  %v3482_v56 = vor.u32 %v3481_v6, %v3477_v34 }
 0x2d7   : > { %15374 = vmatprep.subr.bf16.mxu1 %v17450_v49  ;;  %15368 = vmatprep.mubr.msk.bf16.mxu0 %vm17451_vm1, %v17450_v49 }
 0x2d8   : > { %15388 = vmatprep.mubr.msk.bf16.mxu1 %vm17451_vm1, %v17450_v49 }
 0x2d9   : > { %15355 = vmatpush3.bf16.msra.mxu0 %v16436_v4  ;;  %v16483_v4 = vld [vmem:[%s21686_s3 + $0x378] sm:$0xff]  }
 0x2da   : > { %15375 = vmatpush3.bf16.msra.mxu1 %v16437_v24  ;;  %15356 = vmatprep.subr.bf16.mxu0 %v17450_v49  ;;  %v16484_v24 = vld [vmem:[%s21686_s3 + $0x330] sm:$0xff]  }
 0x2db   : > { %15376 = vmatprep.subr.bf16.mxu1 %v17450_v49 }
 0x2dd   : > { %15357 = vmatpush3.bf16.msra.mxu0 %v16438_v32  ;;  %v16485_v32 = vld [vmem:[%s21686_s3 + $0x370] sm:$0xff]  }
 0x2de   : > { %15377 = vmatpush3.bf16.msra.mxu1 %v16439_v1  ;;  %15358 = vmatprep.subr.bf16.mxu0 %v17450_v49  ;;  %v16486_v1 = vld [vmem:[%s21686_s3 + $0x328] sm:$0xff]  }
 0x2df   : > { %15378 = vmatprep.subr.bf16.mxu1 %v17450_v49 }
 0x2e1   : > { %15359 = vmatpush3.bf16.msra.mxu0 %v16440_v17  ;;  %v16487_v17 = vld [vmem:[%s21686_s3 + $0x368] sm:$0xff]  }
 0x2e2   : > { %15379 = vmatpush3.bf16.msra.mxu1 %v16441_v42  ;;  %15360 = vmatprep.subr.bf16.mxu0 %v17450_v49  ;;  %v16488_v42 = vld [vmem:[%s21686_s3 + $0x320] sm:$0xff]  }
 0x2e3   : > { %15380 = vmatprep.subr.bf16.mxu1 %v17450_v49 }
 0x2e5   : > { %15361 = vmatpush3.bf16.msra.mxu0 %v16442_v62  ;;  %v16489_v62 = vld [vmem:[%s21686_s3 + $0x360] sm:$0xff]  }
 0x2e6   : > { %15381 = vmatpush3.bf16.msra.mxu1 %v16443_v5  ;;  %15362 = vmatprep.subr.bf16.mxu0 %v17450_v49  ;;  %v16490_v5 = vld [vmem:[%s21686_s3 + $0x318] sm:$0xff]  }
 0x2e7   : > { %15382 = vmatprep.subr.bf16.mxu1 %v17450_v49 }
 0x2e9   : > { %15363 = vmatpush3.bf16.msra.mxu0 %v16444_v33  ;;  %v16491_v33 = vld [vmem:[%s21686_s3 + $0x358] sm:$0xff]  }
 0x2ea   : > { %15383 = vmatpush3.bf16.msra.mxu1 %v16445_v12  ;;  %15364 = vmatprep.subr.bf16.mxu0 %v17450_v49  ;;  %v16492_v12 = vld [vmem:[%s21686_s3 + $0x310] sm:$0xff]  }
 0x2eb   : > { %15384 = vmatprep.subr.bf16.mxu1 %v17450_v49 }
 0x2ed   : > { %15365 = vmatpush3.bf16.msra.mxu0 %v16446_v29  ;;  %v16494_v29 = vld [vmem:[%s21686_s3 + $0x308] sm:$0xff]  }
 0x2ee   : > { %15385 = vmatpush3.bf16.msra.mxu1 %v16447_v60  ;;  %15366 = vmatprep.subr.bf16.mxu0 %v17450_v49  ;;  %v16495_v60 = vld [vmem:[%s21686_s3 + $0x348] sm:$0xff]  }
 0x2ef   : > { %15386 = vmatprep.subr.bf16.mxu1 %v17450_v49 }
 0x2f1   : > { %15367 = vmatpush3.bf16.msra.mxu0 %v16448_v23  ;;  %v3704_v23 = vrot.slane %v3479_v0, 2 }
 0x2f2   : > { %15387 = vmatpush3.bf16.msra.mxu1 %v16449_v31  ;;  %15392 = vmatprep.subr.bf16.mxu0 %v17450_v49  ;;  %v16497_v31 = vld [vmem:[%s21686_s3 + $0x340] sm:$0xff]  }
 0x2f3   : > { %15412 = vmatprep.subr.bf16.mxu1 %v17450_v49 }
 0x2f4   : > { %15369 = vmatmul.mubr.bf16.vlgmr.msra.gmra.mxu0 %v2919_v14  ;;  %v3593_v14 = vrot.slane %v18849_v11, 1 }
 0x2f5   : > { %15393 = vmatpush3.bf16.msra.mxu0 %v16450_v54  ;;  %15389 = vmatmul.mubr.bf16.vlgmr.msra.gmra.mxu1 %v3030_v25  ;;  %v16498_v54 = vld [vmem:[%s21686_s3 + $0x3b8] sm:$0xff]   ;;  %v3705_v25 = vor.u32 %v3704_v23, %v3703_v9  ;;  %v16528_v23 = vld [vmem:[%s21686_s3 + $0x400] sm:$0xff]  }
 0x2f6   : > { %15413 = vmatpush3.bf16.msra.mxu1 %v16451_v58  ;;  %15394 = vmatprep.subr.bf16.mxu0 %v17450_v49  ;;  %v16499_v58 = vld [vmem:[%s21686_s3 + $0x3f8] sm:$0xff]  }
 0x2f7   : > { %15414 = vmatprep.subr.bf16.mxu1 %v17450_v49  ;;  %15408 = vmatprep.mubr.msk.bf16.mxu0 %vm17451_vm1, %v17450_v49 }
 0x2f8   : > { %15428 = vmatprep.mubr.msk.bf16.mxu1 %vm17451_vm1, %v17450_v49 }
 0x2f9   : > { %15395 = vmatpush3.bf16.msra.mxu0 %v16452_v37 }
 0x2fa   : > { %15415 = vmatpush3.bf16.msra.mxu1 %v16453_v51  ;;  %15396 = vmatprep.subr.bf16.mxu0 %v17450_v49 }
 0x2fb   : > { %15416 = vmatprep.subr.bf16.mxu1 %v17450_v49 }
 0x2fd   : > { %15397 = vmatpush3.bf16.msra.mxu0 %v16454_v22  ;;  %v16500_v22 = vld [vmem:[%s21686_s3 + $0x3b0] sm:$0xff]  }
 0x2fe   : > { %15417 = vmatpush3.bf16.msra.mxu1 %v16455_v3  ;;  %15398 = vmatprep.subr.bf16.mxu0 %v17450_v49 }
 0x2ff   : > { %15418 = vmatprep.subr.bf16.mxu1 %v17450_v49 }
 0x301   : > { %15399 = vmatpush3.bf16.msra.mxu0 %v16456_v27 }
 0x302   : > { %15419 = vmatpush3.bf16.msra.mxu1 %v16457_v19  ;;  %15400 = vmatprep.subr.bf16.mxu0 %v17450_v49  ;;  %v16501_v19 = vld [vmem:[%s21686_s3 + $0x3f0] sm:$0xff]  }
 0x303   : > { %15420 = vmatprep.subr.bf16.mxu1 %v17450_v49 }
 0x305   : > { %15401 = vmatpush3.bf16.msra.mxu0 %v16458_v39 }
 0x306   : > { %15421 = vmatpush3.bf16.msra.mxu1 %v16459_v2  ;;  %15402 = vmatprep.subr.bf16.mxu0 %v17450_v49 }
 0x307   : > { %15422 = vmatprep.subr.bf16.mxu1 %v17450_v49 }
 0x309   : > { %15403 = vmatpush3.bf16.msra.mxu0 %v16460_v63 }
 0x30a   : > { %15423 = vmatpush3.bf16.msra.mxu1 %v16461_v36  ;;  %15404 = vmatprep.subr.bf16.mxu0 %v17450_v49  ;;  %v16502_v36 = vld [vmem:[%s21686_s3 + $0x3a8] sm:$0xff]  }
 0x30b   : > { %15424 = vmatprep.subr.bf16.mxu1 %v17450_v49 }
 0x30d   : > { %15405 = vmatpush3.bf16.msra.mxu0 %v16462_v30 }
 0x30e   : > { %15425 = vmatpush3.bf16.msra.mxu1 %v16463_v38  ;;  %15406 = vmatprep.subr.bf16.mxu0 %v17450_v49  ;;  %v16503_v38 = vld [vmem:[%s21686_s3 + $0x3e8] sm:$0xff]  }
 0x30f   : > { %15426 = vmatprep.subr.bf16.mxu1 %v17450_v49 }
 0x311   : > { %15407 = vmatpush3.bf16.msra.mxu0 %v16464_v43  ;;  %v16504_v43 = vld [vmem:[%s21686_s3 + $0x3a0] sm:$0xff]  }
 0x312   : > { %15427 = vmatpush3.bf16.msra.mxu1 %v16465_v35  ;;  %15432 = vmatprep.subr.bf16.mxu0 %v17450_v49  ;;  %v16505_v35 = vld [vmem:[%s21686_s3 + $0x3e0] sm:$0xff]  }
 0x313   : > { %15452 = vmatprep.subr.bf16.mxu1 %v17450_v49 }
 0x314   : > { %15409 = vmatmul.mubr.bf16.vlgmr.msra.gmra.mxu0 %v3142_v26  ;;  %v16506_v26 = vld [vmem:[%s21686_s3 + $0x398] sm:$0xff]  }
 0x315   : > { %15433 = vmatpush3.bf16.msra.mxu0 %v16466_v48  ;;  %15429 = vmatmul.mubr.bf16.vlgmr.msra.gmra.mxu1 %v3252_v15  ;;  %v16507_v48 = vld [vmem:[%s21686_s3 + $0x3d8] sm:$0xff]   ;;  %v16508_v15 = vld [vmem:[%s21686_s3 + $0x390] sm:$0xff]  }
 0x316   : > { %15453 = vmatpush3.bf16.msra.mxu1 %v16467_v41  ;;  %15434 = vmatprep.subr.bf16.mxu0 %v17450_v49  ;;  %v16509_v41 = vld [vmem:[%s21686_s3 + $0x3d0] sm:$0xff]  }
 0x317   : > { %15454 = vmatprep.subr.bf16.mxu1 %v17450_v49  ;;  %15448 = vmatprep.mubr.msk.bf16.mxu0 %vm17451_vm1, %v17450_v49 }
 0x318   : > { %15468 = vmatprep.mubr.msk.bf16.mxu1 %vm17451_vm1, %v17450_v49 }
 0x319   : > { %15435 = vmatpush3.bf16.msra.mxu0 %v16468_v57  ;;  %v16510_v57 = vld [vmem:[%s21686_s3 + $0x388] sm:$0xff]  }
 0x31a   : > { %15455 = vmatpush3.bf16.msra.mxu1 %v16469_v18  ;;  %15436 = vmatprep.subr.bf16.mxu0 %v17450_v49  ;;  %v16511_v18 = vld [vmem:[%s21686_s3 + $0x3c8] sm:$0xff]  }
 0x31b   : > { %15456 = vmatprep.subr.bf16.mxu1 %v17450_v49 }
 0x31d   : > { %15437 = vmatpush3.bf16.msra.mxu0 %v16470_v20  ;;  %v16512_v20 = vld [vmem:[%s21686_s3 + $0x380] sm:$0xff]  }
 0x31e   : > { %15457 = vmatpush3.bf16.msra.mxu1 %v16471_v61  ;;  %15438 = vmatprep.subr.bf16.mxu0 %v17450_v49  ;;  %v16513_v61 = vld [vmem:[%s21686_s3 + $0x3c0] sm:$0xff]  }
 0x31f   : > { %15458 = vmatprep.subr.bf16.mxu1 %v17450_v49 }
 0x321   : > { %15439 = vmatpush3.bf16.msra.mxu0 %v16472_v7  ;;  %v12503_v7 = vld [vmem:[%s18480_s18 + $0x2a] sm:$0xff] }
 0x322   : > { %15459 = vmatpush3.bf16.msra.mxu1 %v16473_v13  ;;  %15440 = vmatprep.subr.bf16.mxu0 %v17450_v49  ;;  %v12504_v13 = vld [vmem:[%s18480_s18 + $0x32] sm:$0x3f] }
 0x323   : > { %15460 = vmatprep.subr.bf16.mxu1 %v17450_v49  ;;  %v19020_v10 = vpack.c.bf16 %v12504_v13, %v12503_v7 }
 0x325   : > { %15441 = vmatpush3.bf16.msra.mxu0 %v16474_v40  ;;  %v3815_v40 = vrot.slane %v18849_v11, 2 }
 0x326   : > { %15461 = vmatpush3.bf16.msra.mxu1 %v16475_v50  ;;  %15442 = vmatprep.subr.bf16.mxu0 %v17450_v49  ;;  %v16514_v50 = vld [vmem:[%s21686_s3 + $0x438] sm:$0xff]  }
 0x327   : > { %15462 = vmatprep.subr.bf16.mxu1 %v17450_v49 }
 0x329   : > { %15443 = vmatpush3.bf16.msra.mxu0 %v16476_v53 }
 0x32a   : > { %15463 = vmatpush3.bf16.msra.mxu1 %v16477_v44  ;;  %15444 = vmatprep.subr.bf16.mxu0 %v17450_v49 }
 0x32b   : > { %15464 = vmatprep.subr.bf16.mxu1 %v17450_v49 }
 0x32d   : > { %15445 = vmatpush3.bf16.msra.mxu0 %v16478_v59  ;;  %v16516_v59 = vld [vmem:[%s21686_s3 + $0x430] sm:$0xff]  }
 0x32e   : > { %15465 = vmatpush3.bf16.msra.mxu1 %v16479_v55  ;;  %15446 = vmatprep.subr.bf16.mxu0 %v17450_v49  ;;  %v16517_v55 = vld [vmem:[%s21686_s3 + $0x470] sm:$0xff]  }
 0x32f   : > { %15466 = vmatprep.subr.bf16.mxu1 %v17450_v49 }
 0x331   : > { %15447 = vmatpush3.bf16.msra.mxu0 %v16480_v45 }
 0x332   : > { %15467 = vmatpush3.bf16.msra.mxu1 %v16481_v46  ;;  %15472 = vmatprep.subr.bf16.mxu0 %v17450_v49 }
 0x333   : > { %15492 = vmatprep.subr.bf16.mxu1 %v17450_v49 }
 0x334   : > { %15449 = vmatmul.mubr.bf16.vlgmr.msra.gmra.mxu0 %v18849_v11 }
 0x335   : > { %15473 = vmatpush3.bf16.msra.mxu0 %v16482_v8  ;;  %15469 = vmatmul.mubr.bf16.vlgmr.msra.gmra.mxu1 %v3482_v56  ;;  %v16518_v56 = vld [vmem:[%s21686_s3 + $0x428] sm:$0xff]  }
 0x336   : > { %15493 = vmatpush3.bf16.msra.mxu1 %v16483_v4  ;;  %15474 = vmatprep.subr.bf16.mxu0 %v17450_v49 }
 0x337   : > { %15494 = vmatprep.subr.bf16.mxu1 %v17450_v49  ;;  %15488 = vmatprep.mubr.msk.bf16.mxu0 %vm17451_vm1, %v17450_v49 }
 0x338   : > { %15508 = vmatprep.mubr.msk.bf16.mxu1 %vm17451_vm1, %v17450_v49 }
 0x339   : > { %15475 = vmatpush3.bf16.msra.mxu0 %v16484_v24  ;;  %v16519_v24 = vld [vmem:[%s21686_s3 + $0x468] sm:$0xff]  }
 0x33a   : > { %15495 = vmatpush3.bf16.msra.mxu1 %v16485_v32  ;;  %15476 = vmatprep.subr.bf16.mxu0 %v17450_v49 }
 0x33b   : > { %15496 = vmatprep.subr.bf16.mxu1 %v17450_v49 }
 0x33d   : > { %15477 = vmatpush3.bf16.msra.mxu0 %v16486_v1 }
 0x33e   : > { %15497 = vmatpush3.bf16.msra.mxu1 %v16487_v17  ;;  %15478 = vmatprep.subr.bf16.mxu0 %v17450_v49  ;;  %v16520_v17 = vld [vmem:[%s21686_s3 + $0x420] sm:$0xff]  }
 0x33f   : > { %15498 = vmatprep.subr.bf16.mxu1 %v17450_v49 }
 0x341   : > { %15479 = vmatpush3.bf16.msra.mxu0 %v16488_v42  ;;  %v16521_v42 = vld [vmem:[%s21686_s3 + $0x460] sm:$0xff]  }
 0x342   : > { %15499 = vmatpush3.bf16.msra.mxu1 %v16489_v62  ;;  %15480 = vmatprep.subr.bf16.mxu0 %v17450_v49  ;;  %v16522_v62 = vld [vmem:[%s21686_s3 + $0x418] sm:$0xff]  }
 0x343   : > { %15500 = vmatprep.subr.bf16.mxu1 %v17450_v49 }
 0x345   : > { %15481 = vmatpush3.bf16.msra.mxu0 %v16490_v5  ;;  %v16523_v5 = vld [vmem:[%s21686_s3 + $0x458] sm:$0xff]  }
 0x346   : > { %15501 = vmatpush3.bf16.msra.mxu1 %v16491_v33  ;;  %15482 = vmatprep.subr.bf16.mxu0 %v17450_v49  ;;  %v16524_v33 = vld [vmem:[%s21686_s3 + $0x410] sm:$0xff]  }
 0x347   : > { %15502 = vmatprep.subr.bf16.mxu1 %v17450_v49 }
 0x349   : > { %15483 = vmatpush3.bf16.msra.mxu0 %v16492_v12  ;;  %v16525_v12 = vld [vmem:[%s21686_s3 + $0x450] sm:$0xff]  }
 0x34a   : > { %15503 = vmatpush3.bf16.msra.mxu1 %v16493_v52  ;;  %15484 = vmatprep.subr.bf16.mxu0 %v17450_v49  ;;  %v4042_v52 = vshll.u32 %v19020_v10, 16 }
 0x34b   : > { %15504 = vmatprep.subr.bf16.mxu1 %v17450_v49 }
 0x34c   : > { %v4044_v9 = vrot.slane %v4042_v52, 1  ;;  %v4267_v13 = vrot.slane %v4042_v52, 2  ;;  %v12625_v52 = vld [vmem:[%s18480_s18 + $0x38] sm:$0xff] }
 0x34d   : > { %15485 = vmatpush3.bf16.msra.mxu0 %v16494_v29  ;;  %v16526_v29 = vld [vmem:[%s21686_s3 + $0x408] sm:$0xff]  }
 0x34e   : > { %15505 = vmatpush3.bf16.msra.mxu1 %v16495_v60  ;;  %15486 = vmatprep.subr.bf16.mxu0 %v17450_v49  ;;  %v16527_v60 = vld [vmem:[%s21686_s3 + $0x448] sm:$0xff]  }
 0x34f   : > { %15506 = vmatprep.subr.bf16.mxu1 %v17450_v49 }
 0x351   : > { %15487 = vmatpush3.bf16.msra.mxu0 %v16496_v47  ;;  %v4040_v47 = vshrl.u32 %v19020_v10, 16 }
 0x352   : > { %15507 = vmatpush3.bf16.msra.mxu1 %v16497_v31  ;;  %15512 = vmatprep.subr.bf16.mxu0 %v17450_v49  ;;  %v16529_v31 = vld [vmem:[%s21686_s3 + $0x440] sm:$0xff]  }
 0x353   : > { %15532 = vmatprep.subr.bf16.mxu1 %v17450_v49  ;;  %v4266_v7 = vrot.slane %v4040_v47, 1 }
 0x354   : > { %v2353_v37 = vpop.f32.mrf.mxu0  ;;  %15489 = vmatmul.mubr.bf16.vlgmr.msra.gmra.mxu0 %v3593_v14  ;;  %v4045_v14 = vor.u32 %v4044_v9, %v4040_v47  ;;  %v16557_v9 = vld [vmem:[%s21686_s3 + $0x550] sm:$0xff]  }
 0x355   : > { %v2442_v51 = vpop.f32.mrf.mxu1  ;;  %15513 = vmatpush3.bf16.msra.mxu0 %v16498_v54  ;;  %15509 = vmatmul.mubr.bf16.vlgmr.msra.gmra.mxu1 %v3705_v25  ;;  %v16530_v54 = vld [vmem:[%s21686_s3 + $0x4b8] sm:$0xff]   ;;  %v4156_v25 = vrot.slane %v19020_v10, 1 }
 0x356   : > { %v2443_v3 = vadd.f32 %v2442_v51, %v2353_v37  ;;  %v15250_v27 = vpop.f32.mrf.mxu0  ;;  %15533 = vmatpush3.bf16.msra.mxu1 %v16499_v58  ;;  %15514 = vmatprep.subr.bf16.mxu0 %v17450_v49  ;;  %v16531_v58 = vld [vmem:[%s21686_s3 + $0x4f8] sm:$0xff]  }
 0x357   : > { %v15270_v39 = vpop.f32.mrf.mxu1  ;;  %15534 = vmatprep.subr.bf16.mxu1 %v17450_v49  ;;  %15528 = vmatprep.mubr.msk.bf16.mxu0 %vm17451_vm1, %v17450_v49 }
 0x358   : > { %v2356_v2 = vpop.f32.mrf.mxu0  ;;  %15548 = vmatprep.mubr.msk.bf16.mxu1 %vm17451_vm1, %v17450_v49 }
 0x359   : > { %v2445_v63 = vpop.f32.mrf.mxu1  ;;  %15515 = vmatpush3.bf16.msra.mxu0 %v16500_v22 }
 0x35a   : > { %v18967_v30 = vadd.f32 %v2445_v63, %v2356_v2  ;;  %v15251_v16 = vpop.f32.mrf.mxu0  ;;  %15535 = vmatpush3.bf16.msra.mxu1 %v16501_v19  ;;  %15516 = vmatprep.subr.bf16.mxu0 %v17450_v49  ;;  %v16533_v19 = vld [vmem:[%s21686_s3 + $0x4f0] sm:$0xff]  }
 0x35b   : > { %15536 = vmatprep.subr.bf16.mxu1 %v17450_v49  ;;  %v15271_v21 = vpop.f32.mrf.mxu1  ;;  %v16534_v16 = vld [vmem:[%s21686_s3 + $0x4a8] sm:$0xff]  }
 0x35c   : > { %v16535_v21 = vld [vmem:[%s21686_s3 + $0x4e8] sm:$0xff]  }
 0x35d   : > { %15517 = vmatpush3.bf16.msra.mxu0 %v16502_v36 }
 0x35e   : > { %15537 = vmatpush3.bf16.msra.mxu1 %v16503_v38  ;;  %15518 = vmatprep.subr.bf16.mxu0 %v17450_v49 }
 0x35f   : > { %15538 = vmatprep.subr.bf16.mxu1 %v17450_v49 }
 0x361   : > { %15519 = vmatpush3.bf16.msra.mxu0 %v16504_v43 }
 0x362   : > { %15539 = vmatpush3.bf16.msra.mxu1 %v16505_v35  ;;  %15520 = vmatprep.subr.bf16.mxu0 %v17450_v49 }
 0x363   : > { %15540 = vmatprep.subr.bf16.mxu1 %v17450_v49 }
 0x365   : > { %15521 = vmatpush3.bf16.msra.mxu0 %v16506_v26  ;;  %v16536_v26 = vld [vmem:[%s21686_s3 + $0x4a0] sm:$0xff]  }
 0x366   : > { %15541 = vmatpush3.bf16.msra.mxu1 %v16507_v48  ;;  %15522 = vmatprep.subr.bf16.mxu0 %v17450_v49  ;;  %v16537_v48 = vld [vmem:[%s21686_s3 + $0x4e0] sm:$0xff]  }
 0x367   : > { %15542 = vmatprep.subr.bf16.mxu1 %v17450_v49 }
 0x369   : > { %15523 = vmatpush3.bf16.msra.mxu0 %v16508_v15  ;;  %v16538_v15 = vld [vmem:[%s21686_s3 + $0x498] sm:$0xff]  }
 0x36a   : > { %15543 = vmatpush3.bf16.msra.mxu1 %v16509_v41  ;;  %15524 = vmatprep.subr.bf16.mxu0 %v17450_v49  ;;  %v16539_v41 = vld [vmem:[%s21686_s3 + $0x4d8] sm:$0xff]  }
 0x36b   : > { %15544 = vmatprep.subr.bf16.mxu1 %v17450_v49 }
 0x36d   : > { %15525 = vmatpush3.bf16.msra.mxu0 %v16510_v57  ;;  %v16540_v57 = vld [vmem:[%s21686_s3 + $0x490] sm:$0xff]  }
 0x36e   : > { %15545 = vmatpush3.bf16.msra.mxu1 %v16511_v18  ;;  %15526 = vmatprep.subr.bf16.mxu0 %v17450_v49  ;;  %v16541_v18 = vld [vmem:[%s21686_s3 + $0x4d0] sm:$0xff]  }
 0x36f   : > { %15546 = vmatprep.subr.bf16.mxu1 %v17450_v49 }
 0x371   : > { %15527 = vmatpush3.bf16.msra.mxu0 %v16512_v20  ;;  %v16542_v20 = vld [vmem:[%s21686_s3 + $0x488] sm:$0xff]  }
 0x372   : > { %15547 = vmatpush3.bf16.msra.mxu1 %v16513_v61  ;;  %15552 = vmatprep.subr.bf16.mxu0 %v17450_v49  ;;  %v16543_v61 = vld [vmem:[%s21686_s3 + $0x4c8] sm:$0xff]  }
 0x373   : > { %15572 = vmatprep.subr.bf16.mxu1 %v17450_v49 }
 0x374   : > { %v2551_v53 = vpop.f32.mrf.mxu0  ;;  %15529 = vmatmul.mubr.bf16.vlgmr.msra.gmra.mxu0 %v3815_v40  ;;  %v16544_v40 = vld [vmem:[%s21686_s3 + $0x480] sm:$0xff]  }
 0x375   : > { %v2558_v44 = vadd.f32 %v2551_v53, %v2443_v3  ;;  %15553 = vmatpush3.bf16.msra.mxu0 %v16514_v50  ;;  %v2663_v11 = vpop.f32.mrf.mxu1  ;;  %15549 = vmatmul.mubr.bf16.vlgmr.msra.gmra.mxu1 %v19020_v10  ;;  %v16532_v3 = vld [vmem:[%s21686_s3 + $0x4b0] sm:$0xff]   ;;  %v16545_v50 = vld [vmem:[%s21686_s3 + $0x4c0] sm:$0xff]   ;;  %v16546_v53 = vld [vmem:[%s21686_s3 + $0x538] sm:$0xff]  }
 0x376   : > { %v15290_v0 = vpop.f32.mrf.mxu0  ;;  %15573 = vmatpush3.bf16.msra.mxu1 %v16515_v28  ;;  %15554 = vmatprep.subr.bf16.mxu0 %v17450_v49  ;;  %v4268_v28 = vor.u32 %v4267_v13, %v4266_v7  ;;  %v16572_v7 = vld [vmem:[%s21686_s3 + $0x590] sm:$0xff]  }
 0x377   : > { %v2670_v45 = vadd.f32 %v2663_v11, %v2558_v44  ;;  %v15310_v34 = vpop.f32.mrf.mxu1  ;;  %15574 = vmatprep.subr.bf16.mxu1 %v17450_v49  ;;  %15568 = vmatprep.mubr.msk.bf16.mxu0 %vm17451_vm1, %v17450_v49  ;;  %v4378_v44 = vrot.slane %v19020_v10, 2  ;;  %v16547_v11 = vld [vmem:[%s21686_s3 + $0x578] sm:$0xff]   ;;  %v16573_v13 = vld [vmem:[%s21686_s3 + $0x5d0] sm:$0xff]  }
 0x378   : > { %v2554_v6 = vpop.f32.mrf.mxu0  ;;  %15588 = vmatprep.mubr.msk.bf16.mxu1 %vm17451_vm1, %v17450_v49  ;;  %v16549_v34 = vld [vmem:[%s21686_s3 + $0x570] sm:$0xff]  }
 0x379   : > { %v2559_v46 = vadd.f32 %v2554_v6, %v18967_v30  ;;  %15555 = vmatpush3.bf16.msra.mxu0 %v16516_v59  ;;  %v2666_v8 = vpop.f32.mrf.mxu1 }
 0x37a   : > { %v15291_v4 = vpop.f32.mrf.mxu0  ;;  %15575 = vmatpush3.bf16.msra.mxu1 %v16517_v55  ;;  %15556 = vmatprep.subr.bf16.mxu0 %v17450_v49 }
 0x37b   : > { %v2671_v32 = vadd.f32 %v2666_v8, %v2559_v46  ;;  %15576 = vmatprep.subr.bf16.mxu1 %v17450_v49  ;;  %v15311_v1 = vpop.f32.mrf.mxu1 }
 0x37c   : > { %v16551_v1 = vld [vmem:[%s21686_s3 + $0x568] sm:$0xff]  }
 0x37d   : > { %15557 = vmatpush3.bf16.msra.mxu0 %v16518_v56 }
 0x37e   : > { %15577 = vmatpush3.bf16.msra.mxu1 %v16519_v24  ;;  %15558 = vmatprep.subr.bf16.mxu0 %v17450_v49  ;;  %v16550_v24 = vld [vmem:[%s21686_s3 + $0x528] sm:$0xff]  }
 0x37f   : > { %15578 = vmatprep.subr.bf16.mxu1 %v17450_v49 }
 0x381   : > { %15559 = vmatpush3.bf16.msra.mxu0 %v16520_v17 }
 0x382   : > { %15579 = vmatpush3.bf16.msra.mxu1 %v16521_v42  ;;  %15560 = vmatprep.subr.bf16.mxu0 %v17450_v49 }
 0x383   : > { %15580 = vmatprep.subr.bf16.mxu1 %v17450_v49 }
 0x385   : > { %15561 = vmatpush3.bf16.msra.mxu0 %v16522_v62  ;;  %v16552_v62 = vld [vmem:[%s21686_s3 + $0x520] sm:$0xff]  }
 0x386   : > { %15581 = vmatpush3.bf16.msra.mxu1 %v16523_v5  ;;  %15562 = vmatprep.subr.bf16.mxu0 %v17450_v49  ;;  %v16553_v5 = vld [vmem:[%s21686_s3 + $0x560] sm:$0xff]  }
 0x387   : > { %15582 = vmatprep.subr.bf16.mxu1 %v17450_v49 }
 0x389   : > { %15563 = vmatpush3.bf16.msra.mxu0 %v16524_v33  ;;  %v16554_v33 = vld [vmem:[%s21686_s3 + $0x518] sm:$0xff]  }
 0x38a   : > { %15583 = vmatpush3.bf16.msra.mxu1 %v16525_v12  ;;  %15564 = vmatprep.subr.bf16.mxu0 %v17450_v49  ;;  %v16555_v12 = vld [vmem:[%s21686_s3 + $0x558] sm:$0xff]  }
 0x38b   : > { %15584 = vmatprep.subr.bf16.mxu1 %v17450_v49 }
 0x38d   : > { %15565 = vmatpush3.bf16.msra.mxu0 %v16526_v29  ;;  %v12626_v29 = vld [vmem:[%s18480_s18 + $0x40] sm:$0x3f] }
 0x38e   : > { %15585 = vmatpush3.bf16.msra.mxu1 %v16527_v60  ;;  %15566 = vmatprep.subr.bf16.mxu0 %v17450_v49  ;;  %v16556_v60 = vld [vmem:[%s21686_s3 + $0x510] sm:$0xff]   ;;  %v19220_v47 = vpack.c.bf16 %v12626_v29, %v12625_v52  ;;  %v16584_v52 = vld [vmem:[%s21686_s3 + $0x608] sm:$0xff]   ;;  %v16585_v29 = vld [vmem:[%s21686_s3 + $0x600] sm:$0xff]  }
 0x38f   : > { %15586 = vmatprep.subr.bf16.mxu1 %v17450_v49 }
 0x391   : > { %15567 = vmatpush3.bf16.msra.mxu0 %v16528_v23  ;;  %v16558_v23 = vld [vmem:[%s21686_s3 + $0x508] sm:$0xff]  }
 0x392   : > { %15587 = vmatpush3.bf16.msra.mxu1 %v16529_v31  ;;  %15592 = vmatprep.subr.bf16.mxu0 %v17450_v49  ;;  %v4605_v31 = vshll.u32 %v19220_v47, 16 }
 0x393   : > { %15612 = vmatprep.subr.bf16.mxu1 %v17450_v49 }
 0x394   : > { %v2773_v37 = vpop.f32.mrf.mxu0  ;;  %15569 = vmatmul.mubr.bf16.vlgmr.msra.gmra.mxu0 %v4045_v14  ;;  %v16559_v14 = vld [vmem:[%s21686_s3 + $0x548] sm:$0xff]  }
 0x395   : > { %v2780_v51 = vadd.f32 %v2773_v37, %v2670_v45  ;;  %15593 = vmatpush3.bf16.msra.mxu0 %v16530_v54  ;;  %v2887_v22 = vpop.f32.mrf.mxu1  ;;  %15589 = vmatmul.mubr.bf16.vlgmr.msra.gmra.mxu1 %v4156_v25  ;;  %v16548_v45 = vld [vmem:[%s21686_s3 + $0x530] sm:$0xff]   ;;  %v16560_v54 = vld [vmem:[%s21686_s3 + $0x500] sm:$0xff]   ;;  %v4603_v25 = vshrl.u32 %v19220_v47, 16 }
 0x396   : > { %v15330_v27 = vpop.f32.mrf.mxu0  ;;  %15613 = vmatpush3.bf16.msra.mxu1 %v16531_v58  ;;  %15594 = vmatprep.subr.bf16.mxu0 %v17450_v49  ;;  %v4607_v58 = vrot.slane %v4605_v31, 1  ;;  %v16561_v37 = vld [vmem:[%s21686_s3 + $0x540] sm:$0xff]  }
 0x397   : > { %v2894_v39 = vadd.f32 %v2887_v22, %v2780_v51  ;;  %v15350_v2 = vpop.f32.mrf.mxu1  ;;  %15614 = vmatprep.subr.bf16.mxu1 %v17450_v49  ;;  %15608 = vmatprep.mubr.msk.bf16.mxu0 %vm17451_vm1, %v17450_v49  ;;  %v16562_v51 = vld [vmem:[%s21686_s3 + $0x5b8] sm:$0xff]  }
 0x398   : > { %v2776_v63 = vpop.f32.mrf.mxu0  ;;  %15628 = vmatprep.mubr.msk.bf16.mxu1 %vm17451_vm1, %v17450_v49  ;;  %v4608_v22 = vor.u32 %v4607_v58, %v4603_v25  ;;  %v16564_v2 = vld [vmem:[%s21686_s3 + $0x5b0] sm:$0xff]  }
 0x399   : > { %v2781_v36 = vadd.f32 %v2776_v63, %v2671_v32  ;;  %15595 = vmatpush3.bf16.msra.mxu0 %v16532_v3  ;;  %v2890_v30 = vpop.f32.mrf.mxu1  ;;  %v16563_v3 = vld [vmem:[%s21686_s3 + $0x5f8] sm:$0xff]  }
 0x39a   : > { %v15331_v38 = vpop.f32.mrf.mxu0  ;;  %15615 = vmatpush3.bf16.msra.mxu1 %v16533_v19  ;;  %15596 = vmatprep.subr.bf16.mxu0 %v17450_v49 }
 0x39b   : > { %v2895_v43 = vadd.f32 %v2890_v30, %v2781_v36  ;;  %15616 = vmatprep.subr.bf16.mxu1 %v17450_v49  ;;  %v15351_v35 = vpop.f32.mrf.mxu1  ;;  %v16565_v36 = vld [vmem:[%s21686_s3 + $0x5f0] sm:$0xff]  }
 0x39c   : > { %v16566_v35 = vld [vmem:[%s21686_s3 + $0x5a8] sm:$0xff]  }
 0x39d   : > { %15597 = vmatpush3.bf16.msra.mxu0 %v16534_v16 }
 0x39e   : > { %15617 = vmatpush3.bf16.msra.mxu1 %v16535_v21  ;;  %15598 = vmatprep.subr.bf16.mxu0 %v17450_v49 }
 0x39f   : > { %15618 = vmatprep.subr.bf16.mxu1 %v17450_v49 }
 0x3a1   : > { %15599 = vmatpush3.bf16.msra.mxu0 %v16536_v26 }
 0x3a2   : > { %15619 = vmatpush3.bf16.msra.mxu1 %v16537_v48  ;;  %15600 = vmatprep.subr.bf16.mxu0 %v17450_v49  ;;  %v16567_v48 = vld [vmem:[%s21686_s3 + $0x5e8] sm:$0xff]  }
 0x3a3   : > { %15620 = vmatprep.subr.bf16.mxu1 %v17450_v49 }
 0x3a5   : > { %15601 = vmatpush3.bf16.msra.mxu0 %v16538_v15 }
 0x3a6   : > { %15621 = vmatpush3.bf16.msra.mxu1 %v16539_v41  ;;  %15602 = vmatprep.subr.bf16.mxu0 %v17450_v49 }
 0x3a7   : > { %15622 = vmatprep.subr.bf16.mxu1 %v17450_v49 }
 0x3a9   : > { %15603 = vmatpush3.bf16.msra.mxu0 %v16540_v57  ;;  %v16568_v57 = vld [vmem:[%s21686_s3 + $0x5a0] sm:$0xff]  }
 0x3aa   : > { %15623 = vmatpush3.bf16.msra.mxu1 %v16541_v18  ;;  %15604 = vmatprep.subr.bf16.mxu0 %v17450_v49  ;;  %v16569_v18 = vld [vmem:[%s21686_s3 + $0x5e0] sm:$0xff]  }
 0x3ab   : > { %15624 = vmatprep.subr.bf16.mxu1 %v17450_v49 }
 0x3ad   : > { %15605 = vmatpush3.bf16.msra.mxu0 %v16542_v20  ;;  %v16570_v20 = vld [vmem:[%s21686_s3 + $0x598] sm:$0xff]  }
 0x3ae   : > { %15625 = vmatpush3.bf16.msra.mxu1 %v16543_v61  ;;  %15606 = vmatprep.subr.bf16.mxu0 %v17450_v49  ;;  %v16571_v61 = vld [vmem:[%s21686_s3 + $0x5d8] sm:$0xff]  }
 0x3af   : > { %15626 = vmatprep.subr.bf16.mxu1 %v17450_v49 }
 0x3b1   : > { %15607 = vmatpush3.bf16.msra.mxu0 %v16544_v40  ;;  %v16574_v40 = vld [vmem:[%s21686_s3 + $0x588] sm:$0xff]  }
 0x3b2   : > { %15627 = vmatpush3.bf16.msra.mxu1 %v16545_v50  ;;  %15632 = vmatprep.subr.bf16.mxu0 %v17450_v49  ;;  %v16575_v50 = vld [vmem:[%s21686_s3 + $0x5c8] sm:$0xff]  }
 0x3b3   : > { %15652 = vmatprep.subr.bf16.mxu1 %v17450_v49 }
 0x3b4   : > { %v3003_v59 = vpop.f32.mrf.mxu0  ;;  %15609 = vmatmul.mubr.bf16.vlgmr.msra.gmra.mxu0 %v4268_v28  ;;  %v16576_v28 = vld [vmem:[%s21686_s3 + $0x580] sm:$0xff]  }
 0x3b5   : > { %v3010_v0 = vadd.f32 %v3003_v59, %v2894_v39  ;;  %15633 = vmatpush3.bf16.msra.mxu0 %v16546_v53  ;;  %v3114_v55 = vpop.f32.mrf.mxu1  ;;  %15629 = vmatmul.mubr.bf16.vlgmr.msra.gmra.mxu1 %v4378_v44  ;;  %v4829_v53 = vrot.slane %v4603_v25, 1  ;;  %v4830_v44 = vrot.slane %v4605_v31, 2  ;;  %v4719_v59 = vrot.slane %v19220_v47, 1 }
 0x3b6   : > { %v15370_v10 = vpop.f32.mrf.mxu0  ;;  %15653 = vmatpush3.bf16.msra.mxu1 %v16547_v11  ;;  %15634 = vmatprep.subr.bf16.mxu0 %v17450_v49  ;;  %v16577_v11 = vld [vmem:[%s21686_s3 + $0x5c0] sm:$0xff]  }
 0x3b7   : > { %v3121_v6 = vadd.f32 %v3114_v55, %v3010_v0  ;;  %v15390_v46 = vpop.f32.mrf.mxu1  ;;  %15654 = vmatprep.subr.bf16.mxu1 %v17450_v49  ;;  %15648 = vmatprep.mubr.msk.bf16.mxu0 %vm17451_vm1, %v17450_v49  ;;  %v16578_v0 = vld [vmem:[%s21686_s3 + $0x638] sm:$0xff]   ;;  %v4831_v55 = vor.u32 %v4830_v44, %v4829_v53 }
 0x3b8   : > { %v3006_v8 = vpop.f32.mrf.mxu0  ;;  %15668 = vmatprep.mubr.msk.bf16.mxu1 %vm17451_vm1, %v17450_v49 }
 0x3b9   : > { %v3011_v56 = vadd.f32 %v3006_v8, %v2895_v43  ;;  %15635 = vmatpush3.bf16.msra.mxu0 %v16548_v45  ;;  %v3117_v4 = vpop.f32.mrf.mxu1 }
 0x3ba   : > { %v15371_v32 = vpop.f32.mrf.mxu0  ;;  %15655 = vmatpush3.bf16.msra.mxu1 %v16549_v34  ;;  %15636 = vmatprep.subr.bf16.mxu0 %v17450_v49 }
 0x3bb   : > { %v19196_v17 = vadd.f32 %v3117_v4, %v3011_v56  ;;  %15656 = vmatprep.subr.bf16.mxu1 %v17450_v49  ;;  %v15391_v42 = vpop.f32.mrf.mxu1 }
 0x3bd   : > { %15637 = vmatpush3.bf16.msra.mxu0 %v16550_v24 }
 0x3be   : > { %15657 = vmatpush3.bf16.msra.mxu1 %v16551_v1  ;;  %15638 = vmatprep.subr.bf16.mxu0 %v17450_v49  ;;  %v16580_v1 = vld [vmem:[%s21686_s3 + $0x628] sm:$0xff]  }
 0x3bf   : > { %15658 = vmatprep.subr.bf16.mxu1 %v17450_v49 }
 0x3c1   : > { %15639 = vmatpush3.bf16.msra.mxu0 %v16552_v62 }
 0x3c2   : > { %15659 = vmatpush3.bf16.msra.mxu1 %v16553_v5  ;;  %15640 = vmatprep.subr.bf16.mxu0 %v17450_v49  ;;  %v16581_v5 = vld [vmem:[%s21686_s3 + $0x620] sm:$0xff]  }
 0x3c3   : > { %15660 = vmatprep.subr.bf16.mxu1 %v17450_v49 }
 0x3c5   : > { %15641 = vmatpush3.bf16.msra.mxu0 %v16554_v33  ;;  %v16582_v33 = vld [vmem:[%s21686_s3 + $0x618] sm:$0xff]  }
 0x3c6   : > { %15661 = vmatpush3.bf16.msra.mxu1 %v16555_v12  ;;  %15642 = vmatprep.subr.bf16.mxu0 %v17450_v49  ;;  %v16583_v12 = vld [vmem:[%s21686_s3 + $0x610] sm:$0xff]  }
 0x3c7   : > { %15662 = vmatprep.subr.bf16.mxu1 %v17450_v49 }
 0x3c9   : > { %15643 = vmatpush3.bf16.msra.mxu0 %v16556_v60  ;;  %v4941_v60 = vrot.slane %v19220_v47, 2 }
 0x3ca   : > { %15663 = vmatpush3.bf16.msra.mxu1 %v16557_v9  ;;  %15644 = vmatprep.subr.bf16.mxu0 %v17450_v49 }
 0x3cb   : > { %15664 = vmatprep.subr.bf16.mxu1 %v17450_v49 }
 0x3cd   : > { %15645 = vmatpush3.bf16.msra.mxu0 %v16558_v23 }
 0x3ce   : > { %15665 = vmatpush3.bf16.msra.mxu1 %v16559_v14  ;;  %15646 = vmatprep.subr.bf16.mxu0 %v17450_v49 }
 0x3cf   : > { %15666 = vmatprep.subr.bf16.mxu1 %v17450_v49 }
 0x3d1   : > { %15647 = vmatpush3.bf16.msra.mxu0 %v16560_v54 }
 0x3d2   : > { %15667 = vmatpush3.bf16.msra.mxu1 %v16561_v37  ;;  %15672 = vmatprep.subr.bf16.mxu0 %v17450_v49 }
 0x3d3   : > { %15692 = vmatprep.subr.bf16.mxu1 %v17450_v49 }
 0x3d4   : > { %v3226_v27 = vpop.f32.mrf.mxu0  ;;  %15649 = vmatmul.mubr.bf16.vlgmr.msra.gmra.mxu0 %v19220_v47 }
 0x3d5   : > { %v3233_v19 = vadd.f32 %v3226_v27, %v3121_v6  ;;  %15673 = vmatpush3.bf16.msra.mxu0 %v16562_v51  ;;  %v3336_v39 = vpop.f32.mrf.mxu1  ;;  %15669 = vmatmul.mubr.bf16.vlgmr.msra.gmra.mxu1 %v4608_v22  ;;  %v16579_v6 = vld [vmem:[%s21686_s3 + $0x630] sm:$0xff]  }
 0x3d6   : > { %v15410_v63 = vpop.f32.mrf.mxu0  ;;  %15693 = vmatpush3.bf16.msra.mxu1 %v16563_v3  ;;  %15674 = vmatprep.subr.bf16.mxu0 %v17450_v49 }
 0x3d7   : > { %v3343_v30 = vadd.f32 %v3336_v39, %v3233_v19  ;;  %v15430_v16 = vpop.f32.mrf.mxu1  ;;  %15694 = vmatprep.subr.bf16.mxu1 %v17450_v49  ;;  %15688 = vmatprep.mubr.msk.bf16.mxu0 %vm17451_vm1, %v17450_v49 }
 0x3d8   : > { %v3229_v38 = vpop.f32.mrf.mxu0  ;;  %15708 = vmatprep.mubr.msk.bf16.mxu1 %vm17451_vm1, %v17450_v49 }
 0x3d9   : > { %v3234_v21 = vadd.f32 %v3229_v38, %v19196_v17  ;;  %15675 = vmatpush3.bf16.msra.mxu0 %v16564_v2  ;;  %v3339_v43 = vpop.f32.mrf.mxu1 }
 0x3da   : > { %v15411_v26 = vpop.f32.mrf.mxu0  ;;  %15695 = vmatpush3.bf16.msra.mxu1 %v16565_v36  ;;  %15676 = vmatprep.subr.bf16.mxu0 %v17450_v49 }
 0x3db   : > { %v3344_v15 = vadd.f32 %v3339_v43, %v3234_v21  ;;  %15696 = vmatprep.subr.bf16.mxu1 %v17450_v49  ;;  %v15431_v41 = vpop.f32.mrf.mxu1 }
 0x3dd   : > { %15677 = vmatpush3.bf16.msra.mxu0 %v16566_v35 }
 0x3de   : > { %15697 = vmatpush3.bf16.msra.mxu1 %v16567_v48  ;;  %15678 = vmatprep.subr.bf16.mxu0 %v17450_v49 }
 0x3df   : > { %15698 = vmatprep.subr.bf16.mxu1 %v17450_v49 }
 0x3e1   : > { %15679 = vmatpush3.bf16.msra.mxu0 %v16568_v57 }
 0x3e2   : > { %15699 = vmatpush3.bf16.msra.mxu1 %v16569_v18  ;;  %15680 = vmatprep.subr.bf16.mxu0 %v17450_v49 }
 0x3e3   : > { %15700 = vmatprep.subr.bf16.mxu1 %v17450_v49 }
 0x3e5   : > { %15681 = vmatpush3.bf16.msra.mxu0 %v16570_v20 }
 0x3e6   : > { %15701 = vmatpush3.bf16.msra.mxu1 %v16571_v61  ;;  %15682 = vmatprep.subr.bf16.mxu0 %v17450_v49 }
 0x3e7   : > { %15702 = vmatprep.subr.bf16.mxu1 %v17450_v49 }
 0x3e9   : > { %15683 = vmatpush3.bf16.msra.mxu0 %v16572_v7 }
 0x3ea   : > { %15703 = vmatpush3.bf16.msra.mxu1 %v16573_v13  ;;  %15684 = vmatprep.subr.bf16.mxu0 %v17450_v49 }
 0x3eb   : > { %15704 = vmatprep.subr.bf16.mxu1 %v17450_v49 }
 0x3ed   : > { %15685 = vmatpush3.bf16.msra.mxu0 %v16574_v40 }
 0x3ee   : > { %15705 = vmatpush3.bf16.msra.mxu1 %v16575_v50  ;;  %15686 = vmatprep.subr.bf16.mxu0 %v17450_v49 }
 0x3ef   : > { %15706 = vmatprep.subr.bf16.mxu1 %v17450_v49 }
 0x3f1   : > { %15687 = vmatpush3.bf16.msra.mxu0 %v16576_v28 }
 0x3f2   : > { %15707 = vmatpush3.bf16.msra.mxu1 %v16577_v11  ;;  %15712 = vmatprep.subr.bf16.mxu0 %v17450_v49 }
 0x3f4   : > { %v3450_v45 = vpop.f32.mrf.mxu0  ;;  %15689 = vmatmul.mubr.bf16.vlgmr.msra.gmra.mxu0 %v4719_v59 }
 0x3f5   : > { %v3457_v10 = vadd.f32 %v3450_v45, %v3343_v30  ;;  %15713 = vmatpush3.bf16.msra.mxu0 %v16578_v0  ;;  %v3566_v34 = vpop.f32.mrf.mxu1  ;;  %15709 = vmatmul.mubr.bf16.vlgmr.msra.gmra.mxu1 %v4831_v55 }
 0x3f6   : > { %v15450_v46 = vpop.f32.mrf.mxu0  ;;  %15714 = vmatprep.subr.bf16.mxu0 %v17450_v49  ;;  %15728 = vmatprep.mubr.msk.bf16.mxu0 %vm17451_vm1, %v17450_v49 }
 0x3f7   : > { %v3573_v8 = vadd.f32 %v3566_v34, %v3457_v10  ;;  %v15470_v56 = vpop.f32.mrf.mxu1 }
 0x3f8   : > { %v3453_v4 = vpop.f32.mrf.mxu0 }
 0x3f9   : > { %v3458_v24 = vadd.f32 %v3453_v4, %v3344_v15  ;;  %15715 = vmatpush3.bf16.msra.mxu0 %v16579_v6  ;;  %v3569_v32 = vpop.f32.mrf.mxu1 }
 0x3fa   : > { %v15451_v17 = vpop.f32.mrf.mxu0  ;;  %15716 = vmatprep.subr.bf16.mxu0 %v17450_v49 }
 0x3fb   : > { %v3574_v42 = vadd.f32 %v3569_v32, %v3458_v24  ;;  %v15471_v62 = vpop.f32.mrf.mxu1 }
 0x3fd   : > { %15717 = vmatpush3.bf16.msra.mxu0 %v16580_v1 }
 0x3fe   : > { %15718 = vmatprep.subr.bf16.mxu0 %v17450_v49 }
 0x401   : > { %15719 = vmatpush3.bf16.msra.mxu0 %v16581_v5 }
 0x402   : > { %15720 = vmatprep.subr.bf16.mxu0 %v17450_v49 }
 0x405   : > { %15721 = vmatpush3.bf16.msra.mxu0 %v16582_v33 }
 0x406   : > { %15722 = vmatprep.subr.bf16.mxu0 %v17450_v49 }
 0x409   : > { %15723 = vmatpush3.bf16.msra.mxu0 %v16583_v12 }
 0x40a   : > { %15724 = vmatprep.subr.bf16.mxu0 %v17450_v49 }
 0x40d   : > { %15725 = vmatpush3.bf16.msra.mxu0 %v16584_v52 }
 0x40e   : > { %15726 = vmatprep.subr.bf16.mxu0 %v17450_v49 }
 0x411   : > { %15727 = vmatpush3.bf16.msra.mxu0 %v16585_v29 }
 0x414   : > { %v3677_v9 = vpop.f32.mrf.mxu0  ;;  %15729 = vmatmul.mubr.bf16.vlgmr.msra.gmra.mxu0 %v4941_v60 }
 0x415   : > { %v3684_v23 = vadd.f32 %v3677_v9, %v3573_v8  ;;  %v3789_v31 = vpop.f32.mrf.mxu1 }
 0x416   : > { %v15490_v14 = vpop.f32.mrf.mxu0 }
 0x417   : > { %v3796_v54 = vadd.f32 %v3789_v31, %v3684_v23  ;;  %v15510_v25 = vpop.f32.mrf.mxu1 }
 0x418   : > { %v3680_v58 = vpop.f32.mrf.mxu0 }
 0x419   : > { %v3685_v37 = vadd.f32 %v3680_v58, %v3574_v42  ;;  %v3792_v51 = vpop.f32.mrf.mxu1 }
 0x41a   : > { %v15491_v22 = vpop.f32.mrf.mxu0 }
 0x41b   : > { %v3797_v3 = vadd.f32 %v3792_v51, %v3685_v37  ;;  %v15511_v27 = vpop.f32.mrf.mxu1  ;;  %v12747_v51 = vld [vmem:[%s21687_s4] ss:$0 sm:$0xff] }
 0x434   : > { %v3899_v19 = vpop.f32.mrf.mxu0 }
 0x435   : > { %v3906_v39 = vadd.f32 %v3899_v19, %v3796_v54  ;;  %v4013_v2 = vpop.f32.mrf.mxu1 }
 0x436   : > { %v15530_v49 = vpop.f32.mrf.mxu0 }
 0x437   : > { %v4020_v63 = vadd.f32 %v4013_v2, %v3906_v39  ;;  %v15550_v47 = vpop.f32.mrf.mxu1 }
 0x438   : > { %v3902_v36 = vpop.f32.mrf.mxu0 }
 0x439   : > { %v3907_v30 = vadd.f32 %v3902_v36, %v3797_v3  ;;  %v4016_v16 = vpop.f32.mrf.mxu1 }
 0x43a   : > { %v15531_v38 = vpop.f32.mrf.mxu0 }
 0x43b   : > { %v4021_v21 = vadd.f32 %v4016_v16, %v3907_v30  ;;  %v15551_v43 = vpop.f32.mrf.mxu1 }
 0x454   : > { %v4129_v35 = vpop.f32.mrf.mxu0 }
 0x455   : > { %v4136_v26 = vadd.f32 %v4129_v35, %v4020_v63  ;;  %v4240_v48 = vpop.f32.mrf.mxu1 }
 0x456   : > { %v15570_v15 = vpop.f32.mrf.mxu0 }
 0x457   : > { %v4247_v41 = vadd.f32 %v4240_v48, %v4136_v26  ;;  %v15590_v57 = vpop.f32.mrf.mxu1 }
 0x458   : > { %v4132_v18 = vpop.f32.mrf.mxu0 }
 0x459   : > { %v4137_v20 = vadd.f32 %v4132_v18, %v4021_v21  ;;  %v4243_v61 = vpop.f32.mrf.mxu1 }
 0x45a   : > { %v15571_v7 = vpop.f32.mrf.mxu0 }
 0x45b   : > { %v4248_v13 = vadd.f32 %v4243_v61, %v4137_v20  ;;  %v15591_v40 = vpop.f32.mrf.mxu1 }
 0x474   : > { %v4352_v50 = vpop.f32.mrf.mxu0 }
 0x475   : > { %v4359_v28 = vadd.f32 %v4352_v50, %v4247_v41  ;;  %v4462_v53 = vpop.f32.mrf.mxu1 }
 0x476   : > { %v15610_v44 = vpop.f32.mrf.mxu0 }
 0x477   : > { %v4469_v11 = vadd.f32 %v4462_v53, %v4359_v28  ;;  %v15630_v59 = vpop.f32.mrf.mxu1 }
 0x478   : > { %v4355_v0 = vpop.f32.mrf.mxu0 }
 0x479   : > { %v4360_v55 = vadd.f32 %v4355_v0, %v4248_v13  ;;  %v4465_v45 = vpop.f32.mrf.mxu1 }
 0x47a   : > { %v15611_v10 = vpop.f32.mrf.mxu0 }
 0x47b   : > { %v4470_v34 = vadd.f32 %v4465_v45, %v4360_v55  ;;  %v15631_v6 = vpop.f32.mrf.mxu1 }
 0x494   : > { %v4576_v46 = vpop.f32.mrf.mxu0 }
 0x495   : > { %v4692_v8 = vpop.f32.mrf.mxu1  ;;  %v4583_v9 = vadd.f32 %v4576_v46, %v4469_v11 }
 0x496   : > { %v15650_v56 = vpop.f32.mrf.mxu0 }
 0x497   : > { %v15670_v4 = vpop.f32.mrf.mxu1  ;;  %v4699_v23 = vadd.f32 %v4692_v8, %v4583_v9 }
 0x498   : > { %v4579_v24 = vpop.f32.mrf.mxu0 }
 0x499   : > { %v4695_v32 = vpop.f32.mrf.mxu1  ;;  %v4584_v31 = vadd.f32 %v4579_v24, %v4470_v34 }
 0x49a   : > { %v15651_v1 = vpop.f32.mrf.mxu0 }
 0x49b   : > { %v15671_v17 = vpop.f32.mrf.mxu1  ;;  %v4700_v54 = vadd.f32 %v4695_v32, %v4584_v31 }
 0x4b4   : > { %v4803_v42 = vpop.f32.mrf.mxu0 }
 0x4b5   : > { %v4915_v62 = vpop.f32.mrf.mxu1  ;;  %v4810_v14 = vadd.f32 %v4803_v42, %v4699_v23 }
 0x4b6   : > { %v15690_v5 = vpop.f32.mrf.mxu0 }
 0x4b7   : > { %v15710_v33 = vpop.f32.mrf.mxu1  ;;  %v4922_v25 = vadd.f32 %v4915_v62, %v4810_v14 }
 0x4b8   : > { %v4806_v12 = vpop.f32.mrf.mxu0 }
 0x4b9   : > { %v4918_v52 = vpop.f32.mrf.mxu1  ;;  %v4811_v58 = vadd.f32 %v4806_v12, %v4700_v54 }
 0x4ba   : > { %v15691_v29 = vpop.f32.mrf.mxu0 }
 0x4bb   : > { %v15711_v60 = vpop.f32.mrf.mxu1  ;;  %v4923_v27 = vadd.f32 %v4918_v52, %v4811_v58 }
 0x4d4   : > { %v5025_v37 = vpop.f32.mrf.mxu0 }
 0x4d5   : > { %v5032_v22 = vadd.f32 %v5025_v37, %v4922_v25 }
 0x4d6   : > { %v15730_v3 = vpop.f32.mrf.mxu0 }
 0x4d7   : > { %v5041_v19 = vadd.f32 %v12747_v51, %v5032_v22 }
 0x4d8   : > { %v5028_v39 = vpop.f32.mrf.mxu0 }
 0x4d9   : > { %v5043_v2 = vmax.f32 %v5041_v19, 0.0  ;;  %v5033_v49 = vadd.f32 %v5028_v39, %v4923_v27 }
 0x4da   : > { %v15731_v63 = vpop.f32.mrf.mxu0 }
 0x4db   : > { %5047 = vst [vmem:[%s5046_s19] sm:$0xff] %v5043_v2  ;;  %v5042_v47 = vadd.f32 %v12747_v51, %v5033_v49  ;;  %2223 = sbr.rel (!%p2221_p0) target bundleno = 627 (0x273), region = 162 }
 0x4dd   : > { %v5044_v36 = vmax.f32 %v5042_v47, 0.0 }
 0x4df   : > { %5048 = vst [vmem:[%s5046_s19 + $0x8] sm:$0x3] %v5044_v36 }
 0x4e0 LB: > { %v16586_v30 = vld [vmem:[%s21686_s3 + $0x78] sm:$0xff]   ;;  %v17452_v16 = vmov 0.0   ;;  %v16588_v21 = vld [vmem:[%s21686_s3 + $0x70] sm:$0xff]   ;;  %vm17453_vm2 = vmmov 0   ;;  %v16590_v35 = vld [vmem:[%s21686_s3 + $0x68] sm:$0xff]   ;;  %s12018_s12 = smul.u32 14, %s17446_s20  ;;  %s17446_s20 = sphi %s19366_s20, %s5054_s20  }
 0x4e1   : > { %15732 = vmatprep.subr.bf16.mxu0 %v17452_v16  ;;  %15752 = vmatprep.subr.bf16.mxu1 %v17452_v16  ;;  %v16587_v38 = vld [vmem:[%s21686_s3 + $0x38] sm:$0xff]   ;;  %v16589_v43 = vld [vmem:[%s21686_s3 + $0x30] sm:$0xff]   ;;  %v16591_v26 = vld [vmem:[%s21686_s3 + $0x28] sm:$0xff]   ;;  %s12033_s19 = smul.u32 10, %s17446_s20  ;;  %s5054_s20 = sadd.s32 1, %s17446_s20  }
 0x4e2   : > { %15733 = vmatpush3.bf16.msra.mxu0 %v16586_v30  ;;  %15748 = vmatprep.mubr.msk.bf16.mxu0 %vm17453_vm2, %v17452_v16  ;;  %v16592_v48 = vld [vmem:[%s21686_s3 + $0x60] sm:$0xff]   ;;  %v16594_v41 = vld [vmem:[%s21686_s3 + $0x58] sm:$0xff]   ;;  %s19416_s21 = scalar_lea.vmem [#allocation2], %s12018_s12  ;;  %v16596_v7 = vld [vmem:[%s21686_s3 + $0x50] sm:$0xff]   ;;  %p5051_p1 = scmp.ge.s32.totalorder %s5054_s20, 10  }
 0x4e3   : > { %15753 = vmatpush3.bf16.msra.mxu1 %v16587_v38  ;;  %15734 = vmatprep.subr.bf16.mxu0 %v17452_v16  ;;  %v16593_v15 = vld [vmem:[%s21686_s3 + $0x20] sm:$0xff]   ;;  %v16595_v57 = vld [vmem:[%s21686_s3 + $0x18] sm:$0xff]   ;;  %v12749_v20 = vld [vmem:[%s19416_s21 + $0xcc] sm:$0x3f]  ;;  %s12034_s22 = scalar_lea.vmem [#allocation3], %s12033_s19  ;;  %vm7890_vm3 = vcmask (%p5051_p1), 1045504  }
 0x4e4   : > { %15754 = vmatprep.subr.bf16.mxu1 %v17452_v16  ;;  %15768 = vmatprep.mubr.msk.bf16.mxu1 %vm17453_vm2, %v17452_v16  ;;  %v12748_v18 = vld [vmem:[%s19416_s21 + $0xc4] sm:$0xff]  ;;  %v16597_v13 = vld [vmem:[%s21686_s3 + $0x10] sm:$0xff]   ;;  %v16602_v55 = vld [vmem:[%s21686_s3 + $0xb8] sm:$0xff]  }
 0x4e5   : > { %v19420_v61 = vpack.c.bf16 %v12749_v20, %v12748_v18  ;;  %v16598_v40 = vld [vmem:[%s21686_s3 + $0x48] sm:$0xff]   ;;  %v16600_v11 = vld [vmem:[%s21686_s3 + $0x40] sm:$0xff]   ;;  %v16603_v45 = vld [vmem:[%s21686_s3 + $0xf8] sm:$0xff]  }
 0x4e6   : > { %15735 = vmatpush3.bf16.msra.mxu0 %v16588_v21  ;;  %v16599_v28 = vld [vmem:[%s21686_s3 + $0x8] sm:$0xff]   ;;  %v16601_v59 = vld [vmem:[%s21686_s3] sm:$0xff]   ;;  %v16604_v10 = vld [vmem:[%s21686_s3 + $0xb0] sm:$0xff]  }
 0x4e7   : > { %15755 = vmatpush3.bf16.msra.mxu1 %v16589_v43  ;;  %15736 = vmatprep.subr.bf16.mxu0 %v17452_v16  ;;  %v5097_v50 = vshll.u32 %v19420_v61, 16  ;;  %v5095_v53 = vshrl.u32 %v19420_v61, 16  ;;  %v16605_v34 = vld [vmem:[%s21686_s3 + $0xf0] sm:$0xff]   ;;  %v16606_v6 = vld [vmem:[%s21686_s3 + $0xa8] sm:$0xff]   ;;  %v16608_v8 = vld [vmem:[%s21686_s3 + $0xa0] sm:$0xff]   ;;  %v5298_v52 = vrot.slane %v19420_v61, 1 }
 0x4e8   : > { %15756 = vmatprep.subr.bf16.mxu1 %v17452_v16  ;;  %v16607_v46 = vld [vmem:[%s21686_s3 + $0xe8] sm:$0xff]   ;;  %v16609_v56 = vld [vmem:[%s21686_s3 + $0xe0] sm:$0xff]   ;;  %v16610_v4 = vld [vmem:[%s21686_s3 + $0x98] sm:$0xff]   ;;  %v5520_v47 = vrot.slane %v19420_v61, 2 }
 0x4e9   : > { %v5099_v44 = vrot.slane %v5097_v50, 1  ;;  %v16611_v24 = vld [vmem:[%s21686_s3 + $0xd8] sm:$0xff]   ;;  %v16612_v32 = vld [vmem:[%s21686_s3 + $0x90] sm:$0xff]   ;;  %v16614_v17 = vld [vmem:[%s21686_s3 + $0x88] sm:$0xff]   ;;  %v5408_v62 = vrot.slane %v5095_v53, 1  ;;  %v5409_v33 = vrot.slane %v5097_v50, 2 }
 0x4ea   : > { %15737 = vmatpush3.bf16.msra.mxu0 %v16590_v35  ;;  %v16613_v1 = vld [vmem:[%s21686_s3 + $0xd0] sm:$0xff]   ;;  %v16615_v42 = vld [vmem:[%s21686_s3 + $0xc8] sm:$0xff]   ;;  %v16616_v5 = vld [vmem:[%s21686_s3 + $0x80] sm:$0xff]  }
 0x4eb   : > { %15757 = vmatpush3.bf16.msra.mxu1 %v16591_v26  ;;  %15738 = vmatprep.subr.bf16.mxu0 %v17452_v16  ;;  %v5100_v0 = vor.u32 %v5099_v44, %v5095_v53  ;;  %v16617_v12 = vld [vmem:[%s21686_s3 + $0xc0] sm:$0xff]   ;;  %v16618_v29 = vld [vmem:[%s21686_s3 + $0x138] sm:$0xff]   ;;  %v5410_v60 = vor.u32 %v5409_v33, %v5408_v62  ;;  %v16620_v23 = vld [vmem:[%s21686_s3 + $0x130] sm:$0xff]  }
 0x4ec   : > { %15758 = vmatprep.subr.bf16.mxu1 %v17452_v16  ;;  %v16619_v9 = vld [vmem:[%s21686_s3 + $0x178] sm:$0xff]   ;;  %v16621_v31 = vld [vmem:[%s21686_s3 + $0x170] sm:$0xff]   ;;  %v16622_v14 = vld [vmem:[%s21686_s3 + $0x128] sm:$0xff]  }
 0x4ed   : > { %v16623_v54 = vld [vmem:[%s21686_s3 + $0x168] sm:$0xff]   ;;  %v16624_v25 = vld [vmem:[%s21686_s3 + $0x120] sm:$0xff]   ;;  %v16626_v37 = vld [vmem:[%s21686_s3 + $0x118] sm:$0xff]  }
 0x4ee   : > { %15739 = vmatpush3.bf16.msra.mxu0 %v16592_v48  ;;  %v16625_v58 = vld [vmem:[%s21686_s3 + $0x160] sm:$0xff]   ;;  %v16627_v51 = vld [vmem:[%s21686_s3 + $0x158] sm:$0xff]   ;;  %v16628_v22 = vld [vmem:[%s21686_s3 + $0x110] sm:$0xff]  }
 0x4ef   : > { %15759 = vmatpush3.bf16.msra.mxu1 %v16593_v15  ;;  %15740 = vmatprep.subr.bf16.mxu0 %v17452_v16  ;;  %v16629_v3 = vld [vmem:[%s21686_s3 + $0x150] sm:$0xff]   ;;  %v16630_v27 = vld [vmem:[%s21686_s3 + $0x108] sm:$0xff]   ;;  %v16632_v39 = vld [vmem:[%s21686_s3 + $0x100] sm:$0xff]  }
 0x4f0   : > { %15760 = vmatprep.subr.bf16.mxu1 %v17452_v16  ;;  %v16631_v19 = vld [vmem:[%s21686_s3 + $0x148] sm:$0xff]   ;;  %v16633_v2 = vld [vmem:[%s21686_s3 + $0x140] sm:$0xff]   ;;  %v12854_v49 = vld [vmem:[%s19416_s21 + $0xd2] sm:$0xff] }
 0x4f1   : > { %v12855_v63 = vld [vmem:[%s19416_s21 + $0xda] sm:$0x3f]  ;;  %v16636_v21 = vld [vmem:[%s21686_s3 + $0x1b0] sm:$0xff]   ;;  %v16638_v35 = vld [vmem:[%s21686_s3 + $0x1a8] sm:$0xff]  }
 0x4f2   : > { %15741 = vmatpush3.bf16.msra.mxu0 %v16594_v41  ;;  %v16634_v36 = vld [vmem:[%s21686_s3 + $0x1b8] sm:$0xff]   ;;  %v19596_v30 = vpack.c.bf16 %v12855_v63, %v12854_v49  ;;  %v16637_v43 = vld [vmem:[%s21686_s3 + $0x1f0] sm:$0xff]   ;;  %v16639_v26 = vld [vmem:[%s21686_s3 + $0x1e8] sm:$0xff]  }
 0x4f3   : > { %15761 = vmatpush3.bf16.msra.mxu1 %v16595_v57  ;;  %15742 = vmatprep.subr.bf16.mxu0 %v17452_v16  ;;  %v16635_v38 = vld [vmem:[%s21686_s3 + $0x1f8] sm:$0xff]   ;;  %v16640_v48 = vld [vmem:[%s21686_s3 + $0x1a0] sm:$0xff]   ;;  %v16644_v18 = vld [vmem:[%s21686_s3 + $0x190] sm:$0xff]  }
 0x4f4   : > { %15762 = vmatprep.subr.bf16.mxu1 %v17452_v16  ;;  %v16641_v15 = vld [vmem:[%s21686_s3 + $0x1e0] sm:$0xff]   ;;  %v16642_v41 = vld [vmem:[%s21686_s3 + $0x198] sm:$0xff]   ;;  %v16645_v20 = vld [vmem:[%s21686_s3 + $0x1d0] sm:$0xff]  }
 0x4f5   : > { %v16643_v57 = vld [vmem:[%s21686_s3 + $0x1d8] sm:$0xff]   ;;  %v16649_v53 = vld [vmem:[%s21686_s3 + $0x1c0] sm:$0xff]  }
 0x4f6   : > { %15743 = vmatpush3.bf16.msra.mxu0 %v16596_v7  ;;  %v16646_v7 = vld [vmem:[%s21686_s3 + $0x188] sm:$0xff]   ;;  %v16664_v62 = vld [vmem:[%s21686_s3 + $0x200] sm:$0xff]  }
 0x4f7   : > { %15763 = vmatpush3.bf16.msra.mxu1 %v16597_v13  ;;  %15744 = vmatprep.subr.bf16.mxu0 %v17452_v16  ;;  %v16647_v13 = vld [vmem:[%s21686_s3 + $0x1c8] sm:$0xff]   ;;  %v16680_v49 = vld [vmem:[%s21686_s3 + $0x280] sm:$0xff]  }
 0x4f8   : > { %15764 = vmatprep.subr.bf16.mxu1 %v17452_v16 }
 0x4fa   : > { %15745 = vmatpush3.bf16.msra.mxu0 %v16598_v40  ;;  %v5746_v40 = vshrl.u32 %v19596_v30, 16 }
 0x4fb   : > { %15765 = vmatpush3.bf16.msra.mxu1 %v16599_v28  ;;  %15746 = vmatprep.subr.bf16.mxu0 %v17452_v16  ;;  %v16648_v28 = vld [vmem:[%s21686_s3 + $0x180] sm:$0xff]  }
 0x4fc   : > { %15766 = vmatprep.subr.bf16.mxu1 %v17452_v16 }
 0x4fe   : > { %15747 = vmatpush3.bf16.msra.mxu0 %v16600_v11  ;;  %v16650_v11 = vld [vmem:[%s21686_s3 + $0x238] sm:$0xff]  }
 0x4ff   : > { %15767 = vmatpush3.bf16.msra.mxu1 %v16601_v59  ;;  %15772 = vmatprep.subr.bf16.mxu0 %v17452_v16  ;;  %v5862_v59 = vrot.slane %v19596_v30, 1 }
 0x500   : > { %15792 = vmatprep.subr.bf16.mxu1 %v17452_v16 }
 0x501   : > { %15749 = vmatmul.mubr.bf16.vlgmr.msra.gmra.mxu0 %v5100_v0  ;;  %v16651_v0 = vld [vmem:[%s21686_s3 + $0x278] sm:$0xff]  }
 0x502   : > { %15769 = vmatmul.mubr.bf16.vlgmr.msra.gmra.mxu1 %v19420_v61  ;;  %15773 = vmatpush3.bf16.msra.mxu0 %v16602_v55  ;;  %v5748_v61 = vshll.u32 %v19596_v30, 16  ;;  %v16652_v55 = vld [vmem:[%s21686_s3 + $0x230] sm:$0xff]  }
 0x503   : > { %15793 = vmatpush3.bf16.msra.mxu1 %v16603_v45  ;;  %15774 = vmatprep.subr.bf16.mxu0 %v17452_v16  ;;  %v16653_v45 = vld [vmem:[%s21686_s3 + $0x270] sm:$0xff]  }
 0x504   : > { %15794 = vmatprep.subr.bf16.mxu1 %v17452_v16  ;;  %15788 = vmatprep.mubr.msk.bf16.mxu0 %vm17453_vm2, %v17452_v16  ;;  %v5750_v50 = vrot.slane %v5748_v61, 1 }
 0x505   : > { %15808 = vmatprep.mubr.msk.bf16.mxu1 %vm17453_vm2, %v17452_v16 }
 0x506   : > { %15775 = vmatpush3.bf16.msra.mxu0 %v16604_v10  ;;  %v5751_v44 = vor.u32 %v5750_v50, %v5746_v40  ;;  %v16654_v10 = vld [vmem:[%s21686_s3 + $0x228] sm:$0xff]  }
 0x507   : > { %15795 = vmatpush3.bf16.msra.mxu1 %v16605_v34  ;;  %15776 = vmatprep.subr.bf16.mxu0 %v17452_v16  ;;  %v16655_v34 = vld [vmem:[%s21686_s3 + $0x268] sm:$0xff]  }
 0x508   : > { %15796 = vmatprep.subr.bf16.mxu1 %v17452_v16 }
 0x50a   : > { %15777 = vmatpush3.bf16.msra.mxu0 %v16606_v6  ;;  %v16656_v6 = vld [vmem:[%s21686_s3 + $0x220] sm:$0xff]  }
 0x50b   : > { %15797 = vmatpush3.bf16.msra.mxu1 %v16607_v46  ;;  %15778 = vmatprep.subr.bf16.mxu0 %v17452_v16  ;;  %v16657_v46 = vld [vmem:[%s21686_s3 + $0x260] sm:$0xff]  }
 0x50c   : > { %15798 = vmatprep.subr.bf16.mxu1 %v17452_v16 }
 0x50e   : > { %15779 = vmatpush3.bf16.msra.mxu0 %v16608_v8  ;;  %v16658_v8 = vld [vmem:[%s21686_s3 + $0x218] sm:$0xff]  }
 0x50f   : > { %15799 = vmatpush3.bf16.msra.mxu1 %v16609_v56  ;;  %15780 = vmatprep.subr.bf16.mxu0 %v17452_v16  ;;  %v16659_v56 = vld [vmem:[%s21686_s3 + $0x258] sm:$0xff]  }
 0x510   : > { %15800 = vmatprep.subr.bf16.mxu1 %v17452_v16 }
 0x512   : > { %15781 = vmatpush3.bf16.msra.mxu0 %v16610_v4  ;;  %v16660_v4 = vld [vmem:[%s21686_s3 + $0x210] sm:$0xff]  }
 0x513   : > { %15801 = vmatpush3.bf16.msra.mxu1 %v16611_v24  ;;  %15782 = vmatprep.subr.bf16.mxu0 %v17452_v16  ;;  %v16661_v24 = vld [vmem:[%s21686_s3 + $0x250] sm:$0xff]  }
 0x514   : > { %15802 = vmatprep.subr.bf16.mxu1 %v17452_v16 }
 0x516   : > { %15783 = vmatpush3.bf16.msra.mxu0 %v16612_v32  ;;  %v16662_v32 = vld [vmem:[%s21686_s3 + $0x208] sm:$0xff]  }
 0x517   : > { %15803 = vmatpush3.bf16.msra.mxu1 %v16613_v1  ;;  %15784 = vmatprep.subr.bf16.mxu0 %v17452_v16  ;;  %v5972_v1 = vrot.slane %v5746_v40, 1  ;;  %v16696_v40 = vld [vmem:[%s21686_s3 + $0x300] sm:$0xff]  }
 0x518   : > { %15804 = vmatprep.subr.bf16.mxu1 %v17452_v16 }
 0x51a   : > { %15785 = vmatpush3.bf16.msra.mxu0 %v16614_v17  ;;  %v16663_v17 = vld [vmem:[%s21686_s3 + $0x248] sm:$0xff]  }
 0x51b   : > { %15805 = vmatpush3.bf16.msra.mxu1 %v16615_v42  ;;  %15786 = vmatprep.subr.bf16.mxu0 %v17452_v16  ;;  %v5973_v42 = vrot.slane %v5748_v61, 2  ;;  %v16693_v61 = vld [vmem:[%s21686_s3 + $0x350] sm:$0xff]  }
 0x51c   : > { %15806 = vmatprep.subr.bf16.mxu1 %v17452_v16 }
 0x51d   : > { %v5974_v33 = vor.u32 %v5973_v42, %v5972_v1 }
 0x51e   : > { %15787 = vmatpush3.bf16.msra.mxu0 %v16616_v5  ;;  %v16665_v5 = vld [vmem:[%s21686_s3 + $0x240] sm:$0xff]  }
 0x51f   : > { %15807 = vmatpush3.bf16.msra.mxu1 %v16617_v12  ;;  %15812 = vmatprep.subr.bf16.mxu0 %v17452_v16  ;;  %v16666_v12 = vld [vmem:[%s21686_s3 + $0x2b8] sm:$0xff]  }
 0x520   : > { %15832 = vmatprep.subr.bf16.mxu1 %v17452_v16 }
 0x521   : > { %15789 = vmatmul.mubr.bf16.vlgmr.msra.gmra.mxu0 %v5298_v52  ;;  %v6084_v52 = vrot.slane %v19596_v30, 2 }
 0x522   : > { %15813 = vmatpush3.bf16.msra.mxu0 %v16618_v29  ;;  %15809 = vmatmul.mubr.bf16.vlgmr.msra.gmra.mxu1 %v5410_v60  ;;  %v16667_v29 = vld [vmem:[%s21686_s3 + $0x2f8] sm:$0xff]   ;;  %v16668_v60 = vld [vmem:[%s21686_s3 + $0x2b0] sm:$0xff]  }
 0x523   : > { %15833 = vmatpush3.bf16.msra.mxu1 %v16619_v9  ;;  %15814 = vmatprep.subr.bf16.mxu0 %v17452_v16  ;;  %v16669_v9 = vld [vmem:[%s21686_s3 + $0x2f0] sm:$0xff]  }
 0x524   : > { %15834 = vmatprep.subr.bf16.mxu1 %v17452_v16  ;;  %15828 = vmatprep.mubr.msk.bf16.mxu0 %vm17453_vm2, %v17452_v16 }
 0x525   : > { %15848 = vmatprep.mubr.msk.bf16.mxu1 %vm17453_vm2, %v17452_v16 }
 0x526   : > { %15815 = vmatpush3.bf16.msra.mxu0 %v16620_v23  ;;  %v16670_v23 = vld [vmem:[%s21686_s3 + $0x2a8] sm:$0xff]  }
 0x527   : > { %15835 = vmatpush3.bf16.msra.mxu1 %v16621_v31  ;;  %15816 = vmatprep.subr.bf16.mxu0 %v17452_v16  ;;  %v16671_v31 = vld [vmem:[%s21686_s3 + $0x2e8] sm:$0xff]  }
 0x528   : > { %15836 = vmatprep.subr.bf16.mxu1 %v17452_v16 }
 0x52a   : > { %15817 = vmatpush3.bf16.msra.mxu0 %v16622_v14  ;;  %v16672_v14 = vld [vmem:[%s21686_s3 + $0x2a0] sm:$0xff]  }
 0x52b   : > { %15837 = vmatpush3.bf16.msra.mxu1 %v16623_v54  ;;  %15818 = vmatprep.subr.bf16.mxu0 %v17452_v16  ;;  %v16673_v54 = vld [vmem:[%s21686_s3 + $0x2e0] sm:$0xff]  }
 0x52c   : > { %15838 = vmatprep.subr.bf16.mxu1 %v17452_v16 }
 0x52e   : > { %15819 = vmatpush3.bf16.msra.mxu0 %v16624_v25  ;;  %v16674_v25 = vld [vmem:[%s21686_s3 + $0x298] sm:$0xff]  }
 0x52f   : > { %15839 = vmatpush3.bf16.msra.mxu1 %v16625_v58  ;;  %15820 = vmatprep.subr.bf16.mxu0 %v17452_v16  ;;  %v16675_v58 = vld [vmem:[%s21686_s3 + $0x2d8] sm:$0xff]  }
 0x530   : > { %15840 = vmatprep.subr.bf16.mxu1 %v17452_v16 }
 0x532   : > { %15821 = vmatpush3.bf16.msra.mxu0 %v16626_v37  ;;  %v12976_v37 = vld [vmem:[%s19416_s21 + $0xe0] sm:$0xff] }
 0x533   : > { %15841 = vmatpush3.bf16.msra.mxu1 %v16627_v51  ;;  %15822 = vmatprep.subr.bf16.mxu0 %v17452_v16  ;;  %v12977_v51 = vld [vmem:[%s19416_s21 + $0xe8] sm:$0x3f] }
 0x534   : > { %15842 = vmatprep.subr.bf16.mxu1 %v17452_v16 }
 0x536   : > { %15823 = vmatpush3.bf16.msra.mxu0 %v16628_v22  ;;  %v16676_v22 = vld [vmem:[%s21686_s3 + $0x290] sm:$0xff]  }
 0x537   : > { %15843 = vmatpush3.bf16.msra.mxu1 %v16629_v3  ;;  %15824 = vmatprep.subr.bf16.mxu0 %v17452_v16  ;;  %v19785_v3 = vpack.c.bf16 %v12977_v51, %v12976_v37  ;;  %v16715_v51 = vld [vmem:[%s21686_s3 + $0x478] sm:$0xff]  }
 0x538   : > { %15844 = vmatprep.subr.bf16.mxu1 %v17452_v16 }
 0x539   : > { %v6310_v63 = vshrl.u32 %v19785_v3, 16 }
 0x53a   : > { %15825 = vmatpush3.bf16.msra.mxu0 %v16630_v27  ;;  %v16677_v27 = vld [vmem:[%s21686_s3 + $0x2d0] sm:$0xff]  }
 0x53b   : > { %15845 = vmatpush3.bf16.msra.mxu1 %v16631_v19  ;;  %15826 = vmatprep.subr.bf16.mxu0 %v17452_v16  ;;  %v16678_v19 = vld [vmem:[%s21686_s3 + $0x288] sm:$0xff]   ;;  %v6536_v50 = vrot.slane %v6310_v63, 1 }
 0x53c   : > { %15846 = vmatprep.subr.bf16.mxu1 %v17452_v16 }
 0x53e   : > { %15827 = vmatpush3.bf16.msra.mxu0 %v16632_v39  ;;  %v6312_v39 = vshll.u32 %v19785_v3, 16 }
 0x53f   : > { %15847 = vmatpush3.bf16.msra.mxu1 %v16633_v2  ;;  %15852 = vmatprep.subr.bf16.mxu0 %v17452_v16  ;;  %v16679_v2 = vld [vmem:[%s21686_s3 + $0x2c8] sm:$0xff]  }
 0x540   : > { %15872 = vmatprep.subr.bf16.mxu1 %v17452_v16 }
 0x541   : > { %15829 = vmatmul.mubr.bf16.vlgmr.msra.gmra.mxu0 %v5520_v47  ;;  %v6314_v47 = vrot.slane %v6312_v39, 1 }
 0x542   : > { %15853 = vmatpush3.bf16.msra.mxu0 %v16634_v36  ;;  %15849 = vmatmul.mubr.bf16.vlgmr.msra.gmra.mxu1 %v19596_v30  ;;  %v16681_v36 = vld [vmem:[%s21686_s3 + $0x2c0] sm:$0xff]   ;;  %v16682_v30 = vld [vmem:[%s21686_s3 + $0x338] sm:$0xff]  }
 0x543   : > { %15873 = vmatpush3.bf16.msra.mxu1 %v16635_v38  ;;  %15854 = vmatprep.subr.bf16.mxu0 %v17452_v16  ;;  %v6315_v38 = vor.u32 %v6314_v47, %v6310_v63 }
 0x544   : > { %15874 = vmatprep.subr.bf16.mxu1 %v17452_v16  ;;  %15868 = vmatprep.mubr.msk.bf16.mxu0 %vm17453_vm2, %v17452_v16 }
 0x545   : > { %15888 = vmatprep.mubr.msk.bf16.mxu1 %vm17453_vm2, %v17452_v16 }
 0x546   : > { %15855 = vmatpush3.bf16.msra.mxu0 %v16636_v21  ;;  %v16683_v21 = vld [vmem:[%s21686_s3 + $0x378] sm:$0xff]  }
 0x547   : > { %15875 = vmatpush3.bf16.msra.mxu1 %v16637_v43  ;;  %15856 = vmatprep.subr.bf16.mxu0 %v17452_v16  ;;  %v16684_v43 = vld [vmem:[%s21686_s3 + $0x330] sm:$0xff]  }
 0x548   : > { %15876 = vmatprep.subr.bf16.mxu1 %v17452_v16 }
 0x54a   : > { %15857 = vmatpush3.bf16.msra.mxu0 %v16638_v35  ;;  %v16685_v35 = vld [vmem:[%s21686_s3 + $0x370] sm:$0xff]  }
 0x54b   : > { %15877 = vmatpush3.bf16.msra.mxu1 %v16639_v26  ;;  %15858 = vmatprep.subr.bf16.mxu0 %v17452_v16  ;;  %v16686_v26 = vld [vmem:[%s21686_s3 + $0x328] sm:$0xff]  }
 0x54c   : > { %15878 = vmatprep.subr.bf16.mxu1 %v17452_v16 }
 0x54e   : > { %15859 = vmatpush3.bf16.msra.mxu0 %v16640_v48  ;;  %v16687_v48 = vld [vmem:[%s21686_s3 + $0x368] sm:$0xff]  }
 0x54f   : > { %15879 = vmatpush3.bf16.msra.mxu1 %v16641_v15  ;;  %15860 = vmatprep.subr.bf16.mxu0 %v17452_v16  ;;  %v16688_v15 = vld [vmem:[%s21686_s3 + $0x320] sm:$0xff]  }
 0x550   : > { %15880 = vmatprep.subr.bf16.mxu1 %v17452_v16 }
 0x552   : > { %15861 = vmatpush3.bf16.msra.mxu0 %v16642_v41  ;;  %v16689_v41 = vld [vmem:[%s21686_s3 + $0x360] sm:$0xff]  }
 0x553   : > { %15881 = vmatpush3.bf16.msra.mxu1 %v16643_v57  ;;  %15862 = vmatprep.subr.bf16.mxu0 %v17452_v16  ;;  %v16690_v57 = vld [vmem:[%s21686_s3 + $0x318] sm:$0xff]  }
 0x554   : > { %15882 = vmatprep.subr.bf16.mxu1 %v17452_v16 }
 0x556   : > { %15863 = vmatpush3.bf16.msra.mxu0 %v16644_v18  ;;  %v16691_v18 = vld [vmem:[%s21686_s3 + $0x358] sm:$0xff]  }
 0x557   : > { %15883 = vmatpush3.bf16.msra.mxu1 %v16645_v20  ;;  %15864 = vmatprep.subr.bf16.mxu0 %v17452_v16  ;;  %v16692_v20 = vld [vmem:[%s21686_s3 + $0x310] sm:$0xff]  }
 0x558   : > { %15884 = vmatprep.subr.bf16.mxu1 %v17452_v16 }
 0x55a   : > { %15865 = vmatpush3.bf16.msra.mxu0 %v16646_v7  ;;  %v16694_v7 = vld [vmem:[%s21686_s3 + $0x308] sm:$0xff]  }
 0x55b   : > { %15885 = vmatpush3.bf16.msra.mxu1 %v16647_v13  ;;  %15866 = vmatprep.subr.bf16.mxu0 %v17452_v16  ;;  %v16695_v13 = vld [vmem:[%s21686_s3 + $0x348] sm:$0xff]  }
 0x55c   : > { %15886 = vmatprep.subr.bf16.mxu1 %v17452_v16 }
 0x55e   : > { %15867 = vmatpush3.bf16.msra.mxu0 %v16648_v28  ;;  %v6537_v28 = vrot.slane %v6312_v39, 2 }
 0x55f   : > { %15887 = vmatpush3.bf16.msra.mxu1 %v16649_v53  ;;  %15892 = vmatprep.subr.bf16.mxu0 %v17452_v16  ;;  %v16697_v53 = vld [vmem:[%s21686_s3 + $0x340] sm:$0xff]  }
 0x560   : > { %15912 = vmatprep.subr.bf16.mxu1 %v17452_v16 }
 0x561   : > { %15869 = vmatmul.mubr.bf16.vlgmr.msra.gmra.mxu0 %v5751_v44  ;;  %v6426_v44 = vrot.slane %v19785_v3, 1 }
 0x562   : > { %15893 = vmatpush3.bf16.msra.mxu0 %v16650_v11  ;;  %15889 = vmatmul.mubr.bf16.vlgmr.msra.gmra.mxu1 %v5862_v59  ;;  %v16698_v11 = vld [vmem:[%s21686_s3 + $0x3b8] sm:$0xff]   ;;  %v6538_v59 = vor.u32 %v6537_v28, %v6536_v50  ;;  %v16728_v28 = vld [vmem:[%s21686_s3 + $0x400] sm:$0xff]  }
 0x563   : > { %15913 = vmatpush3.bf16.msra.mxu1 %v16651_v0  ;;  %15894 = vmatprep.subr.bf16.mxu0 %v17452_v16  ;;  %v16699_v0 = vld [vmem:[%s21686_s3 + $0x3f8] sm:$0xff]  }
 0x564   : > { %15914 = vmatprep.subr.bf16.mxu1 %v17452_v16  ;;  %15908 = vmatprep.mubr.msk.bf16.mxu0 %vm17453_vm2, %v17452_v16 }
 0x565   : > { %15928 = vmatprep.mubr.msk.bf16.mxu1 %vm17453_vm2, %v17452_v16 }
 0x566   : > { %15895 = vmatpush3.bf16.msra.mxu0 %v16652_v55 }
 0x567   : > { %15915 = vmatpush3.bf16.msra.mxu1 %v16653_v45  ;;  %15896 = vmatprep.subr.bf16.mxu0 %v17452_v16 }
 0x568   : > { %15916 = vmatprep.subr.bf16.mxu1 %v17452_v16 }
 0x56a   : > { %15897 = vmatpush3.bf16.msra.mxu0 %v16654_v10  ;;  %v16700_v10 = vld [vmem:[%s21686_s3 + $0x3b0] sm:$0xff]  }
 0x56b   : > { %15917 = vmatpush3.bf16.msra.mxu1 %v16655_v34  ;;  %15898 = vmatprep.subr.bf16.mxu0 %v17452_v16 }
 0x56c   : > { %15918 = vmatprep.subr.bf16.mxu1 %v17452_v16 }
 0x56e   : > { %15899 = vmatpush3.bf16.msra.mxu0 %v16656_v6 }
 0x56f   : > { %15919 = vmatpush3.bf16.msra.mxu1 %v16657_v46  ;;  %15900 = vmatprep.subr.bf16.mxu0 %v17452_v16  ;;  %v16701_v46 = vld [vmem:[%s21686_s3 + $0x3f0] sm:$0xff]  }
 0x570   : > { %15920 = vmatprep.subr.bf16.mxu1 %v17452_v16 }
 0x572   : > { %15901 = vmatpush3.bf16.msra.mxu0 %v16658_v8 }
 0x573   : > { %15921 = vmatpush3.bf16.msra.mxu1 %v16659_v56  ;;  %15902 = vmatprep.subr.bf16.mxu0 %v17452_v16 }
 0x574   : > { %15922 = vmatprep.subr.bf16.mxu1 %v17452_v16 }
 0x576   : > { %15903 = vmatpush3.bf16.msra.mxu0 %v16660_v4 }
 0x577   : > { %15923 = vmatpush3.bf16.msra.mxu1 %v16661_v24  ;;  %15904 = vmatprep.subr.bf16.mxu0 %v17452_v16  ;;  %v16702_v24 = vld [vmem:[%s21686_s3 + $0x3a8] sm:$0xff]  }
 0x578   : > { %15924 = vmatprep.subr.bf16.mxu1 %v17452_v16 }
 0x57a   : > { %15905 = vmatpush3.bf16.msra.mxu0 %v16662_v32 }
 0x57b   : > { %15925 = vmatpush3.bf16.msra.mxu1 %v16663_v17  ;;  %15906 = vmatprep.subr.bf16.mxu0 %v17452_v16  ;;  %v16703_v17 = vld [vmem:[%s21686_s3 + $0x3e8] sm:$0xff]  }
 0x57c   : > { %15926 = vmatprep.subr.bf16.mxu1 %v17452_v16 }
 0x57e   : > { %15907 = vmatpush3.bf16.msra.mxu0 %v16664_v62  ;;  %v16704_v62 = vld [vmem:[%s21686_s3 + $0x3a0] sm:$0xff]  }
 0x57f   : > { %15927 = vmatpush3.bf16.msra.mxu1 %v16665_v5  ;;  %15932 = vmatprep.subr.bf16.mxu0 %v17452_v16  ;;  %v16705_v5 = vld [vmem:[%s21686_s3 + $0x3e0] sm:$0xff]  }
 0x580   : > { %15952 = vmatprep.subr.bf16.mxu1 %v17452_v16 }
 0x581   : > { %15909 = vmatmul.mubr.bf16.vlgmr.msra.gmra.mxu0 %v5974_v33  ;;  %v16706_v33 = vld [vmem:[%s21686_s3 + $0x398] sm:$0xff]  }
 0x582   : > { %15933 = vmatpush3.bf16.msra.mxu0 %v16666_v12  ;;  %15929 = vmatmul.mubr.bf16.vlgmr.msra.gmra.mxu1 %v6084_v52  ;;  %v16707_v12 = vld [vmem:[%s21686_s3 + $0x3d8] sm:$0xff]   ;;  %v16708_v52 = vld [vmem:[%s21686_s3 + $0x390] sm:$0xff]  }
 0x583   : > { %15953 = vmatpush3.bf16.msra.mxu1 %v16667_v29  ;;  %15934 = vmatprep.subr.bf16.mxu0 %v17452_v16  ;;  %v16709_v29 = vld [vmem:[%s21686_s3 + $0x3d0] sm:$0xff]  }
 0x584   : > { %15954 = vmatprep.subr.bf16.mxu1 %v17452_v16  ;;  %15948 = vmatprep.mubr.msk.bf16.mxu0 %vm17453_vm2, %v17452_v16 }
 0x585   : > { %15968 = vmatprep.mubr.msk.bf16.mxu1 %vm17453_vm2, %v17452_v16 }
 0x586   : > { %15935 = vmatpush3.bf16.msra.mxu0 %v16668_v60  ;;  %v16710_v60 = vld [vmem:[%s21686_s3 + $0x388] sm:$0xff]  }
 0x587   : > { %15955 = vmatpush3.bf16.msra.mxu1 %v16669_v9  ;;  %15936 = vmatprep.subr.bf16.mxu0 %v17452_v16  ;;  %v16711_v9 = vld [vmem:[%s21686_s3 + $0x3c8] sm:$0xff]  }
 0x588   : > { %15956 = vmatprep.subr.bf16.mxu1 %v17452_v16 }
 0x58a   : > { %15937 = vmatpush3.bf16.msra.mxu0 %v16670_v23  ;;  %v16712_v23 = vld [vmem:[%s21686_s3 + $0x380] sm:$0xff]  }
 0x58b   : > { %15957 = vmatpush3.bf16.msra.mxu1 %v16671_v31  ;;  %15938 = vmatprep.subr.bf16.mxu0 %v17452_v16  ;;  %v16713_v31 = vld [vmem:[%s21686_s3 + $0x3c0] sm:$0xff]  }
 0x58c   : > { %15958 = vmatprep.subr.bf16.mxu1 %v17452_v16 }
 0x58e   : > { %15939 = vmatpush3.bf16.msra.mxu0 %v16672_v14  ;;  %v13098_v14 = vld [vmem:[%s19416_s21 + $0xee] sm:$0xff] }
 0x58f   : > { %15959 = vmatpush3.bf16.msra.mxu1 %v16673_v54  ;;  %15940 = vmatprep.subr.bf16.mxu0 %v17452_v16  ;;  %v13099_v54 = vld [vmem:[%s19416_s21 + $0xf6] sm:$0x3f] }
 0x590   : > { %15960 = vmatprep.subr.bf16.mxu1 %v17452_v16  ;;  %v19956_v37 = vpack.c.bf16 %v13099_v54, %v13098_v14 }
 0x592   : > { %15941 = vmatpush3.bf16.msra.mxu0 %v16674_v25  ;;  %v6648_v25 = vrot.slane %v19785_v3, 2 }
 0x593   : > { %15961 = vmatpush3.bf16.msra.mxu1 %v16675_v58  ;;  %15942 = vmatprep.subr.bf16.mxu0 %v17452_v16  ;;  %v16714_v58 = vld [vmem:[%s21686_s3 + $0x438] sm:$0xff]  }
 0x594   : > { %15962 = vmatprep.subr.bf16.mxu1 %v17452_v16 }
 0x596   : > { %15943 = vmatpush3.bf16.msra.mxu0 %v16676_v22 }
 0x597   : > { %15963 = vmatpush3.bf16.msra.mxu1 %v16677_v27  ;;  %15944 = vmatprep.subr.bf16.mxu0 %v17452_v16 }
 0x598   : > { %15964 = vmatprep.subr.bf16.mxu1 %v17452_v16 }
 0x59a   : > { %15945 = vmatpush3.bf16.msra.mxu0 %v16678_v19  ;;  %v16716_v19 = vld [vmem:[%s21686_s3 + $0x430] sm:$0xff]  }
 0x59b   : > { %15965 = vmatpush3.bf16.msra.mxu1 %v16679_v2  ;;  %15946 = vmatprep.subr.bf16.mxu0 %v17452_v16  ;;  %v16717_v2 = vld [vmem:[%s21686_s3 + $0x470] sm:$0xff]  }
 0x59c   : > { %15966 = vmatprep.subr.bf16.mxu1 %v17452_v16 }
 0x59e   : > { %15947 = vmatpush3.bf16.msra.mxu0 %v16680_v49 }
 0x59f   : > { %15967 = vmatpush3.bf16.msra.mxu1 %v16681_v36  ;;  %15972 = vmatprep.subr.bf16.mxu0 %v17452_v16 }
 0x5a0   : > { %15992 = vmatprep.subr.bf16.mxu1 %v17452_v16 }
 0x5a1   : > { %15949 = vmatmul.mubr.bf16.vlgmr.msra.gmra.mxu0 %v19785_v3 }
 0x5a2   : > { %15973 = vmatpush3.bf16.msra.mxu0 %v16682_v30  ;;  %15969 = vmatmul.mubr.bf16.vlgmr.msra.gmra.mxu1 %v6315_v38  ;;  %v16718_v38 = vld [vmem:[%s21686_s3 + $0x428] sm:$0xff]  }
 0x5a3   : > { %15993 = vmatpush3.bf16.msra.mxu1 %v16683_v21  ;;  %15974 = vmatprep.subr.bf16.mxu0 %v17452_v16 }
 0x5a4   : > { %15994 = vmatprep.subr.bf16.mxu1 %v17452_v16  ;;  %15988 = vmatprep.mubr.msk.bf16.mxu0 %vm17453_vm2, %v17452_v16 }
 0x5a5   : > { %16008 = vmatprep.mubr.msk.bf16.mxu1 %vm17453_vm2, %v17452_v16 }
 0x5a6   : > { %15975 = vmatpush3.bf16.msra.mxu0 %v16684_v43  ;;  %v16719_v43 = vld [vmem:[%s21686_s3 + $0x468] sm:$0xff]  }
 0x5a7   : > { %15995 = vmatpush3.bf16.msra.mxu1 %v16685_v35  ;;  %15976 = vmatprep.subr.bf16.mxu0 %v17452_v16 }
 0x5a8   : > { %15996 = vmatprep.subr.bf16.mxu1 %v17452_v16 }
 0x5aa   : > { %15977 = vmatpush3.bf16.msra.mxu0 %v16686_v26 }
 0x5ab   : > { %15997 = vmatpush3.bf16.msra.mxu1 %v16687_v48  ;;  %15978 = vmatprep.subr.bf16.mxu0 %v17452_v16  ;;  %v16720_v48 = vld [vmem:[%s21686_s3 + $0x420] sm:$0xff]  }
 0x5ac   : > { %15998 = vmatprep.subr.bf16.mxu1 %v17452_v16 }
 0x5ae   : > { %15979 = vmatpush3.bf16.msra.mxu0 %v16688_v15  ;;  %v16721_v15 = vld [vmem:[%s21686_s3 + $0x460] sm:$0xff]  }
 0x5af   : > { %15999 = vmatpush3.bf16.msra.mxu1 %v16689_v41  ;;  %15980 = vmatprep.subr.bf16.mxu0 %v17452_v16  ;;  %v16722_v41 = vld [vmem:[%s21686_s3 + $0x418] sm:$0xff]  }
 0x5b0   : > { %16000 = vmatprep.subr.bf16.mxu1 %v17452_v16 }
 0x5b2   : > { %15981 = vmatpush3.bf16.msra.mxu0 %v16690_v57  ;;  %v16723_v57 = vld [vmem:[%s21686_s3 + $0x458] sm:$0xff]  }
 0x5b3   : > { %16001 = vmatpush3.bf16.msra.mxu1 %v16691_v18  ;;  %15982 = vmatprep.subr.bf16.mxu0 %v17452_v16  ;;  %v16724_v18 = vld [vmem:[%s21686_s3 + $0x410] sm:$0xff]  }
 0x5b4   : > { %16002 = vmatprep.subr.bf16.mxu1 %v17452_v16 }
 0x5b6   : > { %15983 = vmatpush3.bf16.msra.mxu0 %v16692_v20  ;;  %v16725_v20 = vld [vmem:[%s21686_s3 + $0x450] sm:$0xff]  }
 0x5b7   : > { %16003 = vmatpush3.bf16.msra.mxu1 %v16693_v61  ;;  %15984 = vmatprep.subr.bf16.mxu0 %v17452_v16  ;;  %v6876_v61 = vshll.u32 %v19956_v37, 16 }
 0x5b8   : > { %16004 = vmatprep.subr.bf16.mxu1 %v17452_v16 }
 0x5b9   : > { %v6878_v50 = vrot.slane %v6876_v61, 1  ;;  %v7101_v54 = vrot.slane %v6876_v61, 2  ;;  %v13220_v61 = vld [vmem:[%s19416_s21 + $0xfc] sm:$0xff] }
 0x5ba   : > { %15985 = vmatpush3.bf16.msra.mxu0 %v16694_v7  ;;  %v16726_v7 = vld [vmem:[%s21686_s3 + $0x408] sm:$0xff]  }
 0x5bb   : > { %16005 = vmatpush3.bf16.msra.mxu1 %v16695_v13  ;;  %15986 = vmatprep.subr.bf16.mxu0 %v17452_v16  ;;  %v16727_v13 = vld [vmem:[%s21686_s3 + $0x448] sm:$0xff]  }
 0x5bc   : > { %16006 = vmatprep.subr.bf16.mxu1 %v17452_v16 }
 0x5be   : > { %15987 = vmatpush3.bf16.msra.mxu0 %v16696_v40  ;;  %v6874_v40 = vshrl.u32 %v19956_v37, 16 }
 0x5bf   : > { %16007 = vmatpush3.bf16.msra.mxu1 %v16697_v53  ;;  %16012 = vmatprep.subr.bf16.mxu0 %v17452_v16  ;;  %v16729_v53 = vld [vmem:[%s21686_s3 + $0x440] sm:$0xff]  }
 0x5c0   : > { %16032 = vmatprep.subr.bf16.mxu1 %v17452_v16  ;;  %v7100_v14 = vrot.slane %v6874_v40, 1 }
 0x5c1   : > { %v5184_v55 = vpop.f32.mrf.mxu0  ;;  %15989 = vmatmul.mubr.bf16.vlgmr.msra.gmra.mxu0 %v6426_v44  ;;  %v6879_v44 = vor.u32 %v6878_v50, %v6874_v40  ;;  %v16757_v50 = vld [vmem:[%s21686_s3 + $0x550] sm:$0xff]  }
 0x5c2   : > { %v5273_v45 = vpop.f32.mrf.mxu1  ;;  %16013 = vmatpush3.bf16.msra.mxu0 %v16698_v11  ;;  %16009 = vmatmul.mubr.bf16.vlgmr.msra.gmra.mxu1 %v6538_v59  ;;  %v16730_v11 = vld [vmem:[%s21686_s3 + $0x4b8] sm:$0xff]   ;;  %v6990_v59 = vrot.slane %v19956_v37, 1 }
 0x5c3   : > { %v5274_v34 = vadd.f32 %v5273_v45, %v5184_v55  ;;  %v15750_v6 = vpop.f32.mrf.mxu0  ;;  %16033 = vmatpush3.bf16.msra.mxu1 %v16699_v0  ;;  %16014 = vmatprep.subr.bf16.mxu0 %v17452_v16  ;;  %v16731_v0 = vld [vmem:[%s21686_s3 + $0x4f8] sm:$0xff]  }
 0x5c4   : > { %v15770_v8 = vpop.f32.mrf.mxu1  ;;  %16034 = vmatprep.subr.bf16.mxu1 %v17452_v16  ;;  %16028 = vmatprep.mubr.msk.bf16.mxu0 %vm17453_vm2, %v17452_v16 }
 0x5c5   : > { %v5187_v56 = vpop.f32.mrf.mxu0  ;;  %16048 = vmatprep.mubr.msk.bf16.mxu1 %vm17453_vm2, %v17452_v16 }
 0x5c6   : > { %v5276_v4 = vpop.f32.mrf.mxu1  ;;  %16015 = vmatpush3.bf16.msra.mxu0 %v16700_v10 }
 0x5c7   : > { %v19903_v32 = vadd.f32 %v5276_v4, %v5187_v56  ;;  %v15751_v1 = vpop.f32.mrf.mxu0  ;;  %16035 = vmatpush3.bf16.msra.mxu1 %v16701_v46  ;;  %16016 = vmatprep.subr.bf16.mxu0 %v17452_v16  ;;  %v16733_v46 = vld [vmem:[%s21686_s3 + $0x4f0] sm:$0xff]  }
 0x5c8   : > { %16036 = vmatprep.subr.bf16.mxu1 %v17452_v16  ;;  %v15771_v42 = vpop.f32.mrf.mxu1  ;;  %v16734_v1 = vld [vmem:[%s21686_s3 + $0x4a8] sm:$0xff]  }
 0x5c9   : > { %v16735_v42 = vld [vmem:[%s21686_s3 + $0x4e8] sm:$0xff]  }
 0x5ca   : > { %16017 = vmatpush3.bf16.msra.mxu0 %v16702_v24 }
 0x5cb   : > { %16037 = vmatpush3.bf16.msra.mxu1 %v16703_v17  ;;  %16018 = vmatprep.subr.bf16.mxu0 %v17452_v16 }
 0x5cc   : > { %16038 = vmatprep.subr.bf16.mxu1 %v17452_v16 }
 0x5ce   : > { %16019 = vmatpush3.bf16.msra.mxu0 %v16704_v62 }
 0x5cf   : > { %16039 = vmatpush3.bf16.msra.mxu1 %v16705_v5  ;;  %16020 = vmatprep.subr.bf16.mxu0 %v17452_v16 }
 0x5d0   : > { %16040 = vmatprep.subr.bf16.mxu1 %v17452_v16 }
 0x5d2   : > { %16021 = vmatpush3.bf16.msra.mxu0 %v16706_v33  ;;  %v16736_v33 = vld [vmem:[%s21686_s3 + $0x4a0] sm:$0xff]  }
 0x5d3   : > { %16041 = vmatpush3.bf16.msra.mxu1 %v16707_v12  ;;  %16022 = vmatprep.subr.bf16.mxu0 %v17452_v16  ;;  %v16737_v12 = vld [vmem:[%s21686_s3 + $0x4e0] sm:$0xff]  }
 0x5d4   : > { %16042 = vmatprep.subr.bf16.mxu1 %v17452_v16 }
 0x5d6   : > { %16023 = vmatpush3.bf16.msra.mxu0 %v16708_v52  ;;  %v16738_v52 = vld [vmem:[%s21686_s3 + $0x498] sm:$0xff]  }
 0x5d7   : > { %16043 = vmatpush3.bf16.msra.mxu1 %v16709_v29  ;;  %16024 = vmatprep.subr.bf16.mxu0 %v17452_v16  ;;  %v16739_v29 = vld [vmem:[%s21686_s3 + $0x4d8] sm:$0xff]  }
 0x5d8   : > { %16044 = vmatprep.subr.bf16.mxu1 %v17452_v16 }
 0x5da   : > { %16025 = vmatpush3.bf16.msra.mxu0 %v16710_v60  ;;  %v16740_v60 = vld [vmem:[%s21686_s3 + $0x490] sm:$0xff]  }
 0x5db   : > { %16045 = vmatpush3.bf16.msra.mxu1 %v16711_v9  ;;  %16026 = vmatprep.subr.bf16.mxu0 %v17452_v16  ;;  %v16741_v9 = vld [vmem:[%s21686_s3 + $0x4d0] sm:$0xff]  }
 0x5dc   : > { %16046 = vmatprep.subr.bf16.mxu1 %v17452_v16 }
 0x5de   : > { %16027 = vmatpush3.bf16.msra.mxu0 %v16712_v23  ;;  %v16742_v23 = vld [vmem:[%s21686_s3 + $0x488] sm:$0xff]  }
 0x5df   : > { %16047 = vmatpush3.bf16.msra.mxu1 %v16713_v31  ;;  %16052 = vmatprep.subr.bf16.mxu0 %v17452_v16  ;;  %v16743_v31 = vld [vmem:[%s21686_s3 + $0x4c8] sm:$0xff]  }
 0x5e0   : > { %16072 = vmatprep.subr.bf16.mxu1 %v17452_v16 }
 0x5e1   : > { %v5382_v22 = vpop.f32.mrf.mxu0  ;;  %16029 = vmatmul.mubr.bf16.vlgmr.msra.gmra.mxu0 %v6648_v25  ;;  %v16744_v25 = vld [vmem:[%s21686_s3 + $0x480] sm:$0xff]  }
 0x5e2   : > { %v5389_v27 = vadd.f32 %v5382_v22, %v5274_v34  ;;  %16053 = vmatpush3.bf16.msra.mxu0 %v16714_v58  ;;  %v5494_v3 = vpop.f32.mrf.mxu1  ;;  %16049 = vmatmul.mubr.bf16.vlgmr.msra.gmra.mxu1 %v19956_v37  ;;  %v16732_v34 = vld [vmem:[%s21686_s3 + $0x4b0] sm:$0xff]   ;;  %v16745_v58 = vld [vmem:[%s21686_s3 + $0x4c0] sm:$0xff]   ;;  %v16746_v22 = vld [vmem:[%s21686_s3 + $0x538] sm:$0xff]  }
 0x5e3   : > { %v15790_v39 = vpop.f32.mrf.mxu0  ;;  %16073 = vmatpush3.bf16.msra.mxu1 %v16715_v51  ;;  %16054 = vmatprep.subr.bf16.mxu0 %v17452_v16  ;;  %v7102_v51 = vor.u32 %v7101_v54, %v7100_v14  ;;  %v16772_v14 = vld [vmem:[%s21686_s3 + $0x590] sm:$0xff]  }
 0x5e4   : > { %v5501_v49 = vadd.f32 %v5494_v3, %v5389_v27  ;;  %v15810_v63 = vpop.f32.mrf.mxu1  ;;  %16074 = vmatprep.subr.bf16.mxu1 %v17452_v16  ;;  %16068 = vmatprep.mubr.msk.bf16.mxu0 %vm17453_vm2, %v17452_v16  ;;  %v7212_v27 = vrot.slane %v19956_v37, 2  ;;  %v16747_v3 = vld [vmem:[%s21686_s3 + $0x578] sm:$0xff]   ;;  %v16773_v54 = vld [vmem:[%s21686_s3 + $0x5d0] sm:$0xff]  }
 0x5e5   : > { %v5385_v47 = vpop.f32.mrf.mxu0  ;;  %16088 = vmatprep.mubr.msk.bf16.mxu1 %vm17453_vm2, %v17452_v16  ;;  %v16749_v63 = vld [vmem:[%s21686_s3 + $0x570] sm:$0xff]  }
 0x5e6   : > { %v5390_v36 = vadd.f32 %v5385_v47, %v19903_v32  ;;  %16055 = vmatpush3.bf16.msra.mxu0 %v16716_v19  ;;  %v5497_v30 = vpop.f32.mrf.mxu1 }
 0x5e7   : > { %v15791_v21 = vpop.f32.mrf.mxu0  ;;  %16075 = vmatpush3.bf16.msra.mxu1 %v16717_v2  ;;  %16056 = vmatprep.subr.bf16.mxu0 %v17452_v16 }
 0x5e8   : > { %v5502_v35 = vadd.f32 %v5497_v30, %v5390_v36  ;;  %16076 = vmatprep.subr.bf16.mxu1 %v17452_v16  ;;  %v15811_v26 = vpop.f32.mrf.mxu1 }
 0x5e9   : > { %v16751_v26 = vld [vmem:[%s21686_s3 + $0x568] sm:$0xff]  }
 0x5ea   : > { %16057 = vmatpush3.bf16.msra.mxu0 %v16718_v38 }
 0x5eb   : > { %16077 = vmatpush3.bf16.msra.mxu1 %v16719_v43  ;;  %16058 = vmatprep.subr.bf16.mxu0 %v17452_v16  ;;  %v16750_v43 = vld [vmem:[%s21686_s3 + $0x528] sm:$0xff]  }
 0x5ec   : > { %16078 = vmatprep.subr.bf16.mxu1 %v17452_v16 }
 0x5ee   : > { %16059 = vmatpush3.bf16.msra.mxu0 %v16720_v48 }
 0x5ef   : > { %16079 = vmatpush3.bf16.msra.mxu1 %v16721_v15  ;;  %16060 = vmatprep.subr.bf16.mxu0 %v17452_v16 }
 0x5f0   : > { %16080 = vmatprep.subr.bf16.mxu1 %v17452_v16 }
 0x5f2   : > { %16061 = vmatpush3.bf16.msra.mxu0 %v16722_v41  ;;  %v16752_v41 = vld [vmem:[%s21686_s3 + $0x520] sm:$0xff]  }
 0x5f3   : > { %16081 = vmatpush3.bf16.msra.mxu1 %v16723_v57  ;;  %16062 = vmatprep.subr.bf16.mxu0 %v17452_v16  ;;  %v16753_v57 = vld [vmem:[%s21686_s3 + $0x560] sm:$0xff]  }
 0x5f4   : > { %16082 = vmatprep.subr.bf16.mxu1 %v17452_v16 }
 0x5f6   : > { %16063 = vmatpush3.bf16.msra.mxu0 %v16724_v18  ;;  %v16754_v18 = vld [vmem:[%s21686_s3 + $0x518] sm:$0xff]  }
 0x5f7   : > { %16083 = vmatpush3.bf16.msra.mxu1 %v16725_v20  ;;  %16064 = vmatprep.subr.bf16.mxu0 %v17452_v16  ;;  %v16755_v20 = vld [vmem:[%s21686_s3 + $0x558] sm:$0xff]  }
 0x5f8   : > { %16084 = vmatprep.subr.bf16.mxu1 %v17452_v16 }
 0x5fa   : > { %16065 = vmatpush3.bf16.msra.mxu0 %v16726_v7  ;;  %v13221_v7 = vld [vmem:[%s19416_s21 + $0x104] sm:$0x3f] }
 0x5fb   : > { %16085 = vmatpush3.bf16.msra.mxu1 %v16727_v13  ;;  %16066 = vmatprep.subr.bf16.mxu0 %v17452_v16  ;;  %v16756_v13 = vld [vmem:[%s21686_s3 + $0x510] sm:$0xff]   ;;  %v20156_v40 = vpack.c.bf16 %v13221_v7, %v13220_v61  ;;  %v16784_v61 = vld [vmem:[%s21686_s3 + $0x608] sm:$0xff]   ;;  %v16785_v7 = vld [vmem:[%s21686_s3 + $0x600] sm:$0xff]  }
 0x5fc   : > { %16086 = vmatprep.subr.bf16.mxu1 %v17452_v16 }
 0x5fe   : > { %16067 = vmatpush3.bf16.msra.mxu0 %v16728_v28  ;;  %v16758_v28 = vld [vmem:[%s21686_s3 + $0x508] sm:$0xff]  }
 0x5ff   : > { %16087 = vmatpush3.bf16.msra.mxu1 %v16729_v53  ;;  %16092 = vmatprep.subr.bf16.mxu0 %v17452_v16  ;;  %v7440_v53 = vshll.u32 %v20156_v40, 16 }
 0x600   : > { %16112 = vmatprep.subr.bf16.mxu1 %v17452_v16 }
 0x601   : > { %v5604_v55 = vpop.f32.mrf.mxu0  ;;  %16069 = vmatmul.mubr.bf16.vlgmr.msra.gmra.mxu0 %v6879_v44  ;;  %v16759_v44 = vld [vmem:[%s21686_s3 + $0x548] sm:$0xff]  }
 0x602   : > { %v5611_v45 = vadd.f32 %v5604_v55, %v5501_v49  ;;  %16093 = vmatpush3.bf16.msra.mxu0 %v16730_v11  ;;  %v5719_v10 = vpop.f32.mrf.mxu1  ;;  %16089 = vmatmul.mubr.bf16.vlgmr.msra.gmra.mxu1 %v6990_v59  ;;  %v16748_v49 = vld [vmem:[%s21686_s3 + $0x530] sm:$0xff]   ;;  %v16760_v11 = vld [vmem:[%s21686_s3 + $0x500] sm:$0xff]   ;;  %v7438_v59 = vshrl.u32 %v20156_v40, 16 }
 0x603   : > { %v15830_v6 = vpop.f32.mrf.mxu0  ;;  %16113 = vmatpush3.bf16.msra.mxu1 %v16731_v0  ;;  %16094 = vmatprep.subr.bf16.mxu0 %v17452_v16  ;;  %v7442_v0 = vrot.slane %v7440_v53, 1  ;;  %v16761_v55 = vld [vmem:[%s21686_s3 + $0x540] sm:$0xff]  }
 0x604   : > { %v5726_v8 = vadd.f32 %v5719_v10, %v5611_v45  ;;  %v15850_v56 = vpop.f32.mrf.mxu1  ;;  %16114 = vmatprep.subr.bf16.mxu1 %v17452_v16  ;;  %16108 = vmatprep.mubr.msk.bf16.mxu0 %vm17453_vm2, %v17452_v16  ;;  %v16762_v45 = vld [vmem:[%s21686_s3 + $0x5b8] sm:$0xff]  }
 0x605   : > { %v5607_v4 = vpop.f32.mrf.mxu0  ;;  %16128 = vmatprep.mubr.msk.bf16.mxu1 %vm17453_vm2, %v17452_v16  ;;  %v7443_v10 = vor.u32 %v7442_v0, %v7438_v59  ;;  %v16764_v56 = vld [vmem:[%s21686_s3 + $0x5b0] sm:$0xff]  }
 0x606   : > { %v5612_v24 = vadd.f32 %v5607_v4, %v5502_v35  ;;  %16095 = vmatpush3.bf16.msra.mxu0 %v16732_v34  ;;  %v5722_v32 = vpop.f32.mrf.mxu1  ;;  %v16763_v34 = vld [vmem:[%s21686_s3 + $0x5f8] sm:$0xff]  }
 0x607   : > { %v15831_v17 = vpop.f32.mrf.mxu0  ;;  %16115 = vmatpush3.bf16.msra.mxu1 %v16733_v46  ;;  %16096 = vmatprep.subr.bf16.mxu0 %v17452_v16 }
 0x608   : > { %v5727_v62 = vadd.f32 %v5722_v32, %v5612_v24  ;;  %16116 = vmatprep.subr.bf16.mxu1 %v17452_v16  ;;  %v15851_v5 = vpop.f32.mrf.mxu1  ;;  %v16765_v24 = vld [vmem:[%s21686_s3 + $0x5f0] sm:$0xff]  }
 0x609   : > { %v16766_v5 = vld [vmem:[%s21686_s3 + $0x5a8] sm:$0xff]  }
 0x60a   : > { %16097 = vmatpush3.bf16.msra.mxu0 %v16734_v1 }
 0x60b   : > { %16117 = vmatpush3.bf16.msra.mxu1 %v16735_v42  ;;  %16098 = vmatprep.subr.bf16.mxu0 %v17452_v16 }
 0x60c   : > { %16118 = vmatprep.subr.bf16.mxu1 %v17452_v16 }
 0x60e   : > { %16099 = vmatpush3.bf16.msra.mxu0 %v16736_v33 }
 0x60f   : > { %16119 = vmatpush3.bf16.msra.mxu1 %v16737_v12  ;;  %16100 = vmatprep.subr.bf16.mxu0 %v17452_v16  ;;  %v16767_v12 = vld [vmem:[%s21686_s3 + $0x5e8] sm:$0xff]  }
 0x610   : > { %16120 = vmatprep.subr.bf16.mxu1 %v17452_v16 }
 0x612   : > { %16101 = vmatpush3.bf16.msra.mxu0 %v16738_v52 }
 0x613   : > { %16121 = vmatpush3.bf16.msra.mxu1 %v16739_v29  ;;  %16102 = vmatprep.subr.bf16.mxu0 %v17452_v16 }
 0x614   : > { %16122 = vmatprep.subr.bf16.mxu1 %v17452_v16 }
 0x616   : > { %16103 = vmatpush3.bf16.msra.mxu0 %v16740_v60  ;;  %v16768_v60 = vld [vmem:[%s21686_s3 + $0x5a0] sm:$0xff]  }
 0x617   : > { %16123 = vmatpush3.bf16.msra.mxu1 %v16741_v9  ;;  %16104 = vmatprep.subr.bf16.mxu0 %v17452_v16  ;;  %v16769_v9 = vld [vmem:[%s21686_s3 + $0x5e0] sm:$0xff]  }
 0x618   : > { %16124 = vmatprep.subr.bf16.mxu1 %v17452_v16 }
 0x61a   : > { %16105 = vmatpush3.bf16.msra.mxu0 %v16742_v23  ;;  %v16770_v23 = vld [vmem:[%s21686_s3 + $0x598] sm:$0xff]  }
 0x61b   : > { %16125 = vmatpush3.bf16.msra.mxu1 %v16743_v31  ;;  %16106 = vmatprep.subr.bf16.mxu0 %v17452_v16  ;;  %v16771_v31 = vld [vmem:[%s21686_s3 + $0x5d8] sm:$0xff]  }
 0x61c   : > { %16126 = vmatprep.subr.bf16.mxu1 %v17452_v16 }
 0x61e   : > { %16107 = vmatpush3.bf16.msra.mxu0 %v16744_v25  ;;  %v16774_v25 = vld [vmem:[%s21686_s3 + $0x588] sm:$0xff]  }
 0x61f   : > { %16127 = vmatpush3.bf16.msra.mxu1 %v16745_v58  ;;  %16132 = vmatprep.subr.bf16.mxu0 %v17452_v16  ;;  %v16775_v58 = vld [vmem:[%s21686_s3 + $0x5c8] sm:$0xff]  }
 0x620   : > { %16152 = vmatprep.subr.bf16.mxu1 %v17452_v16 }
 0x621   : > { %v5835_v19 = vpop.f32.mrf.mxu0  ;;  %16109 = vmatmul.mubr.bf16.vlgmr.msra.gmra.mxu0 %v7102_v51  ;;  %v16776_v51 = vld [vmem:[%s21686_s3 + $0x580] sm:$0xff]  }
 0x622   : > { %v5842_v39 = vadd.f32 %v5835_v19, %v5726_v8  ;;  %16133 = vmatpush3.bf16.msra.mxu0 %v16746_v22  ;;  %v5946_v2 = vpop.f32.mrf.mxu1  ;;  %16129 = vmatmul.mubr.bf16.vlgmr.msra.gmra.mxu1 %v7212_v27  ;;  %v7664_v22 = vrot.slane %v7438_v59, 1  ;;  %v7665_v27 = vrot.slane %v7440_v53, 2  ;;  %v7554_v19 = vrot.slane %v20156_v40, 1 }
 0x623   : > { %v15870_v37 = vpop.f32.mrf.mxu0  ;;  %16153 = vmatpush3.bf16.msra.mxu1 %v16747_v3  ;;  %16134 = vmatprep.subr.bf16.mxu0 %v17452_v16  ;;  %v16777_v3 = vld [vmem:[%s21686_s3 + $0x5c0] sm:$0xff]  }
 0x624   : > { %v5953_v47 = vadd.f32 %v5946_v2, %v5842_v39  ;;  %v15890_v36 = vpop.f32.mrf.mxu1  ;;  %16154 = vmatprep.subr.bf16.mxu1 %v17452_v16  ;;  %16148 = vmatprep.mubr.msk.bf16.mxu0 %vm17453_vm2, %v17452_v16  ;;  %v16778_v39 = vld [vmem:[%s21686_s3 + $0x638] sm:$0xff]   ;;  %v7666_v2 = vor.u32 %v7665_v27, %v7664_v22 }
 0x625   : > { %v5838_v30 = vpop.f32.mrf.mxu0  ;;  %16168 = vmatprep.mubr.msk.bf16.mxu1 %vm17453_vm2, %v17452_v16 }
 0x626   : > { %v5843_v38 = vadd.f32 %v5838_v30, %v5727_v62  ;;  %16135 = vmatpush3.bf16.msra.mxu0 %v16748_v49  ;;  %v5949_v21 = vpop.f32.mrf.mxu1 }
 0x627   : > { %v15871_v35 = vpop.f32.mrf.mxu0  ;;  %16155 = vmatpush3.bf16.msra.mxu1 %v16749_v63  ;;  %16136 = vmatprep.subr.bf16.mxu0 %v17452_v16 }
 0x628   : > { %v20132_v48 = vadd.f32 %v5949_v21, %v5843_v38  ;;  %16156 = vmatprep.subr.bf16.mxu1 %v17452_v16  ;;  %v15891_v15 = vpop.f32.mrf.mxu1 }
 0x62a   : > { %16137 = vmatpush3.bf16.msra.mxu0 %v16750_v43 }
 0x62b   : > { %16157 = vmatpush3.bf16.msra.mxu1 %v16751_v26  ;;  %16138 = vmatprep.subr.bf16.mxu0 %v17452_v16  ;;  %v16780_v26 = vld [vmem:[%s21686_s3 + $0x628] sm:$0xff]  }
 0x62c   : > { %16158 = vmatprep.subr.bf16.mxu1 %v17452_v16 }
 0x62e   : > { %16139 = vmatpush3.bf16.msra.mxu0 %v16752_v41 }
 0x62f   : > { %16159 = vmatpush3.bf16.msra.mxu1 %v16753_v57  ;;  %16140 = vmatprep.subr.bf16.mxu0 %v17452_v16  ;;  %v16781_v57 = vld [vmem:[%s21686_s3 + $0x620] sm:$0xff]  }
 0x630   : > { %16160 = vmatprep.subr.bf16.mxu1 %v17452_v16 }
 0x632   : > { %16141 = vmatpush3.bf16.msra.mxu0 %v16754_v18  ;;  %v16782_v18 = vld [vmem:[%s21686_s3 + $0x618] sm:$0xff]  }
 0x633   : > { %16161 = vmatpush3.bf16.msra.mxu1 %v16755_v20  ;;  %16142 = vmatprep.subr.bf16.mxu0 %v17452_v16  ;;  %v16783_v20 = vld [vmem:[%s21686_s3 + $0x610] sm:$0xff]  }
 0x634   : > { %16162 = vmatprep.subr.bf16.mxu1 %v17452_v16 }
 0x636   : > { %16143 = vmatpush3.bf16.msra.mxu0 %v16756_v13  ;;  %v7776_v13 = vrot.slane %v20156_v40, 2 }
 0x637   : > { %16163 = vmatpush3.bf16.msra.mxu1 %v16757_v50  ;;  %16144 = vmatprep.subr.bf16.mxu0 %v17452_v16 }
 0x638   : > { %16164 = vmatprep.subr.bf16.mxu1 %v17452_v16 }
 0x63a   : > { %16145 = vmatpush3.bf16.msra.mxu0 %v16758_v28 }
 0x63b   : > { %16165 = vmatpush3.bf16.msra.mxu1 %v16759_v44  ;;  %16146 = vmatprep.subr.bf16.mxu0 %v17452_v16 }
 0x63c   : > { %16166 = vmatprep.subr.bf16.mxu1 %v17452_v16 }
 0x63e   : > { %16147 = vmatpush3.bf16.msra.mxu0 %v16760_v11 }
 0x63f   : > { %16167 = vmatpush3.bf16.msra.mxu1 %v16761_v55  ;;  %16172 = vmatprep.subr.bf16.mxu0 %v17452_v16 }
 0x640   : > { %16192 = vmatprep.subr.bf16.mxu1 %v17452_v16 }
 0x641   : > { %v6058_v6 = vpop.f32.mrf.mxu0  ;;  %16149 = vmatmul.mubr.bf16.vlgmr.msra.gmra.mxu0 %v20156_v40 }
 0x642   : > { %v6065_v46 = vadd.f32 %v6058_v6, %v5953_v47  ;;  %16173 = vmatpush3.bf16.msra.mxu0 %v16762_v45  ;;  %v6168_v8 = vpop.f32.mrf.mxu1  ;;  %16169 = vmatmul.mubr.bf16.vlgmr.msra.gmra.mxu1 %v7443_v10  ;;  %v16779_v47 = vld [vmem:[%s21686_s3 + $0x630] sm:$0xff]  }
 0x643   : > { %v15910_v4 = vpop.f32.mrf.mxu0  ;;  %16193 = vmatpush3.bf16.msra.mxu1 %v16763_v34  ;;  %16174 = vmatprep.subr.bf16.mxu0 %v17452_v16 }
 0x644   : > { %v6175_v32 = vadd.f32 %v6168_v8, %v6065_v46  ;;  %v15930_v1 = vpop.f32.mrf.mxu1  ;;  %16194 = vmatprep.subr.bf16.mxu1 %v17452_v16  ;;  %16188 = vmatprep.mubr.msk.bf16.mxu0 %vm17453_vm2, %v17452_v16 }
 0x645   : > { %v6061_v17 = vpop.f32.mrf.mxu0  ;;  %16208 = vmatprep.mubr.msk.bf16.mxu1 %vm17453_vm2, %v17452_v16 }
 0x646   : > { %v6066_v42 = vadd.f32 %v6061_v17, %v20132_v48  ;;  %16175 = vmatpush3.bf16.msra.mxu0 %v16764_v56  ;;  %v6171_v62 = vpop.f32.mrf.mxu1 }
 0x647   : > { %v15911_v33 = vpop.f32.mrf.mxu0  ;;  %16195 = vmatpush3.bf16.msra.mxu1 %v16765_v24  ;;  %16176 = vmatprep.subr.bf16.mxu0 %v17452_v16 }
 0x648   : > { %v6176_v52 = vadd.f32 %v6171_v62, %v6066_v42  ;;  %16196 = vmatprep.subr.bf16.mxu1 %v17452_v16  ;;  %v15931_v29 = vpop.f32.mrf.mxu1 }
 0x64a   : > { %16177 = vmatpush3.bf16.msra.mxu0 %v16766_v5 }
 0x64b   : > { %16197 = vmatpush3.bf16.msra.mxu1 %v16767_v12  ;;  %16178 = vmatprep.subr.bf16.mxu0 %v17452_v16 }
 0x64c   : > { %16198 = vmatprep.subr.bf16.mxu1 %v17452_v16 }
 0x64e   : > { %16179 = vmatpush3.bf16.msra.mxu0 %v16768_v60 }
 0x64f   : > { %16199 = vmatpush3.bf16.msra.mxu1 %v16769_v9  ;;  %16180 = vmatprep.subr.bf16.mxu0 %v17452_v16 }
 0x650   : > { %16200 = vmatprep.subr.bf16.mxu1 %v17452_v16 }
 0x652   : > { %16181 = vmatpush3.bf16.msra.mxu0 %v16770_v23 }
 0x653   : > { %16201 = vmatpush3.bf16.msra.mxu1 %v16771_v31  ;;  %16182 = vmatprep.subr.bf16.mxu0 %v17452_v16 }
 0x654   : > { %16202 = vmatprep.subr.bf16.mxu1 %v17452_v16 }
 0x656   : > { %16183 = vmatpush3.bf16.msra.mxu0 %v16772_v14 }
 0x657   : > { %16203 = vmatpush3.bf16.msra.mxu1 %v16773_v54  ;;  %16184 = vmatprep.subr.bf16.mxu0 %v17452_v16 }
 0x658   : > { %16204 = vmatprep.subr.bf16.mxu1 %v17452_v16 }
 0x65a   : > { %16185 = vmatpush3.bf16.msra.mxu0 %v16774_v25 }
 0x65b   : > { %16205 = vmatpush3.bf16.msra.mxu1 %v16775_v58  ;;  %16186 = vmatprep.subr.bf16.mxu0 %v17452_v16 }
 0x65c   : > { %16206 = vmatprep.subr.bf16.mxu1 %v17452_v16 }
 0x65e   : > { %16187 = vmatpush3.bf16.msra.mxu0 %v16776_v51 }
 0x65f   : > { %16207 = vmatpush3.bf16.msra.mxu1 %v16777_v3  ;;  %16212 = vmatprep.subr.bf16.mxu0 %v17452_v16 }
 0x661   : > { %v6283_v49 = vpop.f32.mrf.mxu0  ;;  %16189 = vmatmul.mubr.bf16.vlgmr.msra.gmra.mxu0 %v7554_v19 }
 0x662   : > { %v6290_v37 = vadd.f32 %v6283_v49, %v6175_v32  ;;  %16213 = vmatpush3.bf16.msra.mxu0 %v16778_v39  ;;  %v6399_v63 = vpop.f32.mrf.mxu1  ;;  %16209 = vmatmul.mubr.bf16.vlgmr.msra.gmra.mxu1 %v7666_v2 }
 0x663   : > { %v15950_v36 = vpop.f32.mrf.mxu0  ;;  %16214 = vmatprep.subr.bf16.mxu0 %v17452_v16  ;;  %16228 = vmatprep.mubr.msk.bf16.mxu0 %vm17453_vm2, %v17452_v16 }
 0x664   : > { %v6406_v30 = vadd.f32 %v6399_v63, %v6290_v37  ;;  %v15970_v38 = vpop.f32.mrf.mxu1 }
 0x665   : > { %v6286_v21 = vpop.f32.mrf.mxu0 }
 0x666   : > { %v6291_v43 = vadd.f32 %v6286_v21, %v6176_v52  ;;  %16215 = vmatpush3.bf16.msra.mxu0 %v16779_v47  ;;  %v6402_v35 = vpop.f32.mrf.mxu1 }
 0x667   : > { %v15951_v48 = vpop.f32.mrf.mxu0  ;;  %16216 = vmatprep.subr.bf16.mxu0 %v17452_v16 }
 0x668   : > { %v6407_v15 = vadd.f32 %v6402_v35, %v6291_v43  ;;  %v15971_v41 = vpop.f32.mrf.mxu1 }
 0x66a   : > { %16217 = vmatpush3.bf16.msra.mxu0 %v16780_v26 }
 0x66b   : > { %16218 = vmatprep.subr.bf16.mxu0 %v17452_v16 }
 0x66e   : > { %16219 = vmatpush3.bf16.msra.mxu0 %v16781_v57 }
 0x66f   : > { %16220 = vmatprep.subr.bf16.mxu0 %v17452_v16 }
 0x672   : > { %16221 = vmatpush3.bf16.msra.mxu0 %v16782_v18 }
 0x673   : > { %16222 = vmatprep.subr.bf16.mxu0 %v17452_v16 }
 0x676   : > { %16223 = vmatpush3.bf16.msra.mxu0 %v16783_v20 }
 0x677   : > { %16224 = vmatprep.subr.bf16.mxu0 %v17452_v16 }
 0x67a   : > { %16225 = vmatpush3.bf16.msra.mxu0 %v16784_v61 }
 0x67b   : > { %16226 = vmatprep.subr.bf16.mxu0 %v17452_v16 }
 0x67e   : > { %16227 = vmatpush3.bf16.msra.mxu0 %v16785_v7 }
 0x681   : > { %v6510_v50 = vpop.f32.mrf.mxu0  ;;  %16229 = vmatmul.mubr.bf16.vlgmr.msra.gmra.mxu0 %v7776_v13 }
 0x682   : > { %v6517_v28 = vadd.f32 %v6510_v50, %v6406_v30  ;;  %v6622_v53 = vpop.f32.mrf.mxu1 }
 0x683   : > { %v15990_v44 = vpop.f32.mrf.mxu0 }
 0x684   : > { %v6629_v11 = vadd.f32 %v6622_v53, %v6517_v28  ;;  %v16010_v59 = vpop.f32.mrf.mxu1 }
 0x685   : > { %v6513_v0 = vpop.f32.mrf.mxu0 }
 0x686   : > { %v6518_v55 = vadd.f32 %v6513_v0, %v6407_v15  ;;  %v6625_v45 = vpop.f32.mrf.mxu1 }
 0x687   : > { %v15991_v10 = vpop.f32.mrf.mxu0 }
 0x688   : > { %v6630_v34 = vadd.f32 %v6625_v45, %v6518_v55  ;;  %v16011_v6 = vpop.f32.mrf.mxu1  ;;  %v13342_v45 = vld [vmem:[%s21687_s4] ss:$0 sm:$0xff]  ;;  %s17455_s4 = smov (%p5051_p1), [#allocation5]  }
 0x6a1   : > { %v6732_v46 = vpop.f32.mrf.mxu0 }
 0x6a2   : > { %v6739_v8 = vadd.f32 %v6732_v46, %v6629_v11  ;;  %v6847_v56 = vpop.f32.mrf.mxu1 }
 0x6a3   : > { %v16030_v16 = vpop.f32.mrf.mxu0 }
 0x6a4   : > { %v6854_v4 = vadd.f32 %v6847_v56, %v6739_v8  ;;  %v16050_v40 = vpop.f32.mrf.mxu1 }
 0x6a5   : > { %v6735_v24 = vpop.f32.mrf.mxu0 }
 0x6a6   : > { %v6740_v32 = vadd.f32 %v6735_v24, %v6630_v34  ;;  %v6850_v1 = vpop.f32.mrf.mxu1 }
 0x6a7   : > { %v16031_v17 = vpop.f32.mrf.mxu0 }
 0x6a8   : > { %v6855_v42 = vadd.f32 %v6850_v1, %v6740_v32  ;;  %v16051_v62 = vpop.f32.mrf.mxu1  ;;  %v16786_v32 = vld [vmem:[%s21688_s5 + $0xf4] ss:$8 sps:$4 sm:$0xff] (%p5051_p1)   ;;  %v17454_v17 = vmov (%p5051_p1), 0  }
 0x6a9   :  { %v16788_v1 = vld [vmem:[%s21688_s5 + $0x74] ss:$8 sps:$4 sm:$0xff] (%p5051_p1)   ;;  %8285 = vmatprep.mubr.bf16.mxu0 (%p5051_p1), %v17454_v17  ;;  %8406 = vmatprep.mubr.bf16.mxu1 (%p5051_p1), %v17454_v17  ;;  %v16791_v62 = vld [vmem:[%s21688_s5 + $0x70] ss:$8 sps:$4 sm:$0xff] (%p5051_p1)  }
 0x6aa   :  { %8253 = vmatprep.subr.bf16.mxu0 (%p5051_p1), %v16786_v32  ;;  %8374 = vmatprep.subr.bf16.mxu1 (%p5051_p1), %v16788_v1 }
 0x6ab   :  { %8375 = vmatpush1.bf16.msra.mxu1 (%p5051_p1), %v16791_v62  ;;  %v16840_v62 = vld [vmem:[%s21688_s5 + $0x160] ss:$8 sps:$4 sm:$0xff] (%p5051_p1)  }
 0x6c1   : > { %v6963_v5 = vpop.f32.mrf.mxu0 }
 0x6c2   : > { %v6970_v33 = vadd.f32 %v6963_v5, %v6854_v4  ;;  %v7074_v12 = vpop.f32.mrf.mxu1  ;;  %v16792_v5 = vld [vmem:[%s21688_s5 + $0xe4] ss:$8 sps:$4 sm:$0xff] (%p5051_p1)  }
 0x6c3   : > { %v16070_v52 = vpop.f32.mrf.mxu0 }
 0x6c4   : > { %v7081_v29 = vadd.f32 %v7074_v12, %v6970_v33  ;;  %v16090_v60 = vpop.f32.mrf.mxu1  ;;  %v16794_v33 = vld [vmem:[%s21688_s5 + $0x64] ss:$8 sps:$4 sm:$0xff] (%p5051_p1)   ;;  %v16796_v12 = vld [vmem:[%s21688_s5 + $0xe0] ss:$8 sps:$4 sm:$0xff] (%p5051_p1)  }
 0x6c5   : > { %v6966_v9 = vpop.f32.mrf.mxu0  ;;  %v16797_v52 = vld [vmem:[%s21688_s5 + $0x60] ss:$8 sps:$4 sm:$0xff] (%p5051_p1)   ;;  %8376 = vmatprep.subr.bf16.mxu1 (%p5051_p1), %v16794_v33  ;;  %v16800_v60 = vld [vmem:[%s21688_s5 + $0x54] ss:$8 sps:$4 sm:$0xff] (%p5051_p1)  }
 0x6c6   : > { %v6971_v23 = vadd.f32 %v6966_v9, %v6855_v42  ;;  %v7077_v31 = vpop.f32.mrf.mxu1  ;;  %v16790_v42 = vld [vmem:[%s21688_s5 + $0xf0] ss:$8 sps:$4 sm:$0xff] (%p5051_p1)   ;;  %8377 = vmatpush1.bf16.msra.mxu1 (%p5051_p1), %v16797_v52  ;;  %v16848_v33 = vld [vmem:[%s21688_s5 + $0x154] ss:$8 sps:$4 sm:$0xff] (%p5051_p1)  }
 0x6c7   : > { %v16071_v14 = vpop.f32.mrf.mxu0  ;;  %8254 = vmatpush1.bf16.msra.mxu0 (%p5051_p1), %v16790_v42  ;;  %v16802_v9 = vld [vmem:[%s21688_s5 + $0xd0] ss:$8 sps:$4 sm:$0xff] (%p5051_p1)   ;;  %8378 = vmatprep.subr.bf16.mxu1 (%p5051_p1), %v16800_v60  ;;  %v16845_v42 = vld [vmem:[%s21688_s5 + $0x1e4] ss:$8 sps:$4 sm:$0xff] (%p5051_p1)  }
 0x6c8   : > { %v7082_v54 = vadd.f32 %v7077_v31, %v6971_v23  ;;  %v16091_v25 = vpop.f32.mrf.mxu1  ;;  %8255 = vmatprep.subr.bf16.mxu0 (%p5051_p1), %v16792_v5  ;;  %v16803_v23 = vld [vmem:[%s21688_s5 + $0x50] ss:$8 sps:$4 sm:$0xff] (%p5051_p1)   ;;  %v16804_v31 = vld [vmem:[%s21688_s5 + $0xc4] ss:$8 sps:$4 sm:$0xff] (%p5051_p1)   ;;  %v16843_v5 = vld [vmem:[%s21688_s5 + $0x1e0] ss:$8 sps:$4 sm:$0xff] (%p5051_p1)  }
 0x6c9   :  { %v16806_v14 = vld [vmem:[%s21688_s5 + $0x44] ss:$8 sps:$4 sm:$0xff] (%p5051_p1)   ;;  %v16809_v25 = vld [vmem:[%s21688_s5 + $0x40] ss:$8 sps:$4 sm:$0xff] (%p5051_p1)   ;;  %v16846_v52 = vld [vmem:[%s21688_s5 + $0x150] ss:$8 sps:$4 sm:$0xff] (%p5051_p1)  }
 0x6ca   :  { %8379 = vmatpush1.bf16.msra.mxu1 (%p5051_p1), %v16803_v23  ;;  %v16854_v60 = vld [vmem:[%s21688_s5 + $0x144] ss:$8 sps:$4 sm:$0xff] (%p5051_p1)   ;;  %v16852_v23 = vld [vmem:[%s21688_s5 + $0x140] ss:$8 sps:$4 sm:$0xff] (%p5051_p1)  }
 0x6cb   :  { %8256 = vmatpush1.bf16.msra.mxu0 (%p5051_p1), %v16796_v12  ;;  %8380 = vmatprep.subr.bf16.mxu1 (%p5051_p1), %v16806_v14  ;;  %v16851_v12 = vld [vmem:[%s21688_s5 + $0x1d4] ss:$8 sps:$4 sm:$0xff] (%p5051_p1)  }
 0x6cc   :  { %v16860_v14 = vld [vmem:[%s21688_s5 + $0x134] ss:$8 sps:$4 sm:$0xff] (%p5051_p1)  }
 0x6ce   :  { %8381 = vmatpush1.bf16.msra.mxu1 (%p5051_p1), %v16809_v25  ;;  %v16858_v25 = vld [vmem:[%s21688_s5 + $0x130] ss:$8 sps:$4 sm:$0xff] (%p5051_p1)  }
 0x6e1   : > { %v7186_v58 = vpop.f32.mrf.mxu0 }
 0x6e2   : > { %v7193_v51 = vadd.f32 %v7186_v58, %v7081_v29  ;;  %v7296_v22 = vpop.f32.mrf.mxu1  ;;  %v16798_v29 = vld [vmem:[%s21688_s5 + $0xd4] ss:$8 sps:$4 sm:$0xff] (%p5051_p1)  }
 0x6e3   : > { %v16110_v27 = vpop.f32.mrf.mxu0  ;;  %8257 = vmatprep.subr.bf16.mxu0 (%p5051_p1), %v16798_v29  ;;  %v16810_v58 = vld [vmem:[%s21688_s5 + $0xb4] ss:$8 sps:$4 sm:$0xff] (%p5051_p1)   ;;  %v16849_v29 = vld [vmem:[%s21688_s5 + $0x1d0] ss:$8 sps:$4 sm:$0xff] (%p5051_p1)  }
 0x6e4   : > { %v7303_v3 = vadd.f32 %v7296_v22, %v7193_v51  ;;  %v16130_v19 = vpop.f32.mrf.mxu1  ;;  %8258 = vmatpush1.bf16.msra.mxu0 (%p5051_p1), %v16802_v9  ;;  %v16812_v51 = vld [vmem:[%s21688_s5 + $0x34] ss:$8 sps:$4 sm:$0xff] (%p5051_p1)   ;;  %v16814_v22 = vld [vmem:[%s21688_s5 + $0xb0] ss:$8 sps:$4 sm:$0xff] (%p5051_p1)   ;;  %v16857_v9 = vld [vmem:[%s21688_s5 + $0x1c4] ss:$8 sps:$4 sm:$0xff] (%p5051_p1)  }
 0x6e5   : > { %v7189_v39 = vpop.f32.mrf.mxu0  ;;  %8259 = vmatprep.subr.bf16.mxu0 (%p5051_p1), %v16804_v31  ;;  %v16815_v27 = vld [vmem:[%s21688_s5 + $0x30] ss:$8 sps:$4 sm:$0xff] (%p5051_p1)   ;;  %8382 = vmatprep.subr.bf16.mxu1 (%p5051_p1), %v16812_v51  ;;  %v16818_v19 = vld [vmem:[%s21688_s5 + $0x24] ss:$8 sps:$4 sm:$0xff] (%p5051_p1)   ;;  %v16855_v31 = vld [vmem:[%s21688_s5 + $0x1c0] ss:$8 sps:$4 sm:$0xff] (%p5051_p1)  }
 0x6e6   : > { %v7194_v2 = vadd.f32 %v7189_v39, %v7082_v54  ;;  %v7299_v49 = vpop.f32.mrf.mxu1  ;;  %v16808_v54 = vld [vmem:[%s21688_s5 + $0xc0] ss:$8 sps:$4 sm:$0xff] (%p5051_p1)   ;;  %8383 = vmatpush1.bf16.msra.mxu1 (%p5051_p1), %v16815_v27  ;;  %v16866_v51 = vld [vmem:[%s21688_s5 + $0x124] ss:$8 sps:$4 sm:$0xff] (%p5051_p1)  }
 0x6e7   : > { %v16111_v37 = vpop.f32.mrf.mxu0  ;;  %v16820_v39 = vld [vmem:[%s21688_s5 + $0xa0] ss:$8 sps:$4 sm:$0xff] (%p5051_p1)   ;;  %8384 = vmatprep.subr.bf16.mxu1 (%p5051_p1), %v16818_v19  ;;  %v16872_v19 = vld [vmem:[%s21688_s5 + $0x114] ss:$8 sps:$4 sm:$0xff] (%p5051_p1)  }
 0x6e8   : > { %v7304_v63 = vadd.f32 %v7299_v49, %v7194_v2  ;;  %v16131_v47 = vpop.f32.mrf.mxu1  ;;  %8260 = vmatpush1.bf16.msra.mxu0 (%p5051_p1), %v16808_v54  ;;  %v16821_v2 = vld [vmem:[%s21688_s5 + $0x20] ss:$8 sps:$4 sm:$0xff] (%p5051_p1)   ;;  %v16822_v49 = vld [vmem:[%s21688_s5 + $0x94] ss:$8 sps:$4 sm:$0xff] (%p5051_p1)  }
 0x6e9   :  { %8261 = vmatprep.subr.bf16.mxu0 (%p5051_p1), %v16810_v58  ;;  %v16824_v37 = vld [vmem:[%s21688_s5 + $0x14] ss:$8 sps:$4 sm:$0xff] (%p5051_p1)   ;;  %v16826_v47 = vld [vmem:[%s21688_s5 + $0x90] ss:$8 sps:$4 sm:$0xff] (%p5051_p1)   ;;  %v16864_v27 = vld [vmem:[%s21688_s5 + $0x120] ss:$8 sps:$4 sm:$0xff] (%p5051_p1)  }
 0x6ea   :  { %8385 = vmatpush1.bf16.msra.mxu1 (%p5051_p1), %v16821_v2  ;;  %v16863_v54 = vld [vmem:[%s21688_s5 + $0x1b4] ss:$8 sps:$4 sm:$0xff] (%p5051_p1)   ;;  %v16861_v58 = vld [vmem:[%s21688_s5 + $0x1b0] ss:$8 sps:$4 sm:$0xff] (%p5051_p1)  }
 0x6eb   :  { %8386 = vmatprep.subr.bf16.mxu1 (%p5051_p1), %v16824_v37  ;;  %v16870_v2 = vld [vmem:[%s21688_s5 + $0x110] ss:$8 sps:$4 sm:$0xff] (%p5051_p1)   ;;  %v16878_v37 = vld [vmem:[%s21688_s5 + $0x104] ss:$8 sps:$4 sm:$0xff] (%p5051_p1)  }
 0x6ec   :  { %8262 = vmatpush1.bf16.msra.mxu0 (%p5051_p1), %v16814_v22  ;;  %v16869_v22 = vld [vmem:[%s21688_s5 + $0x1a4] ss:$8 sps:$4 sm:$0xff] (%p5051_p1)  }
 0x701   : > { %v7411_v36 = vpop.f32.mrf.mxu0 }
 0x702   : > { %v7527_v30 = vpop.f32.mrf.mxu1  ;;  %v7418_v50 = vadd.f32 %v7411_v36, %v7303_v3  ;;  %v16816_v3 = vld [vmem:[%s21688_s5 + $0xa4] ss:$8 sps:$4 sm:$0xff] (%p5051_p1)  }
 0x703   : > { %v16150_v38 = vpop.f32.mrf.mxu0  ;;  %8263 = vmatprep.subr.bf16.mxu0 (%p5051_p1), %v16816_v3  ;;  %v16867_v3 = vld [vmem:[%s21688_s5 + $0x1a0] ss:$8 sps:$4 sm:$0xff] (%p5051_p1)  }
 0x704   : > { %v16170_v21 = vpop.f32.mrf.mxu1  ;;  %v7534_v28 = vadd.f32 %v7527_v30, %v7418_v50  ;;  %8264 = vmatpush1.bf16.msra.mxu0 (%p5051_p1), %v16820_v39  ;;  %v16875_v39 = vld [vmem:[%s21688_s5 + $0x194] ss:$8 sps:$4 sm:$0xff] (%p5051_p1)  }
 0x705   : > { %v7414_v43 = vpop.f32.mrf.mxu0  ;;  %8265 = vmatprep.subr.bf16.mxu0 (%p5051_p1), %v16822_v49  ;;  %v16873_v49 = vld [vmem:[%s21688_s5 + $0x190] ss:$8 sps:$4 sm:$0xff] (%p5051_p1)  }
 0x706   : > { %v7530_v35 = vpop.f32.mrf.mxu1  ;;  %v7419_v53 = vadd.f32 %v7414_v43, %v7304_v63 }
 0x707   : > { %v16151_v26 = vpop.f32.mrf.mxu0 }
 0x708   : > { %v16171_v48 = vpop.f32.mrf.mxu1  ;;  %v7535_v11 = vadd.f32 %v7530_v35, %v7419_v53  ;;  %8266 = vmatpush1.bf16.msra.mxu0 (%p5051_p1), %v16826_v47  ;;  %v16876_v47 = vld [vmem:[%s21688_s5 + $0x100] ss:$8 sps:$4 sm:$0xff] (%p5051_p1)  }
 0x709   :  { %v16827_v48 = vld [vmem:[%s21688_s5 + $0x10] ss:$8 sps:$4 sm:$0xff] (%p5051_p1)  }
 0x70a   :  { %8387 = vmatpush1.bf16.msra.mxu1 (%p5051_p1), %v16827_v48  ;;  %v16882_v48 = vld [vmem:[%s21688_s5 + $0x270] ss:$8 sps:$4 sm:$0xff] (%p5051_p1)  }
 0x721   : > { %v7638_v15 = vpop.f32.mrf.mxu0 }
 0x722   : > { %v7750_v41 = vpop.f32.mrf.mxu1  ;;  %v7645_v44 = vadd.f32 %v7638_v15, %v7534_v28 }
 0x723   : > { %v16190_v57 = vpop.f32.mrf.mxu0 }
 0x724   : > { %v16210_v18 = vpop.f32.mrf.mxu1  ;;  %v7757_v59 = vadd.f32 %v7750_v41, %v7645_v44  ;;  %v16828_v57 = vld [vmem:[%s21688_s5 + $0x84] ss:$8 sps:$4 sm:$0xff] (%p5051_p1)   ;;  %v16832_v44 = vld [vmem:[%s21688_s5 + $0x80] ss:$8 sps:$4 sm:$0xff] (%p5051_p1)  }
 0x725   : > { %v7641_v20 = vpop.f32.mrf.mxu0  ;;  %v16830_v18 = vld [vmem:[%s21688_s5 + $0x4] ss:$8 sps:$4 sm:$0xff] (%p5051_p1)   ;;  %8267 = vmatprep.subr.bf16.mxu0 (%p5051_p1), %v16828_v57 }
 0x726   : > { %v7753_v61 = vpop.f32.mrf.mxu1  ;;  %v7646_v0 = vadd.f32 %v7641_v20, %v7535_v11  ;;  %v16833_v11 = vld [vmem:[%s21688_s5] ss:$8 sps:$4 sm:$0xff] (%p5051_p1)   ;;  %8388 = vmatprep.subr.bf16.mxu1 (%p5051_p1), %v16830_v18  ;;  %8268 = vmatpush1.bf16.msra.mxu0 (%p5051_p1), %v16832_v44 }
 0x727   : > { %v16191_v7 = vpop.f32.mrf.mxu0  ;;  %8389 = vmatpush1.bf16.msra.mxu1 (%p5051_p1), %v16833_v11 }
 0x728   : > { %v16211_v13 = vpop.f32.mrf.mxu1  ;;  %v7758_v6 = vadd.f32 %v7753_v61, %v7646_v0 }
 0x741   : > { %v7860_v55 = vpop.f32.mrf.mxu0 }
 0x742   : > { %v7867_v10 = vadd.f32 %v7860_v55, %v7757_v59  ;;  %v16836_v55 = vld [vmem:[%s21688_s5 + $0x174] ss:$8 sps:$4 sm:$0xff] (%p5051_p1)  }
 0x743   : > { %v16230_v34 = vpop.f32.mrf.mxu0  ;;  %8514 = vmatprep.subr.bf16.mxu0 (%p5051_p1), %v16836_v55 }
 0x744   : > { %v7876_v46 = vadd.f32 %v13342_v45, %v7867_v10 }
 0x745   : > { %v7863_v8 = vpop.f32.mrf.mxu0 }
 0x746   : > { %v7878_v56 = vmax.f32 %v7876_v46, 0.0  ;;  %v7868_v16 = vadd.f32 %v7863_v8, %v7758_v6 }
 0x747   : > { %v16231_v4 = vpop.f32.mrf.mxu0 }
 0x748   : > { %13343 = vst [vmem:[%s12034_s22 + $0x64] sm:$0xff] %v7878_v56  ;;  %v7877_v40 = vadd.f32 %v13342_v45, %v7868_v16  ;;  %5053 = sbr.rel (!%p5051_p1) target bundleno = 1248 (0x4e0), region = 173  ;;  %v16839_v45 = vld [vmem:[%s21688_s5 + $0x1f4] ss:$8 sps:$4 sm:$0xff] (%p5051_p1)   ;;  %v16834_v56 = vld [vmem:[%s21688_s5 + $0x170] ss:$8 sps:$4 sm:$0xff] (%p5051_p1)  }
 0x749   :  { %8656 = vmatprep.subr.bf16.mxu1 (%p5051_p1), %v16839_v45  ;;  %v16837_v16 = vld [vmem:[%s21688_s5 + $0x1f0] ss:$8 sps:$4 sm:$0xff] (%p5051_p1)  }
 0x74a   : > { %v7879_v24 = vmax.f32 %v7877_v40, 0.0 }
 0x74c   : > { %13344 = vst [vmem:[%s12034_s22 + $0x6c] sm:$0x3] %v7879_v24  ;;  %v16842_v24 = vld [vmem:[%s21688_s5 + $0x164] ss:$8 sps:$4 sm:$0xff] (%p5051_p1)  }
 0x753   :  { %v7886_v63 = vld [vmem:[#allocation3 + $0x8] sm:$0xff]  ;;  %v7885_v36 = vld [vmem:[#allocation3] sm:$0xff]  ;;  %v7887_v30 = vld [vmem:[#allocation3 + $0x10] sm:$0xf] }
 0x754   :  { %v7891_v38 = vrot.slane %v7886_v63, 2  ;;  %v8012_v21 = vld [vmem:[#allocation3 + $0x6c] sm:$0xff]  ;;  %v7892_v43 = vrot.slane %v7887_v30, 2  ;;  %v8013_v35 = vld [vmem:[#allocation3 + $0x74] sm:$0xf]  ;;  %v8011_v15 = vld [vmem:[#allocation3 + $0x64] sm:$0xff] }
 0x755   :  { %v8016_v26 = vrot.slane %v8012_v21, 2  ;;  %v8017_v41 = vrot.slane %v8013_v35, 2  ;;  %v7912_v35 = vld [vmem:[#allocation3 + $0x1c] sm:$0xff] }
 0x756   :  { %v7893_v20 = vsel %vm7890_vm3, %v7891_v38, %v7892_v43  ;;  %v7897_v61 = vmax.f32 %v7886_v63, %v7892_v43  ;;  %v16881_v63 = vld [vmem:[%s21688_s5 + $0x184] ss:$8 sps:$4 sm:$0xff]   ;;  %v16884_v38 = vld [vmem:[%s21688_s5 + $0x274] ss:$8 sps:$4 sm:$0xff]  }
 0x757   :  { %v7896_v7 = vmax.f32 %v7885_v36, %v7893_v20  ;;  %v8018_v13 = vsel %vm7890_vm3, %v8016_v26, %v8017_v41  ;;  %v8022_v50 = vmax.f32 %v8012_v21, %v8017_v41  ;;  %v16879_v36 = vld [vmem:[%s21688_s5 + $0x180] ss:$8 sps:$4 sm:$0xff]   ;;  %v16887_v43 = vld [vmem:[%s21688_s5 + $0x2f4] ss:$8 sps:$4 sm:$0xff]   ;;  %v7913_v26 = vld [vmem:[#allocation3 + $0x24] sm:$0xf] }
 0x758   :  { %v8021_v28 = vmax.f32 %v8011_v15, %v8018_v13  ;;  %v7907_v53 = vrot.slane %v7897_v61, 1  ;;  %v7911_v15 = vld [vmem:[#allocation3 + $0x14] sm:$0xff]  ;;  %v7916_v41 = vrot.slane %v7912_v35, 2  ;;  %v7917_v57 = vrot.slane %v7913_v26, 2  ;;  %v8037_v18 = vld [vmem:[#allocation3 + $0x80] sm:$0xff] }
 0x759   :  { %v7899_v59 = vrot.slane %v7896_v7, 1  ;;  %v8032_v6 = vrot.slane %v8022_v50, 1  ;;  %v8038_v20 = vld [vmem:[#allocation3 + $0x88] sm:$0xf]  ;;  %v8036_v13 = vld [vmem:[#allocation3 + $0x78] sm:$0xff] }
 0x75a   :  { %v8024_v0 = vrot.slane %v8021_v28, 1  ;;  %v7909_v10 = vmax.f32 %v7897_v61, %v7907_v53  ;;  %v16885_v53 = vld [vmem:[%s21688_s5 + $0x2f0] ss:$8 sps:$4 sm:$0xff]   ;;  %v7918_v44 = vsel %vm7890_vm3, %v7916_v41, %v7917_v57  ;;  %v7922_v11 = vmax.f32 %v7912_v35, %v7917_v57  ;;  %v16938_v26 = vld [vmem:[%s21688_s5 + $0x364] ss:$8 sps:$4 sm:$0xff]  }
 0x75b   :  { %v7901_v34 = vmax.f32 %v7896_v7, %v7899_v59  ;;  %v8034_v8 = vmax.f32 %v8022_v50, %v8032_v6  ;;  %v8041_v50 = vrot.slane %v8037_v18, 2  ;;  %v16890_v59 = vld [vmem:[%s21688_s5 + $0x264] ss:$8 sps:$4 sm:$0xff]   ;;  %v7921_v55 = vmax.f32 %v7911_v15, %v7918_v44  ;;  %v16933_v35 = vld [vmem:[%s21688_s5 + $0x3f0] ss:$8 sps:$4 sm:$0xff]  }
 0x75c   :  { %v8026_v46 = vmax.f32 %v8021_v28, %v8024_v0  ;;  %7910 = vst [vmem:[#allocation4 + $0x8] sm:$0x1] %v7909_v10  ;;  %v8042_v28 = vrot.slane %v8038_v20, 2  ;;  %v16893_v0 = vld [vmem:[%s21688_s5 + $0x2e4] ss:$8 sps:$4 sm:$0xff]   ;;  %v7932_v6 = vrot.slane %v7922_v11, 1 }
 0x75d   :  { %7903 = vst [vmem:[#allocation4] ss:$4 sps:$4 sm:$0x55] %v7901_v34   ;;  %8035 = vst [vmem:[#allocation4 + $0x9] sm:$0x1] %v8034_v8  ;;  %v7924_v8 = vrot.slane %v7921_v55, 1 }
 0x75e   :  { %8028 = vst [vmem:[#allocation4 + $0x1] ss:$4 sps:$4 sm:$0x55] %v8026_v46   ;;  %v8043_v45 = vsel %vm7890_vm3, %v8041_v50, %v8042_v28  ;;  %v8047_v10 = vmax.f32 %v8037_v18, %v8042_v28  ;;  %v16888_v46 = vld [vmem:[%s21688_s5 + $0x260] ss:$8 sps:$4 sm:$0xff]  }
 0x75f   :  { %v8046_v34 = vmax.f32 %v8036_v13, %v8043_v45  ;;  %v16936_v15 = vld [vmem:[%s21688_s5 + $0x360] ss:$8 sps:$4 sm:$0xff]   ;;  %v16944_v57 = vld [vmem:[%s21688_s5 + $0x354] ss:$8 sps:$4 sm:$0xff]   ;;  %v16942_v20 = vld [vmem:[%s21688_s5 + $0x350] ss:$8 sps:$4 sm:$0xff]  }
 0x760   :  { %v16939_v41 = vld [vmem:[%s21688_s5 + $0x3e0] ss:$8 sps:$4 sm:$0xff]   ;;  %v16947_v18 = vld [vmem:[%s21688_s5 + $0x3d4] ss:$8 sps:$4 sm:$0xff]   ;;  %v16953_v13 = vld [vmem:[%s21688_s5 + $0x3c4] ss:$8 sps:$4 sm:$0xff]  }
 0x761   :  { %v16948_v50 = vld [vmem:[%s21688_s5 + $0x340] ss:$8 sps:$4 sm:$0xff]   ;;  %v16959_v44 = vld [vmem:[%s21688_s5 + $0x3b4] ss:$8 sps:$4 sm:$0xff]  }
 0x762   :  { %v16951_v28 = vld [vmem:[%s21688_s5 + $0x3c0] ss:$8 sps:$4 sm:$0xff]  }
 0x763   :  { %v16960_v45 = vld [vmem:[%s21688_s5 + $0x320] ss:$8 sps:$4 sm:$0xff]  }
 0x765   :  { %v8154_v4 = vld [vmem:[#allocation4 + $0x2] sm:$0x3]  ;;  %v8136_v40 = vld [vmem:[#allocation4] sm:$0x3]  ;;  %v8415_v30 = vld [vmem:[#allocation4 + $0x4] sm:$0x3] }
 0x766   :  { %v8155_v32 = vpack.c.bf16 %v8154_v4, %v8154_v4  ;;  %v8137_v1 = vpack.c.bf16 %v8136_v40, %v8136_v40  ;;  %v8557_v21 = vld [vmem:[#allocation4 + $0x6] sm:$0x3]  ;;  %v8416_v61 = vpack.c.bf16 %v8415_v30, %v8415_v30  ;;  %v8049_v4 = vrot.slane %v8046_v34, 1 }
 0x767   :  { %v8558_v7 = vpack.c.bf16 %v8557_v21, %v8557_v21  ;;  %v7934_v40 = vmax.f32 %v7922_v11, %v7932_v6  ;;  %v16935_v30 = vld [vmem:[%s21688_s5 + $0x3f4] ss:$8 sps:$4 sm:$0xff]   ;;  %v16930_v21 = vld [vmem:[%s21688_s5 + $0x370] ss:$8 sps:$4 sm:$0xff]  }
 0x768   :  { %8286 = vmatmul.mubr.bf16.vlgmr.msra.gmra.mxu0 %v8155_v32  ;;  %8407 = vmatmul.mubr.bf16.vlgmr.msra.gmra.mxu1 %v8137_v1  ;;  %v16899_v32 = vld [vmem:[%s21688_s5 + $0x2d4] ss:$8 sps:$4 sm:$0xff]   ;;  %v7926_v1 = vmax.f32 %v7921_v55, %v7924_v8  ;;  %v16954_v11 = vld [vmem:[%s21688_s5 + $0x330] ss:$8 sps:$4 sm:$0xff]   ;;  %v16965_v55 = vld [vmem:[%s21688_s5 + $0x3a4] ss:$8 sps:$4 sm:$0xff]  }
 0x769   :  { %8515 = vmatpush1.bf16.msra.mxu0 %v16834_v56  ;;  %8657 = vmatpush1.bf16.msra.mxu1 %v16837_v16  ;;  %v8057_v56 = vrot.slane %v8047_v10, 1  ;;  %v16891_v16 = vld [vmem:[%s21688_s5 + $0x2e0] ss:$8 sps:$4 sm:$0xff]   ;;  %7935 = vst [vmem:[#allocation4 + $0x12] sm:$0x1] %v7934_v40 }
 0x76a   :  { %8516 = vmatprep.subr.bf16.mxu0 %v16842_v24  ;;  %8658 = vmatprep.subr.bf16.mxu1 %v16845_v42  ;;  %v16896_v24 = vld [vmem:[%s21688_s5 + $0x254] ss:$8 sps:$4 sm:$0xff]   ;;  %7927 = vst [vmem:[#allocation4 + $0xa] ss:$4 sps:$4 sm:$0x55] %v7926_v1  }
 0x76b   :  { %8546 = vmatprep.mubr.bf16.mxu0 %v17454_v17  ;;  %8688 = vmatprep.mubr.bf16.mxu1 %v17454_v17  ;;  %v8059_v42 = vmax.f32 %v8047_v10, %v8057_v56  ;;  %v16963_v10 = vld [vmem:[%s21688_s5 + $0x3a0] ss:$8 sps:$4 sm:$0xff]   ;;  %v16971_v6 = vld [vmem:[%s21688_s5 + $0x394] ss:$8 sps:$4 sm:$0xff]   ;;  %v16969_v8 = vld [vmem:[%s21688_s5 + $0x390] ss:$8 sps:$4 sm:$0xff]  }
 0x76c   :  { %v16974_v56 = vld [vmem:[%s21688_s5 + $0x304] ss:$8 sps:$4 sm:$0xff]   ;;  %v16975_v40 = vld [vmem:[%s21688_s5 + $0x380] ss:$8 sps:$4 sm:$0xff]   ;;  %v16980_v1 = vld [vmem:[%s21688_s5 + $0x474] ss:$8 sps:$4 sm:$0xff]  }
 0x76d   :  { %8517 = vmatpush1.bf16.msra.mxu0 %v16840_v62  ;;  %8659 = vmatpush1.bf16.msra.mxu1 %v16843_v5  ;;  %v8051_v62 = vmax.f32 %v8046_v34, %v8049_v4  ;;  %v16894_v5 = vld [vmem:[%s21688_s5 + $0x250] ss:$8 sps:$4 sm:$0xff]   ;;  %8060 = vst [vmem:[#allocation4 + $0x13] sm:$0x1] %v8059_v42  ;;  %v16968_v34 = vld [vmem:[%s21688_s5 + $0x314] ss:$8 sps:$4 sm:$0xff]  }
 0x76e   :  { %8518 = vmatprep.subr.bf16.mxu0 %v16848_v33  ;;  %8660 = vmatprep.subr.bf16.mxu1 %v16851_v12  ;;  %v16897_v33 = vld [vmem:[%s21688_s5 + $0x2d0] ss:$8 sps:$4 sm:$0xff]   ;;  %v16902_v12 = vld [vmem:[%s21688_s5 + $0x244] ss:$8 sps:$4 sm:$0xff]   ;;  %v16972_v4 = vld [vmem:[%s21688_s5 + $0x300] ss:$8 sps:$4 sm:$0xff]  }
 0x76f   :  { %8052 = vst [vmem:[#allocation4 + $0xb] ss:$4 sps:$4 sm:$0x55] %v8051_v62   ;;  %v16983_v42 = vld [vmem:[%s21688_s5 + $0x4f4] ss:$8 sps:$4 sm:$0xff]  }
 0x770   :  { %v16978_v62 = vld [vmem:[%s21688_s5 + $0x470] ss:$8 sps:$4 sm:$0xff]  }
 0x771   :  { %8519 = vmatpush1.bf16.msra.mxu0 %v16846_v52  ;;  %8661 = vmatpush1.bf16.msra.mxu1 %v16849_v29  ;;  %v16905_v52 = vld [vmem:[%s21688_s5 + $0x2c4] ss:$8 sps:$4 sm:$0xff]   ;;  %v16900_v29 = vld [vmem:[%s21688_s5 + $0x240] ss:$8 sps:$4 sm:$0xff]  }
 0x772   :  { %8520 = vmatprep.subr.bf16.mxu0 %v16854_v60  ;;  %8662 = vmatprep.subr.bf16.mxu1 %v16857_v9  ;;  %v16903_v60 = vld [vmem:[%s21688_s5 + $0x2c0] ss:$8 sps:$4 sm:$0xff]   ;;  %v16908_v9 = vld [vmem:[%s21688_s5 + $0x234] ss:$8 sps:$4 sm:$0xff]  }
 0x775   :  { %8521 = vmatpush1.bf16.msra.mxu0 %v16852_v23  ;;  %8663 = vmatpush1.bf16.msra.mxu1 %v16855_v31  ;;  %v16911_v23 = vld [vmem:[%s21688_s5 + $0x2b4] ss:$8 sps:$4 sm:$0xff]   ;;  %v16906_v31 = vld [vmem:[%s21688_s5 + $0x230] ss:$8 sps:$4 sm:$0xff]  }
 0x776   :  { %8522 = vmatprep.subr.bf16.mxu0 %v16860_v14  ;;  %8664 = vmatprep.subr.bf16.mxu1 %v16863_v54  ;;  %v16909_v14 = vld [vmem:[%s21688_s5 + $0x2b0] ss:$8 sps:$4 sm:$0xff]   ;;  %v16914_v54 = vld [vmem:[%s21688_s5 + $0x224] ss:$8 sps:$4 sm:$0xff]  }
 0x779   :  { %8523 = vmatpush1.bf16.msra.mxu0 %v16858_v25  ;;  %8665 = vmatpush1.bf16.msra.mxu1 %v16861_v58  ;;  %v16917_v25 = vld [vmem:[%s21688_s5 + $0x2a4] ss:$8 sps:$4 sm:$0xff]   ;;  %v16912_v58 = vld [vmem:[%s21688_s5 + $0x220] ss:$8 sps:$4 sm:$0xff]  }
 0x77a   :  { %8524 = vmatprep.subr.bf16.mxu0 %v16866_v51  ;;  %8666 = vmatprep.subr.bf16.mxu1 %v16869_v22  ;;  %v16915_v51 = vld [vmem:[%s21688_s5 + $0x2a0] ss:$8 sps:$4 sm:$0xff]   ;;  %v16920_v22 = vld [vmem:[%s21688_s5 + $0x214] ss:$8 sps:$4 sm:$0xff]  }
 0x77d   :  { %8525 = vmatpush1.bf16.msra.mxu0 %v16864_v27  ;;  %8667 = vmatpush1.bf16.msra.mxu1 %v16867_v3  ;;  %v16923_v27 = vld [vmem:[%s21688_s5 + $0x294] ss:$8 sps:$4 sm:$0xff]   ;;  %v16918_v3 = vld [vmem:[%s21688_s5 + $0x210] ss:$8 sps:$4 sm:$0xff]  }
 0x77e   :  { %8526 = vmatprep.subr.bf16.mxu0 %v16872_v19  ;;  %8668 = vmatprep.subr.bf16.mxu1 %v16875_v39  ;;  %v16921_v19 = vld [vmem:[%s21688_s5 + $0x290] ss:$8 sps:$4 sm:$0xff]   ;;  %v16926_v39 = vld [vmem:[%s21688_s5 + $0x204] ss:$8 sps:$4 sm:$0xff]  }
 0x781   :  { %8527 = vmatpush1.bf16.msra.mxu0 %v16870_v2  ;;  %8669 = vmatpush1.bf16.msra.mxu1 %v16873_v49  ;;  %v16929_v2 = vld [vmem:[%s21688_s5 + $0x284] ss:$8 sps:$4 sm:$0xff]   ;;  %v16924_v49 = vld [vmem:[%s21688_s5 + $0x200] ss:$8 sps:$4 sm:$0xff]  }
 0x782   :  { %8528 = vmatprep.subr.bf16.mxu0 %v16878_v37  ;;  %8670 = vmatprep.subr.bf16.mxu1 %v16881_v63  ;;  %v16927_v37 = vld [vmem:[%s21688_s5 + $0x280] ss:$8 sps:$4 sm:$0xff]   ;;  %v8699_v63 = vld [vmem:[#allocation4 + $0x8] sm:$0x3] }
 0x785   :  { %8529 = vmatpush1.bf16.msra.mxu0 %v16876_v47  ;;  %8671 = vmatpush1.bf16.msra.mxu1 %v16879_v36  ;;  %v16932_v47 = vld [vmem:[%s21688_s5 + $0x374] ss:$8 sps:$4 sm:$0xff]   ;;  %v8841_v36 = vld [vmem:[#allocation4 + $0xa] sm:$0x3] }
 0x786   :  { %8798 = vmatprep.subr.bf16.mxu0 %v16884_v38  ;;  %8940 = vmatprep.subr.bf16.mxu1 %v16887_v43  ;;  %v8700_v38 = vpack.c.bf16 %v8699_v63, %v8699_v63  ;;  %v8842_v43 = vpack.c.bf16 %v8841_v36, %v8841_v36 }
 0x788   :  { %8547 = vmatmul.mubr.bf16.vlgmr.msra.gmra.mxu0 %v8416_v61  ;;  %8689 = vmatmul.mubr.bf16.vlgmr.msra.gmra.mxu1 %v8558_v7  ;;  %v16945_v61 = vld [vmem:[%s21688_s5 + $0x3d0] ss:$8 sps:$4 sm:$0xff]   ;;  %v16950_v7 = vld [vmem:[%s21688_s5 + $0x344] ss:$8 sps:$4 sm:$0xff]  }
 0x789   :  { %8799 = vmatpush1.bf16.msra.mxu0 %v16882_v48  ;;  %8941 = vmatpush1.bf16.msra.mxu1 %v16885_v53  ;;  %v16941_v48 = vld [vmem:[%s21688_s5 + $0x3e4] ss:$8 sps:$4 sm:$0xff]   ;;  %v16956_v53 = vld [vmem:[%s21688_s5 + $0x334] ss:$8 sps:$4 sm:$0xff]  }
 0x78a   :  { %8800 = vmatprep.subr.bf16.mxu0 %v16890_v59  ;;  %8942 = vmatprep.subr.bf16.mxu1 %v16893_v0  ;;  %v16957_v59 = vld [vmem:[%s21688_s5 + $0x3b0] ss:$8 sps:$4 sm:$0xff]   ;;  %v16962_v0 = vld [vmem:[%s21688_s5 + $0x324] ss:$8 sps:$4 sm:$0xff]  }
 0x78b   :  { %8830 = vmatprep.mubr.bf16.mxu0 %v17454_v17  ;;  %8972 = vmatprep.mubr.bf16.mxu1 %v17454_v17 }
 0x78d   :  { %8801 = vmatpush1.bf16.msra.mxu0 %v16888_v46  ;;  %8943 = vmatpush1.bf16.msra.mxu1 %v16891_v16  ;;  %v16966_v46 = vld [vmem:[%s21688_s5 + $0x310] ss:$8 sps:$4 sm:$0xff]   ;;  %v16977_v16 = vld [vmem:[%s21688_s5 + $0x384] ss:$8 sps:$4 sm:$0xff]  }
 0x78e   :  { %8802 = vmatprep.subr.bf16.mxu0 %v16896_v24  ;;  %8944 = vmatprep.subr.bf16.mxu1 %v16899_v32  ;;  %v8983_v24 = vld [vmem:[#allocation4 + $0xc] sm:$0x3]  ;;  %v9125_v32 = vld [vmem:[#allocation4 + $0xe] sm:$0x3] }
 0x791   :  { %8803 = vmatpush1.bf16.msra.mxu0 %v16894_v5  ;;  %8945 = vmatpush1.bf16.msra.mxu1 %v16897_v33  ;;  %v16981_v5 = vld [vmem:[%s21688_s5 + $0x4f0] ss:$8 sps:$4 sm:$0xff]   ;;  %v8984_v33 = vpack.c.bf16 %v8983_v24, %v8983_v24  ;;  %v17031_v24 = vld [vmem:[%s21688_s5 + $0x5f4] ss:$8 sps:$4 sm:$0xff]  }
 0x792   :  { %8804 = vmatprep.subr.bf16.mxu0 %v16902_v12  ;;  %8946 = vmatprep.subr.bf16.mxu1 %v16905_v52  ;;  %v9126_v12 = vpack.c.bf16 %v9125_v32, %v9125_v32  ;;  %v16986_v52 = vld [vmem:[%s21688_s5 + $0x464] ss:$8 sps:$4 sm:$0xff]  }
 0x795   :  { %8805 = vmatpush1.bf16.msra.mxu0 %v16900_v29  ;;  %8947 = vmatpush1.bf16.msra.mxu1 %v16903_v60  ;;  %v16989_v29 = vld [vmem:[%s21688_s5 + $0x4e4] ss:$8 sps:$4 sm:$0xff]   ;;  %v7937_v60 = vld [vmem:[#allocation3 + $0x30] sm:$0xff] }
 0x796   :  { %8806 = vmatprep.subr.bf16.mxu0 %v16908_v9  ;;  %8948 = vmatprep.subr.bf16.mxu1 %v16911_v23  ;;  %v7936_v9 = vld [vmem:[#allocation3 + $0x28] sm:$0xff]  ;;  %v7938_v23 = vld [vmem:[#allocation3 + $0x38] sm:$0xf] }
 0x799   :  { %8807 = vmatpush1.bf16.msra.mxu0 %v16906_v31  ;;  %8949 = vmatpush1.bf16.msra.mxu1 %v16909_v14  ;;  %v7941_v31 = vrot.slane %v7937_v60, 2  ;;  %v8062_v14 = vld [vmem:[#allocation3 + $0x94] sm:$0xff] }
 0x79a   :  { %8808 = vmatprep.subr.bf16.mxu0 %v16914_v54  ;;  %8950 = vmatprep.subr.bf16.mxu1 %v16917_v25  ;;  %v7942_v54 = vrot.slane %v7938_v23, 2  ;;  %v8063_v25 = vld [vmem:[#allocation3 + $0x9c] sm:$0xf]  ;;  %v17041_v23 = vld [vmem:[%s21688_s5 + $0x5d0] ss:$8 sps:$4 sm:$0xff]  }
 0x79d   :  { %8809 = vmatpush1.bf16.msra.mxu0 %v16912_v58  ;;  %8951 = vmatpush1.bf16.msra.mxu1 %v16915_v51  ;;  %v8066_v58 = vrot.slane %v8062_v14, 2  ;;  %v8061_v51 = vld [vmem:[#allocation3 + $0x8c] sm:$0xff] }
 0x79e   :  { %8810 = vmatprep.subr.bf16.mxu0 %v16920_v22  ;;  %8952 = vmatprep.subr.bf16.mxu1 %v16923_v27  ;;  %v8067_v22 = vrot.slane %v8063_v25, 2  ;;  %v16984_v27 = vld [vmem:[%s21688_s5 + $0x460] ss:$8 sps:$4 sm:$0xff]  }
 0x79f   :  { %v17047_v25 = vld [vmem:[%s21688_s5 + $0x5c0] ss:$8 sps:$4 sm:$0xff]  }
 0x7a0   :  { %v8072_v63 = vmax.f32 %v8062_v14, %v8067_v22  ;;  %v17049_v14 = vld [vmem:[%s21688_s5 + $0x5c4] ss:$8 sps:$4 sm:$0xff]  }
 0x7a1   :  { %8811 = vmatpush1.bf16.msra.mxu0 %v16918_v3  ;;  %8953 = vmatpush1.bf16.msra.mxu1 %v16921_v19  ;;  %v16987_v3 = vld [vmem:[%s21688_s5 + $0x4e0] ss:$8 sps:$4 sm:$0xff]   ;;  %v7943_v19 = vsel %vm7890_vm3, %v7941_v31, %v7942_v54  ;;  %v17046_v31 = vld [vmem:[%s21688_s5 + $0x544] ss:$8 sps:$4 sm:$0xff]  }
 0x7a2   :  { %8812 = vmatprep.subr.bf16.mxu0 %v16926_v39  ;;  %8954 = vmatprep.subr.bf16.mxu1 %v16929_v2  ;;  %v7947_v39 = vmax.f32 %v7937_v60, %v7942_v54  ;;  %v16992_v2 = vld [vmem:[%s21688_s5 + $0x454] ss:$8 sps:$4 sm:$0xff]   ;;  %v17044_v54 = vld [vmem:[%s21688_s5 + $0x540] ss:$8 sps:$4 sm:$0xff]  }
 0x7a3   :  { %v17043_v60 = vld [vmem:[%s21688_s5 + $0x5d4] ss:$8 sps:$4 sm:$0xff]  }
 0x7a5   :  { %8813 = vmatpush1.bf16.msra.mxu0 %v16924_v49  ;;  %8955 = vmatpush1.bf16.msra.mxu1 %v16927_v37  ;;  %v7946_v49 = vmax.f32 %v7936_v9, %v7943_v19  ;;  %v8068_v37 = vsel %vm7890_vm3, %v8066_v58, %v8067_v22  ;;  %v17038_v9 = vld [vmem:[%s21688_s5 + $0x550] ss:$8 sps:$4 sm:$0xff]   ;;  %v17052_v58 = vld [vmem:[%s21688_s5 + $0x534] ss:$8 sps:$4 sm:$0xff]   ;;  %v17061_v19 = vld [vmem:[%s21688_s5 + $0x5a4] ss:$8 sps:$4 sm:$0xff]  }
 0x7a6   :  { %9082 = vmatprep.subr.bf16.mxu0 %v16932_v47  ;;  %9224 = vmatprep.subr.bf16.mxu1 %v16935_v30  ;;  %v16995_v47 = vld [vmem:[%s21688_s5 + $0x4d4] ss:$8 sps:$4 sm:$0xff]   ;;  %v8071_v36 = vmax.f32 %v8061_v51, %v8068_v37  ;;  %v7957_v30 = vrot.slane %v7947_v39, 1  ;;  %v17050_v22 = vld [vmem:[%s21688_s5 + $0x530] ss:$8 sps:$4 sm:$0xff]  }
 0x7a7   :  { %v17055_v51 = vld [vmem:[%s21688_s5 + $0x5b4] ss:$8 sps:$4 sm:$0xff]  }
 0x7a8   :  { %8831 = vmatmul.mubr.bf16.vlgmr.msra.gmra.mxu0 %v8700_v38  ;;  %8973 = vmatmul.mubr.bf16.vlgmr.msra.gmra.mxu1 %v8842_v43  ;;  %v7949_v38 = vrot.slane %v7946_v49, 1  ;;  %v16993_v43 = vld [vmem:[%s21688_s5 + $0x4d0] ss:$8 sps:$4 sm:$0xff]  }
 0x7a9   :  { %9083 = vmatpush1.bf16.msra.mxu0 %v16930_v21  ;;  %9225 = vmatpush1.bf16.msra.mxu1 %v16933_v35  ;;  %v16990_v21 = vld [vmem:[%s21688_s5 + $0x450] ss:$8 sps:$4 sm:$0xff]   ;;  %v8074_v35 = vrot.slane %v8071_v36, 1 }
 0x7aa   :  { %9084 = vmatprep.subr.bf16.mxu0 %v16938_v26  ;;  %9226 = vmatprep.subr.bf16.mxu1 %v16941_v48  ;;  %v7959_v26 = vmax.f32 %v7947_v39, %v7957_v30  ;;  %v16998_v48 = vld [vmem:[%s21688_s5 + $0x444] ss:$8 sps:$4 sm:$0xff]  }
 0x7ab   :  { %9114 = vmatprep.mubr.bf16.mxu0 %v17454_v17  ;;  %9256 = vmatprep.mubr.bf16.mxu1 %v17454_v17  ;;  %v7962_v39 = vld [vmem:[#allocation3 + $0x44] sm:$0xff] }
 0x7ac   :  { %7960 = vst [vmem:[#allocation4 + $0x1c] sm:$0x1] %v7959_v26  ;;  %v7966_v37 = vrot.slane %v7962_v39, 2  ;;  %v8086_v30 = vld [vmem:[#allocation3 + $0xa0] sm:$0xff] }
 0x7ad   :  { %9085 = vmatpush1.bf16.msra.mxu0 %v16936_v15  ;;  %9227 = vmatpush1.bf16.msra.mxu1 %v16939_v41  ;;  %v7951_v15 = vmax.f32 %v7946_v49, %v7949_v38  ;;  %v8082_v41 = vrot.slane %v8072_v63, 1  ;;  %v7961_v49 = vld [vmem:[#allocation3 + $0x3c] sm:$0xff] }
 0x7ae   :  { %9086 = vmatprep.subr.bf16.mxu0 %v16944_v57  ;;  %9228 = vmatprep.subr.bf16.mxu1 %v16947_v18  ;;  %v17001_v57 = vld [vmem:[%s21688_s5 + $0x4c4] ss:$8 sps:$4 sm:$0xff]   ;;  %v8076_v18 = vmax.f32 %v8071_v36, %v8074_v35  ;;  %v8088_v36 = vld [vmem:[#allocation3 + $0xb0] sm:$0xf]  ;;  %v17056_v35 = vld [vmem:[%s21688_s5 + $0x520] ss:$8 sps:$4 sm:$0xff]  }
 0x7af   :  { %7952 = vst [vmem:[#allocation4 + $0x14] ss:$4 sps:$4 sm:$0x55] %v7951_v15   ;;  %v17059_v15 = vld [vmem:[%s21688_s5 + $0x5a0] ss:$8 sps:$4 sm:$0xff]  }
 0x7b0   :  { %8077 = vst [vmem:[#allocation4 + $0x15] ss:$4 sps:$4 sm:$0x55] %v8076_v18   ;;  %v17067_v18 = vld [vmem:[%s21688_s5 + $0x594] ss:$8 sps:$4 sm:$0xff]  }
 0x7b1   :  { %9087 = vmatpush1.bf16.msra.mxu0 %v16942_v20  ;;  %9229 = vmatpush1.bf16.msra.mxu1 %v16945_v61  ;;  %v8084_v20 = vmax.f32 %v8072_v63, %v8082_v41  ;;  %v16996_v61 = vld [vmem:[%s21688_s5 + $0x440] ss:$8 sps:$4 sm:$0xff]   ;;  %v17064_v41 = vld [vmem:[%s21688_s5 + $0x514] ss:$8 sps:$4 sm:$0xff]  }
 0x7b2   :  { %9088 = vmatprep.subr.bf16.mxu0 %v16950_v7  ;;  %9230 = vmatprep.subr.bf16.mxu1 %v16953_v13  ;;  %v16999_v7 = vld [vmem:[%s21688_s5 + $0x4c0] ss:$8 sps:$4 sm:$0xff]   ;;  %v17004_v13 = vld [vmem:[%s21688_s5 + $0x434] ss:$8 sps:$4 sm:$0xff]  }
 0x7b3   :  { %8085 = vst [vmem:[#allocation4 + $0x1d] sm:$0x1] %v8084_v20 }
 0x7b5   :  { %9089 = vmatpush1.bf16.msra.mxu0 %v16948_v50  ;;  %9231 = vmatpush1.bf16.msra.mxu1 %v16951_v28  ;;  %v17007_v50 = vld [vmem:[%s21688_s5 + $0x4b4] ss:$8 sps:$4 sm:$0xff]   ;;  %v17002_v28 = vld [vmem:[%s21688_s5 + $0x430] ss:$8 sps:$4 sm:$0xff]  }
 0x7b6   :  { %9090 = vmatprep.subr.bf16.mxu0 %v16956_v53  ;;  %9232 = vmatprep.subr.bf16.mxu1 %v16959_v44  ;;  %v17005_v53 = vld [vmem:[%s21688_s5 + $0x4b0] ss:$8 sps:$4 sm:$0xff]   ;;  %v17010_v44 = vld [vmem:[%s21688_s5 + $0x424] ss:$8 sps:$4 sm:$0xff]  }
 0x7b9   :  { %9091 = vmatpush1.bf16.msra.mxu0 %v16954_v11  ;;  %9233 = vmatpush1.bf16.msra.mxu1 %v16957_v59  ;;  %v17013_v11 = vld [vmem:[%s21688_s5 + $0x4a4] ss:$8 sps:$4 sm:$0xff]   ;;  %v17008_v59 = vld [vmem:[%s21688_s5 + $0x420] ss:$8 sps:$4 sm:$0xff]  }
 0x7ba   :  { %9092 = vmatprep.subr.bf16.mxu0 %v16962_v0  ;;  %9234 = vmatprep.subr.bf16.mxu1 %v16965_v55  ;;  %v17011_v0 = vld [vmem:[%s21688_s5 + $0x4a0] ss:$8 sps:$4 sm:$0xff]   ;;  %v17016_v55 = vld [vmem:[%s21688_s5 + $0x414] ss:$8 sps:$4 sm:$0xff]  }
 0x7bd   :  { %9093 = vmatpush1.bf16.msra.mxu0 %v16960_v45  ;;  %9235 = vmatpush1.bf16.msra.mxu1 %v16963_v10  ;;  %v17019_v45 = vld [vmem:[%s21688_s5 + $0x494] ss:$8 sps:$4 sm:$0xff]   ;;  %v17014_v10 = vld [vmem:[%s21688_s5 + $0x410] ss:$8 sps:$4 sm:$0xff]  }
 0x7be   :  { %9094 = vmatprep.subr.bf16.mxu0 %v16968_v34  ;;  %9236 = vmatprep.subr.bf16.mxu1 %v16971_v6  ;;  %v17017_v34 = vld [vmem:[%s21688_s5 + $0x490] ss:$8 sps:$4 sm:$0xff]   ;;  %v17022_v6 = vld [vmem:[%s21688_s5 + $0x404] ss:$8 sps:$4 sm:$0xff]  }
 0x7c1   :  { %9095 = vmatpush1.bf16.msra.mxu0 %v16966_v46  ;;  %9237 = vmatpush1.bf16.msra.mxu1 %v16969_v8  ;;  %v17025_v46 = vld [vmem:[%s21688_s5 + $0x484] ss:$8 sps:$4 sm:$0xff]   ;;  %v17020_v8 = vld [vmem:[%s21688_s5 + $0x400] ss:$8 sps:$4 sm:$0xff]  }
 0x7c2   :  { %9096 = vmatprep.subr.bf16.mxu0 %v16974_v56  ;;  %9238 = vmatprep.subr.bf16.mxu1 %v16977_v16  ;;  %v17023_v56 = vld [vmem:[%s21688_s5 + $0x480] ss:$8 sps:$4 sm:$0xff]  }
 0x7c3   :  { %v9267_v16 = vld [vmem:[#allocation4 + $0x10] sm:$0x3] }
 0x7c4   :  { %v9268_v32 = vpack.c.bf16 %v9267_v16, %v9267_v16  ;;  %v17079_v16 = vld [vmem:[%s21688_s5 + $0x6f4] ss:$8 sps:$4 sm:$0xff]  }
 0x7c5   :  { %9097 = vmatpush1.bf16.msra.mxu0 %v16972_v4  ;;  %9239 = vmatpush1.bf16.msra.mxu1 %v16975_v40  ;;  %v17028_v4 = vld [vmem:[%s21688_s5 + $0x574] ss:$8 sps:$4 sm:$0xff]   ;;  %v9409_v40 = vld [vmem:[#allocation4 + $0x12] sm:$0x3] }
 0x7c6   :  { %9366 = vmatprep.subr.bf16.mxu0 %v16980_v1  ;;  %9508 = vmatprep.subr.bf16.mxu1 %v16983_v42  ;;  %v17026_v1 = vld [vmem:[%s21688_s5 + $0x570] ss:$8 sps:$4 sm:$0xff]   ;;  %v9410_v42 = vpack.c.bf16 %v9409_v40, %v9409_v40 }
 0x7c7   :  { %v17074_v40 = vld [vmem:[%s21688_s5 + $0x670] ss:$8 sps:$4 sm:$0xff]  }
 0x7c8   :  { %9115 = vmatmul.mubr.bf16.vlgmr.msra.gmra.mxu0 %v8984_v33  ;;  %9257 = vmatmul.mubr.bf16.vlgmr.msra.gmra.mxu1 %v9126_v12  ;;  %v17037_v33 = vld [vmem:[%s21688_s5 + $0x5e4] ss:$8 sps:$4 sm:$0xff]   ;;  %v17032_v12 = vld [vmem:[%s21688_s5 + $0x560] ss:$8 sps:$4 sm:$0xff]  }
 0x7c9   :  { %9367 = vmatpush1.bf16.msra.mxu0 %v16978_v62  ;;  %9509 = vmatpush1.bf16.msra.mxu1 %v16981_v5  ;;  %v17029_v62 = vld [vmem:[%s21688_s5 + $0x5f0] ss:$8 sps:$4 sm:$0xff]   ;;  %v17034_v5 = vld [vmem:[%s21688_s5 + $0x564] ss:$8 sps:$4 sm:$0xff]  }
 0x7ca   :  { %9368 = vmatprep.subr.bf16.mxu0 %v16986_v52  ;;  %9510 = vmatprep.subr.bf16.mxu1 %v16989_v29  ;;  %v17035_v52 = vld [vmem:[%s21688_s5 + $0x5e0] ss:$8 sps:$4 sm:$0xff]   ;;  %v17040_v29 = vld [vmem:[%s21688_s5 + $0x554] ss:$8 sps:$4 sm:$0xff]  }
 0x7cb   :  { %9398 = vmatprep.mubr.bf16.mxu0 %v17454_v17  ;;  %9540 = vmatprep.mubr.bf16.mxu1 %v17454_v17 }
 0x7cd   :  { %9369 = vmatpush1.bf16.msra.mxu0 %v16984_v27  ;;  %9511 = vmatpush1.bf16.msra.mxu1 %v16987_v3  ;;  %v17053_v27 = vld [vmem:[%s21688_s5 + $0x5b0] ss:$8 sps:$4 sm:$0xff]   ;;  %v17058_v3 = vld [vmem:[%s21688_s5 + $0x524] ss:$8 sps:$4 sm:$0xff]  }
 0x7ce   :  { %9370 = vmatprep.subr.bf16.mxu0 %v16992_v2  ;;  %9512 = vmatprep.subr.bf16.mxu1 %v16995_v47  ;;  %v7963_v2 = vld [vmem:[#allocation3 + $0x4c] sm:$0xf] }
 0x7cf   :  { %v7967_v63 = vrot.slane %v7963_v2, 2  ;;  %v8087_v47 = vld [vmem:[#allocation3 + $0xa8] sm:$0xff] }
 0x7d0   :  { %v8091_v38 = vrot.slane %v8087_v47, 2  ;;  %v17110_v2 = vld [vmem:[%s21688_s5 + $0x610] ss:$8 sps:$4 sm:$0xff]  }
 0x7d1   :  { %9371 = vmatpush1.bf16.msra.mxu0 %v16990_v21  ;;  %9513 = vmatpush1.bf16.msra.mxu1 %v16993_v43  ;;  %v8092_v21 = vrot.slane %v8088_v36, 2  ;;  %v7968_v43 = vsel %vm7890_vm3, %v7966_v37, %v7967_v63  ;;  %v17118_v37 = vld [vmem:[%s21688_s5 + $0x604] ss:$8 sps:$4 sm:$0xff]   ;;  %v17119_v36 = vld [vmem:[%s21688_s5 + $0x680] ss:$8 sps:$4 sm:$0xff]  }
 0x7d2   :  { %9372 = vmatprep.subr.bf16.mxu0 %v16998_v48  ;;  %9514 = vmatprep.subr.bf16.mxu1 %v17001_v57  ;;  %v7971_v26 = vmax.f32 %v7961_v49, %v7968_v43  ;;  %v17113_v49 = vld [vmem:[%s21688_s5 + $0x690] ss:$8 sps:$4 sm:$0xff]   ;;  %v17127_v43 = vld [vmem:[%s21688_s5 + $0x7f4] ss:$8 sps:$4 sm:$0xff]  }
 0x7d3   :  { %v8093_v48 = vsel %vm7890_vm3, %v8091_v38, %v8092_v21  ;;  %v17124_v38 = vld [vmem:[%s21688_s5 + $0x774] ss:$8 sps:$4 sm:$0xff]  }
 0x7d4   :  { %v8096_v57 = vmax.f32 %v8086_v30, %v8093_v48  ;;  %v7974_v20 = vrot.slane %v7971_v26, 1  ;;  %v9835_v30 = vld [vmem:[#allocation4 + $0x18] sm:$0x3] }
 0x7d5   :  { %9373 = vmatpush1.bf16.msra.mxu0 %v16996_v61  ;;  %9515 = vmatpush1.bf16.msra.mxu1 %v16999_v7  ;;  %v7972_v61 = vmax.f32 %v7962_v39, %v7967_v63  ;;  %v8097_v7 = vmax.f32 %v8087_v47, %v8092_v21  ;;  %v17115_v39 = vld [vmem:[%s21688_s5 + $0x694] ss:$8 sps:$4 sm:$0xff]   ;;  %v17121_v63 = vld [vmem:[%s21688_s5 + $0x684] ss:$8 sps:$4 sm:$0xff]   ;;  %v17116_v47 = vld [vmem:[%s21688_s5 + $0x600] ss:$8 sps:$4 sm:$0xff]  }
 0x7d6   :  { %9374 = vmatprep.subr.bf16.mxu0 %v17004_v13  ;;  %9516 = vmatprep.subr.bf16.mxu1 %v17007_v50  ;;  %v8099_v13 = vrot.slane %v8096_v57, 1  ;;  %v17062_v50 = vld [vmem:[%s21688_s5 + $0x510] ss:$8 sps:$4 sm:$0xff]   ;;  %v9977_v21 = vld [vmem:[#allocation4 + $0x1a] sm:$0x3] }
 0x7d7   :  { %v9978_v48 = vpack.c.bf16 %v9977_v21, %v9977_v21 }
 0x7d9   :  { %9375 = vmatpush1.bf16.msra.mxu0 %v17002_v28  ;;  %9517 = vmatpush1.bf16.msra.mxu1 %v17005_v53  ;;  %v7976_v28 = vmax.f32 %v7971_v26, %v7974_v20  ;;  %v7982_v53 = vrot.slane %v7972_v61, 1  ;;  %v17122_v26 = vld [vmem:[%s21688_s5 + $0x770] ss:$8 sps:$4 sm:$0xff]  }
 0x7da   :  { %9376 = vmatprep.subr.bf16.mxu0 %v17010_v44  ;;  %9518 = vmatprep.subr.bf16.mxu1 %v17013_v11  ;;  %v17065_v44 = vld [vmem:[%s21688_s5 + $0x590] ss:$8 sps:$4 sm:$0xff]   ;;  %v17070_v11 = vld [vmem:[%s21688_s5 + $0x504] ss:$8 sps:$4 sm:$0xff]  }
 0x7db   :  { %7977 = vst [vmem:[#allocation4 + $0x1e] ss:$4 sps:$4 sm:$0x55] %v7976_v28  }
 0x7dd   :  { %9377 = vmatpush1.bf16.msra.mxu0 %v17008_v59  ;;  %9519 = vmatpush1.bf16.msra.mxu1 %v17011_v0  ;;  %v8101_v59 = vmax.f32 %v8096_v57, %v8099_v13  ;;  %v8107_v0 = vrot.slane %v8097_v7, 1  ;;  %v17133_v57 = vld [vmem:[%s21688_s5 + $0x7e4] ss:$8 sps:$4 sm:$0xff]  }
 0x7de   :  { %9378 = vmatprep.subr.bf16.mxu0 %v17016_v55  ;;  %9520 = vmatprep.subr.bf16.mxu1 %v17019_v45  ;;  %v17073_v55 = vld [vmem:[%s21688_s5 + $0x584] ss:$8 sps:$4 sm:$0xff]   ;;  %v7984_v45 = vmax.f32 %v7972_v61, %v7982_v53  ;;  %v17128_v61 = vld [vmem:[%s21688_s5 + $0x760] ss:$8 sps:$4 sm:$0xff]  }
 0x7df   :  { %8102 = vst [vmem:[#allocation4 + $0x1f] ss:$4 sps:$4 sm:$0x55] %v8101_v59  }
 0x7e0   :  { %7985 = vst [vmem:[#allocation4 + $0x26] sm:$0x1] %v7984_v45 }
 0x7e1   :  { %9379 = vmatpush1.bf16.msra.mxu0 %v17014_v10  ;;  %9521 = vmatpush1.bf16.msra.mxu1 %v17017_v34  ;;  %v17068_v10 = vld [vmem:[%s21688_s5 + $0x500] ss:$8 sps:$4 sm:$0xff]   ;;  %v8109_v34 = vmax.f32 %v8097_v7, %v8107_v0  ;;  %v17134_v0 = vld [vmem:[%s21688_s5 + $0x750] ss:$8 sps:$4 sm:$0xff]  }
 0x7e2   :  { %9380 = vmatprep.subr.bf16.mxu0 %v17022_v6  ;;  %9522 = vmatprep.subr.bf16.mxu1 %v17025_v46  ;;  %v17071_v6 = vld [vmem:[%s21688_s5 + $0x580] ss:$8 sps:$4 sm:$0xff]   ;;  %v17076_v46 = vld [vmem:[%s21688_s5 + $0x674] ss:$8 sps:$4 sm:$0xff]  }
 0x7e3   :  { %8110 = vst [vmem:[#allocation4 + $0x27] sm:$0x1] %v8109_v34  ;;  %v17131_v7 = vld [vmem:[%s21688_s5 + $0x7e0] ss:$8 sps:$4 sm:$0xff]  }
 0x7e5   :  { %9381 = vmatpush1.bf16.msra.mxu0 %v17020_v8  ;;  %9523 = vmatpush1.bf16.msra.mxu1 %v17023_v56  ;;  %v9551_v8 = vld [vmem:[#allocation4 + $0x14] sm:$0x3]  ;;  %v9693_v56 = vld [vmem:[#allocation4 + $0x16] sm:$0x3] }
 0x7e6   :  { %9650 = vmatprep.subr.bf16.mxu0 %v17028_v4  ;;  %9792 = vmatprep.subr.bf16.mxu1 %v17031_v24  ;;  %v9552_v4 = vpack.c.bf16 %v9551_v8, %v9551_v8  ;;  %v9694_v24 = vpack.c.bf16 %v9693_v56, %v9693_v56  ;;  %v17140_v8 = vld [vmem:[%s21688_s5 + $0x740] ss:$8 sps:$4 sm:$0xff]   ;;  %v10261_v21 = vld [vmem:[#allocation4 + $0x1e] sm:$0x3] }
 0x7e7   :  { %v17143_v56 = vld [vmem:[%s21688_s5 + $0x7c0] ss:$8 sps:$4 sm:$0xff]  }
 0x7e8   :  { %9399 = vmatmul.mubr.bf16.vlgmr.msra.gmra.mxu0 %v9268_v32  ;;  %9541 = vmatmul.mubr.bf16.vlgmr.msra.gmra.mxu1 %v9410_v42  ;;  %v17077_v32 = vld [vmem:[%s21688_s5 + $0x6f0] ss:$8 sps:$4 sm:$0xff]   ;;  %v17085_v42 = vld [vmem:[%s21688_s5 + $0x6e4] ss:$8 sps:$4 sm:$0xff]  }
 0x7e9   :  { %9651 = vmatpush1.bf16.msra.mxu0 %v17026_v1  ;;  %9793 = vmatpush1.bf16.msra.mxu1 %v17029_v62  ;;  %v17082_v1 = vld [vmem:[%s21688_s5 + $0x664] ss:$8 sps:$4 sm:$0xff]   ;;  %v17080_v62 = vld [vmem:[%s21688_s5 + $0x660] ss:$8 sps:$4 sm:$0xff]  }
 0x7ea   :  { %9652 = vmatprep.subr.bf16.mxu0 %v17034_v5  ;;  %9794 = vmatprep.subr.bf16.mxu1 %v17037_v33  ;;  %v17083_v5 = vld [vmem:[%s21688_s5 + $0x6e0] ss:$8 sps:$4 sm:$0xff]   ;;  %v17088_v33 = vld [vmem:[%s21688_s5 + $0x654] ss:$8 sps:$4 sm:$0xff]  }
 0x7eb   :  { %9682 = vmatprep.mubr.bf16.mxu0 %v17454_v17  ;;  %9824 = vmatprep.mubr.bf16.mxu1 %v17454_v17 }
 0x7ed   :  { %9653 = vmatpush1.bf16.msra.mxu0 %v17032_v12  ;;  %9795 = vmatpush1.bf16.msra.mxu1 %v17035_v52  ;;  %v17091_v12 = vld [vmem:[%s21688_s5 + $0x6d4] ss:$8 sps:$4 sm:$0xff]   ;;  %v17086_v52 = vld [vmem:[%s21688_s5 + $0x650] ss:$8 sps:$4 sm:$0xff]  }
 0x7ee   :  { %9654 = vmatprep.subr.bf16.mxu0 %v17040_v29  ;;  %9796 = vmatprep.subr.bf16.mxu1 %v17043_v60  ;;  %v17089_v29 = vld [vmem:[%s21688_s5 + $0x6d0] ss:$8 sps:$4 sm:$0xff]   ;;  %v17094_v60 = vld [vmem:[%s21688_s5 + $0x644] ss:$8 sps:$4 sm:$0xff]  }
 0x7f1   :  { %9655 = vmatpush1.bf16.msra.mxu0 %v17038_v9  ;;  %9797 = vmatpush1.bf16.msra.mxu1 %v17041_v23  ;;  %v17097_v9 = vld [vmem:[%s21688_s5 + $0x6c4] ss:$8 sps:$4 sm:$0xff]   ;;  %v17092_v23 = vld [vmem:[%s21688_s5 + $0x640] ss:$8 sps:$4 sm:$0xff]  }
 0x7f2   :  { %9656 = vmatprep.subr.bf16.mxu0 %v17046_v31  ;;  %9798 = vmatprep.subr.bf16.mxu1 %v17049_v14  ;;  %v17095_v31 = vld [vmem:[%s21688_s5 + $0x6c0] ss:$8 sps:$4 sm:$0xff]   ;;  %v17100_v14 = vld [vmem:[%s21688_s5 + $0x634] ss:$8 sps:$4 sm:$0xff]  }
 0x7f5   :  { %9657 = vmatpush1.bf16.msra.mxu0 %v17044_v54  ;;  %9799 = vmatpush1.bf16.msra.mxu1 %v17047_v25  ;;  %v17103_v54 = vld [vmem:[%s21688_s5 + $0x6b4] ss:$8 sps:$4 sm:$0xff]   ;;  %v17098_v25 = vld [vmem:[%s21688_s5 + $0x630] ss:$8 sps:$4 sm:$0xff]  }
 0x7f6   :  { %9658 = vmatprep.subr.bf16.mxu0 %v17052_v58  ;;  %9800 = vmatprep.subr.bf16.mxu1 %v17055_v51  ;;  %v17101_v58 = vld [vmem:[%s21688_s5 + $0x6b0] ss:$8 sps:$4 sm:$0xff]   ;;  %v17106_v51 = vld [vmem:[%s21688_s5 + $0x624] ss:$8 sps:$4 sm:$0xff]  }
 0x7f9   :  { %9659 = vmatpush1.bf16.msra.mxu0 %v17050_v22  ;;  %9801 = vmatpush1.bf16.msra.mxu1 %v17053_v27  ;;  %v17109_v22 = vld [vmem:[%s21688_s5 + $0x6a4] ss:$8 sps:$4 sm:$0xff]   ;;  %v17104_v27 = vld [vmem:[%s21688_s5 + $0x620] ss:$8 sps:$4 sm:$0xff]  }
 0x7fa   :  { %9660 = vmatprep.subr.bf16.mxu0 %v17058_v3  ;;  %9802 = vmatprep.subr.bf16.mxu1 %v17061_v19  ;;  %v17107_v3 = vld [vmem:[%s21688_s5 + $0x6a0] ss:$8 sps:$4 sm:$0xff]   ;;  %v17112_v19 = vld [vmem:[%s21688_s5 + $0x614] ss:$8 sps:$4 sm:$0xff]  }
 0x7fd   :  { %9661 = vmatpush1.bf16.msra.mxu0 %v17056_v35  ;;  %9803 = vmatpush1.bf16.msra.mxu1 %v17059_v15  ;;  %v9836_v35 = vpack.c.bf16 %v9835_v30, %v9835_v30  ;;  %v17125_v15 = vld [vmem:[%s21688_s5 + $0x7f0] ss:$8 sps:$4 sm:$0xff]  }
 0x7fe   :  { %9662 = vmatprep.subr.bf16.mxu0 %v17064_v41  ;;  %9804 = vmatprep.subr.bf16.mxu1 %v17067_v18  ;;  %v17130_v41 = vld [vmem:[%s21688_s5 + $0x764] ss:$8 sps:$4 sm:$0xff]  }
 0x801   :  { %9663 = vmatpush1.bf16.msra.mxu0 %v17062_v50  ;;  %9805 = vmatpush1.bf16.msra.mxu1 %v17065_v44  ;;  %v17136_v50 = vld [vmem:[%s21688_s5 + $0x754] ss:$8 sps:$4 sm:$0xff]  }
 0x802   :  { %9664 = vmatprep.subr.bf16.mxu0 %v17070_v11  ;;  %9806 = vmatprep.subr.bf16.mxu1 %v17073_v55  ;;  %v17139_v44 = vld [vmem:[%s21688_s5 + $0x7d4] ss:$8 sps:$4 sm:$0xff]   ;;  %v17137_v55 = vld [vmem:[%s21688_s5 + $0x7d0] ss:$8 sps:$4 sm:$0xff]  }
 0x805   :  { %9665 = vmatpush1.bf16.msra.mxu0 %v17068_v10  ;;  %9807 = vmatpush1.bf16.msra.mxu1 %v17071_v6  ;;  %v17142_v10 = vld [vmem:[%s21688_s5 + $0x744] ss:$8 sps:$4 sm:$0xff]  }
 0x806   :  { %9934 = vmatprep.subr.bf16.mxu0 %v17076_v46  ;;  %10076 = vmatprep.subr.bf16.mxu1 %v17079_v16  ;;  %v17145_v6 = vld [vmem:[%s21688_s5 + $0x7c4] ss:$8 sps:$4 sm:$0xff]   ;;  %v17148_v16 = vld [vmem:[%s21688_s5 + $0x734] ss:$8 sps:$4 sm:$0xff]  }
 0x808   :  { %9683 = vmatmul.mubr.bf16.vlgmr.msra.gmra.mxu0 %v9552_v4  ;;  %9825 = vmatmul.mubr.bf16.vlgmr.msra.gmra.mxu1 %v9694_v24  ;;  %v17151_v4 = vld [vmem:[%s21688_s5 + $0x7b4] ss:$8 sps:$4 sm:$0xff]   ;;  %v17149_v24 = vld [vmem:[%s21688_s5 + $0x7b0] ss:$8 sps:$4 sm:$0xff]  }
 0x809   :  { %9935 = vmatpush1.bf16.msra.mxu0 %v17074_v40  ;;  %10077 = vmatpush1.bf16.msra.mxu1 %v17077_v32  ;;  %v17146_v40 = vld [vmem:[%s21688_s5 + $0x730] ss:$8 sps:$4 sm:$0xff]   ;;  %v17154_v32 = vld [vmem:[%s21688_s5 + $0x724] ss:$8 sps:$4 sm:$0xff]  }
 0x80a   :  { %9936 = vmatprep.subr.bf16.mxu0 %v17082_v1  ;;  %10078 = vmatprep.subr.bf16.mxu1 %v17085_v42  ;;  %v17157_v1 = vld [vmem:[%s21688_s5 + $0x7a4] ss:$8 sps:$4 sm:$0xff]  }
 0x80b   :  { %9966 = vmatprep.mubr.bf16.mxu0 %v17454_v17  ;;  %10108 = vmatprep.mubr.bf16.mxu1 %v17454_v17  ;;  %v21068_v42 = vld [vmem:[#allocation3 + $0x58] sm:$0xff] }
 0x80d   :  { %9937 = vmatpush1.bf16.msra.mxu0 %v17080_v62  ;;  %10079 = vmatpush1.bf16.msra.mxu1 %v17083_v5  ;;  %v17152_v62 = vld [vmem:[%s21688_s5 + $0x720] ss:$8 sps:$4 sm:$0xff]   ;;  %v7986_v5 = vld [vmem:[#allocation3 + $0x50] sm:$0xff] }
 0x80e   :  { %9938 = vmatprep.subr.bf16.mxu0 %v17088_v33  ;;  %10080 = vmatprep.subr.bf16.mxu1 %v17091_v12  ;;  %v21073_v33 = vld [vmem:[#allocation3 + $0x60] sm:$0xf]  ;;  %v7991_v12 = vrot.slane %v21068_v42, 2 }
 0x811   :  { %9939 = vmatpush1.bf16.msra.mxu0 %v17086_v52  ;;  %10081 = vmatpush1.bf16.msra.mxu1 %v17089_v29  ;;  %v21076_v52 = vld [vmem:[#allocation3 + $0xbc] sm:$0xff]  ;;  %v7992_v29 = vrot.slane %v21073_v33, 2 }
 0x812   :  { %9940 = vmatprep.subr.bf16.mxu0 %v17094_v60  ;;  %10082 = vmatprep.subr.bf16.mxu1 %v17097_v9  ;;  %v21079_v60 = vld [vmem:[#allocation3 + $0xc4] sm:$0xf]  ;;  %v8116_v9 = vrot.slane %v21076_v52, 2 }
 0x815   :  { %9941 = vmatpush1.bf16.msra.mxu0 %v17092_v23  ;;  %10083 = vmatpush1.bf16.msra.mxu1 %v17095_v31  ;;  %v17155_v23 = vld [vmem:[%s21688_s5 + $0x7a0] ss:$8 sps:$4 sm:$0xff]  }
 0x816   :  { %9942 = vmatprep.subr.bf16.mxu0 %v17100_v14  ;;  %10084 = vmatprep.subr.bf16.mxu1 %v17103_v54  ;;  %v8111_v31 = vld [vmem:[#allocation3 + $0xb4] sm:$0xff]  ;;  %v8117_v14 = vrot.slane %v21079_v60, 2 }
 0x817   :  { %v17160_v54 = vld [vmem:[%s21688_s5 + $0x714] ss:$8 sps:$4 sm:$0xff]  }
 0x819   :  { %9943 = vmatpush1.bf16.msra.mxu0 %v17098_v25  ;;  %10085 = vmatpush1.bf16.msra.mxu1 %v17101_v58  ;;  %v17163_v25 = vld [vmem:[%s21688_s5 + $0x794] ss:$8 sps:$4 sm:$0xff]   ;;  %v7993_v58 = vsel %vm7890_vm3, %v7991_v12, %v7992_v29  ;;  %v17205_v12 = vld [vmem:[%s21688_s5 + $0x8a4] ss:$8 sps:$4 sm:$0xff]  }
 0x81a   :  { %9944 = vmatprep.subr.bf16.mxu0 %v17106_v51  ;;  %10086 = vmatprep.subr.bf16.mxu1 %v17109_v22  ;;  %v7996_v51 = vmax.f32 %v7986_v5, %v7993_v58  ;;  %v8118_v22 = vsel %vm7890_vm3, %v8116_v9, %v8117_v14  ;;  %v17202_v5 = vld [vmem:[%s21688_s5 + $0x824] ss:$8 sps:$4 sm:$0xff]   ;;  %v17200_v9 = vld [vmem:[%s21688_s5 + $0x820] ss:$8 sps:$4 sm:$0xff]   ;;  %v17211_v58 = vld [vmem:[%s21688_s5 + $0x894] ss:$8 sps:$4 sm:$0xff]  }
 0x81d   :  { %9945 = vmatpush1.bf16.msra.mxu0 %v17104_v27  ;;  %10087 = vmatpush1.bf16.msra.mxu1 %v17107_v3  ;;  %v8121_v27 = vmax.f32 %v8111_v31, %v8118_v22  ;;  %v17158_v3 = vld [vmem:[%s21688_s5 + $0x710] ss:$8 sps:$4 sm:$0xff]   ;;  %v7997_v31 = vmax.f32 %v21068_v42, %v7992_v29  ;;  %v17217_v22 = vld [vmem:[%s21688_s5 + $0x884] ss:$8 sps:$4 sm:$0xff]  }
 0x81e   :  { %9946 = vmatprep.subr.bf16.mxu0 %v17112_v19  ;;  %10088 = vmatprep.subr.bf16.mxu1 %v17115_v39  ;;  %v17161_v19 = vld [vmem:[%s21688_s5 + $0x790] ss:$8 sps:$4 sm:$0xff]   ;;  %v7999_v39 = vrot.slane %v7996_v51, 1 }
 0x81f   :  { %v17206_v42 = vld [vmem:[%s21688_s5 + $0x810] ss:$8 sps:$4 sm:$0xff]  }
 0x821   :  { %9947 = vmatpush1.bf16.msra.mxu0 %v17110_v2  ;;  %10089 = vmatpush1.bf16.msra.mxu1 %v17113_v49  ;;  %v17166_v2 = vld [vmem:[%s21688_s5 + $0x704] ss:$8 sps:$4 sm:$0xff]  }
 0x822   :  { %9948 = vmatprep.subr.bf16.mxu0 %v17118_v37  ;;  %10090 = vmatprep.subr.bf16.mxu1 %v17121_v63  ;;  %v17169_v49 = vld [vmem:[%s21688_s5 + $0x784] ss:$8 sps:$4 sm:$0xff]   ;;  %v8124_v37 = vrot.slane %v8121_v27, 1  ;;  %v17164_v63 = vld [vmem:[%s21688_s5 + $0x700] ss:$8 sps:$4 sm:$0xff]  }
 0x824   :  { %v8126_v30 = vmax.f32 %v8121_v27, %v8124_v37  ;;  %v17212_v27 = vld [vmem:[%s21688_s5 + $0x800] ss:$8 sps:$4 sm:$0xff]   ;;  %v17218_v37 = vld [vmem:[%s21688_s5 + $0x970] ss:$8 sps:$4 sm:$0xff]  }
 0x825   :  { %9949 = vmatpush1.bf16.msra.mxu0 %v17116_v47  ;;  %10091 = vmatpush1.bf16.msra.mxu1 %v17119_v36  ;;  %v8001_v47 = vmax.f32 %v7996_v51, %v7999_v39  ;;  %v17167_v36 = vld [vmem:[%s21688_s5 + $0x780] ss:$8 sps:$4 sm:$0xff]   ;;  %v8007_v51 = vrot.slane %v7997_v31, 1  ;;  %v17220_v39 = vld [vmem:[%s21688_s5 + $0x974] ss:$8 sps:$4 sm:$0xff]  }
 0x826   :  { %10218 = vmatprep.subr.bf16.mxu0 %v17124_v38  ;;  %10360 = vmatprep.subr.bf16.mxu1 %v17127_v43  ;;  %v10119_v38 = vld [vmem:[#allocation4 + $0x1c] sm:$0x3]  ;;  %v17172_v43 = vld [vmem:[%s21688_s5 + $0x874] ss:$8 sps:$4 sm:$0xff]  }
 0x827   :  { %8002 = vst [vmem:[#allocation4 + $0x28] ss:$4 sps:$4 sm:$0x55] %v8001_v47   ;;  %8127 = vst [vmem:[#allocation4 + $0x29] ss:$4 sps:$4 sm:$0x55] %v8126_v30   ;;  %v8009_v29 = vmax.f32 %v7997_v31, %v8007_v51 }
 0x828   :  { %v8287_v18 = vpop.f32.mrf.mxu0  ;;  %v8408_v20 = vpop.f32.mrf.mxu1  ;;  %9967 = vmatmul.mubr.bf16.vlgmr.msra.gmra.mxu0 %v9836_v35  ;;  %10109 = vmatmul.mubr.bf16.vlgmr.msra.gmra.mxu1 %v9978_v48  ;;  %v17175_v35 = vld [vmem:[%s21688_s5 + $0x8f4] ss:$8 sps:$4 sm:$0xff]   ;;  %v10262_v48 = vpack.c.bf16 %v10261_v21, %v10261_v21  ;;  %v17226_v30 = vld [vmem:[%s21688_s5 + $0x964] ss:$8 sps:$4 sm:$0xff]   ;;  %v17224_v21 = vld [vmem:[%s21688_s5 + $0x960] ss:$8 sps:$4 sm:$0xff]  }
 0x829   :  { %v21020_v13 = vadd.f32 %v8408_v20, %v8287_v18  ;;  %10219 = vmatpush1.bf16.msra.mxu0 %v17122_v26  ;;  %10361 = vmatpush1.bf16.msra.mxu1 %v17125_v15  ;;  %v10120_v26 = vpack.c.bf16 %v10119_v38, %v10119_v38  ;;  %v17170_v15 = vld [vmem:[%s21688_s5 + $0x870] ss:$8 sps:$4 sm:$0xff]   ;;  %v17181_v18 = vld [vmem:[%s21688_s5 + $0x8e4] ss:$8 sps:$4 sm:$0xff]   ;;  %8010 = vst [vmem:[#allocation4 + $0x30] sm:$0x1] %v8009_v29 }
 0x82a   :  { %v8289_v28 = vpop.f32.mrf.mxu0  ;;  %v8410_v53 = vpop.f32.mrf.mxu1  ;;  %10220 = vmatprep.subr.bf16.mxu0 %v17130_v41  ;;  %10362 = vmatprep.subr.bf16.mxu1 %v17133_v57  ;;  %v17173_v41 = vld [vmem:[%s21688_s5 + $0x8f0] ss:$8 sps:$4 sm:$0xff]   ;;  %v17178_v57 = vld [vmem:[%s21688_s5 + $0x864] ss:$8 sps:$4 sm:$0xff]   ;;  %v10829_v31 = vld [vmem:[#allocation4 + $0x26] sm:$0x3] }
 0x82b   :  { %v21028_v11 = vadd.f32 %v8410_v53, %v8289_v28  ;;  %10250 = vmatprep.mubr.bf16.mxu0 %v17454_v17  ;;  %10392 = vmatprep.mubr.bf16.mxu1 %v17454_v17  ;;  %v17179_v28 = vld [vmem:[%s21688_s5 + $0x8e0] ss:$8 sps:$4 sm:$0xff]   ;;  %v17184_v53 = vld [vmem:[%s21688_s5 + $0x854] ss:$8 sps:$4 sm:$0xff]   ;;  %v17229_v38 = vld [vmem:[%s21688_s5 + $0x9e4] ss:$8 sps:$4 sm:$0xff]   ;;  %v10830_v51 = vpack.c.bf16 %v10829_v31, %v10829_v31 }
 0x82c   :  { %v8291_v59 = vpop.f32.mrf.mxu0  ;;  %v8412_v45 = vpop.f32.mrf.mxu1  ;;  %v17277_v29 = vld [vmem:[%s21688_s5 + $0xae4] ss:$8 sps:$4 sm:$0xff]  }
 0x82d   :  { %10221 = vmatpush1.bf16.msra.mxu0 %v17128_v61  ;;  %10363 = vmatpush1.bf16.msra.mxu1 %v17131_v7 }
 0x82e   :  { %v8292_v34 = vpop.f32.mrf.mxu0  ;;  %10222 = vmatprep.subr.bf16.mxu0 %v17136_v50  ;;  %10364 = vmatprep.subr.bf16.mxu1 %v17139_v44  ;;  %v8413_v46 = vpop.f32.mrf.mxu1  ;;  %v17176_v50 = vld [vmem:[%s21688_s5 + $0x860] ss:$8 sps:$4 sm:$0xff]  }
 0x831   :  { %10223 = vmatpush1.bf16.msra.mxu0 %v17134_v0  ;;  %10365 = vmatpush1.bf16.msra.mxu1 %v17137_v55 }
 0x832   :  { %10224 = vmatprep.subr.bf16.mxu0 %v17142_v10  ;;  %10366 = vmatprep.subr.bf16.mxu1 %v17145_v6  ;;  %v17182_v10 = vld [vmem:[%s21688_s5 + $0x850] ss:$8 sps:$4 sm:$0xff]  }
 0x835   :  { %10225 = vmatpush1.bf16.msra.mxu0 %v17140_v8  ;;  %10367 = vmatpush1.bf16.msra.mxu1 %v17143_v56  ;;  %v17190_v8 = vld [vmem:[%s21688_s5 + $0x844] ss:$8 sps:$4 sm:$0xff]  }
 0x836   :  { %10226 = vmatprep.subr.bf16.mxu0 %v17148_v16  ;;  %10368 = vmatprep.subr.bf16.mxu1 %v17151_v4  ;;  %v17193_v56 = vld [vmem:[%s21688_s5 + $0x8c4] ss:$8 sps:$4 sm:$0xff]   ;;  %v17188_v4 = vld [vmem:[%s21688_s5 + $0x840] ss:$8 sps:$4 sm:$0xff]  }
 0x839   :  { %10227 = vmatpush1.bf16.msra.mxu0 %v17146_v40  ;;  %10369 = vmatpush1.bf16.msra.mxu1 %v17149_v24  ;;  %v17191_v40 = vld [vmem:[%s21688_s5 + $0x8c0] ss:$8 sps:$4 sm:$0xff]   ;;  %v17196_v24 = vld [vmem:[%s21688_s5 + $0x834] ss:$8 sps:$4 sm:$0xff]  }
 0x83a   :  { %10228 = vmatprep.subr.bf16.mxu0 %v17154_v32  ;;  %10370 = vmatprep.subr.bf16.mxu1 %v17157_v1  ;;  %v17199_v32 = vld [vmem:[%s21688_s5 + $0x8b4] ss:$8 sps:$4 sm:$0xff]   ;;  %v17194_v1 = vld [vmem:[%s21688_s5 + $0x830] ss:$8 sps:$4 sm:$0xff]  }
 0x83d   :  { %10229 = vmatpush1.bf16.msra.mxu0 %v17152_v62  ;;  %10371 = vmatpush1.bf16.msra.mxu1 %v17155_v23  ;;  %v17197_v62 = vld [vmem:[%s21688_s5 + $0x8b0] ss:$8 sps:$4 sm:$0xff]   ;;  %v17203_v23 = vld [vmem:[%s21688_s5 + $0x8a0] ss:$8 sps:$4 sm:$0xff]  }
 0x83e   :  { %10230 = vmatprep.subr.bf16.mxu0 %v17160_v54  ;;  %10372 = vmatprep.subr.bf16.mxu1 %v17163_v25  ;;  %v8122_v54 = vmax.f32 %v21076_v52, %v8117_v14  ;;  %v17208_v25 = vld [vmem:[%s21688_s5 + $0x814] ss:$8 sps:$4 sm:$0xff]   ;;  %v17209_v52 = vld [vmem:[%s21688_s5 + $0x890] ss:$8 sps:$4 sm:$0xff]   ;;  %v17214_v14 = vld [vmem:[%s21688_s5 + $0x804] ss:$8 sps:$4 sm:$0xff]  }
 0x840   :  { %v8132_v33 = vrot.slane %v8122_v54, 1 }
 0x841   :  { %10231 = vmatpush1.bf16.msra.mxu0 %v17158_v3  ;;  %10373 = vmatpush1.bf16.msra.mxu1 %v17161_v19  ;;  %v17215_v3 = vld [vmem:[%s21688_s5 + $0x880] ss:$8 sps:$4 sm:$0xff]   ;;  %v10403_v19 = vld [vmem:[#allocation4 + $0x20] sm:$0x3] }
 0x842   :  { %10232 = vmatprep.subr.bf16.mxu0 %v17166_v2  ;;  %10374 = vmatprep.subr.bf16.mxu1 %v17169_v49  ;;  %v8134_v60 = vmax.f32 %v8122_v54, %v8132_v33  ;;  %v10545_v2 = vld [vmem:[#allocation4 + $0x22] sm:$0x3]  ;;  %v17223_v49 = vld [vmem:[%s21688_s5 + $0x9f4] ss:$8 sps:$4 sm:$0xff]   ;;  %v10404_v47 = vpack.c.bf16 %v10403_v19, %v10403_v19 }
 0x843   :  { %v17268_v54 = vld [vmem:[%s21688_s5 + $0xa74] ss:$8 sps:$4 sm:$0xff]   ;;  %v17266_v33 = vld [vmem:[%s21688_s5 + $0xa70] ss:$8 sps:$4 sm:$0xff]  }
 0x844   :  { %8135 = vst [vmem:[#allocation4 + $0x31] sm:$0x1] %v8134_v60 }
 0x845   :  { %10233 = vmatpush1.bf16.msra.mxu0 %v17164_v63  ;;  %10375 = vmatpush1.bf16.msra.mxu1 %v17167_v36  ;;  %v17221_v63 = vld [vmem:[%s21688_s5 + $0x9f0] ss:$8 sps:$4 sm:$0xff]   ;;  %v10546_v36 = vpack.c.bf16 %v10545_v2, %v10545_v2  ;;  %v17280_v2 = vld [vmem:[%s21688_s5 + $0xa54] ss:$8 sps:$4 sm:$0xff]  }
 0x846   :  { %10502 = vmatprep.subr.bf16.mxu0 %v17172_v43  ;;  %10644 = vmatprep.subr.bf16.mxu1 %v17175_v35  ;;  %v17227_v43 = vld [vmem:[%s21688_s5 + $0x9e0] ss:$8 sps:$4 sm:$0xff]  }
 0x848   :  { %v8548_v20 = vpop.f32.mrf.mxu0  ;;  %10251 = vmatmul.mubr.bf16.vlgmr.msra.gmra.mxu0 %v10120_v26  ;;  %v8690_v61 = vpop.f32.mrf.mxu1  ;;  %10393 = vmatmul.mubr.bf16.vlgmr.msra.gmra.mxu1 %v10262_v48 }
 0x849   :  { %v8555_v7 = vadd.f32 %v8548_v20, %v21020_v13  ;;  %10503 = vmatpush1.bf16.msra.mxu0 %v17170_v15  ;;  %10645 = vmatpush1.bf16.msra.mxu1 %v17173_v41  ;;  %v17187_v13 = vld [vmem:[%s21688_s5 + $0x8d4] ss:$8 sps:$4 sm:$0xff]  }
 0x84a   :  { %v8550_v44 = vpop.f32.mrf.mxu0  ;;  %v8692_v59 = vpop.f32.mrf.mxu1  ;;  %10504 = vmatprep.subr.bf16.mxu0 %v17178_v57  ;;  %10646 = vmatprep.subr.bf16.mxu1 %v17181_v18  ;;  %v17232_v57 = vld [vmem:[%s21688_s5 + $0x954] ss:$8 sps:$4 sm:$0xff]  }
 0x84b   :  { %v8556_v0 = vadd.f32 %v8550_v44, %v21028_v11  ;;  %v21148_v55 = vadd.f32 %v8690_v61, %v8555_v7  ;;  %10534 = vmatprep.mubr.bf16.mxu0 %v17454_v17  ;;  %10676 = vmatprep.mubr.bf16.mxu1 %v17454_v17  ;;  %v17185_v11 = vld [vmem:[%s21688_s5 + $0x8d0] ss:$8 sps:$4 sm:$0xff]   ;;  %v17235_v18 = vld [vmem:[%s21688_s5 + $0x9d4] ss:$8 sps:$4 sm:$0xff]  }
 0x84c   :  { %v8552_v45 = vpop.f32.mrf.mxu0  ;;  %v8694_v34 = vpop.f32.mrf.mxu1  ;;  %v17233_v44 = vld [vmem:[%s21688_s5 + $0x9d0] ss:$8 sps:$4 sm:$0xff]  }
 0x84d   :  { %v21155_v6 = vadd.f32 %v8692_v59, %v8556_v0  ;;  %10505 = vmatpush1.bf16.msra.mxu0 %v17176_v50  ;;  %10647 = vmatpush1.bf16.msra.mxu1 %v17179_v28  ;;  %v17241_v0 = vld [vmem:[%s21688_s5 + $0x9c4] ss:$8 sps:$4 sm:$0xff]   ;;  %v17236_v45 = vld [vmem:[%s21688_s5 + $0x940] ss:$8 sps:$4 sm:$0xff]   ;;  %v17244_v34 = vld [vmem:[%s21688_s5 + $0x934] ss:$8 sps:$4 sm:$0xff]  }
 0x84e   :  { %v8553_v46 = vpop.f32.mrf.mxu0  ;;  %10506 = vmatprep.subr.bf16.mxu0 %v17184_v53  ;;  %10648 = vmatprep.subr.bf16.mxu1 %v17187_v13  ;;  %v8695_v16 = vpop.f32.mrf.mxu1  ;;  %v17230_v53 = vld [vmem:[%s21688_s5 + $0x950] ss:$8 sps:$4 sm:$0xff]   ;;  %v17238_v13 = vld [vmem:[%s21688_s5 + $0x944] ss:$8 sps:$4 sm:$0xff]  }
 0x84f   :  { %v17245_v46 = vld [vmem:[%s21688_s5 + $0x9b0] ss:$8 sps:$4 sm:$0xff]   ;;  %v17248_v16 = vld [vmem:[%s21688_s5 + $0x920] ss:$8 sps:$4 sm:$0xff]  }
 0x851   :  { %10507 = vmatpush1.bf16.msra.mxu0 %v17182_v10  ;;  %10649 = vmatpush1.bf16.msra.mxu1 %v17185_v11  ;;  %v17239_v10 = vld [vmem:[%s21688_s5 + $0x9c0] ss:$8 sps:$4 sm:$0xff]   ;;  %v17242_v11 = vld [vmem:[%s21688_s5 + $0x930] ss:$8 sps:$4 sm:$0xff]  }
 0x852   :  { %10508 = vmatprep.subr.bf16.mxu0 %v17190_v8  ;;  %10650 = vmatprep.subr.bf16.mxu1 %v17193_v56  ;;  %v17250_v8 = vld [vmem:[%s21688_s5 + $0x924] ss:$8 sps:$4 sm:$0xff]  }
 0x853   :  { %v17253_v56 = vld [vmem:[%s21688_s5 + $0x9a4] ss:$8 sps:$4 sm:$0xff]  }
 0x855   :  { %10509 = vmatpush1.bf16.msra.mxu0 %v17188_v4  ;;  %10651 = vmatpush1.bf16.msra.mxu1 %v17191_v40  ;;  %v17251_v4 = vld [vmem:[%s21688_s5 + $0x9a0] ss:$8 sps:$4 sm:$0xff]   ;;  %v17256_v40 = vld [vmem:[%s21688_s5 + $0x914] ss:$8 sps:$4 sm:$0xff]  }
 0x856   :  { %10510 = vmatprep.subr.bf16.mxu0 %v17196_v24  ;;  %10652 = vmatprep.subr.bf16.mxu1 %v17199_v32  ;;  %v17259_v24 = vld [vmem:[%s21688_s5 + $0x994] ss:$8 sps:$4 sm:$0xff]   ;;  %v17254_v32 = vld [vmem:[%s21688_s5 + $0x910] ss:$8 sps:$4 sm:$0xff]  }
 0x859   :  { %10511 = vmatpush1.bf16.msra.mxu0 %v17194_v1  ;;  %10653 = vmatpush1.bf16.msra.mxu1 %v17197_v62  ;;  %v17257_v1 = vld [vmem:[%s21688_s5 + $0x990] ss:$8 sps:$4 sm:$0xff]   ;;  %v17262_v62 = vld [vmem:[%s21688_s5 + $0x904] ss:$8 sps:$4 sm:$0xff]  }
 0x85a   :  { %10512 = vmatprep.subr.bf16.mxu0 %v17202_v5  ;;  %10654 = vmatprep.subr.bf16.mxu1 %v17205_v12  ;;  %v17265_v5 = vld [vmem:[%s21688_s5 + $0x984] ss:$8 sps:$4 sm:$0xff]   ;;  %v17260_v12 = vld [vmem:[%s21688_s5 + $0x900] ss:$8 sps:$4 sm:$0xff]  }
 0x85d   :  { %10513 = vmatpush1.bf16.msra.mxu0 %v17200_v9  ;;  %10655 = vmatpush1.bf16.msra.mxu1 %v17203_v23  ;;  %v17263_v9 = vld [vmem:[%s21688_s5 + $0x980] ss:$8 sps:$4 sm:$0xff]   ;;  %v10687_v23 = vld [vmem:[#allocation4 + $0x24] sm:$0x3] }
 0x85e   :  { %10514 = vmatprep.subr.bf16.mxu0 %v17208_v25  ;;  %10656 = vmatprep.subr.bf16.mxu1 %v17211_v58  ;;  %v17271_v25 = vld [vmem:[%s21688_s5 + $0xaf4] ss:$8 sps:$4 sm:$0xff]   ;;  %v10688_v58 = vpack.c.bf16 %v10687_v23, %v10687_v23 }
 0x861   :  { %10515 = vmatpush1.bf16.msra.mxu0 %v17206_v42  ;;  %10657 = vmatpush1.bf16.msra.mxu1 %v17209_v52  ;;  %v17269_v42 = vld [vmem:[%s21688_s5 + $0xaf0] ss:$8 sps:$4 sm:$0xff]   ;;  %v17274_v52 = vld [vmem:[%s21688_s5 + $0xa64] ss:$8 sps:$4 sm:$0xff]  }
 0x862   :  { %10516 = vmatprep.subr.bf16.mxu0 %v17214_v14  ;;  %10658 = vmatprep.subr.bf16.mxu1 %v17217_v22 }
 0x865   :  { %10517 = vmatpush1.bf16.msra.mxu0 %v17212_v27  ;;  %10659 = vmatpush1.bf16.msra.mxu1 %v17215_v3  ;;  %v17272_v27 = vld [vmem:[%s21688_s5 + $0xa60] ss:$8 sps:$4 sm:$0xff]  }
 0x866   :  { %10786 = vmatprep.subr.bf16.mxu0 %v17220_v39  ;;  %10928 = vmatprep.subr.bf16.mxu1 %v17223_v49  ;;  %v17275_v3 = vld [vmem:[%s21688_s5 + $0xae0] ss:$8 sps:$4 sm:$0xff]   ;;  %v17283_v49 = vld [vmem:[%s21688_s5 + $0xad4] ss:$8 sps:$4 sm:$0xff]  }
 0x868   :  { %v8832_v35 = vpop.f32.mrf.mxu0  ;;  %10535 = vmatmul.mubr.bf16.vlgmr.msra.gmra.mxu0 %v10404_v47  ;;  %v8974_v26 = vpop.f32.mrf.mxu1  ;;  %10677 = vmatmul.mubr.bf16.vlgmr.msra.gmra.mxu1 %v10546_v36 }
 0x869   :  { %v8839_v48 = vadd.f32 %v8832_v35, %v21148_v55  ;;  %10787 = vmatpush1.bf16.msra.mxu0 %v17218_v37  ;;  %10929 = vmatpush1.bf16.msra.mxu1 %v17221_v63  ;;  %v17286_v35 = vld [vmem:[%s21688_s5 + $0xa44] ss:$8 sps:$4 sm:$0xff]  }
 0x86a   :  { %v8834_v15 = vpop.f32.mrf.mxu0  ;;  %v8976_v41 = vpop.f32.mrf.mxu1  ;;  %10788 = vmatprep.subr.bf16.mxu0 %v17226_v30  ;;  %10930 = vmatprep.subr.bf16.mxu1 %v17229_v38  ;;  %v17278_v38 = vld [vmem:[%s21688_s5 + $0xa50] ss:$8 sps:$4 sm:$0xff]  }
 0x86b   :  { %v8840_v20 = vadd.f32 %v8834_v15, %v21155_v6  ;;  %v21258_v61 = vadd.f32 %v8974_v26, %v8839_v48  ;;  %10818 = vmatprep.mubr.bf16.mxu0 %v17454_v17  ;;  %10960 = vmatprep.mubr.bf16.mxu1 %v17454_v17  ;;  %v17247_v6 = vld [vmem:[%s21688_s5 + $0x9b4] ss:$8 sps:$4 sm:$0xff]   ;;  %v17289_v26 = vld [vmem:[%s21688_s5 + $0xac4] ss:$8 sps:$4 sm:$0xff]   ;;  %v17284_v15 = vld [vmem:[%s21688_s5 + $0xa40] ss:$8 sps:$4 sm:$0xff]  }
 0x86c   :  { %v8836_v7 = vpop.f32.mrf.mxu0  ;;  %v8978_v50 = vpop.f32.mrf.mxu1 }
 0x86d   :  { %v21262_v28 = vadd.f32 %v8976_v41, %v8840_v20  ;;  %10789 = vmatpush1.bf16.msra.mxu0 %v17224_v21  ;;  %10931 = vmatpush1.bf16.msra.mxu1 %v17227_v43  ;;  %v17281_v21 = vld [vmem:[%s21688_s5 + $0xad0] ss:$8 sps:$4 sm:$0xff]   ;;  %v17287_v41 = vld [vmem:[%s21688_s5 + $0xac0] ss:$8 sps:$4 sm:$0xff]   ;;  %v17298_v7 = vld [vmem:[%s21688_s5 + $0xa24] ss:$8 sps:$4 sm:$0xff]  }
 0x86e   :  { %v8837_v59 = vpop.f32.mrf.mxu0  ;;  %10790 = vmatprep.subr.bf16.mxu0 %v17232_v57  ;;  %10932 = vmatprep.subr.bf16.mxu1 %v17235_v18  ;;  %v8979_v55 = vpop.f32.mrf.mxu1  ;;  %v17292_v57 = vld [vmem:[%s21688_s5 + $0xa34] ss:$8 sps:$4 sm:$0xff]   ;;  %v17290_v20 = vld [vmem:[%s21688_s5 + $0xa30] ss:$8 sps:$4 sm:$0xff]   ;;  %v17301_v50 = vld [vmem:[%s21688_s5 + $0xaa4] ss:$8 sps:$4 sm:$0xff]  }
 0x86f   :  { %v17295_v18 = vld [vmem:[%s21688_s5 + $0xab4] ss:$8 sps:$4 sm:$0xff]   ;;  %v17310_v55 = vld [vmem:[%s21688_s5 + $0xa04] ss:$8 sps:$4 sm:$0xff]  }
 0x870   :  { %v17307_v59 = vld [vmem:[%s21688_s5 + $0xa94] ss:$8 sps:$4 sm:$0xff]  }
 0x871   :  { %10791 = vmatpush1.bf16.msra.mxu0 %v17230_v53  ;;  %10933 = vmatpush1.bf16.msra.mxu1 %v17233_v44  ;;  %v17299_v53 = vld [vmem:[%s21688_s5 + $0xaa0] ss:$8 sps:$4 sm:$0xff]   ;;  %v17304_v44 = vld [vmem:[%s21688_s5 + $0xa14] ss:$8 sps:$4 sm:$0xff]  }
 0x872   :  { %10792 = vmatprep.subr.bf16.mxu0 %v17238_v13  ;;  %10934 = vmatprep.subr.bf16.mxu1 %v17241_v0  ;;  %v17302_v13 = vld [vmem:[%s21688_s5 + $0xa10] ss:$8 sps:$4 sm:$0xff]  }
 0x873   :  { %v17305_v0 = vld [vmem:[%s21688_s5 + $0xa90] ss:$8 sps:$4 sm:$0xff]  }
 0x875   :  { %10793 = vmatpush1.bf16.msra.mxu0 %v17236_v45  ;;  %10935 = vmatpush1.bf16.msra.mxu1 %v17239_v10  ;;  %v17313_v45 = vld [vmem:[%s21688_s5 + $0xa84] ss:$8 sps:$4 sm:$0xff]   ;;  %v17308_v10 = vld [vmem:[%s21688_s5 + $0xa00] ss:$8 sps:$4 sm:$0xff]  }
 0x876   :  { %10794 = vmatprep.subr.bf16.mxu0 %v17244_v34  ;;  %10936 = vmatprep.subr.bf16.mxu1 %v17247_v6  ;;  %v17311_v34 = vld [vmem:[%s21688_s5 + $0xa80] ss:$8 sps:$4 sm:$0xff]   ;;  %v10971_v6 = vld [vmem:[#allocation4 + $0x28] sm:$0x3] }
 0x879   :  { %10795 = vmatpush1.bf16.msra.mxu0 %v17242_v11  ;;  %10937 = vmatpush1.bf16.msra.mxu1 %v17245_v46  ;;  %v11113_v11 = vld [vmem:[#allocation4 + $0x2a] sm:$0x3]  ;;  %v17316_v46 = vld [vmem:[%s21688_s5 + $0xb74] ss:$8 sps:$4 sm:$0xff]  }
 0x87a   :  { %10796 = vmatprep.subr.bf16.mxu0 %v17250_v8  ;;  %10938 = vmatprep.subr.bf16.mxu1 %v17253_v56  ;;  %v17319_v8 = vld [vmem:[%s21688_s5 + $0xbf4] ss:$8 sps:$4 sm:$0xff]   ;;  %v10972_v56 = vpack.c.bf16 %v10971_v6, %v10971_v6 }
 0x87d   :  { %10797 = vmatpush1.bf16.msra.mxu0 %v17248_v16  ;;  %10939 = vmatpush1.bf16.msra.mxu1 %v17251_v4  ;;  %v11114_v16 = vpack.c.bf16 %v11113_v11, %v11113_v11  ;;  %v17314_v4 = vld [vmem:[%s21688_s5 + $0xb70] ss:$8 sps:$4 sm:$0xff]  }
 0x87e   :  { %10798 = vmatprep.subr.bf16.mxu0 %v17256_v40  ;;  %10940 = vmatprep.subr.bf16.mxu1 %v17259_v24  ;;  %v17317_v40 = vld [vmem:[%s21688_s5 + $0xbf0] ss:$8 sps:$4 sm:$0xff]   ;;  %v17322_v24 = vld [vmem:[%s21688_s5 + $0xb64] ss:$8 sps:$4 sm:$0xff]  }
 0x881   :  { %10799 = vmatpush1.bf16.msra.mxu0 %v17254_v32  ;;  %10941 = vmatpush1.bf16.msra.mxu1 %v17257_v1  ;;  %v17325_v32 = vld [vmem:[%s21688_s5 + $0xbe4] ss:$8 sps:$4 sm:$0xff]  }
 0x882   :  { %10800 = vmatprep.subr.bf16.mxu0 %v17262_v62  ;;  %10942 = vmatprep.subr.bf16.mxu1 %v17265_v5 }
 0x885   :  { %10801 = vmatpush1.bf16.msra.mxu0 %v17260_v12  ;;  %10943 = vmatpush1.bf16.msra.mxu1 %v17263_v9  ;;  %v17320_v12 = vld [vmem:[%s21688_s5 + $0xb60] ss:$8 sps:$4 sm:$0xff]  }
 0x886   :  { %11070 = vmatprep.subr.bf16.mxu0 %v17268_v54  ;;  %11212 = vmatprep.subr.bf16.mxu1 %v17271_v25  ;;  %v17323_v9 = vld [vmem:[%s21688_s5 + $0xbe0] ss:$8 sps:$4 sm:$0xff]   ;;  %v17328_v54 = vld [vmem:[%s21688_s5 + $0xb54] ss:$8 sps:$4 sm:$0xff]  }
 0x887   :  { %v17331_v25 = vld [vmem:[%s21688_s5 + $0xbd4] ss:$8 sps:$4 sm:$0xff]  }
 0x888   :  { %v9116_v60 = vpop.f32.mrf.mxu0  ;;  %10819 = vmatmul.mubr.bf16.vlgmr.msra.gmra.mxu0 %v10688_v58  ;;  %v9258_v14 = vpop.f32.mrf.mxu1  ;;  %10961 = vmatmul.mubr.bf16.vlgmr.msra.gmra.mxu1 %v10830_v51 }
 0x889   :  { %v9123_v22 = vadd.f32 %v9116_v60, %v21258_v61  ;;  %11071 = vmatpush1.bf16.msra.mxu0 %v17266_v33  ;;  %11213 = vmatpush1.bf16.msra.mxu1 %v17269_v42  ;;  %v17293_v61 = vld [vmem:[%s21688_s5 + $0xab0] ss:$8 sps:$4 sm:$0xff]  }
 0x88a   :  { %v9118_v19 = vpop.f32.mrf.mxu0  ;;  %v9260_v39 = vpop.f32.mrf.mxu1  ;;  %11072 = vmatprep.subr.bf16.mxu0 %v17274_v52  ;;  %11214 = vmatprep.subr.bf16.mxu1 %v17277_v29  ;;  %v17326_v29 = vld [vmem:[%s21688_s5 + $0xb50] ss:$8 sps:$4 sm:$0xff]  }
 0x88b   :  { %v9124_v37 = vadd.f32 %v9118_v19, %v21262_v28  ;;  %v21362_v63 = vadd.f32 %v9258_v14, %v9123_v22  ;;  %11102 = vmatprep.mubr.bf16.mxu0 %v17454_v17  ;;  %11244 = vmatprep.mubr.bf16.mxu1 %v17454_v17  ;;  %v17296_v28 = vld [vmem:[%s21688_s5 + $0xa20] ss:$8 sps:$4 sm:$0xff]   ;;  %v17329_v60 = vld [vmem:[%s21688_s5 + $0xbd0] ss:$8 sps:$4 sm:$0xff]   ;;  %v17334_v22 = vld [vmem:[%s21688_s5 + $0xb44] ss:$8 sps:$4 sm:$0xff]  }
 0x88c   :  { %v9120_v47 = vpop.f32.mrf.mxu0  ;;  %v9262_v36 = vpop.f32.mrf.mxu1  ;;  %v17332_v19 = vld [vmem:[%s21688_s5 + $0xb40] ss:$8 sps:$4 sm:$0xff]  }
 0x88d   :  { %v21366_v30 = vadd.f32 %v9260_v39, %v9124_v37  ;;  %11073 = vmatpush1.bf16.msra.mxu0 %v17272_v27  ;;  %11215 = vmatpush1.bf16.msra.mxu1 %v17275_v3  ;;  %v17337_v27 = vld [vmem:[%s21688_s5 + $0xbc4] ss:$8 sps:$4 sm:$0xff]   ;;  %v17335_v39 = vld [vmem:[%s21688_s5 + $0xbc0] ss:$8 sps:$4 sm:$0xff]   ;;  %v17338_v37 = vld [vmem:[%s21688_s5 + $0xb30] ss:$8 sps:$4 sm:$0xff]  }
 0x88e   :  { %v9121_v43 = vpop.f32.mrf.mxu0  ;;  %11074 = vmatprep.subr.bf16.mxu0 %v17280_v2  ;;  %11216 = vmatprep.subr.bf16.mxu1 %v17283_v49  ;;  %v9263_v48 = vpop.f32.mrf.mxu1  ;;  %v17340_v2 = vld [vmem:[%s21688_s5 + $0xb34] ss:$8 sps:$4 sm:$0xff]   ;;  %v17346_v47 = vld [vmem:[%s21688_s5 + $0xb24] ss:$8 sps:$4 sm:$0xff]  }
 0x88f   :  { %v17343_v49 = vld [vmem:[%s21688_s5 + $0xbb4] ss:$8 sps:$4 sm:$0xff]   ;;  %v17349_v36 = vld [vmem:[%s21688_s5 + $0xba4] ss:$8 sps:$4 sm:$0xff]  }
 0x890   :  { %v17355_v43 = vld [vmem:[%s21688_s5 + $0xb94] ss:$8 sps:$4 sm:$0xff]   ;;  %v17358_v48 = vld [vmem:[%s21688_s5 + $0xb04] ss:$8 sps:$4 sm:$0xff]  }
 0x891   :  { %11075 = vmatpush1.bf16.msra.mxu0 %v17278_v38  ;;  %11217 = vmatpush1.bf16.msra.mxu1 %v17281_v21  ;;  %v17347_v38 = vld [vmem:[%s21688_s5 + $0xba0] ss:$8 sps:$4 sm:$0xff]   ;;  %v17352_v21 = vld [vmem:[%s21688_s5 + $0xb14] ss:$8 sps:$4 sm:$0xff]  }
 0x892   :  { %11076 = vmatprep.subr.bf16.mxu0 %v17286_v35  ;;  %11218 = vmatprep.subr.bf16.mxu1 %v17289_v26  ;;  %v17350_v35 = vld [vmem:[%s21688_s5 + $0xb10] ss:$8 sps:$4 sm:$0xff]  }
 0x893   :  { %v17353_v26 = vld [vmem:[%s21688_s5 + $0xb90] ss:$8 sps:$4 sm:$0xff]  }
 0x895   :  { %11077 = vmatpush1.bf16.msra.mxu0 %v17284_v15  ;;  %11219 = vmatpush1.bf16.msra.mxu1 %v17287_v41  ;;  %v17361_v15 = vld [vmem:[%s21688_s5 + $0xb84] ss:$8 sps:$4 sm:$0xff]   ;;  %v17356_v41 = vld [vmem:[%s21688_s5 + $0xb00] ss:$8 sps:$4 sm:$0xff]  }
 0x896   :  { %11078 = vmatprep.subr.bf16.mxu0 %v17292_v57  ;;  %11220 = vmatprep.subr.bf16.mxu1 %v17295_v18  ;;  %v17359_v57 = vld [vmem:[%s21688_s5 + $0xb80] ss:$8 sps:$4 sm:$0xff]   ;;  %v11255_v18 = vld [vmem:[#allocation4 + $0x2c] sm:$0x3] }
 0x899   :  { %11079 = vmatpush1.bf16.msra.mxu0 %v17290_v20  ;;  %11221 = vmatpush1.bf16.msra.mxu1 %v17293_v61  ;;  %v11397_v20 = vld [vmem:[#allocation4 + $0x2e] sm:$0x3] }
 0x89a   :  { %11080 = vmatprep.subr.bf16.mxu0 %v17298_v7  ;;  %11222 = vmatprep.subr.bf16.mxu1 %v17301_v50  ;;  %v17364_v61 = vld [vmem:[%s21688_s5 + $0xc74] ss:$8 sps:$4 sm:$0xff]   ;;  %v11256_v7 = vpack.c.bf16 %v11255_v18, %v11255_v18  ;;  %v11398_v50 = vpack.c.bf16 %v11397_v20, %v11397_v20  ;;  %v17391_v18 = vld [vmem:[%s21690_s7 + $0x28] sm:$0xff]   ;;  %v17392_v20 = vld [vmem:[%s21690_s7 + $0x60] sm:$0xff]  }
 0x89d   :  { %11081 = vmatpush1.bf16.msra.mxu0 %v17296_v28  ;;  %11223 = vmatpush1.bf16.msra.mxu1 %v17299_v53  ;;  %v17362_v28 = vld [vmem:[%s21688_s5 + $0xc70] ss:$8 sps:$4 sm:$0xff]   ;;  %v17367_v53 = vld [vmem:[%s21688_s5 + $0xc64] ss:$8 sps:$4 sm:$0xff]  }
 0x89e   :  { %11082 = vmatprep.subr.bf16.mxu0 %v17304_v44  ;;  %11224 = vmatprep.subr.bf16.mxu1 %v17307_v59 }
 0x8a1   :  { %11083 = vmatpush1.bf16.msra.mxu0 %v17302_v13  ;;  %11225 = vmatpush1.bf16.msra.mxu1 %v17305_v0  ;;  %v17365_v0 = vld [vmem:[%s21688_s5 + $0xc60] ss:$8 sps:$4 sm:$0xff]  }
 0x8a2   :  { %11084 = vmatprep.subr.bf16.mxu0 %v17310_v55  ;;  %11226 = vmatprep.subr.bf16.mxu1 %v17313_v45 }
 0x8a5   :  { %11085 = vmatpush1.bf16.msra.mxu0 %v17308_v10  ;;  %11227 = vmatpush1.bf16.msra.mxu1 %v17311_v34  ;;  %v17370_v10 = vld [vmem:[%s21688_s5 + $0xc54] ss:$8 sps:$4 sm:$0xff]  }
 0x8a6   :  { %11354 = vmatprep.subr.bf16.mxu0 %v17316_v46  ;;  %11496 = vmatprep.subr.bf16.mxu1 %v17319_v8 }
 0x8a8   :  { %v9400_v1 = vpop.f32.mrf.mxu0  ;;  %11103 = vmatmul.mubr.bf16.vlgmr.msra.gmra.mxu0 %v10972_v56  ;;  %v9542_v62 = vpop.f32.mrf.mxu1  ;;  %11245 = vmatmul.mubr.bf16.vlgmr.msra.gmra.mxu1 %v11114_v16  ;;  %v17368_v56 = vld [vmem:[%s21688_s5 + $0xc50] ss:$8 sps:$4 sm:$0xff]  }
 0x8a9   :  { %v9407_v5 = vadd.f32 %v9400_v1, %v21362_v63  ;;  %11355 = vmatpush1.bf16.msra.mxu0 %v17314_v4  ;;  %11497 = vmatpush1.bf16.msra.mxu1 %v17317_v40  ;;  %v17341_v63 = vld [vmem:[%s21688_s5 + $0xbb0] ss:$8 sps:$4 sm:$0xff]   ;;  %v17371_v40 = vld [vmem:[%s21688_s5 + $0xc40] ss:$8 sps:$4 sm:$0xff]   ;;  %v17379_v1 = vld [vmem:[%s21688_s5 + $0xc24] ss:$8 sps:$4 sm:$0xff]  }
 0x8aa   :  { %v9402_v23 = vpop.f32.mrf.mxu0  ;;  %v9544_v31 = vpop.f32.mrf.mxu1  ;;  %11356 = vmatprep.subr.bf16.mxu0 %v17322_v24  ;;  %11498 = vmatprep.subr.bf16.mxu1 %v17325_v32  ;;  %v17376_v24 = vld [vmem:[%s21688_s5 + $0xc34] ss:$8 sps:$4 sm:$0xff]   ;;  %v17374_v32 = vld [vmem:[%s21688_s5 + $0xc30] ss:$8 sps:$4 sm:$0xff]  }
 0x8ab   :  { %v9408_v58 = vadd.f32 %v9402_v23, %v21366_v30  ;;  %v21466_v51 = vadd.f32 %v9542_v62, %v9407_v5  ;;  %11386 = vmatprep.mubr.bf16.mxu0 %v17454_v17  ;;  %11528 = vmatprep.mubr.bf16.mxu1 %v17454_v17  ;;  %v17344_v30 = vld [vmem:[%s21688_s5 + $0xb20] ss:$8 sps:$4 sm:$0xff]   ;;  %v17382_v5 = vld [vmem:[%s21688_s5 + $0xc14] ss:$8 sps:$4 sm:$0xff]  }
 0x8ac   :  { %v9404_v33 = vpop.f32.mrf.mxu0  ;;  %v9546_v42 = vpop.f32.mrf.mxu1  ;;  %v17377_v62 = vld [vmem:[%s21688_s5 + $0xc20] ss:$8 sps:$4 sm:$0xff]  }
 0x8ad   :  { %v21470_v52 = vadd.f32 %v9544_v31, %v9408_v58  ;;  %11357 = vmatpush1.bf16.msra.mxu0 %v17320_v12  ;;  %11499 = vmatpush1.bf16.msra.mxu1 %v17323_v9  ;;  %v17380_v12 = vld [vmem:[%s21688_s5 + $0xc10] ss:$8 sps:$4 sm:$0xff]   ;;  %v17385_v9 = vld [vmem:[%s21688_s5 + $0xc04] ss:$8 sps:$4 sm:$0xff]   ;;  %v17383_v23 = vld [vmem:[%s21688_s5 + $0xc00] ss:$8 sps:$4 sm:$0xff]  }
 0x8ae   :  { %v9405_v14 = vpop.f32.mrf.mxu0  ;;  %11358 = vmatprep.subr.bf16.mxu0 %v17328_v54  ;;  %11500 = vmatprep.subr.bf16.mxu1 %v17331_v25  ;;  %v9547_v3 = vpop.f32.mrf.mxu1  ;;  %v11539_v31 = vld [vmem:[#allocation4 + $0x30] sm:$0x3]  ;;  %v21709_v25 = vmov 0.0  }
 0x8af   :  { %v11540_v54 = vpack.c.bf16 %v11539_v31, %v11539_v31 }
 0x8b1   :  { %11359 = vmatpush1.bf16.msra.mxu0 %v17326_v29  ;;  %11501 = vmatpush1.bf16.msra.mxu1 %v17329_v60 }
 0x8b2   :  { %11360 = vmatprep.subr.bf16.mxu0 %v17334_v22  ;;  %11502 = vmatprep.subr.bf16.mxu1 %v17337_v27 }
 0x8b5   :  { %11361 = vmatpush1.bf16.msra.mxu0 %v17332_v19  ;;  %11503 = vmatpush1.bf16.msra.mxu1 %v17335_v39 }
 0x8b6   :  { %11362 = vmatprep.subr.bf16.mxu0 %v17340_v2  ;;  %11504 = vmatprep.subr.bf16.mxu1 %v17343_v49 }
 0x8b9   :  { %11363 = vmatpush1.bf16.msra.mxu0 %v17338_v37  ;;  %11505 = vmatpush1.bf16.msra.mxu1 %v17341_v63 }
 0x8ba   :  { %11364 = vmatprep.subr.bf16.mxu0 %v17346_v47  ;;  %11506 = vmatprep.subr.bf16.mxu1 %v17349_v36 }
 0x8bd   :  { %11365 = vmatpush1.bf16.msra.mxu0 %v17344_v30  ;;  %11507 = vmatpush1.bf16.msra.mxu1 %v17347_v38 }
 0x8be   :  { %11366 = vmatprep.subr.bf16.mxu0 %v17352_v21  ;;  %11508 = vmatprep.subr.bf16.mxu1 %v17355_v43 }
 0x8c1   :  { %11367 = vmatpush1.bf16.msra.mxu0 %v17350_v35  ;;  %11509 = vmatpush1.bf16.msra.mxu1 %v17353_v26  ;;  %v17386_v26 = vld [vmem:[%s21690_s7 + $0x78] sm:$0xff]  }
 0x8c2   :  { %11368 = vmatprep.subr.bf16.mxu0 %v17358_v48  ;;  %11510 = vmatprep.subr.bf16.mxu1 %v17361_v15  ;;  %v17387_v48 = vld [vmem:[%s21690_s7 + $0x38] sm:$0xff]   ;;  %v17388_v15 = vld [vmem:[%s21690_s7 + $0x70] sm:$0xff]  }
 0x8c5   :  { %11369 = vmatpush1.bf16.msra.mxu0 %v17356_v41  ;;  %11511 = vmatpush1.bf16.msra.mxu1 %v17359_v57  ;;  %v17389_v41 = vld [vmem:[%s21690_s7 + $0x30] sm:$0xff]   ;;  %v17390_v57 = vld [vmem:[%s21690_s7 + $0x68] sm:$0xff]  }
 0x8c6   :  { %11638 = vmatprep.subr.bf16.mxu0 %v17364_v61  ;;  %14737 = vmatprep.subr.bf16.mxu1 %v17386_v26  ;;  %v17393_v61 = vld [vmem:[%s21690_s7 + $0x20] sm:$0xff]  }
 0x8c8   :  { %v9684_v44 = vpop.f32.mrf.mxu0  ;;  %11387 = vmatmul.mubr.bf16.vlgmr.msra.gmra.mxu0 %v11256_v7  ;;  %v9826_v59 = vpop.f32.mrf.mxu1  ;;  %11529 = vmatmul.mubr.bf16.vlgmr.msra.gmra.mxu1 %v11398_v50  ;;  %v17394_v7 = vld [vmem:[%s21690_s7 + $0x58] sm:$0xff]  }
 0x8c9   :  { %v9691_v13 = vadd.f32 %v9684_v44, %v21466_v51  ;;  %11639 = vmatpush1.bf16.msra.mxu0 %v17362_v28  ;;  %11670 = vmatprep.mubr.bf16.mxu0 %v17454_v17  ;;  %v17373_v17 = vld [vmem:[%s21688_s5 + $0xc44] ss:$8 sps:$4 sm:$0xff]   ;;  %v17395_v50 = vld [vmem:[%s21690_s7 + $0x18] sm:$0xff]   ;;  %v17396_v28 = vld [vmem:[%s21690_s7 + $0x50] sm:$0xff]  }
 0x8ca   :  { %v9686_v55 = vpop.f32.mrf.mxu0  ;;  %v9828_v45 = vpop.f32.mrf.mxu1  ;;  %11640 = vmatprep.subr.bf16.mxu0 %v17367_v53  ;;  %14738 = vmatpush3.bf16.msra.mxu1 %v17387_v48  ;;  %v17397_v53 = vld [vmem:[%s21690_s7 + $0x10] sm:$0xff]  }
 0x8cb   :  { %v9692_v34 = vadd.f32 %v9686_v55, %v21470_v52  ;;  %v9833_v6 = vadd.f32 %v9826_v59, %v9691_v13  ;;  %14739 = vmatprep.subr.bf16.mxu1 %v17388_v15 }
 0x8cc   :  { %v9688_v11 = vpop.f32.mrf.mxu0  ;;  %v9830_v46 = vpop.f32.mrf.mxu1 }
 0x8cd   :  { %v9834_v8 = vadd.f32 %v9828_v45, %v9692_v34  ;;  %11641 = vmatpush1.bf16.msra.mxu0 %v17365_v0  ;;  %v17398_v45 = vld [vmem:[%s21690_s7 + $0x48] sm:$0xff]  }
 0x8ce   :  { %v9689_v16 = vpop.f32.mrf.mxu0  ;;  %11642 = vmatprep.subr.bf16.mxu0 %v17370_v10  ;;  %v9831_v4 = vpop.f32.mrf.mxu1  ;;  %14740 = vmatpush3.bf16.msra.mxu1 %v17389_v41 }
 0x8cf   :  { %14741 = vmatprep.subr.bf16.mxu1 %v17390_v57  ;;  %v17401_v4 = vld [vmem:[%s21690_s7] sm:$0xff]  }
 0x8d1   :  { %11643 = vmatpush1.bf16.msra.mxu0 %v17368_v56 }
 0x8d2   :  { %11644 = vmatprep.subr.bf16.mxu0 %v17373_v17  ;;  %14742 = vmatpush3.bf16.msra.mxu1 %v17391_v18  ;;  %v17400_v17 = vld [vmem:[%s21690_s7 + $0x40] sm:$0xff]  }
 0x8d3   :  { %14743 = vmatprep.subr.bf16.mxu1 %v17392_v20  ;;  %v11681_v20 = vld [vmem:[%s21689_s6] sm:$0x3] }
 0x8d5   :  { %11645 = vmatpush1.bf16.msra.mxu0 %v17371_v40  ;;  %v17402_v40 = vld [vmem:[%s21692_s9 + $0x38] sm:$0xff]  }
 0x8d6   :  { %11646 = vmatprep.subr.bf16.mxu0 %v17376_v24  ;;  %14744 = vmatpush3.bf16.msra.mxu1 %v17393_v61  ;;  %v17403_v24 = vld [vmem:[%s21692_s9 + $0x30] sm:$0xff]  }
 0x8d7   :  { %14745 = vmatprep.subr.bf16.mxu1 %v17394_v7 }
 0x8d9   :  { %11647 = vmatpush1.bf16.msra.mxu0 %v17374_v32  ;;  %v17404_v32 = vld [vmem:[%s21692_s9 + $0x28] sm:$0xff]  }
 0x8da   :  { %11648 = vmatprep.subr.bf16.mxu0 %v17379_v1  ;;  %14746 = vmatpush3.bf16.msra.mxu1 %v17395_v50  ;;  %v17405_v1 = vld [vmem:[%s21692_s9 + $0x20] sm:$0xff]  }
 0x8db   :  { %14747 = vmatprep.subr.bf16.mxu1 %v17396_v28 }
 0x8dd   :  { %11649 = vmatpush1.bf16.msra.mxu0 %v17377_v62  ;;  %v17406_v62 = vld [vmem:[%s21692_s9 + $0x18] sm:$0xff]  }
 0x8de   :  { %11650 = vmatprep.subr.bf16.mxu0 %v17382_v5  ;;  %14748 = vmatpush3.bf16.msra.mxu1 %v17397_v53 }
 0x8df   :  { %14749 = vmatprep.subr.bf16.mxu1 %v17398_v45 }
 0x8e1   :  { %11651 = vmatpush1.bf16.msra.mxu0 %v17380_v12 }
 0x8e2   :  { %11652 = vmatprep.subr.bf16.mxu0 %v17385_v9 }
 0x8e5   :  { %11653 = vmatpush1.bf16.msra.mxu0 %v17383_v23 }
 0x8e6   :  { %16232 = vmatprep.subr.bf16.mxu0 %v21709_v25 }
 0x8e8   :  { %v9968_v58 = vpop.f32.mrf.mxu0  ;;  %11671 = vmatmul.mubr.bf16.vlgmr.msra.gmra.mxu0 %v11540_v54  ;;  %v10110_v51 = vpop.f32.mrf.mxu1 }
 0x8e9   :  { %v9975_v33 = vadd.f32 %v9968_v58, %v9833_v6  ;;  %16248 = vmatprep.mubr.msk.bf16.mxu0 %vm17449_vm0, %v21709_v25  ;;  %v17399_v6 = vld [vmem:[%s21690_s7 + $0x8] sm:$0xff]   ;;  %16233 = vmatpush3.bf16.msra.mxu0 %v17402_v40 }
 0x8ea   :  { %v9970_v42 = vpop.f32.mrf.mxu0  ;;  %v10112_v52 = vpop.f32.mrf.mxu1  ;;  %14750 = vmatpush3.bf16.msra.mxu1 %v17399_v6  ;;  %16234 = vmatprep.subr.bf16.mxu0 %v21709_v25 }
 0x8eb   :  { %v9976_v29 = vadd.f32 %v9970_v42, %v9834_v8  ;;  %v10117_v60 = vadd.f32 %v10110_v51, %v9975_v33  ;;  %14751 = vmatprep.subr.bf16.mxu1 %v17400_v17  ;;  %v17408_v17 = vld [vmem:[%s21692_s9 + $0x8] sm:$0xff]  }
 0x8ec   :  { %v9972_v14 = vpop.f32.mrf.mxu0  ;;  %v10114_v22 = vpop.f32.mrf.mxu1 }
 0x8ed   :  { %v10118_v27 = vadd.f32 %v10112_v52, %v9976_v29  ;;  %16235 = vmatpush3.bf16.msra.mxu0 %v17403_v24  ;;  %v14129_v24 = vld [vmem:[%s21691_s8] ss:$0 sm:$0xff] }
 0x8ee   :  { %v9973_v3 = vpop.f32.mrf.mxu0  ;;  %v10115_v19 = vpop.f32.mrf.mxu1  ;;  %14752 = vmatpush3.bf16.msra.mxu1 %v17401_v4  ;;  %16236 = vmatprep.subr.bf16.mxu0 %v21709_v25  ;;  %v17409_v4 = vld [vmem:[%s21692_s9] sm:$0xff]  }
 0x8f1   :  { %16237 = vmatpush3.bf16.msra.mxu0 %v17404_v32 }
 0x8f2   :  { %16238 = vmatprep.subr.bf16.mxu0 %v21709_v25 }
 0x8f5   :  { %16239 = vmatpush3.bf16.msra.mxu0 %v17405_v1 }
 0x8f6   :  { %16240 = vmatprep.subr.bf16.mxu0 %v21709_v25 }
 0x8f9   :  { %16241 = vmatpush3.bf16.msra.mxu0 %v17406_v62 }
 0x8fa   :  { %16242 = vmatprep.subr.bf16.mxu0 %v21709_v25 }
 0x908   :  { %v10252_v39 = vpop.f32.mrf.mxu0  ;;  %v10394_v2 = vpop.f32.mrf.mxu1 }
 0x909   :  { %v10259_v49 = vadd.f32 %v10252_v39, %v10117_v60 }
 0x90a   :  { %v10254_v37 = vpop.f32.mrf.mxu0  ;;  %v10396_v63 = vpop.f32.mrf.mxu1 }
 0x90b   :  { %v10260_v47 = vadd.f32 %v10254_v37, %v10118_v27  ;;  %v10401_v36 = vadd.f32 %v10394_v2, %v10259_v49 }
 0x90c   :  { %v10256_v30 = vpop.f32.mrf.mxu0  ;;  %v10398_v38 = vpop.f32.mrf.mxu1 }
 0x90d   :  { %v10402_v21 = vadd.f32 %v10396_v63, %v10260_v47 }
 0x90e   :  { %v10257_v43 = vpop.f32.mrf.mxu0  ;;  %v10399_v35 = vpop.f32.mrf.mxu1 }
 0x90f   :  { %v11683_v43 = vlaneseq }
 0x911   :  { %v11684_v48 = vshrl.u32 %v11683_v43, 7 }
 0x913   :  { %v11685_v18 = vsub.s32 0, %v11684_v48  ;;  %v11689_v7 = vsub.s32 1, %v11684_v48 }
 0x915   :  { %v11686_v28 = vrot.slane %v11681_v20, %v11685_v18 }
 0x928   :  { %v10536_v44 = vpop.f32.mrf.mxu0  ;;  %v10678_v59 = vpop.f32.mrf.mxu1 }
 0x929   :  { %v10543_v13 = vadd.f32 %v10536_v44, %v10401_v36 }
 0x92a   :  { %v10538_v0 = vpop.f32.mrf.mxu0  ;;  %v10680_v55 = vpop.f32.mrf.mxu1 }
 0x92b   :  { %v10544_v10 = vadd.f32 %v10538_v0, %v10402_v21  ;;  %v10685_v34 = vadd.f32 %v10678_v59, %v10543_v13  ;;  %v11690_v13 = vrot.slane %v11681_v20, %v11689_v7 }
 0x92c   :  { %v10540_v11 = vpop.f32.mrf.mxu0  ;;  %v10682_v46 = vpop.f32.mrf.mxu1 }
 0x92d   :  { %v10686_v8 = vadd.f32 %v10680_v55, %v10544_v10 }
 0x92e   :  { %v10541_v56 = vpop.f32.mrf.mxu0  ;;  %v10683_v16 = vpop.f32.mrf.mxu1 }
 0x92f   :  { %v17407_v16 = vld [vmem:[%s21692_s9 + $0x10] sm:$0xff]   ;;  %s11994_s9 = sshll.u32 %s17455_s4, 4  ;;  %s11995_s9 = int_to_ptr.vmem [resolvable:$true] %s11994_s9 }
 0x930   :  { %16243 = vmatpush3.bf16.msra.mxu0 %v17407_v16  ;;  %s17410_s8 = scalar_lea.vmem %s11995_s9, 32  ;;  %p17415_p3 = scmp.lt.s32.totalorder %s11995_s9, %s11995_s9 }
 0x931   :  { %16244 = vmatprep.subr.bf16.mxu0 %v21709_v25  ;;  %p17411_p2 = scmp.ne.s32.totalorder %s11995_s9, %s17410_s8  ;;  %p17416_p4 = scmp.lt.s32.totalorder %s17410_s8, %s17410_s8 }
 0x933   :  { %p17417_p5 = por %p17416_p4, %p17415_p3 }
 0x934   :  { %16245 = vmatpush3.bf16.msra.mxu0 %v17408_v17 }
 0x935   :  { %16246 = vmatprep.subr.bf16.mxu0 %v21709_v25  ;;  %v14146_v25 = vld [vmem:[%s21693_s10] ss:$0 sm:$0xff]  ;;  %p17418_p6 = pnand %p17417_p5, %p17411_p2 }
 0x938   :  { %16247 = vmatpush3.bf16.msra.mxu0 %v17409_v4 }
 0x948   :  { %v10820_v5 = vpop.f32.mrf.mxu0  ;;  %v10962_v12 = vpop.f32.mrf.mxu1 }
 0x949   :  { %v10827_v9 = vadd.f32 %v10820_v5, %v10685_v34 }
 0x94a   :  { %v10822_v23 = vpop.f32.mrf.mxu0  ;;  %v10964_v31 = vpop.f32.mrf.mxu1 }
 0x94b   :  { %v10828_v54 = vadd.f32 %v10822_v23, %v10686_v8  ;;  %v10969_v58 = vadd.f32 %v10962_v12, %v10827_v9 }
 0x94c   :  { %v10824_v51 = vpop.f32.mrf.mxu0  ;;  %v10966_v33 = vpop.f32.mrf.mxu1 }
 0x94d   :  { %v10970_v42 = vadd.f32 %v10964_v31, %v10828_v54 }
 0x94e   :  { %v10825_v52 = vpop.f32.mrf.mxu0  ;;  %v10967_v29 = vpop.f32.mrf.mxu1 }
 0x968   :  { %v11104_v60 = vpop.f32.mrf.mxu0  ;;  %v11246_v14 = vpop.f32.mrf.mxu1 }
 0x969   :  { %v11111_v35 = vadd.f32 %v11104_v60, %v10969_v58 }
 0x96a   :  { %v11106_v22 = vpop.f32.mrf.mxu0  ;;  %v11248_v27 = vpop.f32.mrf.mxu1 }
 0x96b   :  { %v11112_v26 = vadd.f32 %v11106_v22, %v10970_v42  ;;  %v11253_v15 = vadd.f32 %v11246_v14, %v11111_v35 }
 0x96c   :  { %v11108_v3 = vpop.f32.mrf.mxu0  ;;  %v11250_v19 = vpop.f32.mrf.mxu1 }
 0x96d   :  { %v11254_v41 = vadd.f32 %v11248_v27, %v11112_v26 }
 0x96e   :  { %v11109_v39 = vpop.f32.mrf.mxu0  ;;  %v11251_v2 = vpop.f32.mrf.mxu1 }
 0x988   :  { %v11388_v49 = vpop.f32.mrf.mxu0  ;;  %v11530_v37 = vpop.f32.mrf.mxu1 }
 0x989   :  { %v11395_v57 = vadd.f32 %v11388_v49, %v11253_v15 }
 0x98a   :  { %v11390_v63 = vpop.f32.mrf.mxu0  ;;  %v11532_v47 = vpop.f32.mrf.mxu1 }
 0x98b   :  { %v11396_v61 = vadd.f32 %v11390_v63, %v11254_v41  ;;  %v11537_v50 = vadd.f32 %v11530_v37, %v11395_v57 }
 0x98c   :  { %v11392_v36 = vpop.f32.mrf.mxu0  ;;  %v11534_v30 = vpop.f32.mrf.mxu1 }
 0x98d   :  { %v11538_v44 = vadd.f32 %v11532_v47, %v11396_v61 }
 0x98e   :  { %v11393_v38 = vpop.f32.mrf.mxu0  ;;  %v11535_v21 = vpop.f32.mrf.mxu1 }
 0x9a8   :  { %v11672_v53 = vpop.f32.mrf.mxu0 }
 0x9a9   :  { %v11679_v59 = vadd.f32 %v11672_v53, %v11537_v50 }
 0x9aa   :  { %v11674_v0 = vpop.f32.mrf.mxu0 }
 0x9ab   :  { %v11693_v55 = vadd.f32 %v11686_v28, %v11679_v59  ;;  %v11680_v45 = vadd.f32 %v11674_v0, %v11538_v44 }
 0x9ac   :  { %v11676_v10 = vpop.f32.mrf.mxu0 }
 0x9ad   :  { %v11694_v34 = vadd.f32 %v11690_v13, %v11680_v45  ;;  %v11695_v6 = vmax.f32 %v11693_v55, 0.0 }
 0x9ae   :  { %v11677_v11 = vpop.f32.mrf.mxu0 }
 0x9af   :  { %v11696_v46 = vmax.f32 %v11694_v34, 0.0  ;;  %v11697_v56 = vpack.c.bf16 %v11695_v6, %v11695_v6 }
 0x9b1   :  { %v11698_v8 = vpack.c.bf16 %v11696_v46, %v11696_v46 }
 0x9b3   :  { %11866 = vmatprep.mubr.bf16.mxu1 %v11698_v8 }
 0x9b4   :  { %11867 = vmatmul.mubr.bf16.vlgmr.msra.gmra.mxu1 %v11697_v56 }
 0xa74   :  { %v14753_v40 = vpop.f32.mrf.mxu1 }
 0xa76   :  { %v14754_v32 = vpop.f32.mrf.mxu1 }
 0xa77   :  { %v14755_v1 = vadd.f32 %v14754_v32, %v14753_v40 }
 0xa78   :  { %v14756_v62 = vpop.f32.mrf.mxu1 }
 0xa79   :  { %v11869_v5 = vadd.f32 %v14755_v1, %v14129_v24 }
 0xa7a   :  { %v14757_v12 = vpop.f32.mrf.mxu1 }
 0xa7b   :  { %v11874_v9 = vmax.f32 %v11869_v5, 0.0 }
 0xa7d   :  { %v11875_v23 = vpack.c.bf16 %v11874_v9, %v11874_v9 }
 0xa7f   :  { %16249 = vmatmul.mubr.bf16.vlgmr.msra.gmra.mxu0 %v11875_v23 }
 0xb3f   :  { %v11981_v31 = vpop.f32.mrf.mxu0 }
 0xb40   :  { %v11982_v54 = vadd.f32 %v14146_v25, %v11981_v31 }
 0xb41   :  { %v16250_v58 = vpop.f32.mrf.mxu0 }
 0xb42   :  { %11987 = vst [vmem:[#allocation5] sm:$0x3] %v11982_v54 }
 0xb43   :  { %v11984_v51 = vpop.f32.mrf.mxu0 }
 0xb44   :  { %17421 = shalt.err (!%p17418_p6)
}
 0xb45   :  { %11997 = dma.vmem_to_hbm [thread:$0]  %s11995_s9, 32, %s21694_s11, [#allocation6]   ;;  %v16251_v33 = vpop.f32.mrf.mxu0 }
 0xb46   :  { %17438 = dma.done.wait [#allocation6], 32  }
 0xb47   :  { %17439 = vsyncadd [#allocation6], 4294967264 }
 0xb48   :  { %12001 = vsyncpa [#allocation6], 1 }

</bundles_post_ra>
